<compile_context>
chip_gen: v6e
topology: v6e:2x2x1
jax: 0.10.0
libtpu: 0.0.40
codegen_flags: <defaults>
</compile_context>

<pallas_src>
import jax
import jax.numpy as jnp
from jax.experimental import pallas as pl
from jax.experimental.pallas import tpu as pltpu

INPUT_DIM = 40
HID = 512
NUM_CLASSES = 8
CTX_TOTAL = 8   # frames consumed by the stack: 4 (tdnn1) + 2 (tdnn2) + 2 (tdnn3)


# --------------------------- Pallas kernel body -------------------------------
def _xvector_kernel(x_ref, w1_ref, b1_ref, w2_ref, b2_ref, w3_ref, b3_ref,
                    w4_ref, b4_ref, w5_ref, b5_ref,
                    w6a_ref, w6b_ref, b6_ref, w7_ref, b7_ref, w8_ref, b8_ref,
                    pred_ref, xvec_ref):
    """Whole X_vector forward for ONE batch element; all activations in VMEM."""
    f32 = jnp.float32
    bf16 = jnp.bfloat16

    x = x_ref[0]                                   # (T, INPUT_DIM), f32
    t = x.shape[0]
    t1, t2, t3 = t - 4, t - 6, t - 8               # frames after tdnn1/2/3

    # tdnn1: context 5, dilation 1 (split-weight partial matmuls, no unfold)
    acc = jnp.zeros((t1, HID), f32)
    for i in range(5):
        acc += jnp.dot(x[i:i + t1, :].astype(bf16), w1_ref[i],
                       preferred_element_type=f32)
    h = jnp.maximum(acc + b1_ref[...], 0.0)

    # tdnn2: context 3, dilation 1
    acc = jnp.zeros((t2, HID), f32)
    for i in range(3):
        acc += jnp.dot(h[i:i + t2, :].astype(bf16), w2_ref[i],
                       preferred_element_type=f32)
    h = jnp.maximum(acc + b2_ref[...], 0.0)

    # tdnn3: context 2, dilation 2
    acc = jnp.zeros((t3, HID), f32)
    for i in range(2):
        acc += jnp.dot(h[2 * i:2 * i + t3, :].astype(bf16), w3_ref[i],
                       preferred_element_type=f32)
    h = jnp.maximum(acc + b3_ref[...], 0.0)

    # tdnn4 / tdnn5: context 1 -> pointwise Linears
    h = jnp.maximum(jnp.dot(h.astype(bf16), w4_ref[...],
                            preferred_element_type=f32) + b4_ref[...], 0.0)
    h = jnp.maximum(jnp.dot(h.astype(bf16), w5_ref[...],
                            preferred_element_type=f32) + b5_ref[...], 0.0)

    # statistics pooling: mean + unbiased variance over time (torch.var, ddof=1)
    mean = jnp.sum(h, axis=0, keepdims=True) * (1.0 / t3)          # (1, HID) f32
    diff = h - mean
    var = jnp.sum(diff * diff, axis=0, keepdims=True) * (1.0 / (t3 - 1))

    # segment6 over cat(mean, var) (weight pre-split -> no concat) -> segment7 -> output
    s6 = (jnp.dot(mean.astype(bf16), w6a_ref[...], preferred_element_type=f32)
          + jnp.dot(var.astype(bf16), w6b_ref[...], preferred_element_type=f32)
          + b6_ref[...])
    xvec = jnp.dot(s6.astype(bf16), w7_ref[...],
                   preferred_element_type=f32) + b7_ref[...]
    pred = jnp.dot(xvec.astype(bf16), w8_ref[...],
                   preferred_element_type=f32) + b8_ref[...]
    pred_ref[0] = pred.astype(pred_ref.dtype)
    xvec_ref[0] = xvec.astype(xvec_ref.dtype)


# ------------------------------ Pallas wrapper --------------------------------
def x_vector_forward(x, params):
    """x: (B, T, INPUT_DIM) f32 -> (predictions (B, NUM_CLASSES), x_vec (B, HID))."""
    B, T, D = x.shape
    if T - CTX_TOTAL < 2:
        raise ValueError("need >= 10 input frames (unbiased variance over >= 2 pooled frames)")

    const2 = lambda b: (0, 0)       # weights: fetched once, VMEM-resident
    const3 = lambda b: (0, 0, 0)

    pred, xvec = pl.pallas_call(
        _xvector_kernel,
        out_shape=(jax.ShapeDtypeStruct((B, 1, NUM_CLASSES), jnp.float32),
                   jax.ShapeDtypeStruct((B, 1, HID), jnp.float32)),
        grid=(B,),
        in_specs=[
            pl.BlockSpec((1, T, D), lambda b: (b, 0, 0)),        # one utterance per step
            pl.BlockSpec((5, D, HID), const3),                   # tdnn1 (stacked contexts)
            pl.BlockSpec((1, HID), const2),
            pl.BlockSpec((3, HID, HID), const3),                 # tdnn2
            pl.BlockSpec((1, HID), const2),
            pl.BlockSpec((2, HID, HID), const3),                 # tdnn3
            pl.BlockSpec((1, HID), const2),
            pl.BlockSpec((HID, HID), const2),                    # tdnn4
            pl.BlockSpec((1, HID), const2),
            pl.BlockSpec((HID, HID), const2),                    # tdnn5
            pl.BlockSpec((1, HID), const2),
            pl.BlockSpec((HID, HID), const2),                    # segment6 (mean half)
            pl.BlockSpec((HID, HID), const2),                    # segment6 (var half)
            pl.BlockSpec((1, HID), const2),
            pl.BlockSpec((HID, HID), const2),                    # segment7
            pl.BlockSpec((1, HID), const2),
            pl.BlockSpec((HID, NUM_CLASSES), const2),            # output
            pl.BlockSpec((1, NUM_CLASSES), const2),
        ],
        out_specs=(pl.BlockSpec((1, 1, NUM_CLASSES), lambda b: (b, 0, 0)),
                   pl.BlockSpec((1, 1, HID), lambda b: (b, 0, 0))),
        compiler_params=pltpu.CompilerParams(
            dimension_semantics=("parallel",),
            vmem_limit_bytes=48 * 1024 * 1024),
    )(x, params["w1"], params["b1"], params["w2"], params["b2"],
      params["w3"], params["b3"], params["w4"], params["b4"],
      params["w5"], params["b5"], params["w6a"], params["w6b"], params["b6"],
      params["w7"], params["b7"], params["w8"], params["b8"])
    return pred[:, 0, :], xvec[:, 0, :]


# --------------------------------- params -------------------------------------
def init_params(key):
    """Synthetic weights with PyTorch-Linear semantics.  TDNN kernels are stored
    stacked per-context as (context, in_dim, out_dim) in bf16 (MXU-native);
    biases stay f32.  segment6's Linear(1024,512) over cat(mean,var) is split
    into mean/var halves (w6a, w6b)."""
    ks = jax.random.split(key, 17)
    s = 0.05
    f32 = jnp.float32

    def w(k, shape, dtype=jnp.bfloat16):
        return (s * jax.random.normal(k, shape, f32)).astype(dtype)

    return {
        "w1": w(ks[0], (5, INPUT_DIM, HID)), "b1": w(ks[1], (1, HID), f32),
        "w2": w(ks[2], (3, HID, HID)),       "b2": w(ks[3], (1, HID), f32),
        "w3": w(ks[4], (2, HID, HID)),       "b3": w(ks[5], (1, HID), f32),
        "w4": w(ks[6], (HID, HID)),          "b4": w(ks[7], (1, HID), f32),
        "w5": w(ks[8], (HID, HID)),          "b5": w(ks[9], (1, HID), f32),
        "w6a": w(ks[10], (HID, HID)),
        "w6b": w(ks[11], (HID, HID)),
        "b6": w(ks[12], (1, HID), f32),
        "w7": w(ks[13], (HID, HID)),         "b7": w(ks[14], (1, HID), f32),
        "w8": w(ks[15], (HID, NUM_CLASSES)), "b8": w(ks[16], (1, NUM_CLASSES), f32),
    }


# ------------------------------- reference ------------------------------------
def _context_unfold(x, context, dilation):
    """Matches F.unfold((context, D), stride=(1, D), dilation=(dilation, 1)):
    output frame t = concat_i x[:, t + i*dilation, :]."""
    if context == 1:
        return x
    B, T, D = x.shape
    T_out = T - dilation * (context - 1)
    parts = [x[:, i * dilation:i * dilation + T_out, :] for i in range(context)]
    return jnp.concatenate(parts, axis=-1)


def _reference_forward(x, p):
    """Plain-JAX reference (f32 math over the same bf16-stored weight values)."""
    def tdnn(h, w, b, ctx, dil):
        w2d = w.astype(jnp.float32).reshape(-1, w.shape[-1])
        u = _context_unfold(h, ctx, dil)
        return jnp.maximum(jnp.einsum("btk,kn->btn", u, w2d) + b[0], 0.0)

    h = tdnn(x, p["w1"], p["b1"], 5, 1)
    h = tdnn(h, p["w2"], p["b2"], 3, 1)
    h = tdnn(h, p["w3"], p["b3"], 2, 2)
    h = tdnn(h, p["w4"], p["b4"], 1, 1)
    h = tdnn(h, p["w5"], p["b5"], 1, 3)
    mean = jnp.mean(h, axis=1)
    var = jnp.var(h, axis=1, ddof=1)
    s6 = (mean @ p["w6a"].astype(jnp.float32)
          + var @ p["w6b"].astype(jnp.float32) + p["b6"][0])
    xvec = s6 @ p["w7"].astype(jnp.float32) + p["b7"][0]
    pred = xvec @ p["w8"].astype(jnp.float32) + p["b8"][0]
    return pred, xvec


if __name__ == "__main__":
    key = jax.random.PRNGKey(0)
    kp, kx = jax.random.split(key)
    params = init_params(kp)

    B, T = 2, 24                    # frames: 24 -> 20 -> 18 -> 16 (pooled)
    x = jax.random.normal(kx, (B, T, INPUT_DIM), jnp.float32)

    pred, xvec = jax.jit(x_vector_forward)(x, params)
    pred, xvec = jax.block_until_ready((pred, xvec))

    assert pred.shape == (B, NUM_CLASSES), pred.shape
    assert xvec.shape == (B, HID), xvec.shape
    assert bool(jnp.all(jnp.isfinite(pred))) and bool(jnp.all(jnp.isfinite(xvec)))

    ref_pred, ref_xvec = _reference_forward(x, params)
    assert jnp.allclose(pred, ref_pred, atol=1e-1, rtol=1e-1), \
        float(jnp.max(jnp.abs(pred - ref_pred)))
    assert jnp.allclose(xvec, ref_xvec, atol=1e-1, rtol=1e-1), \
        float(jnp.max(jnp.abs(xvec - ref_xvec)))

    # TODO(synk): nn.Dropout(p=0.5) layers are identity here (inference mode);
    #             self.softmax exists on the module but is never used in forward.
    print("KERNEL_OK")
</pallas_src>

<mosaic_0001>
module attributes {stable_mosaic.version = 11 : i64} {
  func.func @_xvector_kernel(%arg0: i32, %arg1: memref<1x24x40xf32, #tpu.memory_space<vmem>>, %arg2: memref<5x40x512xbf16, #tpu.memory_space<vmem>>, %arg3: memref<1x512xf32, #tpu.memory_space<vmem>>, %arg4: memref<3x512x512xbf16, #tpu.memory_space<vmem>>, %arg5: memref<1x512xf32, #tpu.memory_space<vmem>>, %arg6: memref<2x512x512xbf16, #tpu.memory_space<vmem>>, %arg7: memref<1x512xf32, #tpu.memory_space<vmem>>, %arg8: memref<512x512xbf16, #tpu.memory_space<vmem>>, %arg9: memref<1x512xf32, #tpu.memory_space<vmem>>, %arg10: memref<512x512xbf16, #tpu.memory_space<vmem>>, %arg11: memref<1x512xf32, #tpu.memory_space<vmem>>, %arg12: memref<512x512xbf16, #tpu.memory_space<vmem>>, %arg13: memref<512x512xbf16, #tpu.memory_space<vmem>>, %arg14: memref<1x512xf32, #tpu.memory_space<vmem>>, %arg15: memref<512x512xbf16, #tpu.memory_space<vmem>>, %arg16: memref<1x512xf32, #tpu.memory_space<vmem>>, %arg17: memref<512x8xbf16, #tpu.memory_space<vmem>>, %arg18: memref<1x8xf32, #tpu.memory_space<vmem>>, %arg19: memref<1x1x8xf32, #tpu.memory_space<vmem>>, %arg20: memref<1x1x512xf32, #tpu.memory_space<vmem>>) attributes {dimension_semantics = [#tpu.dimension_semantics<parallel>], iteration_bounds = array<i64: 2>, scalar_prefetch = 0 : i64, scratch_operands = 0 : i64, tpu.core_type = #tpu.core_type<tc>, window_params = [{transform_indices = @transform_0, window_bounds = array<i64: 1, 24, 40>}, {pipeline_mode = #tpu.pipeline_mode<synchronous>, transform_indices = @transform_1, window_bounds = array<i64: 5, 40, 512>}, {pipeline_mode = #tpu.pipeline_mode<synchronous>, transform_indices = @transform_2, window_bounds = array<i64: 1, 512>}, {pipeline_mode = #tpu.pipeline_mode<synchronous>, transform_indices = @transform_3, window_bounds = array<i64: 3, 512, 512>}, {pipeline_mode = #tpu.pipeline_mode<synchronous>, transform_indices = @transform_4, window_bounds = array<i64: 1, 512>}, {pipeline_mode = #tpu.pipeline_mode<synchronous>, transform_indices = @transform_5, window_bounds = array<i64: 2, 512, 512>}, {pipeline_mode = #tpu.pipeline_mode<synchronous>, transform_indices = @transform_6, window_bounds = array<i64: 1, 512>}, {pipeline_mode = #tpu.pipeline_mode<synchronous>, transform_indices = @transform_7, window_bounds = array<i64: 512, 512>}, {pipeline_mode = #tpu.pipeline_mode<synchronous>, transform_indices = @transform_8, window_bounds = array<i64: 1, 512>}, {pipeline_mode = #tpu.pipeline_mode<synchronous>, transform_indices = @transform_9, window_bounds = array<i64: 512, 512>}, {pipeline_mode = #tpu.pipeline_mode<synchronous>, transform_indices = @transform_10, window_bounds = array<i64: 1, 512>}, {pipeline_mode = #tpu.pipeline_mode<synchronous>, transform_indices = @transform_11, window_bounds = array<i64: 512, 512>}, {pipeline_mode = #tpu.pipeline_mode<synchronous>, transform_indices = @transform_12, window_bounds = array<i64: 512, 512>}, {pipeline_mode = #tpu.pipeline_mode<synchronous>, transform_indices = @transform_13, window_bounds = array<i64: 1, 512>}, {pipeline_mode = #tpu.pipeline_mode<synchronous>, transform_indices = @transform_14, window_bounds = array<i64: 512, 512>}, {pipeline_mode = #tpu.pipeline_mode<synchronous>, transform_indices = @transform_15, window_bounds = array<i64: 1, 512>}, {pipeline_mode = #tpu.pipeline_mode<synchronous>, transform_indices = @transform_16, window_bounds = array<i64: 512, 8>}, {pipeline_mode = #tpu.pipeline_mode<synchronous>, transform_indices = @transform_17, window_bounds = array<i64: 1, 8>}, {transform_indices = @transform_18, window_bounds = array<i64: 1, 1, 8>}, {transform_indices = @transform_19, window_bounds = array<i64: 1, 1, 512>}]} {
    %c0 = arith.constant 0 : index
    %c0_0 = arith.constant 0 : index
    %c0_1 = arith.constant 0 : index
    %0 = vector.load %arg1[%c0, %c0_0, %c0_1] : memref<1x24x40xf32, #tpu.memory_space<vmem>>, vector<1x24x40xf32>
    %1 = vector.shape_cast %0 : vector<1x24x40xf32> to vector<24x40xf32>
    %cst = arith.constant 0.000000e+00 : f32
    %2 = vector.broadcast %cst : f32 to vector<20x512xf32>
    %3 = vector.extract_strided_slice %1 {offsets = [0, 0], sizes = [20, 40], strides = [1, 1]} : vector<24x40xf32> to vector<20x40xf32>
    %4 = arith.truncf %3 : vector<20x40xf32> to vector<20x40xbf16>
    %c0_2 = arith.constant 0 : index
    %c0_3 = arith.constant 0 : index
    %c0_4 = arith.constant 0 : index
    %5 = vector.load %arg2[%c0_2, %c0_3, %c0_4] : memref<5x40x512xbf16, #tpu.memory_space<vmem>>, vector<1x40x512xbf16>
    %6 = vector.shape_cast %5 : vector<1x40x512xbf16> to vector<40x512xbf16>
    %cst_5 = arith.constant dense<0.000000e+00> : vector<20x512xf32>
    %7 = tpu.matmul %4, %6, %cst_5 {dimension_numbers = #tpu.dot_dimension_numbers<[1], [0], [0], [1], [0, 0, 1, 1], [], []>} : vector<20x40xbf16>, vector<40x512xbf16>, vector<20x512xf32> -> vector<20x512xf32>
    %8 = arith.addf %2, %7 : vector<20x512xf32>
    %9 = vector.extract_strided_slice %1 {offsets = [1, 0], sizes = [20, 40], strides = [1, 1]} : vector<24x40xf32> to vector<20x40xf32>
    %10 = arith.truncf %9 : vector<20x40xf32> to vector<20x40xbf16>
    %c1 = arith.constant 1 : index
    %c0_6 = arith.constant 0 : index
    %c0_7 = arith.constant 0 : index
    %11 = vector.load %arg2[%c1, %c0_6, %c0_7] : memref<5x40x512xbf16, #tpu.memory_space<vmem>>, vector<1x40x512xbf16>
    %12 = vector.shape_cast %11 : vector<1x40x512xbf16> to vector<40x512xbf16>
    %cst_8 = arith.constant dense<0.000000e+00> : vector<20x512xf32>
    %13 = tpu.matmul %10, %12, %cst_8 {dimension_numbers = #tpu.dot_dimension_numbers<[1], [0], [0], [1], [0, 0, 1, 1], [], []>} : vector<20x40xbf16>, vector<40x512xbf16>, vector<20x512xf32> -> vector<20x512xf32>
    %14 = arith.addf %8, %13 : vector<20x512xf32>
    %15 = vector.extract_strided_slice %1 {offsets = [2, 0], sizes = [20, 40], strides = [1, 1]} : vector<24x40xf32> to vector<20x40xf32>
    %16 = arith.truncf %15 : vector<20x40xf32> to vector<20x40xbf16>
    %c2 = arith.constant 2 : index
    %c0_9 = arith.constant 0 : index
    %c0_10 = arith.constant 0 : index
    %17 = vector.load %arg2[%c2, %c0_9, %c0_10] : memref<5x40x512xbf16, #tpu.memory_space<vmem>>, vector<1x40x512xbf16>
    %18 = vector.shape_cast %17 : vector<1x40x512xbf16> to vector<40x512xbf16>
    %cst_11 = arith.constant dense<0.000000e+00> : vector<20x512xf32>
    %19 = tpu.matmul %16, %18, %cst_11 {dimension_numbers = #tpu.dot_dimension_numbers<[1], [0], [0], [1], [0, 0, 1, 1], [], []>} : vector<20x40xbf16>, vector<40x512xbf16>, vector<20x512xf32> -> vector<20x512xf32>
    %20 = arith.addf %14, %19 : vector<20x512xf32>
    %21 = vector.extract_strided_slice %1 {offsets = [3, 0], sizes = [20, 40], strides = [1, 1]} : vector<24x40xf32> to vector<20x40xf32>
    %22 = arith.truncf %21 : vector<20x40xf32> to vector<20x40xbf16>
    %c3 = arith.constant 3 : index
    %c0_12 = arith.constant 0 : index
    %c0_13 = arith.constant 0 : index
    %23 = vector.load %arg2[%c3, %c0_12, %c0_13] : memref<5x40x512xbf16, #tpu.memory_space<vmem>>, vector<1x40x512xbf16>
    %24 = vector.shape_cast %23 : vector<1x40x512xbf16> to vector<40x512xbf16>
    %cst_14 = arith.constant dense<0.000000e+00> : vector<20x512xf32>
    %25 = tpu.matmul %22, %24, %cst_14 {dimension_numbers = #tpu.dot_dimension_numbers<[1], [0], [0], [1], [0, 0, 1, 1], [], []>} : vector<20x40xbf16>, vector<40x512xbf16>, vector<20x512xf32> -> vector<20x512xf32>
    %26 = arith.addf %20, %25 : vector<20x512xf32>
    %27 = vector.extract_strided_slice %1 {offsets = [4, 0], sizes = [20, 40], strides = [1, 1]} : vector<24x40xf32> to vector<20x40xf32>
    %28 = arith.truncf %27 : vector<20x40xf32> to vector<20x40xbf16>
    %c4 = arith.constant 4 : index
    %c0_15 = arith.constant 0 : index
    %c0_16 = arith.constant 0 : index
    %29 = vector.load %arg2[%c4, %c0_15, %c0_16] : memref<5x40x512xbf16, #tpu.memory_space<vmem>>, vector<1x40x512xbf16>
    %30 = vector.shape_cast %29 : vector<1x40x512xbf16> to vector<40x512xbf16>
    %cst_17 = arith.constant dense<0.000000e+00> : vector<20x512xf32>
    %31 = tpu.matmul %28, %30, %cst_17 {dimension_numbers = #tpu.dot_dimension_numbers<[1], [0], [0], [1], [0, 0, 1, 1], [], []>} : vector<20x40xbf16>, vector<40x512xbf16>, vector<20x512xf32> -> vector<20x512xf32>
    %32 = arith.addf %26, %31 : vector<20x512xf32>
    %c0_18 = arith.constant 0 : index
    %c0_19 = arith.constant 0 : index
    %33 = vector.load %arg3[%c0_18, %c0_19] : memref<1x512xf32, #tpu.memory_space<vmem>>, vector<1x512xf32>
    %34 = vector.broadcast %33 : vector<1x512xf32> to vector<20x512xf32>
    %35 = arith.addf %32, %34 : vector<20x512xf32>
    %cst_20 = arith.constant 0.000000e+00 : f32
    %36 = vector.broadcast %cst_20 : f32 to vector<20x512xf32>
    %37 = arith.maximumf %35, %36 : vector<20x512xf32>
    %cst_21 = arith.constant 0.000000e+00 : f32
    %38 = vector.broadcast %cst_21 : f32 to vector<18x512xf32>
    %39 = vector.extract_strided_slice %37 {offsets = [0, 0], sizes = [18, 512], strides = [1, 1]} : vector<20x512xf32> to vector<18x512xf32>
    %40 = arith.truncf %39 : vector<18x512xf32> to vector<18x512xbf16>
    %c0_22 = arith.constant 0 : index
    %c0_23 = arith.constant 0 : index
    %c0_24 = arith.constant 0 : index
    %41 = vector.load %arg4[%c0_22, %c0_23, %c0_24] : memref<3x512x512xbf16, #tpu.memory_space<vmem>>, vector<1x512x512xbf16>
    %42 = vector.shape_cast %41 : vector<1x512x512xbf16> to vector<512x512xbf16>
    %cst_25 = arith.constant dense<0.000000e+00> : vector<18x512xf32>
    %43 = tpu.matmul %40, %42, %cst_25 {dimension_numbers = #tpu.dot_dimension_numbers<[1], [0], [0], [1], [0, 0, 1, 1], [], []>} : vector<18x512xbf16>, vector<512x512xbf16>, vector<18x512xf32> -> vector<18x512xf32>
    %44 = arith.addf %38, %43 : vector<18x512xf32>
    %45 = vector.extract_strided_slice %37 {offsets = [1, 0], sizes = [18, 512], strides = [1, 1]} : vector<20x512xf32> to vector<18x512xf32>
    %46 = arith.truncf %45 : vector<18x512xf32> to vector<18x512xbf16>
    %c1_26 = arith.constant 1 : index
    %c0_27 = arith.constant 0 : index
    %c0_28 = arith.constant 0 : index
    %47 = vector.load %arg4[%c1_26, %c0_27, %c0_28] : memref<3x512x512xbf16, #tpu.memory_space<vmem>>, vector<1x512x512xbf16>
    %48 = vector.shape_cast %47 : vector<1x512x512xbf16> to vector<512x512xbf16>
    %cst_29 = arith.constant dense<0.000000e+00> : vector<18x512xf32>
    %49 = tpu.matmul %46, %48, %cst_29 {dimension_numbers = #tpu.dot_dimension_numbers<[1], [0], [0], [1], [0, 0, 1, 1], [], []>} : vector<18x512xbf16>, vector<512x512xbf16>, vector<18x512xf32> -> vector<18x512xf32>
    %50 = arith.addf %44, %49 : vector<18x512xf32>
    %51 = vector.extract_strided_slice %37 {offsets = [2, 0], sizes = [18, 512], strides = [1, 1]} : vector<20x512xf32> to vector<18x512xf32>
    %52 = arith.truncf %51 : vector<18x512xf32> to vector<18x512xbf16>
    %c2_30 = arith.constant 2 : index
    %c0_31 = arith.constant 0 : index
    %c0_32 = arith.constant 0 : index
    %53 = vector.load %arg4[%c2_30, %c0_31, %c0_32] : memref<3x512x512xbf16, #tpu.memory_space<vmem>>, vector<1x512x512xbf16>
    %54 = vector.shape_cast %53 : vector<1x512x512xbf16> to vector<512x512xbf16>
    %cst_33 = arith.constant dense<0.000000e+00> : vector<18x512xf32>
    %55 = tpu.matmul %52, %54, %cst_33 {dimension_numbers = #tpu.dot_dimension_numbers<[1], [0], [0], [1], [0, 0, 1, 1], [], []>} : vector<18x512xbf16>, vector<512x512xbf16>, vector<18x512xf32> -> vector<18x512xf32>
    %56 = arith.addf %50, %55 : vector<18x512xf32>
    %c0_34 = arith.constant 0 : index
    %c0_35 = arith.constant 0 : index
    %57 = vector.load %arg5[%c0_34, %c0_35] : memref<1x512xf32, #tpu.memory_space<vmem>>, vector<1x512xf32>
    %58 = vector.broadcast %57 : vector<1x512xf32> to vector<18x512xf32>
    %59 = arith.addf %56, %58 : vector<18x512xf32>
    %cst_36 = arith.constant 0.000000e+00 : f32
    %60 = vector.broadcast %cst_36 : f32 to vector<18x512xf32>
    %61 = arith.maximumf %59, %60 : vector<18x512xf32>
    %cst_37 = arith.constant 0.000000e+00 : f32
    %62 = vector.broadcast %cst_37 : f32 to vector<16x512xf32>
    %63 = vector.extract_strided_slice %61 {offsets = [0, 0], sizes = [16, 512], strides = [1, 1]} : vector<18x512xf32> to vector<16x512xf32>
    %64 = arith.truncf %63 : vector<16x512xf32> to vector<16x512xbf16>
    %c0_38 = arith.constant 0 : index
    %c0_39 = arith.constant 0 : index
    %c0_40 = arith.constant 0 : index
    %65 = vector.load %arg6[%c0_38, %c0_39, %c0_40] : memref<2x512x512xbf16, #tpu.memory_space<vmem>>, vector<1x512x512xbf16>
    %66 = vector.shape_cast %65 : vector<1x512x512xbf16> to vector<512x512xbf16>
    %cst_41 = arith.constant dense<0.000000e+00> : vector<16x512xf32>
    %67 = tpu.matmul %64, %66, %cst_41 {dimension_numbers = #tpu.dot_dimension_numbers<[1], [0], [0], [1], [0, 0, 1, 1], [], []>} : vector<16x512xbf16>, vector<512x512xbf16>, vector<16x512xf32> -> vector<16x512xf32>
    %68 = arith.addf %62, %67 : vector<16x512xf32>
    %69 = vector.extract_strided_slice %61 {offsets = [2, 0], sizes = [16, 512], strides = [1, 1]} : vector<18x512xf32> to vector<16x512xf32>
    %70 = arith.truncf %69 : vector<16x512xf32> to vector<16x512xbf16>
    %c1_42 = arith.constant 1 : index
    %c0_43 = arith.constant 0 : index
    %c0_44 = arith.constant 0 : index
    %71 = vector.load %arg6[%c1_42, %c0_43, %c0_44] : memref<2x512x512xbf16, #tpu.memory_space<vmem>>, vector<1x512x512xbf16>
    %72 = vector.shape_cast %71 : vector<1x512x512xbf16> to vector<512x512xbf16>
    %cst_45 = arith.constant dense<0.000000e+00> : vector<16x512xf32>
    %73 = tpu.matmul %70, %72, %cst_45 {dimension_numbers = #tpu.dot_dimension_numbers<[1], [0], [0], [1], [0, 0, 1, 1], [], []>} : vector<16x512xbf16>, vector<512x512xbf16>, vector<16x512xf32> -> vector<16x512xf32>
    %74 = arith.addf %68, %73 : vector<16x512xf32>
    %c0_46 = arith.constant 0 : index
    %c0_47 = arith.constant 0 : index
    %75 = vector.load %arg7[%c0_46, %c0_47] : memref<1x512xf32, #tpu.memory_space<vmem>>, vector<1x512xf32>
    %76 = vector.broadcast %75 : vector<1x512xf32> to vector<16x512xf32>
    %77 = arith.addf %74, %76 : vector<16x512xf32>
    %cst_48 = arith.constant 0.000000e+00 : f32
    %78 = vector.broadcast %cst_48 : f32 to vector<16x512xf32>
    %79 = arith.maximumf %77, %78 : vector<16x512xf32>
    %80 = arith.truncf %79 : vector<16x512xf32> to vector<16x512xbf16>
    %c0_49 = arith.constant 0 : index
    %c0_50 = arith.constant 0 : index
    %81 = vector.load %arg8[%c0_49, %c0_50] : memref<512x512xbf16, #tpu.memory_space<vmem>>, vector<512x512xbf16>
    %cst_51 = arith.constant dense<0.000000e+00> : vector<16x512xf32>
    %82 = tpu.matmul %80, %81, %cst_51 {dimension_numbers = #tpu.dot_dimension_numbers<[1], [0], [0], [1], [0, 0, 1, 1], [], []>} : vector<16x512xbf16>, vector<512x512xbf16>, vector<16x512xf32> -> vector<16x512xf32>
    %c0_52 = arith.constant 0 : index
    %c0_53 = arith.constant 0 : index
    %83 = vector.load %arg9[%c0_52, %c0_53] : memref<1x512xf32, #tpu.memory_space<vmem>>, vector<1x512xf32>
    %84 = vector.broadcast %83 : vector<1x512xf32> to vector<16x512xf32>
    %85 = arith.addf %82, %84 : vector<16x512xf32>
    %cst_54 = arith.constant 0.000000e+00 : f32
    %86 = vector.broadcast %cst_54 : f32 to vector<16x512xf32>
    %87 = arith.maximumf %85, %86 : vector<16x512xf32>
    %88 = arith.truncf %87 : vector<16x512xf32> to vector<16x512xbf16>
    %c0_55 = arith.constant 0 : index
    %c0_56 = arith.constant 0 : index
    %89 = vector.load %arg10[%c0_55, %c0_56] : memref<512x512xbf16, #tpu.memory_space<vmem>>, vector<512x512xbf16>
    %cst_57 = arith.constant dense<0.000000e+00> : vector<16x512xf32>
    %90 = tpu.matmul %88, %89, %cst_57 {dimension_numbers = #tpu.dot_dimension_numbers<[1], [0], [0], [1], [0, 0, 1, 1], [], []>} : vector<16x512xbf16>, vector<512x512xbf16>, vector<16x512xf32> -> vector<16x512xf32>
    %c0_58 = arith.constant 0 : index
    %c0_59 = arith.constant 0 : index
    %91 = vector.load %arg11[%c0_58, %c0_59] : memref<1x512xf32, #tpu.memory_space<vmem>>, vector<1x512xf32>
    %92 = vector.broadcast %91 : vector<1x512xf32> to vector<16x512xf32>
    %93 = arith.addf %90, %92 : vector<16x512xf32>
    %cst_60 = arith.constant 0.000000e+00 : f32
    %94 = vector.broadcast %cst_60 : f32 to vector<16x512xf32>
    %95 = arith.maximumf %93, %94 : vector<16x512xf32>
    %cst_61 = arith.constant dense<0.000000e+00> : vector<512xf32>
    %96 = vector.multi_reduction <add>, %95, %cst_61 [0] : vector<16x512xf32> to vector<512xf32>
    %97 = vector.shape_cast %96 : vector<512xf32> to vector<1x512xf32>
    %cst_62 = arith.constant 6.250000e-02 : f32
    %98 = vector.broadcast %cst_62 : f32 to vector<1x512xf32>
    %99 = arith.mulf %97, %98 : vector<1x512xf32>
    %100 = vector.broadcast %99 : vector<1x512xf32> to vector<16x512xf32>
    %101 = arith.subf %95, %100 : vector<16x512xf32>
    %102 = arith.mulf %101, %101 : vector<16x512xf32>
    %cst_63 = arith.constant dense<0.000000e+00> : vector<512xf32>
    %103 = vector.multi_reduction <add>, %102, %cst_63 [0] : vector<16x512xf32> to vector<512xf32>
    %104 = vector.shape_cast %103 : vector<512xf32> to vector<1x512xf32>
    %cst_64 = arith.constant 0.0666666701 : f32
    %105 = vector.broadcast %cst_64 : f32 to vector<1x512xf32>
    %106 = arith.mulf %104, %105 : vector<1x512xf32>
    %107 = arith.truncf %99 : vector<1x512xf32> to vector<1x512xbf16>
    %c0_65 = arith.constant 0 : index
    %c0_66 = arith.constant 0 : index
    %108 = vector.load %arg12[%c0_65, %c0_66] : memref<512x512xbf16, #tpu.memory_space<vmem>>, vector<512x512xbf16>
    %cst_67 = arith.constant dense<0.000000e+00> : vector<1x512xf32>
    %109 = tpu.matmul %107, %108, %cst_67 {dimension_numbers = #tpu.dot_dimension_numbers<[1], [0], [0], [1], [0, 0, 1, 1], [], []>} : vector<1x512xbf16>, vector<512x512xbf16>, vector<1x512xf32> -> vector<1x512xf32>
    %110 = arith.truncf %106 : vector<1x512xf32> to vector<1x512xbf16>
    %c0_68 = arith.constant 0 : index
    %c0_69 = arith.constant 0 : index
    %111 = vector.load %arg13[%c0_68, %c0_69] : memref<512x512xbf16, #tpu.memory_space<vmem>>, vector<512x512xbf16>
    %cst_70 = arith.constant dense<0.000000e+00> : vector<1x512xf32>
    %112 = tpu.matmul %110, %111, %cst_70 {dimension_numbers = #tpu.dot_dimension_numbers<[1], [0], [0], [1], [0, 0, 1, 1], [], []>} : vector<1x512xbf16>, vector<512x512xbf16>, vector<1x512xf32> -> vector<1x512xf32>
    %113 = arith.addf %109, %112 : vector<1x512xf32>
    %c0_71 = arith.constant 0 : index
    %c0_72 = arith.constant 0 : index
    %114 = vector.load %arg14[%c0_71, %c0_72] : memref<1x512xf32, #tpu.memory_space<vmem>>, vector<1x512xf32>
    %115 = arith.addf %113, %114 : vector<1x512xf32>
    %116 = arith.truncf %115 : vector<1x512xf32> to vector<1x512xbf16>
    %c0_73 = arith.constant 0 : index
    %c0_74 = arith.constant 0 : index
    %117 = vector.load %arg15[%c0_73, %c0_74] : memref<512x512xbf16, #tpu.memory_space<vmem>>, vector<512x512xbf16>
    %cst_75 = arith.constant dense<0.000000e+00> : vector<1x512xf32>
    %118 = tpu.matmul %116, %117, %cst_75 {dimension_numbers = #tpu.dot_dimension_numbers<[1], [0], [0], [1], [0, 0, 1, 1], [], []>} : vector<1x512xbf16>, vector<512x512xbf16>, vector<1x512xf32> -> vector<1x512xf32>
    %c0_76 = arith.constant 0 : index
    %c0_77 = arith.constant 0 : index
    %119 = vector.load %arg16[%c0_76, %c0_77] : memref<1x512xf32, #tpu.memory_space<vmem>>, vector<1x512xf32>
    %120 = arith.addf %118, %119 : vector<1x512xf32>
    %121 = arith.truncf %120 : vector<1x512xf32> to vector<1x512xbf16>
    %c0_78 = arith.constant 0 : index
    %c0_79 = arith.constant 0 : index
    %122 = vector.load %arg17[%c0_78, %c0_79] : memref<512x8xbf16, #tpu.memory_space<vmem>>, vector<512x8xbf16>
    %cst_80 = arith.constant dense<0.000000e+00> : vector<1x8xf32>
    %123 = tpu.matmul %121, %122, %cst_80 {dimension_numbers = #tpu.dot_dimension_numbers<[1], [0], [0], [1], [0, 0, 1, 1], [], []>} : vector<1x512xbf16>, vector<512x8xbf16>, vector<1x8xf32> -> vector<1x8xf32>
    %c0_81 = arith.constant 0 : index
    %c0_82 = arith.constant 0 : index
    %124 = vector.load %arg18[%c0_81, %c0_82] : memref<1x8xf32, #tpu.memory_space<vmem>>, vector<1x8xf32>
    %125 = arith.addf %123, %124 : vector<1x8xf32>
    %c0_83 = arith.constant 0 : index
    %c0_84 = arith.constant 0 : index
    %c0_85 = arith.constant 0 : index
    %126 = vector.load %arg19[%c0_83, %c0_84, %c0_85] : memref<1x1x8xf32, #tpu.memory_space<vmem>>, vector<1x1x8xf32>
    %127 = vector.shape_cast %126 : vector<1x1x8xf32> to vector<1x8xf32>
    %128 = vector.shape_cast %125 : vector<1x8xf32> to vector<1x1x8xf32>
    tpu.vector_store %arg19[%c0_83, %c0_84, %c0_85], %128 {strides = array<i32>} : memref<1x1x8xf32, #tpu.memory_space<vmem>>, vector<1x1x8xf32>,
    %c0_86 = arith.constant 0 : index
    %c0_87 = arith.constant 0 : index
    %c0_88 = arith.constant 0 : index
    %129 = vector.load %arg20[%c0_86, %c0_87, %c0_88] : memref<1x1x512xf32, #tpu.memory_space<vmem>>, vector<1x1x512xf32>
    %130 = vector.shape_cast %129 : vector<1x1x512xf32> to vector<1x512xf32>
    %131 = vector.shape_cast %120 : vector<1x512xf32> to vector<1x1x512xf32>
    tpu.vector_store %arg20[%c0_86, %c0_87, %c0_88], %131 {strides = array<i32>} : memref<1x1x512xf32, #tpu.memory_space<vmem>>, vector<1x1x512xf32>,
    return
  }
  func.func @transform_0(%arg0: i32) -> (i32, i32, i32) {
    %c0_i32 = arith.constant 0 : i32
    %c0_i32_0 = arith.constant 0 : i32
    %c0_i32_1 = arith.constant 0 : i32
    return %arg0, %c0_i32, %c0_i32_0 : i32, i32, i32
  }
  func.func @transform_1(%arg0: i32) -> (i32, i32, i32) {
    %c0_i32 = arith.constant 0 : i32
    %c0_i32_0 = arith.constant 0 : i32
    %c0_i32_1 = arith.constant 0 : i32
    %c0_i32_2 = arith.constant 0 : i32
    return %c0_i32, %c0_i32_0, %c0_i32_1 : i32, i32, i32
  }
  func.func @transform_2(%arg0: i32) -> (i32, i32) {
    %c0_i32 = arith.constant 0 : i32
    %c0_i32_0 = arith.constant 0 : i32
    %c0_i32_1 = arith.constant 0 : i32
    return %c0_i32, %c0_i32_0 : i32, i32
  }
  func.func @transform_3(%arg0: i32) -> (i32, i32, i32) {
    %c0_i32 = arith.constant 0 : i32
    %c0_i32_0 = arith.constant 0 : i32
    %c0_i32_1 = arith.constant 0 : i32
    %c0_i32_2 = arith.constant 0 : i32
    return %c0_i32, %c0_i32_0, %c0_i32_1 : i32, i32, i32
  }
  func.func @transform_4(%arg0: i32) -> (i32, i32) {
    %c0_i32 = arith.constant 0 : i32
    %c0_i32_0 = arith.constant 0 : i32
    %c0_i32_1 = arith.constant 0 : i32
    return %c0_i32, %c0_i32_0 : i32, i32
  }
  func.func @transform_5(%arg0: i32) -> (i32, i32, i32) {
    %c0_i32 = arith.constant 0 : i32
    %c0_i32_0 = arith.constant 0 : i32
    %c0_i32_1 = arith.constant 0 : i32
    %c0_i32_2 = arith.constant 0 : i32
    return %c0_i32, %c0_i32_0, %c0_i32_1 : i32, i32, i32
  }
  func.func @transform_6(%arg0: i32) -> (i32, i32) {
    %c0_i32 = arith.constant 0 : i32
    %c0_i32_0 = arith.constant 0 : i32
    %c0_i32_1 = arith.constant 0 : i32
    return %c0_i32, %c0_i32_0 : i32, i32
  }
  func.func @transform_7(%arg0: i32) -> (i32, i32) {
    %c0_i32 = arith.constant 0 : i32
    %c0_i32_0 = arith.constant 0 : i32
    %c0_i32_1 = arith.constant 0 : i32
    return %c0_i32, %c0_i32_0 : i32, i32
  }
  func.func @transform_8(%arg0: i32) -> (i32, i32) {
    %c0_i32 = arith.constant 0 : i32
    %c0_i32_0 = arith.constant 0 : i32
    %c0_i32_1 = arith.constant 0 : i32
    return %c0_i32, %c0_i32_0 : i32, i32
  }
  func.func @transform_9(%arg0: i32) -> (i32, i32) {
    %c0_i32 = arith.constant 0 : i32
    %c0_i32_0 = arith.constant 0 : i32
    %c0_i32_1 = arith.constant 0 : i32
    return %c0_i32, %c0_i32_0 : i32, i32
  }
  func.func @transform_10(%arg0: i32) -> (i32, i32) {
    %c0_i32 = arith.constant 0 : i32
    %c0_i32_0 = arith.constant 0 : i32
    %c0_i32_1 = arith.constant 0 : i32
    return %c0_i32, %c0_i32_0 : i32, i32
  }
  func.func @transform_11(%arg0: i32) -> (i32, i32) {
    %c0_i32 = arith.constant 0 : i32
    %c0_i32_0 = arith.constant 0 : i32
    %c0_i32_1 = arith.constant 0 : i32
    return %c0_i32, %c0_i32_0 : i32, i32
  }
  func.func @transform_12(%arg0: i32) -> (i32, i32) {
    %c0_i32 = arith.constant 0 : i32
    %c0_i32_0 = arith.constant 0 : i32
    %c0_i32_1 = arith.constant 0 : i32
    return %c0_i32, %c0_i32_0 : i32, i32
  }
  func.func @transform_13(%arg0: i32) -> (i32, i32) {
    %c0_i32 = arith.constant 0 : i32
    %c0_i32_0 = arith.constant 0 : i32
    %c0_i32_1 = arith.constant 0 : i32
    return %c0_i32, %c0_i32_0 : i32, i32
  }
  func.func @transform_14(%arg0: i32) -> (i32, i32) {
    %c0_i32 = arith.constant 0 : i32
    %c0_i32_0 = arith.constant 0 : i32
    %c0_i32_1 = arith.constant 0 : i32
    return %c0_i32, %c0_i32_0 : i32, i32
  }
  func.func @transform_15(%arg0: i32) -> (i32, i32) {
    %c0_i32 = arith.constant 0 : i32
    %c0_i32_0 = arith.constant 0 : i32
    %c0_i32_1 = arith.constant 0 : i32
    return %c0_i32, %c0_i32_0 : i32, i32
  }
  func.func @transform_16(%arg0: i32) -> (i32, i32) {
    %c0_i32 = arith.constant 0 : i32
    %c0_i32_0 = arith.constant 0 : i32
    %c0_i32_1 = arith.constant 0 : i32
    return %c0_i32, %c0_i32_0 : i32, i32
  }
  func.func @transform_17(%arg0: i32) -> (i32, i32) {
    %c0_i32 = arith.constant 0 : i32
    %c0_i32_0 = arith.constant 0 : i32
    %c0_i32_1 = arith.constant 0 : i32
    return %c0_i32, %c0_i32_0 : i32, i32
  }
  func.func @transform_18(%arg0: i32) -> (i32, i32, i32) {
    %c0_i32 = arith.constant 0 : i32
    %c0_i32_0 = arith.constant 0 : i32
    %c0_i32_1 = arith.constant 0 : i32
    return %arg0, %c0_i32, %c0_i32_0 : i32, i32, i32
  }
  func.func @transform_19(%arg0: i32) -> (i32, i32, i32) {
    %c0_i32 = arith.constant 0 : i32
    %c0_i32_0 = arith.constant 0 : i32
    %c0_i32_1 = arith.constant 0 : i32
    return %arg0, %c0_i32, %c0_i32_0 : i32, i32, i32
  }
}

</mosaic_0001>

<bundles_post_ra>
// kernel: x_vector_forward.1
= control target key start
LH: loop header
LB: loop body
LE: loop exit
PB: predicated region body
PF: predicated region fallthrough
CT: control target
= control target key end

     0   :  { %s17879_s0 = inlined_call_operand.hbm [shape: f32[2,24,40], index: 0, kind: input, shape index: {}]   ;;  %s17880_s1 = inlined_call_operand.hbm [shape: bf16[5,40,512], index: 1, kind: input, shape index: {}]   ;;  %s17881_s2 = inlined_call_operand.hbm [shape: f32[1,512], index: 2, kind: input, shape index: {}]   ;;  %s17882_s3 = inlined_call_operand.hbm [shape: bf16[3,512,512], index: 3, kind: input, shape index: {}]   ;;  %s17883_s4 = inlined_call_operand.hbm [shape: f32[1,512], index: 4, kind: input, shape index: {}]   ;;  %s17884_s5 = inlined_call_operand.hbm [shape: bf16[2,512,512], index: 5, kind: input, shape index: {}]   ;;  %s17885_s6 = inlined_call_operand.hbm [shape: f32[1,512], index: 6, kind: input, shape index: {}]   ;;  %s17886_s7 = inlined_call_operand.hbm [shape: bf16[512,512], index: 7, kind: input, shape index: {}]   ;;  %s17887_s8 = inlined_call_operand.hbm [shape: f32[1,512], index: 8, kind: input, shape index: {}]   ;;  %s17888_s9 = inlined_call_operand.hbm [shape: bf16[512,512], index: 9, kind: input, shape index: {}]   ;;  %s17889_s10 = inlined_call_operand.hbm [shape: f32[1,512], index: 10, kind: input, shape index: {}]   ;;  %s17890_s11 = inlined_call_operand.hbm [shape: bf16[512,512], index: 11, kind: input, shape index: {}]   ;;  %s17891_s12 = inlined_call_operand.hbm [shape: bf16[512,512], index: 12, kind: input, shape index: {}]   ;;  %s17892_s13 = inlined_call_operand.hbm [shape: f32[1,512], index: 13, kind: input, shape index: {}]   ;;  %s17893_s14 = inlined_call_operand.hbm [shape: bf16[512,512], index: 14, kind: input, shape index: {}]   ;;  %s17894_s15 = inlined_call_operand.hbm [shape: f32[1,512], index: 15, kind: input, shape index: {}]   ;;  %s17895_s16 = inlined_call_operand.vmem [shape: bf16[512,8], index: 16, kind: input, shape index: {}]   ;;  %s17896_s17 = inlined_call_operand.hbm [shape: f32[1,8], index: 17, kind: input, shape index: {}]   ;;  %s17897_s18 = inlined_call_operand.hbm [shape: f32[2,1,8], index: 18, kind: output, shape index: {0}]   ;;  %s17898_s19 = inlined_call_operand.vmem [shape: f32[2,1,512], index: 19, kind: output, shape index: {1}]  }
   0x1   :  { %17914 = sst [smem:[#allocation43_spill]] %s17879_s0 }
   0x2   :  { %17915 = sst [smem:[#allocation44_spill]] %s17880_s1 }
   0x3   :  { %17916 = sst [smem:[#allocation45_spill]] %s17881_s2 }
   0x4   :  { %17917 = sst [smem:[#allocation46_spill]] %s17882_s3 }
   0x5   :  { %17918 = sst [smem:[#allocation47_spill]] %s17883_s4 }
   0x6   :  { %17919 = sst [smem:[#allocation48_spill]] %s17884_s5 }
   0x7   :  { %17920 = sst [smem:[#allocation49_spill]] %s17885_s6 }
   0x8   :  { %17921 = sst [smem:[#allocation50_spill]] %s17886_s7 }
   0x9   :  { %17922 = sst [smem:[#allocation51_spill]] %s17887_s8 }
   0xa   :  { %17923 = sst [smem:[#allocation52_spill]] %s17888_s9 }
   0xb   :  { %17924 = sst [smem:[#allocation53_spill]] %s17889_s10 }
   0xc   :  { %17925 = sst [smem:[#allocation54_spill]] %s17895_s16 }
   0xd   :  { %17926 = sst [smem:[#allocation55_spill]] %s17897_s18 }
   0xe   :  { %17927 = sst [smem:[#allocation56_spill]] %s17898_s19 }
   0xf   :  { %25 = vsyncpa [#allocation3], 0 }
  0x10   :  { %27 = vsyncpa [#allocation3 + $0x1], 0 }
  0x11   :  { %28 = vsyncpa [#allocation6], 0 }
  0x12   :  { %29 = vsyncpa [#allocation9], 0 }
  0x13   :  { %30 = vsyncpa [#allocation12], 0 }
  0x14   :  { %31 = vsyncpa [#allocation15], 0 }
  0x15   :  { %32 = vsyncpa [#allocation18], 0 }
  0x16   :  { %33 = vsyncpa [#allocation21], 0 }
  0x17   :  { %34 = vsyncpa [#allocation24], 0 }
  0x18   :  { %35 = vsyncpa [#allocation27], 0 }
  0x19   :  { %36 = vsyncpa [#allocation4], 0 }
  0x1a   :  { %38 = vsyncpa [#allocation4 + $0x1], 0  ;;  %s16828_s0 = smov 0   ;;  %s16830_s30 = smov 0  }
  0x1b   :  { %s16832_s20 = smov 0   ;;  %s16834_s21 = smov 0  }
  0x1c LB: > { %s16704_s1 = smov [#allocation5]   ;;  %s16849_s2 = sadd.s32 4294967295, %s16702_s21   ;;  %s16702_s21 = sphi %s16834_s21, %s17982_s21   ;;  %s16698_s20 = sphi %s16832_s20, %s17981_s20   ;;  %s16694_s30 = sphi %s16830_s30, %s17980_s30   ;;  %s16690_s0 = sphi %s16828_s0, %s17979_s0  }
  0x1d   : > { %s496_s22 = sshll.u32 %s16704_s1, 4  ;;  %p12428_p0 = scmp.ge.s32.totalorder %s16702_s21, 1  ;;  %s497_s22 = int_to_ptr.vmem [resolvable:$true] %s496_s22 }
  0x1e   : > { %p17902_p1 = scmp.eq.s32.totalorder %s16849_s2, 0  ;;  %p484_p2 = scmp.lt.s32.totalorder %s16702_s21, 3 }
  0x1f   : > { %s16705_s24 = smov [#allocation8]   ;;  %s16706_s26 = smov [#allocation11]  }
  0x20   : > { %p16854_p3 = pnand %p12428_p0, %p484_p2  ;;  %s520_s25 = sshll.u32 %s16705_s24, 4  ;;  %s16867_s25 = int_to_ptr.vmem [resolvable:$true] %s520_s25 }
  0x21   : > { %s544_s27 = sshll.u32 %s16706_s26, 4  ;;  %s16173_s29 = scalar_lea.vmem %s497_s22, 6400  ;;  %s16869_s27 = int_to_ptr.vmem [resolvable:$true] %s544_s27 }
  0x22   : > { %s17928_s23 = scalar_select %p16854_p3, 1, 0 }
  0x23   : > { %p13985_p5 = pneg %p16854_p3  ;;  %p16174_p8 = scmp.ne.s32.totalorder %s497_s22, %s16173_s29 }
  0x24   : > { %p16181_p11 = scmp.lt.s32.totalorder %s497_s22, %s497_s22  ;;  %p16182_p12 = scmp.lt.s32.totalorder %s16173_s29, %s16173_s29 }
  0x25   : > { %p16863_p6 = pnand %p13985_p5, %p17902_p1 }
  0x26   : > { %p16183_p13 = por %p16182_p12, %p16181_p11 }
  0x27   : > { %p16873_p7 = pneg %p16863_p6 }
  0x29   : > { %p16176_p9 = pnand %p16174_p8, %p16873_p7 }
  0x2b   : > { %p16177_p10 = pneg %p16176_p9 }
  0x2d   : > { %p16184_p0 = pnand %p16183_p13, %p16177_p10 }
  0x2f   : > { %16187 = shalt.err (!%p16184_p0)
}
  0x30   : > { %s17904_s1 = smov 256   ;;  %s16708_s24 = smov 16  }
  0x31   : > { %s17931_s19 = sld [smem:[#allocation44_spill]]  ;;  %s16199_s16 = scalar_lea.vmem %s16867_s25, 49152 }
  0x32   : > { %p16200_p2 = scmp.ne.s32.totalorder %s16867_s25, %s16199_s16  ;;  %p16207_p9 = scmp.lt.s32.totalorder %s16867_s25, %s16867_s25 }
  0x33   : > { %p16208_p10 = scmp.lt.s32.totalorder %s16199_s16, %s16199_s16 }
  0x34   : > { %p16202_p5 = pnand %p16200_p2, %p16873_p7 }
  0x35   : > { %p16209_p11 = por %p16208_p10, %p16207_p9 }
  0x36   : > { %p16203_p8 = pneg %p16202_p5 }
  0x37   : > { %13988 = dma.hbm_to_vmem [thread:$0]  (!%p16863_p6), %s17931_s19, 6400, %s497_s22, [#allocation6], %s17904_s1, %s17904_s1, %s16708_s24  }
  0x38   : > { %p16210_p12 = pnand %p16209_p11, %p16203_p8 }
  0x3a   : > { %16213 = shalt.err (!%p16210_p12)
}
  0x3b   : > { %s17932_s19 = sld [smem:[#allocation46_spill]]  ;;  %s16225_s22 = scalar_lea.vmem %s16869_s27, 32768 }
  0x3c   : > { %p16226_p13 = scmp.ne.s32.totalorder %s16869_s27, %s16225_s22  ;;  %p16233_p5 = scmp.lt.s32.totalorder %s16869_s27, %s16869_s27 }
  0x3d   : > { %p16234_p8 = scmp.lt.s32.totalorder %s16225_s22, %s16225_s22 }
  0x3e   : > { %p16228_p0 = pnand %p16226_p13, %p16873_p7 }
  0x3f   : > { %p16235_p9 = por %p16234_p8, %p16233_p5 }
  0x40   : > { %p16229_p2 = pneg %p16228_p0 }
  0x41   : > { %13994 = dma.hbm_to_vmem [thread:$0]  (!%p16863_p6), %s17932_s19, 49152, %s16867_s25, [#allocation9], %s17904_s1, %s17904_s1, %s16708_s24  }
  0x42   : > { %p16236_p10 = pnand %p16235_p9, %p16229_p2 }
  0x44   : > { %16239 = shalt.err (!%p16236_p10)
}
  0x45   : > { %s17933_s5 = sld [smem:[#allocation48_spill]]  ;;  %s16709_s25 = smov [#allocation14]  }
  0x46   : > { %s568_s29 = sshll.u32 %s16709_s25, 4  ;;  %s16710_s18 = smov [#allocation17]   ;;  %s569_s29 = int_to_ptr.vmem [resolvable:$true] %s568_s29 }
  0x47   : > { %s592_s19 = sshll.u32 %s16710_s18, 4  ;;  %s16251_s22 = scalar_lea.vmem %s569_s29, 16384  ;;  %s593_s19 = int_to_ptr.vmem [resolvable:$true] %s592_s19 }
  0x48   : > { %p16252_p11 = scmp.ne.s32.totalorder %s569_s29, %s16251_s22  ;;  %p16259_p0 = scmp.lt.s32.totalorder %s569_s29, %s569_s29 }
  0x49   : > { %p16260_p2 = scmp.lt.s32.totalorder %s16251_s22, %s16251_s22 }
  0x4a   : > { %p16254_p12 = pnand %p16252_p11, %p16873_p7 }
  0x4b   : > { %14000 = dma.hbm_to_vmem [thread:$0]  (!%p16863_p6), %s17933_s5, 32768, %s16869_s27, [#allocation12], %s17904_s1, %s17904_s1, %s16708_s24  }
  0x4c   : > { %p16255_p13 = pneg %p16254_p12  ;;  %p16261_p5 = por %p16260_p2, %p16259_p0 }
  0x4e   : > { %p16262_p8 = pnand %p16261_p5, %p16255_p13 }
  0x50   : > { %16265 = shalt.err (!%p16262_p8)
}
  0x51   : > { %s17934_s7 = sld [smem:[#allocation50_spill]]  ;;  %s16277_s26 = scalar_lea.vmem %s593_s19, 16384 }
  0x52   : > { %p16278_p9 = scmp.ne.s32.totalorder %s593_s19, %s16277_s26  ;;  %p16285_p12 = scmp.lt.s32.totalorder %s593_s19, %s593_s19 }
  0x53   : > { %p16286_p0 = scmp.lt.s32.totalorder %s16277_s26, %s16277_s26 }
  0x54   : > { %p16280_p10 = pnand %p16278_p9, %p16873_p7 }
  0x55   : > { %p16287_p13 = por %p16286_p0, %p16285_p12 }
  0x56   : > { %p16281_p11 = pneg %p16280_p10 }
  0x57   : > { %14006 = dma.hbm_to_vmem [thread:$0]  (!%p16863_p6), %s17934_s7, 16384, %s569_s29, [#allocation15], %s17904_s1, %s17904_s1, %s16708_s24  }
  0x58   : > { %p16288_p2 = pnand %p16287_p13, %p16281_p11 }
  0x5a   : > { %16291 = shalt.err (!%p16288_p2)
}
  0x5b   : > { %s17935_s9 = sld [smem:[#allocation52_spill]]  ;;  %s16711_s29 = smov [#allocation20]  }
  0x5c   : > { %s616_s22 = sshll.u32 %s16711_s29, 4  ;;  %s16712_s27 = smov [#allocation23]   ;;  %s617_s22 = int_to_ptr.vmem [resolvable:$true] %s616_s22 }
  0x5d   : > { %s643_s16 = sshll.u32 %s16712_s27, 4  ;;  %s16303_s5 = scalar_lea.vmem %s617_s22, 16384  ;;  %s644_s16 = int_to_ptr.vmem [resolvable:$true] %s643_s16 }
  0x5e   : > { %p16304_p5 = scmp.ne.s32.totalorder %s617_s22, %s16303_s5  ;;  %p16311_p10 = scmp.lt.s32.totalorder %s617_s22, %s617_s22 }
  0x5f   : > { %p16312_p11 = scmp.lt.s32.totalorder %s16303_s5, %s16303_s5 }
  0x60   : > { %p16306_p8 = pnand %p16304_p5, %p16873_p7 }
  0x61   : > { %14012 = dma.hbm_to_vmem [thread:$0]  (!%p16863_p6), %s17935_s9, 16384, %s593_s19, [#allocation18], %s17904_s1, %s17904_s1, %s16708_s24  }
  0x62   : > { %p16307_p9 = pneg %p16306_p8  ;;  %p16313_p12 = por %p16312_p11, %p16311_p10 }
  0x64   : > { %p16314_p0 = pnand %p16313_p12, %p16307_p9 }
  0x66   : > { %16317 = shalt.err (!%p16314_p0)
}
  0x67   : > { %14018 = dma.hbm_to_vmem [thread:$0]  (!%p16863_p6), %s17890_s11, 16384, %s617_s22, [#allocation21], %s17904_s1, %s17904_s1, %s16708_s24  }
  0x68   : > { %s16329_s25 = scalar_lea.vmem %s644_s16, 64  ;;  %p16337_p8 = scmp.lt.s32.totalorder %s644_s16, %s644_s16 }
  0x69   : > { %p16330_p13 = scmp.ne.s32.totalorder %s644_s16, %s16329_s25  ;;  %p16338_p10 = scmp.lt.s32.totalorder %s16329_s25, %s16329_s25 }
  0x6b   : > { %p16332_p2 = pnand %p16330_p13, %p16873_p7  ;;  %p16339_p9 = por %p16338_p10, %p16337_p8 }
  0x6d   : > { %p16333_p5 = pneg %p16332_p2 }
  0x6f   : > { %p16340_p11 = pnand %p16339_p9, %p16333_p5 }
  0x71   : > { %16343 = shalt.err (!%p16340_p11)
}
  0x72   : > { %14024 = dma.hbm_to_vmem [thread:$0]  (!%p16863_p6), %s17892_s13, 64, %s644_s16, [#allocation24]  }
  0x73   : > { %s16713_s29 = smov [#allocation26]   ;;  %s16714_s27 = smov [#allocation7]  }
  0x74   : > { %s667_s22 = sshll.u32 %s16713_s29, 4  ;;  %s510_s19 = sshll.u32 %s16714_s27, 4  ;;  %s668_s22 = int_to_ptr.vmem [resolvable:$true] %s667_s22  ;;  %s511_s19 = int_to_ptr.vmem [resolvable:$true] %s510_s19 }
  0x75   : > { %s16355_s26 = scalar_lea.vmem %s668_s22, 64  ;;  %p16363_p2 = scmp.lt.s32.totalorder %s668_s22, %s668_s22 }
  0x76   : > { %p16356_p12 = scmp.ne.s32.totalorder %s668_s22, %s16355_s26  ;;  %p16364_p5 = scmp.lt.s32.totalorder %s16355_s26, %s16355_s26 }
  0x78   : > { %p16358_p0 = pnand %p16356_p12, %p16873_p7  ;;  %p16365_p8 = por %p16364_p5, %p16363_p2 }
  0x7a   : > { %p16359_p13 = pneg %p16358_p0 }
  0x7c   : > { %p16366_p10 = pnand %p16365_p8, %p16359_p13 }
  0x7e   : > { %16369 = shalt.err (!%p16366_p10)
}
  0x7f   : > { %14030 = dma.hbm_to_vmem [thread:$0]  (!%p16863_p6), %s17894_s15, 64, %s668_s22, [#allocation27]  }
  0x80   : > { %s16381_s16 = scalar_lea.vmem %s511_s19, 64  ;;  %p16389_p12 = scmp.lt.s32.totalorder %s511_s19, %s511_s19 }
  0x81   : > { %p16382_p9 = scmp.ne.s32.totalorder %s511_s19, %s16381_s16  ;;  %p16390_p0 = scmp.lt.s32.totalorder %s16381_s16, %s16381_s16 }
  0x83   : > { %p16384_p11 = pnand %p16382_p9, %p16873_p7  ;;  %p16391_p1 = por %p16390_p0, %p16389_p12 }
  0x85   : > { %p16385_p4 = pneg %p16384_p11 }
  0x87   : > { %p16392_p3 = pnand %p16391_p1, %p16385_p4 }
  0x89   : > { %16395 = shalt.err (!%p16392_p3)
}
  0x8a   : > { %s17936_s27 = sld [smem:[#allocation45_spill]]  ;;  %s16715_s26 = smov [#allocation10]  }
  0x8b   : > { %s534_s22 = sshll.u32 %s16715_s26, 4  ;;  %s16716_s25 = smov [#allocation13]   ;;  %s535_s22 = int_to_ptr.vmem [resolvable:$true] %s534_s22 }
  0x8c   : > { %s558_s5 = sshll.u32 %s16716_s25, 4  ;;  %s16407_s1 = scalar_lea.vmem %s535_s22, 64  ;;  %s559_s5 = int_to_ptr.vmem [resolvable:$true] %s558_s5 }
  0x8d   : > { %p16408_p13 = scmp.ne.s32.totalorder %s535_s22, %s16407_s1  ;;  %p16415_p8 = scmp.lt.s32.totalorder %s535_s22, %s535_s22 }
  0x8e   : > { %p16416_p1 = scmp.lt.s32.totalorder %s16407_s1, %s16407_s1 }
  0x8f   : > { %p16410_p2 = pnand %p16408_p13, %p16873_p7 }
  0x90   : > { %13991 = dma.hbm_to_vmem [thread:$0]  (!%p16863_p6), %s17936_s27, 64, %s511_s19, [#allocation6]  }
  0x91   : > { %p16411_p5 = pneg %p16410_p2  ;;  %p16417_p3 = por %p16416_p1, %p16415_p8 }
  0x93   : > { %p16418_p4 = pnand %p16417_p3, %p16411_p5 }
  0x95   : > { %16421 = shalt.err (!%p16418_p4)
}
  0x96   : > { %s17937_s4 = sld [smem:[#allocation47_spill]]  ;;  %s16433_s19 = scalar_lea.vmem %s559_s5, 64 }
  0x97   : > { %p16434_p10 = scmp.ne.s32.totalorder %s559_s5, %s16433_s19  ;;  %p16441_p12 = scmp.lt.s32.totalorder %s559_s5, %s559_s5 }
  0x98   : > { %p16442_p0 = scmp.lt.s32.totalorder %s16433_s19, %s16433_s19 }
  0x99   : > { %p16436_p9 = pnand %p16434_p10, %p16873_p7 }
  0x9a   : > { %p16443_p13 = por %p16442_p0, %p16441_p12 }
  0x9b   : > { %p16437_p11 = pneg %p16436_p9 }
  0x9c   : > { %13997 = dma.hbm_to_vmem [thread:$0]  (!%p16863_p6), %s17937_s4, 64, %s535_s22, [#allocation9]  }
  0x9d   : > { %p16444_p2 = pnand %p16443_p13, %p16437_p11 }
  0x9f   : > { %16447 = shalt.err (!%p16444_p2)
}
  0xa0   : > { %s17938_s6 = sld [smem:[#allocation49_spill]]  ;;  %s16717_s27 = smov [#allocation16]  }
  0xa1   : > { %s582_s26 = sshll.u32 %s16717_s27, 4  ;;  %s16718_s22 = smov [#allocation19]   ;;  %s583_s26 = int_to_ptr.vmem [resolvable:$true] %s582_s26 }
  0xa2   : > { %s606_s25 = sshll.u32 %s16718_s22, 4  ;;  %s16459_s16 = scalar_lea.vmem %s583_s26, 64  ;;  %s607_s25 = int_to_ptr.vmem [resolvable:$true] %s606_s25 }
  0xa3   : > { %p16460_p5 = scmp.ne.s32.totalorder %s583_s26, %s16459_s16  ;;  %p16467_p3 = scmp.lt.s32.totalorder %s583_s26, %s583_s26 }
  0xa4   : > { %p16468_p4 = scmp.lt.s32.totalorder %s16459_s16, %s16459_s16 }
  0xa5   : > { %p16462_p8 = pnand %p16460_p5, %p16873_p7 }
  0xa6   : > { %14003 = dma.hbm_to_vmem [thread:$0]  (!%p16863_p6), %s17938_s6, 64, %s559_s5, [#allocation12]  }
  0xa7   : > { %p16463_p1 = pneg %p16462_p8  ;;  %p16469_p10 = por %p16468_p4, %p16467_p3 }
  0xa9   : > { %p16470_p9 = pnand %p16469_p10, %p16463_p1 }
  0xab   : > { %16473 = shalt.err (!%p16470_p9)
}
  0xac   : > { %s17939_s8 = sld [smem:[#allocation51_spill]]  ;;  %s16485_s5 = scalar_lea.vmem %s607_s25, 64 }
  0xad   : > { %p16486_p11 = scmp.ne.s32.totalorder %s607_s25, %s16485_s5  ;;  %p16493_p13 = scmp.lt.s32.totalorder %s607_s25, %s607_s25 }
  0xae   : > { %p16494_p2 = scmp.lt.s32.totalorder %s16485_s5, %s16485_s5 }
  0xaf   : > { %p16488_p12 = pnand %p16486_p11, %p16873_p7 }
  0xb0   : > { %p16495_p5 = por %p16494_p2, %p16493_p13 }
  0xb1   : > { %p16489_p0 = pneg %p16488_p12 }
  0xb2   : > { %14009 = dma.hbm_to_vmem [thread:$0]  (!%p16863_p6), %s17939_s8, 64, %s583_s26, [#allocation15]  }
  0xb3   : > { %p16496_p8 = pnand %p16495_p5, %p16489_p0 }
  0xb5   : > { %16499 = shalt.err (!%p16496_p8)
}
  0xb6   : > { %s17940_s10 = sld [smem:[#allocation53_spill]]  ;;  %s16719_s27 = smov [#allocation22]  }
  0xb7   : > { %s629_s26 = sshll.u32 %s16719_s27, 4  ;;  %s16720_s22 = smov [#allocation25]   ;;  %s630_s26 = int_to_ptr.vmem [resolvable:$true] %s629_s26 }
  0xb8   : > { %s653_s16 = sshll.u32 %s16720_s22, 4  ;;  %s16511_s18 = scalar_lea.vmem %s630_s26, 16384  ;;  %s654_s16 = int_to_ptr.vmem [resolvable:$true] %s653_s16 }
  0xb9   : > { %p16512_p1 = scmp.ne.s32.totalorder %s630_s26, %s16511_s18  ;;  %p16519_p10 = scmp.lt.s32.totalorder %s630_s26, %s630_s26 }
  0xba   : > { %p16520_p9 = scmp.lt.s32.totalorder %s16511_s18, %s16511_s18 }
  0xbb   : > { %p16514_p3 = pnand %p16512_p1, %p16873_p7 }
  0xbc   : > { %14015 = dma.hbm_to_vmem [thread:$0]  (!%p16863_p6), %s17940_s10, 64, %s607_s25, [#allocation18]  }
  0xbd   : > { %p16515_p4 = pneg %p16514_p3  ;;  %p16521_p11 = por %p16520_p9, %p16519_p10 }
  0xbf   : > { %p16522_p12 = pnand %p16521_p11, %p16515_p4 }
  0xc1   : > { %16525 = shalt.err (!%p16522_p12)
}
  0xc2   : > { %s17941_s19 = smov 256   ;;  %s16537_s1 = scalar_lea.vmem %s654_s16, 16384 }
  0xc3   : > { %14021 = dma.hbm_to_vmem [thread:$0]  (!%p16863_p6), %s17891_s12, 16384, %s630_s26, [#allocation21], %s17941_s19, %s17941_s19, %s16708_s24  }
  0xc4   : > { %p16538_p0 = scmp.ne.s32.totalorder %s654_s16, %s16537_s1  ;;  %p16545_p5 = scmp.lt.s32.totalorder %s654_s16, %s654_s16 }
  0xc5   : > { %p16546_p8 = scmp.lt.s32.totalorder %s16537_s1, %s16537_s1 }
  0xc6   : > { %p16540_p13 = pnand %p16538_p0, %p16873_p7 }
  0xc7   : > { %p16547_p1 = por %p16546_p8, %p16545_p5 }
  0xc8   : > { %p16541_p2 = pneg %p16540_p13 }
  0xca   : > { %p16548_p3 = pnand %p16547_p1, %p16541_p2 }
  0xcc   : > { %16551 = shalt.err (!%p16548_p3)
}
  0xcd   : > { %14027 = dma.hbm_to_vmem [thread:$0]  (!%p16863_p6), %s17893_s14, 16384, %s654_s16, [#allocation24], %s17941_s19, %s17941_s19, %s16708_s24  }
  0xce   : > { %s16721_s26 = smov [#allocation28]  }
  0xcf   : > { %s681_s22 = sshll.u32 %s16721_s26, 4  ;;  %s682_s22 = int_to_ptr.vmem [resolvable:$true] %s681_s22 }
  0xd0   : > { %s16563_s18 = scalar_lea.vmem %s682_s22, 16  ;;  %s16570_s25 = scalar_lea.vmem %s682_s22, 32 }
  0xd1   : > { %p16564_p4 = scmp.ne.s32.totalorder %s682_s22, %s16563_s18  ;;  %p16571_p11 = scmp.lt.s32.totalorder %s682_s22, %s682_s22 }
  0xd2   : > { %p16572_p12 = scmp.lt.s32.totalorder %s16570_s25, %s16563_s18 }
  0xd3   : > { %p16566_p10 = pnand %p16564_p4, %p16873_p7 }
  0xd4   : > { %p16573_p0 = por %p16572_p12, %p16571_p11 }
  0xd5   : > { %p16567_p9 = pneg %p16566_p10 }
  0xd7   : > { %p16574_p13 = pnand %p16573_p0, %p16567_p9 }
  0xd9   : > { %16577 = shalt.err (!%p16574_p13)
}
  0xda   : > { %14033 = dma.hbm_to_vmem [thread:$0]  (!%p16863_p6), %s17896_s17, 16, %s682_s22, [#allocation27]  }
  0xdb   : > { %s12427_s28 = sadd.s32 4294967294, %s16702_s21   ;;  %s17025_s3 = sadd.s32 1, %s16702_s21  }
  0xdc   : > { %s48_s24 = ssub.s32 %s16702_s21, %s17025_s3  ;;  %s51_s16 = sadd.s32 1, %s16698_s20 }
  0xdd   : > { %p49_p7 = scmp.eq.s32.totalorder %s48_s24, 0  ;;  %p58_p2 = scmp.ne.s32.totalorder %s16698_s20, %s16694_s30 }
  0xde   : > { %p59_p5 = scmp.eq.s32.totalorder %s16702_s21, 0  ;;  %p64_p8 = scmp.ne.s32.totalorder %s16694_s30, %s16690_s0 }
  0xdf   : > { %s17036_s19 = scalar_select %p49_p7, %s16698_s20, %s51_s16  }
  0xe0   : > { %p60_p1 = por %p59_p5, %p58_p2  ;;  %p17942_p3 = scmp.eq.s32.totalorder %s16849_s2, 0 }
  0xe1   : > { %p445_p6 = scmp.eq.s32.totalorder %s16849_s2, 1  ;;  %p451_p10 = scmp.eq.s32.totalorder %s12427_s28, 1 }
  0xe2   : > { %p17040_p4 = por %p17942_p3, %p64_p8  ;;  %p14058_p9 = scmp.lt.s32.totalorder %s16702_s21, 2 }
  0xe3   : > { %s692_s27 = sand.u32 1, %s16698_s20   ;;  %p17047_p11 = por %p445_p6, %p58_p2 }
  0xe4   : > { %s17943_s29 = scalar_select %p17040_p4, 1, 0 }
  0xe5   : > { %s17944_s26 = scalar_select %p17047_p11, 1, 0 }
  0xe6   : > { %p17051_p12 = por %p451_p10, %p64_p8  ;;  %s13914_s18 = smul.u32 24, %s692_s27 }
  0xe7   : > { %s13915_s25 = smul.u32 384, %s16702_s21  ;;  %p17056_p0 = pnand %p14058_p9, %p60_p1 }
  0xe8   : > { %s17945_s22 = scalar_select %p17051_p12, 1, 0 }
  0xe9   : > { %s17947_s16 = sld [smem:[#allocation43_spill]]  ;;  %s696_s4 = scalar_lea.vmem [#allocation2], %s13914_s18 }
  0xea   : > { %s703_s6 = sshll.u32 %s696_s4, 4  ;;  %s17067_s7 = scalar_lea.sflag [#allocation3], %s692_s27  ;;  %s17065_s6 = int_to_ptr.vmem [resolvable:$true] %s703_s6 }
  0xeb   : > { %p16580_p7 = pneg %p17056_p0 }
  0xef   : > { %s17063_s28 = scalar_lea.hbm %s17947_s16, %s13915_s25  ;;  %s16583_s25 = scalar_lea.hbm %s17947_s16, 768 }
  0xf0   : > { %s16578_s8 = scalar_lea.hbm %s17063_s28, 384  ;;  %p16584_p8 = scmp.lt.s32.totalorder %s17063_s28, %s17947_s16 }
  0xf1   : > { %p16579_p13 = scmp.ne.s32.totalorder %s17063_s28, %s16578_s8  ;;  %p16585_p1 = scmp.lt.s32.totalorder %s16583_s25, %s16578_s8 }
  0xf3   : > { %p16581_p2 = pnand %p16580_p7, %p16579_p13  ;;  %p16586_p3 = por %p16585_p1, %p16584_p8 }
  0xf5   : > { %p16582_p5 = pneg %p16581_p2 }
  0xf7   : > { %p16587_p6 = pnand %p16586_p3, %p16582_p5 }
  0xf9   : > { %16590 = shalt.err (!%p16587_p6)
}
  0xfa   : > { %s16591_s4 = scalar_lea.vmem %s17065_s6, 384  ;;  %s16722_s27 = smov [#allocation2]  }
  0xfb   : > { %p16592_p10 = scmp.ne.s32.totalorder %s17065_s6, %s16591_s4  ;;  %s16596_s18 = sshll.u32 %s16722_s27, 4  ;;  %s16597_s18 = int_to_ptr.vmem [resolvable:$false] %s16596_s18 }
  0xfc   : > { %s16598_s9 = scalar_lea.vmem %s16597_s18, 768  ;;  %p16599_p2 = scmp.lt.s32.totalorder %s17065_s6, %s16597_s18 }
  0xfd   : > { %p16594_p9 = pnand %p16592_p10, %p16580_p7  ;;  %p16600_p12 = scmp.lt.s32.totalorder %s16598_s9, %s16591_s4 }
  0xff   : > { %p16595_p13 = pneg %p16594_p9  ;;  %p16601_p11 = por %p16600_p12, %p16599_p2 }
 0x101   : > { %p16602_p4 = pnand %p16601_p11, %p16595_p13 }
 0x103   : > { %16605 = shalt.err (!%p16602_p4)
}
 0x104   : > { %s16723_s8 = smov 128   ;;  %s16724_s10 = smov 8  }
 0x105   : > { %14037 = dma.hbm_to_vmem [thread:$0]  (!%p17056_p0), %s17063_s28, 384, %s17065_s6, %s17067_s7, %s16723_s8, %s16723_s8, %s16724_s10  }
 0x106   : > { %p17948_p7 = scmp.ne.s32.totalorder %s17928_s23, 0 }
 0x108   : > { %715 = sbr.rel (%p17948_p7) target bundleno = 2982 (0xba6), region = 92 }
 0x10d   : > { %s17091_s1 = sand.u32 1, %s16694_s30   ;;  %p17949_p4 = scmp.ne.s32.totalorder %s17943_s29, 0 }
 0x10e   : > { %s13916_s25 = smul.u32 24, %s17091_s1  ;;  %s718_s24 = scalar_lea.sflag [#allocation3], %s17091_s1 }
 0x110   : > { %s17095_s4 = scalar_lea.vmem [#allocation2], %s13916_s25 }
 0x111   : > { %16649 = dma.done.wait (%p17949_p4), %s718_s24, 384  }
 0x112   : > { %16651 = vsyncadd (%p17949_p4), %s718_s24, 4294966912  ;;  %p17950_p11 = scmp.eq.s32.totalorder %s16849_s2, 0 }
 0x114   : > { %16653 = dma.done.wait (%p17950_p11), [#allocation6], 6464   ;;  %p17951_p12 = pmov %p17950_p11 }
 0x115   : > { %p17952_p0 = pmov %p17950_p11 }
 0x116   : > { %16655 = vsyncadd (%p17951_p12), [#allocation6], 4294960832 }
 0x117   : > { %16657 = dma.done.wait (%p17952_p0), [#allocation9], 49216   ;;  %p17953_p5 = pmov %p17952_p0 }
 0x118   : > { %p17954_p8 = pmov %p17952_p0 }
 0x119   : > { %16659 = vsyncadd (%p17953_p5), [#allocation9], 4294918080 }
 0x11a   : > { %16661 = dma.done.wait (%p17954_p8), [#allocation12], 32832   ;;  %p17955_p1 = pmov %p17952_p0 }
 0x11b   : > { %p17956_p3 = pmov %p17952_p0 }
 0x11c   : > { %16663 = vsyncadd (%p17955_p1), [#allocation12], 4294934464 }
 0x11d   : > { %16665 = dma.done.wait (%p17956_p3), [#allocation15], 16448   ;;  %p17957_p6 = pmov %p17952_p0 }
 0x11e   : > { %p17958_p10 = pmov %p17952_p0 }
 0x11f   : > { %16667 = vsyncadd (%p17957_p6), [#allocation15], 4294950848 }
 0x120   : > { %16669 = dma.done.wait (%p17958_p10), [#allocation18], 16448   ;;  %p17959_p9 = pmov %p17952_p0 }
 0x121   : > { %p17960_p13 = pmov %p17952_p0 }
 0x122   : > { %16671 = vsyncadd (%p17959_p9), [#allocation18], 4294950848 }
 0x123   : > { %16673 = dma.done.wait (%p17960_p13), [#allocation21], 32768   ;;  %p17961_p2 = pmov %p17952_p0 }
 0x124   : > { %p17962_p7 = pmov %p17952_p0 }
 0x125   : > { %16675 = vsyncadd (%p17961_p2), [#allocation21], 4294934528 }
 0x126   : > { %16677 = dma.done.wait (%p17962_p7), [#allocation24], 16448   ;;  %p17963_p4 = pmov %p17952_p0 }
 0x127   : > { %p17964_p11 = pmov %p17952_p0 }
 0x128   : > { %16679 = vsyncadd (%p17963_p4), [#allocation24], 4294950848 }
 0x129   : > { %16681 = dma.done.wait (%p17964_p11), [#allocation27], 80   ;;  %p17965_p12 = pmov %p17952_p0 }
 0x12a   : > { %v16725_v0 = vmov 0   ;;  %v872_v1 = vld [vmem:[#allocation5 + $0x90] sm:$0xff]  ;;  %vm947_vm0 = vcmask 1043456   ;;  %v873_v2 = vld [vmem:[#allocation5 + $0x98] sm:$0xff]  ;;  %v861_v20 = vld [vmem:[#allocation5 + $0x40] sm:$0xff]  ;;  %vm940_vm2 = vcmask 326656  }
 0x12b   : > { %16683 = vsyncadd (%p17965_p12), [#allocation27], 4294967216  ;;  %992 = vmatprep.mubr.bf16.mxu0 %v16725_v0  ;;  %1043 = vmatprep.mubr.bf16.mxu1 %v16725_v0  ;;  %v12474_v3 = vcombine.high %v872_v1, %v872_v1  ;;  %v12476_v4 = vcombine.high %v873_v2, %v873_v2  ;;  %v12473_v5 = vcombine.low %v872_v1, %v872_v1  ;;  %v14134_v7 = vld [vmem:[#allocation5 + $0x74] ss:$16 sps:$4 sm:$0xff]   ;;  %v14136_v8 = vld [vmem:[#allocation5 + $0x7c] ss:$16 sps:$4 sm:$0xff]  }
 0x12c   : > { %v12475_v6 = vcombine.low %v873_v2, %v873_v2  ;;  %v14138_v11 = vld [vmem:[#allocation5 + $0x70] ss:$16 sps:$4 sm:$0xff]   ;;  %v14139_v12 = vld [vmem:[#allocation5 + $0x78] ss:$16 sps:$4 sm:$0xff]   ;;  %v14140_v13 = vld [vmem:[#allocation5 + $0x54] ss:$16 sps:$4 sm:$0xff]   ;;  %v12492_v24 = vcombine.high %v861_v20, %v861_v20  ;;  %v12491_v29 = vcombine.low %v861_v20, %v861_v20 }
 0x12d   : > { %12477 = vmatprep.subr.msk.bf16.mxu0 %vm947_vm0, %v12474_v3  ;;  %12480 = vmatprep.subr.msk.bf16.mxu1 %vm947_vm0, %v12476_v4  ;;  %v949_v9 = vsel %vm947_vm0, %v12473_v5, 0  ;;  %v14142_v14 = vld [vmem:[#allocation5 + $0x5c] ss:$16 sps:$4 sm:$0xff]   ;;  %v14144_v22 = vld [vmem:[#allocation5 + $0x50] ss:$16 sps:$4 sm:$0xff]   ;;  %vm1641_vm3 = vcmask 1045504  }
 0x12e   : > { %v955_v10 = vsel %vm947_vm0, %v12475_v6, 0  ;;  %971 = vmatpush1.bf16.msra.mxu0 %v949_v9  ;;  %v848_v15 = vld [vmem:[%s17095_s4] sm:$0xff]  ;;  %v849_v16 = vld [vmem:[%s17095_s4 + $0x8] sm:$0xff]  ;;  %v850_v17 = vld [vmem:[%s17095_s4 + $0x10] sm:$0xff]  ;;  %vm874_vm1 = vsmask.f32 7424 }
 0x12f   : > { %1022 = vmatpush1.bf16.msra.mxu1 %v955_v10  ;;  %972 = vmatprep.subr.bf16.mxu0 %v14134_v7  ;;  %v17142_v18 = vpack.c.bf16 %v849_v16, %v848_v15  ;;  %v17144_v19 = vpack.c.bf16 %v850_v17, %v850_v17  ;;  %v862_v21 = vld [vmem:[#allocation5 + $0x48] sm:$0xff]  ;;  %v14152_v34 = vld [vmem:[#allocation5 + $0x24] ss:$16 sps:$4 sm:$0xff]   ;;  %v1117_v35 = vsel %vm947_vm0, %v12491_v29, 0  ;;  %v14150_v40 = vld [vmem:[#allocation5 + $0x20] ss:$16 sps:$4 sm:$0xff]  }
 0x130   : > { %1023 = vmatprep.subr.bf16.mxu1 %v14136_v8  ;;  %v14145_v23 = vld [vmem:[#allocation5 + $0x58] ss:$16 sps:$4 sm:$0xff]   ;;  %v12494_v28 = vcombine.high %v862_v21, %v862_v21  ;;  %v12493_v30 = vcombine.low %v862_v21, %v862_v21  ;;  %v14155_v37 = vld [vmem:[#allocation5 + $0x2c] ss:$16 sps:$4 sm:$0xff]   ;;  %v14158_v44 = vld [vmem:[#allocation5 + $0x4] ss:$16 sps:$4 sm:$0xff]  }
 0x131   : > { %v876_v25 = vshrl.u32 %v17142_v18, 16  ;;  %v878_v26 = vshll.u32 %v17142_v18, 16  ;;  %v883_v27 = vshll.u32 %v17144_v19, 16  ;;  %v1642_v38 = vrot.slane %v17142_v18, 2  ;;  %v14153_v43 = vld [vmem:[#allocation5 + $0x28] ss:$16 sps:$4 sm:$0xff]  }
 0x132   : > { %973 = vmatpush1.bf16.msra.mxu0 %v14138_v11  ;;  %v1123_v36 = vsel %vm947_vm0, %v12493_v30, 0  ;;  %v887_v41 = vshrl.u32 %v17144_v19, 16  ;;  %v17165_v42 = vrot.slane %v17144_v19, 2  ;;  %v14161_v45 = vld [vmem:[#allocation5 + $0xc] ss:$16 sps:$4 sm:$0xff]   ;;  %v1239_v48 = vld [vmem:[#allocation5 + $0xe0] sm:$0xff] }
 0x133   : > { %1024 = vmatpush1.bf16.msra.mxu1 %v14139_v12  ;;  %974 = vmatprep.subr.bf16.mxu0 %v14140_v13  ;;  %v880_v31 = vrot.slane %v878_v26, 1  ;;  %v885_v32 = vrot.slane %v883_v27, 1  ;;  %v1240_v49 = vld [vmem:[#allocation5 + $0xe8] sm:$0xff]  ;;  %v14156_v50 = vld [vmem:[#allocation5] ss:$16 sps:$4 sm:$0xff]   ;;  %v12510_v52 = vcombine.high %v1239_v48, %v1239_v48  ;;  %v12509_v54 = vcombine.low %v1239_v48, %v1239_v48  ;;  %v1439_v2 = vld [vmem:[#allocation5 + $0x138] sm:$0xff] }
 0x134   : > { %1025 = vmatprep.subr.bf16.mxu1 %v14142_v14  ;;  %v17168_v46 = vsel %vm1641_vm3, %v1642_v38, %v17165_v42  ;;  %v14159_v51 = vld [vmem:[#allocation5 + $0x8] ss:$16 sps:$4 sm:$0xff]   ;;  %v12512_v53 = vcombine.high %v1240_v49, %v1240_v49  ;;  %v12511_v55 = vcombine.low %v1240_v49, %v1240_v49  ;;  %v14168_v56 = vld [vmem:[#allocation5 + $0xc4] ss:$16 sps:$4 sm:$0xff]   ;;  %v14171_v59 = vld [vmem:[#allocation5 + $0xcc] ss:$16 sps:$4 sm:$0xff]   ;;  %v12530_v6 = vcombine.high %v1439_v2, %v1439_v2 }
 0x135   : > { %v881_v33 = vor.u32 %v880_v31, %v876_v25  ;;  %v889_v47 = vor.u32 %v887_v41, %v885_v32  ;;  %v1304_v57 = vsel %vm947_vm0, %v12509_v54, 0  ;;  %v14166_v60 = vld [vmem:[#allocation5 + $0xc0] ss:$16 sps:$4 sm:$0xff]   ;;  %v14169_v61 = vld [vmem:[#allocation5 + $0xc8] ss:$16 sps:$4 sm:$0xff]   ;;  %v1244_v7 = vrot.slane %v17142_v18, 1 }
 0x136   : > { %975 = vmatpush1.bf16.msra.mxu0 %v14144_v22  ;;  %v1310_v58 = vsel %vm947_vm0, %v12511_v55, 0  ;;  %v14174_v62 = vld [vmem:[#allocation5 + $0xa4] ss:$16 sps:$4 sm:$0xff]   ;;  %v14177_v63 = vld [vmem:[#allocation5 + $0xac] ss:$16 sps:$4 sm:$0xff]   ;;  %v1245_v8 = vrot.slane %v17144_v19, 1  ;;  %v12529_v10 = vcombine.low %v1439_v2, %v1439_v2 }
 0x137   : > { %1026 = vmatpush1.bf16.msra.mxu1 %v14145_v23  ;;  %12495 = vmatprep.subr.msk.bf16.mxu0 %vm947_vm0, %v12492_v24  ;;  %v886_v39 = vsel %vm874_vm1, %v881_v33, %v885_v32  ;;  %v1438_v1 = vld [vmem:[#allocation5 + $0x130] sm:$0xff]  ;;  %v14175_v4 = vld [vmem:[#allocation5 + $0xa8] ss:$16 sps:$4 sm:$0xff]   ;;  %vm1243_vm4 = vcmask 1046528   ;;  %v14187_v12 = vld [vmem:[#allocation5 + $0x11c] ss:$16 sps:$4 sm:$0xff]  }
 0x138   : > { %12498 = vmatprep.subr.msk.bf16.mxu1 %vm947_vm0, %v12494_v28  ;;  %v14172_v3 = vld [vmem:[#allocation5 + $0xa0] ss:$16 sps:$4 sm:$0xff]   ;;  %v12528_v5 = vcombine.high %v1438_v1, %v1438_v1  ;;  %v12527_v9 = vcombine.low %v1438_v1, %v1438_v1  ;;  %v14184_v11 = vld [vmem:[#allocation5 + $0x114] ss:$16 sps:$4 sm:$0xff]   ;;  %v1246_v13 = vsel %vm1243_vm4, %v1244_v7, %v1245_v8  ;;  %v1511_v15 = vsel %vm947_vm0, %v12529_v10, 0  ;;  %v1640_v23 = vld [vmem:[#allocation5 + $0x188] sm:$0xff] }
 0x139   : > { %12478 = vmatmul.mubr.msk.bf16.vlgmr.msra.gmra.mxu0 %vm940_vm2, %v886_v39  ;;  %v14182_v16 = vld [vmem:[#allocation5 + $0x110] ss:$16 sps:$4 sm:$0xff]   ;;  %v14185_v17 = vld [vmem:[#allocation5 + $0x118] ss:$16 sps:$4 sm:$0xff]   ;;  %v14190_v20 = vld [vmem:[#allocation5 + $0xf4] ss:$16 sps:$4 sm:$0xff]  }
 0x13a   : > { %12481 = vmatmul.mubr.msk.bf16.vlgmr.msra.gmra.mxu1 %vm940_vm2, %v886_v39  ;;  %1139 = vmatpush1.bf16.msra.mxu0 %v1117_v35  ;;  %v1505_v14 = vsel %vm947_vm0, %v12527_v9, 0  ;;  %v14193_v21 = vld [vmem:[#allocation5 + $0xfc] ss:$16 sps:$4 sm:$0xff]   ;;  %v1639_v22 = vld [vmem:[#allocation5 + $0x180] sm:$0xff]  ;;  %v14191_v28 = vld [vmem:[#allocation5 + $0xf8] ss:$16 sps:$4 sm:$0xff]  }
 0x13b   : > { %1190 = vmatpush1.bf16.msra.mxu1 %v1123_v36  ;;  %1140 = vmatprep.subr.bf16.mxu0 %v14152_v34  ;;  %v14188_v24 = vld [vmem:[#allocation5 + $0xf0] ss:$16 sps:$4 sm:$0xff]   ;;  %v1441_v29 = vrot.slane %v876_v25, 1  ;;  %v1442_v30 = vrot.slane %v878_v26, 2  ;;  %v1445_v31 = vrot.slane %v883_v27, 2  ;;  %v1444_v32 = vrot.slane %v887_v41, 1 }
 0x13c   : > { %1191 = vmatprep.subr.bf16.mxu1 %v14155_v37  ;;  %1002 = vmatprep.mubr.bf16.mxu0 %v16725_v0  ;;  %v12546_v33 = vcombine.high %v1639_v22, %v1639_v22  ;;  %v12548_v34 = vcombine.high %v1640_v23, %v1640_v23  ;;  %vm1440_vm5 = vsmask.f32 6400  ;;  %v12547_v26 = vcombine.low %v1640_v23, %v1640_v23  ;;  %v14200_v27 = vld [vmem:[#allocation5 + $0x164] ss:$16 sps:$4 sm:$0xff]   ;;  %v14203_v35 = vld [vmem:[#allocation5 + $0x16c] ss:$16 sps:$4 sm:$0xff]  }
 0x13d   : > { %1053 = vmatprep.mubr.bf16.mxu1 %v16725_v0  ;;  %v1446_v25 = vor.u32 %v1445_v31, %v1444_v32  ;;  %v14198_v39 = vld [vmem:[#allocation5 + $0x160] ss:$16 sps:$4 sm:$0xff]   ;;  %v14206_v41 = vld [vmem:[#allocation5 + $0x144] ss:$16 sps:$4 sm:$0xff]   ;;  %v14215_v48 = vld [vmem:[#allocation8 + $0x6e4] ss:$16 sps:$4 sm:$0xff]  }
 0x13e   : > { %1141 = vmatpush1.bf16.msra.mxu0 %v14150_v40  ;;  %v1708_v38 = vsel %vm947_vm0, %v12547_v26, 0  ;;  %v14201_v40 = vld [vmem:[#allocation5 + $0x168] ss:$16 sps:$4 sm:$0xff]   ;;  %v14210_v49 = vld [vmem:[#allocation8 + $0x4e0] ss:$16 sps:$4 sm:$0xff]   ;;  %s17971_s23 = sld [smem:[#allocation54_spill]] }
 0x13f   : > { %1192 = vmatpush1.bf16.msra.mxu1 %v14153_v43  ;;  %1142 = vmatprep.subr.bf16.mxu0 %v14158_v44  ;;  %v14209_v43 = vld [vmem:[#allocation5 + $0x14c] ss:$16 sps:$4 sm:$0xff]   ;;  %v14204_v44 = vld [vmem:[#allocation5 + $0x140] ss:$16 sps:$4 sm:$0xff]   ;;  %v14227_v54 = vld [vmem:[#allocation8 + $0x6a4] ss:$16 sps:$4 sm:$0xff]  }
 0x140   : > { %1193 = vmatprep.subr.bf16.mxu1 %v14161_v45  ;;  %v14207_v45 = vld [vmem:[#allocation5 + $0x148] ss:$16 sps:$4 sm:$0xff]   ;;  %v14222_v55 = vld [vmem:[#allocation8 + $0x4a0] ss:$16 sps:$4 sm:$0xff]   ;;  %p843_p0 = scmp.lt.s32.totalorder %s16849_s2, 1  ;;  %s17973_s5 = sld [smem:[#allocation56_spill]] }
 0x141   : > { %12479 = vmatmul.mubr.msk.bf16.gmra.mxu0 %vm940_vm2, %v889_v47  ;;  %v14242_v1 = vld [vmem:[#allocation8 + $0x444] ss:$16 sps:$4 sm:$0xff]   ;;  %v14246_v7 = vld [vmem:[#allocation8 + $0x420] ss:$16 sps:$4 sm:$0xff]   ;;  %s13867_s27 = sshll.u32 %s16849_s2, 4  ;;  %s836_s18 = scalar_lea.vmem [#allocation29], %s17091_s1 }
 0x142   : > { %12482 = vmatmul.mubr.msk.bf16.gmra.mxu1 %vm940_vm2, %v889_v47  ;;  %1143 = vmatpush1.bf16.msra.mxu0 %v14156_v50  ;;  %v14212_v47 = vld [vmem:[#allocation8 + $0x4e4] ss:$16 sps:$4 sm:$0xff]   ;;  %v14213_v50 = vld [vmem:[#allocation8 + $0x6e0] ss:$16 sps:$4 sm:$0xff]   ;;  %s844_s4 = scalar_select %p843_p0, %s16849_s2, 1  ;;  %vm12129_vm7 = vcmask 57344  }
 0x143   : > { %1194 = vmatpush1.bf16.msra.mxu1 %v14159_v51  ;;  %1160 = vmatprep.mubr.bf16.mxu0 %v16725_v0  ;;  %v14218_v51 = vld [vmem:[#allocation8 + $0x4c4] ss:$16 sps:$4 sm:$0xff]   ;;  %v14276_v32 = vld [vmem:[#allocation8 + $0x580] ss:$16 sps:$4 sm:$0xff]   ;;  %s12182_s9 = sshll.u32 %s836_s18, 4  ;;  %s17975_s25 = sld [smem:[#allocation55_spill]]  ;;  %s12183_s9 = int_to_ptr.vmem [resolvable:$true] %s12182_s9 }
 0x144   : > { %1211 = vmatprep.mubr.bf16.mxu1 %v16725_v0  ;;  %12513 = vmatprep.subr.msk.bf16.mxu0 %vm947_vm0, %v12510_v52  ;;  %v14216_v52 = vld [vmem:[#allocation8 + $0x4c0] ss:$16 sps:$4 sm:$0xff]   ;;  %v14245_v2 = vld [vmem:[#allocation8 + $0x644] ss:$16 sps:$4 sm:$0xff]   ;;  %s12464_s6 = sshll.u32 %s844_s4, 2  ;;  %s12166_s4 = scalar_lea.sflag [#allocation4], %s17091_s1 }
 0x145   : > { %12516 = vmatprep.subr.msk.bf16.mxu1 %vm947_vm0, %v12512_v53  ;;  %v14219_v53 = vld [vmem:[#allocation8 + $0x6c0] ss:$16 sps:$4 sm:$0xff]   ;;  %v14254_v9 = vld [vmem:[#allocation8 + $0x404] ss:$16 sps:$4 sm:$0xff]   ;;  %p17976_p8 = scmp.ne.s32.totalorder %s17944_s26, 0  ;;  %s16727_s2 = smov [#allocation29]  }
 0x146   : > { %v14257_v10 = vld [vmem:[#allocation8 + $0x604] ss:$16 sps:$4 sm:$0xff]   ;;  %s846_s28 = scalar_lea.vmem %s17973_s5, %s12464_s6  ;;  %s16606_s6 = scalar_lea.vmem %s12183_s9, 16 }
 0x147   : > { %v14272_v23 = vld [vmem:[#allocation8 + $0x5a4] ss:$16 sps:$4 sm:$0xff]   ;;  %p16607_p5 = scmp.ne.s32.totalorder %s12183_s9, %s16606_s6  ;;  %s16610_s7 = sshll.u32 %s16727_s2, 4  ;;  %s16611_s7 = int_to_ptr.vmem [resolvable:$false] %s16610_s7 }
 0x148   : > { %v14281_v31 = vld [vmem:[#allocation8 + $0x784] ss:$16 sps:$4 sm:$0xff]   ;;  %s16612_s29 = scalar_lea.vmem %s16611_s7, 32  ;;  %p16613_p6 = scmp.lt.s32.totalorder %s12183_s9, %s16611_s7 }
 0x149   : > { %12496 = vmatmul.mubr.msk.bf16.vlgmr.msra.gmra.mxu0 %vm940_vm2, %v17142_v18  ;;  %v14290_v26 = vld [vmem:[#allocation8 + $0x544] ss:$16 sps:$4 sm:$0xff]   ;;  %s17842_s24 = scalar_lea.hbm %s17975_s25, %s13867_s27  ;;  %p16608_p1 = pnand %p16607_p5, %p17976_p8 }
 0x14a   : > { %12499 = vmatmul.mubr.msk.bf16.vlgmr.msra.gmra.mxu1 %vm940_vm2, %v17142_v18  ;;  %1326 = vmatpush1.bf16.msra.mxu0 %v1304_v57  ;;  %v1443_v18 = vor.u32 %v1442_v30, %v1441_v29  ;;  %v14233_v57 = vld [vmem:[#allocation8 + $0x684] ss:$16 sps:$4 sm:$0xff]   ;;  %v14273_v29 = vld [vmem:[#allocation8 + $0x7a0] ss:$16 sps:$4 sm:$0xff]   ;;  %p16614_p10 = scmp.lt.s32.totalorder %s16612_s29, %s16606_s6 }
 0x14b   : > { %1377 = vmatpush1.bf16.msra.mxu1 %v1310_v58  ;;  %1327 = vmatprep.subr.bf16.mxu0 %v14168_v56  ;;  %v14230_v56 = vld [vmem:[#allocation8 + $0x484] ss:$16 sps:$4 sm:$0xff]   ;;  %v14228_v58 = vld [vmem:[#allocation8 + $0x480] ss:$16 sps:$4 sm:$0xff]   ;;  %p16609_p3 = pneg %p16608_p1 }
 0x14c   : > { %1378 = vmatprep.subr.bf16.mxu1 %v14171_v59  ;;  %1170 = vmatprep.mubr.bf16.mxu0 %v16725_v0  ;;  %v1447_v36 = vsel %vm1440_vm5, %v1443_v18, %v1446_v25  ;;  %v14231_v59 = vld [vmem:[#allocation8 + $0x680] ss:$16 sps:$4 sm:$0xff]   ;;  %v14278_v30 = vld [vmem:[#allocation8 + $0x584] ss:$16 sps:$4 sm:$0xff]   ;;  %p16615_p9 = por %p16614_p10, %p16613_p6 }
 0x14d   : > { %1221 = vmatprep.mubr.bf16.mxu1 %v16725_v0  ;;  %v14287_v18 = vld [vmem:[#allocation8 + $0x764] ss:$16 sps:$4 sm:$0xff]  }
 0x14e   : > { %1328 = vmatpush1.bf16.msra.mxu0 %v14166_v60  ;;  %v14236_v60 = vld [vmem:[#allocation8 + $0x464] ss:$16 sps:$4 sm:$0xff]   ;;  %p16616_p13 = pnand %p16615_p9, %p16609_p3 }
 0x14f   : > { %1379 = vmatpush1.bf16.msra.mxu1 %v14169_v61  ;;  %1329 = vmatprep.subr.bf16.mxu0 %v14174_v62  ;;  %v14239_v61 = vld [vmem:[#allocation8 + $0x664] ss:$16 sps:$4 sm:$0xff]   ;;  %v14234_v62 = vld [vmem:[#allocation8 + $0x460] ss:$16 sps:$4 sm:$0xff]  }
 0x150   : > { %1380 = vmatprep.subr.bf16.mxu1 %v14177_v63  ;;  %v14237_v63 = vld [vmem:[#allocation8 + $0x660] ss:$16 sps:$4 sm:$0xff]  }
 0x151   : > { %12497 = vmatmul.mubr.msk.bf16.gmra.mxu0 %vm940_vm2, %v17144_v19 }
 0x152   : > { %12500 = vmatmul.mubr.msk.bf16.gmra.mxu1 %vm940_vm2, %v17144_v19  ;;  %1330 = vmatpush1.bf16.msra.mxu0 %v14172_v3  ;;  %v12545_v19 = vcombine.low %v1639_v22, %v1639_v22  ;;  %v14240_v3 = vld [vmem:[#allocation8 + $0x440] ss:$16 sps:$4 sm:$0xff]  }
 0x153   : > { %1381 = vmatpush1.bf16.msra.mxu1 %v14175_v4  ;;  %1347 = vmatprep.mubr.bf16.mxu0 %v16725_v0  ;;  %v14243_v4 = vld [vmem:[#allocation8 + $0x640] ss:$16 sps:$4 sm:$0xff]  }
 0x154   : > { %1398 = vmatprep.mubr.bf16.mxu1 %v16725_v0  ;;  %12531 = vmatprep.subr.msk.bf16.mxu0 %vm947_vm0, %v12528_v5  ;;  %v1702_v37 = vsel %vm947_vm0, %v12545_v19, 0  ;;  %v14248_v5 = vld [vmem:[#allocation8 + $0x424] ss:$16 sps:$4 sm:$0xff]   ;;  %v14267_v22 = vld [vmem:[#allocation8 + $0x7c0] ss:$16 sps:$4 sm:$0xff]  }
 0x155   : > { %12534 = vmatprep.subr.msk.bf16.mxu1 %vm947_vm0, %v12530_v6  ;;  %v14251_v6 = vld [vmem:[#allocation8 + $0x624] ss:$16 sps:$4 sm:$0xff]   ;;  %v14285_v19 = vld [vmem:[#allocation8 + $0x760] ss:$16 sps:$4 sm:$0xff]  }
 0x159   : > { %12514 = vmatmul.mubr.msk.bf16.vlgmr.msra.gmra.mxu0 %vm940_vm2, %v1246_v13 }
 0x15a   : > { %12517 = vmatmul.mubr.msk.bf16.vlgmr.msra.gmra.mxu1 %vm940_vm2, %v1246_v13  ;;  %1527 = vmatpush1.bf16.msra.mxu0 %v1505_v14  ;;  %v14260_v13 = vld [vmem:[#allocation8 + $0x5e4] ss:$16 sps:$4 sm:$0xff]  }
 0x15b   : > { %1578 = vmatpush1.bf16.msra.mxu1 %v1511_v15  ;;  %1528 = vmatprep.subr.bf16.mxu0 %v14184_v11  ;;  %v14252_v11 = vld [vmem:[#allocation8 + $0x400] ss:$16 sps:$4 sm:$0xff]   ;;  %v14263_v14 = vld [vmem:[#allocation8 + $0x7e4] ss:$16 sps:$4 sm:$0xff]  }
 0x15c   : > { %1579 = vmatprep.subr.bf16.mxu1 %v14187_v12  ;;  %1357 = vmatprep.mubr.bf16.mxu0 %v16725_v0  ;;  %v14255_v12 = vld [vmem:[#allocation8 + $0x600] ss:$16 sps:$4 sm:$0xff]  }
 0x15d   : > { %1408 = vmatprep.mubr.bf16.mxu1 %v16725_v0  ;;  %v14258_v15 = vld [vmem:[#allocation8 + $0x5e0] ss:$16 sps:$4 sm:$0xff]  }
 0x15e   : > { %1529 = vmatpush1.bf16.msra.mxu0 %v14182_v16  ;;  %v14261_v16 = vld [vmem:[#allocation8 + $0x7e0] ss:$16 sps:$4 sm:$0xff]  }
 0x15f   : > { %1580 = vmatpush1.bf16.msra.mxu1 %v14185_v17  ;;  %1530 = vmatprep.subr.bf16.mxu0 %v14190_v20  ;;  %v14266_v17 = vld [vmem:[#allocation8 + $0x5c4] ss:$16 sps:$4 sm:$0xff]  }
 0x160   : > { %1581 = vmatprep.subr.bf16.mxu1 %v14193_v21  ;;  %v14269_v20 = vld [vmem:[#allocation8 + $0x7c4] ss:$16 sps:$4 sm:$0xff]   ;;  %v14264_v21 = vld [vmem:[#allocation8 + $0x5c0] ss:$16 sps:$4 sm:$0xff]  }
 0x161   : > { %12515 = vmatmul.mubr.msk.bf16.gmra.mxu0 %vm940_vm2, %v1245_v8 }
 0x162   : > { %12518 = vmatmul.mubr.msk.bf16.gmra.mxu1 %vm940_vm2, %v1245_v8  ;;  %1531 = vmatpush1.bf16.msra.mxu0 %v14188_v24  ;;  %v14249_v8 = vld [vmem:[#allocation8 + $0x620] ss:$16 sps:$4 sm:$0xff]   ;;  %v14275_v24 = vld [vmem:[#allocation8 + $0x7a4] ss:$16 sps:$4 sm:$0xff]  }
 0x163   : > { %1582 = vmatpush1.bf16.msra.mxu1 %v14191_v28  ;;  %1548 = vmatprep.mubr.bf16.mxu0 %v16725_v0  ;;  %v14270_v28 = vld [vmem:[#allocation8 + $0x5a0] ss:$16 sps:$4 sm:$0xff]  }
 0x164   : > { %1599 = vmatprep.mubr.bf16.mxu1 %v16725_v0  ;;  %12549 = vmatprep.subr.msk.bf16.mxu0 %vm947_vm0, %v12546_v33  ;;  %v14279_v33 = vld [vmem:[#allocation8 + $0x780] ss:$16 sps:$4 sm:$0xff]  }
 0x165   : > { %12552 = vmatprep.subr.msk.bf16.mxu1 %vm947_vm0, %v12548_v34  ;;  %v14284_v34 = vld [vmem:[#allocation8 + $0x564] ss:$16 sps:$4 sm:$0xff]  }
 0x169   : > { %12532 = vmatmul.mubr.msk.bf16.vlgmr.msra.gmra.mxu0 %vm940_vm2, %v1447_v36 }
 0x16a   : > { %12535 = vmatmul.mubr.msk.bf16.vlgmr.msra.gmra.mxu1 %vm940_vm2, %v1447_v36  ;;  %1724 = vmatpush1.bf16.msra.mxu0 %v1702_v37  ;;  %v14291_v36 = vld [vmem:[#allocation8 + $0x740] ss:$16 sps:$4 sm:$0xff]   ;;  %v14296_v37 = vld [vmem:[#allocation8 + $0x524] ss:$16 sps:$4 sm:$0xff]  }
 0x16b   : > { %1775 = vmatpush1.bf16.msra.mxu1 %v1708_v38  ;;  %1725 = vmatprep.subr.bf16.mxu0 %v14200_v27  ;;  %v14293_v27 = vld [vmem:[#allocation8 + $0x744] ss:$16 sps:$4 sm:$0xff]  }
 0x16c   : > { %1776 = vmatprep.subr.bf16.mxu1 %v14203_v35  ;;  %1558 = vmatprep.mubr.bf16.mxu0 %v16725_v0  ;;  %v14288_v35 = vld [vmem:[#allocation8 + $0x540] ss:$16 sps:$4 sm:$0xff]   ;;  %v14299_v38 = vld [vmem:[#allocation8 + $0x724] ss:$16 sps:$4 sm:$0xff]  }
 0x16d   : > { %1609 = vmatprep.mubr.bf16.mxu1 %v16725_v0 }
 0x16e   : > { %1726 = vmatpush1.bf16.msra.mxu0 %v14198_v39  ;;  %v14294_v39 = vld [vmem:[#allocation8 + $0x520] ss:$16 sps:$4 sm:$0xff]  }
 0x16f   : > { %1777 = vmatpush1.bf16.msra.mxu1 %v14201_v40  ;;  %1727 = vmatprep.subr.bf16.mxu0 %v14206_v41  ;;  %v14297_v40 = vld [vmem:[#allocation8 + $0x720] ss:$16 sps:$4 sm:$0xff]  }
 0x170   : > { %1778 = vmatprep.subr.bf16.mxu1 %v14209_v43  ;;  %v14300_v41 = vld [vmem:[#allocation8 + $0x500] ss:$16 sps:$4 sm:$0xff]   ;;  %v14302_v43 = vld [vmem:[#allocation8 + $0x504] ss:$16 sps:$4 sm:$0xff]  }
 0x171   : > { %12533 = vmatmul.mubr.msk.bf16.gmra.mxu0 %vm940_vm2, %v1446_v25 }
 0x172   : > { %12536 = vmatmul.mubr.msk.bf16.gmra.mxu1 %vm940_vm2, %v1446_v25  ;;  %1728 = vmatpush1.bf16.msra.mxu0 %v14204_v44  ;;  %v14282_v25 = vld [vmem:[#allocation8 + $0x560] ss:$16 sps:$4 sm:$0xff]  }
 0x173   : > { %1779 = vmatpush1.bf16.msra.mxu1 %v14207_v45  ;;  %1745 = vmatprep.mubr.bf16.mxu0 %v16725_v0  ;;  %v14303_v44 = vld [vmem:[#allocation8 + $0x700] ss:$16 sps:$4 sm:$0xff]   ;;  %v14305_v45 = vld [vmem:[#allocation8 + $0x704] ss:$16 sps:$4 sm:$0xff]  }
 0x174   : > { %1796 = vmatprep.mubr.bf16.mxu1 %v16725_v0  ;;  %2846 = vmatprep.subr.bf16.mxu0 %v14212_v47  ;;  %v14308_v47 = vld [vmem:[#allocation8 + $0x4ec] ss:$16 sps:$4 sm:$0xff]  }
 0x175   : > { %2897 = vmatprep.subr.bf16.mxu1 %v14215_v48  ;;  %v14311_v48 = vld [vmem:[#allocation8 + $0x6ec] ss:$16 sps:$4 sm:$0xff]  }
 0x179   : > { %12550 = vmatmul.mubr.msk.bf16.vlgmr.msra.gmra.mxu0 %vm940_vm2, %v17168_v46 }
 0x17a   : > { %12553 = vmatmul.mubr.msk.bf16.vlgmr.msra.gmra.mxu1 %vm940_vm2, %v17168_v46  ;;  %1755 = vmatprep.mubr.bf16.mxu0 %v16725_v0  ;;  %v14221_v46 = vld [vmem:[#allocation8 + $0x6c4] ss:$16 sps:$4 sm:$0xff]  }
 0x17b   : > { %1806 = vmatprep.mubr.bf16.mxu1 %v16725_v0  ;;  %2847 = vmatpush1.bf16.msra.mxu0 %v14210_v49  ;;  %v14224_v0 = vld [vmem:[#allocation8 + $0x4a4] ss:$16 sps:$4 sm:$0xff]  }
 0x17c   : > { %2898 = vmatpush1.bf16.msra.mxu1 %v14213_v50  ;;  %2848 = vmatprep.subr.bf16.mxu0 %v14218_v51 }
 0x17d   : > { %2899 = vmatprep.subr.bf16.mxu1 %v14221_v46 }
 0x17f   : > { %2849 = vmatpush1.bf16.msra.mxu0 %v14216_v52 }
 0x180   : > { %2900 = vmatpush1.bf16.msra.mxu1 %v14219_v53  ;;  %2850 = vmatprep.subr.bf16.mxu0 %v14224_v0 }
 0x181   : > { %12551 = vmatmul.mubr.msk.bf16.gmra.mxu0 %vm940_vm2, %v17165_v42  ;;  %2901 = vmatprep.subr.bf16.mxu1 %v14227_v54 }
 0x182   : > { %12554 = vmatmul.mubr.msk.bf16.gmra.mxu1 %vm940_vm2, %v17165_v42  ;;  %v14225_v42 = vld [vmem:[#allocation8 + $0x6a0] ss:$16 sps:$4 sm:$0xff]  }
 0x183   : > { %2851 = vmatpush1.bf16.msra.mxu0 %v14222_v55 }
 0x184   : > { %2902 = vmatpush1.bf16.msra.mxu1 %v14225_v42  ;;  %2852 = vmatprep.subr.bf16.mxu0 %v14230_v56 }
 0x185   : > { %2903 = vmatprep.subr.bf16.mxu1 %v14233_v57 }
 0x187   : > { %2853 = vmatpush1.bf16.msra.mxu0 %v14228_v58 }
 0x188   : > { %2904 = vmatpush1.bf16.msra.mxu1 %v14231_v59  ;;  %2854 = vmatprep.subr.bf16.mxu0 %v14236_v60 }
 0x189   : > { %2905 = vmatprep.subr.bf16.mxu1 %v14239_v61 }
 0x18b   : > { %2855 = vmatpush1.bf16.msra.mxu0 %v14234_v62 }
 0x18c   : > { %2906 = vmatpush1.bf16.msra.mxu1 %v14237_v63  ;;  %2856 = vmatprep.subr.bf16.mxu0 %v14242_v1 }
 0x18d   : > { %2907 = vmatprep.subr.bf16.mxu1 %v14245_v2 }
 0x18f   : > { %2857 = vmatpush1.bf16.msra.mxu0 %v14240_v3 }
 0x190   : > { %2908 = vmatpush1.bf16.msra.mxu1 %v14243_v4  ;;  %2858 = vmatprep.subr.bf16.mxu0 %v14248_v5 }
 0x191   : > { %2909 = vmatprep.subr.bf16.mxu1 %v14251_v6 }
 0x193   : > { %2859 = vmatpush1.bf16.msra.mxu0 %v14246_v7 }
 0x194   : > { %2910 = vmatpush1.bf16.msra.mxu1 %v14249_v8  ;;  %2860 = vmatprep.subr.bf16.mxu0 %v14254_v9 }
 0x195   : > { %2911 = vmatprep.subr.bf16.mxu1 %v14257_v10 }
 0x197   : > { %2861 = vmatpush1.bf16.msra.mxu0 %v14252_v11 }
 0x198   : > { %2912 = vmatpush1.bf16.msra.mxu1 %v14255_v12  ;;  %2862 = vmatprep.subr.bf16.mxu0 %v14260_v13 }
 0x199   : > { %2913 = vmatprep.subr.bf16.mxu1 %v14263_v14 }
 0x19b   : > { %2863 = vmatpush2.bf16.msra.mxu0 %v14258_v15 }
 0x19c   : > { %2914 = vmatpush2.bf16.msra.mxu1 %v14261_v16  ;;  %2864 = vmatprep.subr.bf16.mxu0 %v14266_v17 }
 0x19d   : > { %2915 = vmatprep.subr.bf16.mxu1 %v14269_v20 }
 0x19f   : > { %2865 = vmatpush2.bf16.msra.mxu0 %v14264_v21 }
 0x1a0   : > { %2916 = vmatpush2.bf16.msra.mxu1 %v14267_v22  ;;  %2866 = vmatprep.subr.bf16.mxu0 %v14272_v23 }
 0x1a1   : > { %2917 = vmatprep.subr.bf16.mxu1 %v14275_v24 }
 0x1a3   : > { %2867 = vmatpush2.bf16.msra.mxu0 %v14270_v28 }
 0x1a4   : > { %2918 = vmatpush2.bf16.msra.mxu1 %v14273_v29  ;;  %2868 = vmatprep.subr.bf16.mxu0 %v14278_v30 }
 0x1a5   : > { %2919 = vmatprep.subr.bf16.mxu1 %v14281_v31 }
 0x1a7   : > { %2869 = vmatpush2.bf16.msra.mxu0 %v14276_v32 }
 0x1a8   : > { %2920 = vmatpush2.bf16.msra.mxu1 %v14279_v33  ;;  %2870 = vmatprep.subr.bf16.mxu0 %v14284_v34 }
 0x1a9   : > { %2921 = vmatprep.subr.bf16.mxu1 %v14287_v18 }
 0x1ab   : > { %2871 = vmatpush2.bf16.msra.mxu0 %v14282_v25  ;;  %v17908_v25 = vlaneseq }
 0x1ac   : > { %2922 = vmatpush2.bf16.msra.mxu1 %v14285_v19  ;;  %2872 = vmatprep.subr.bf16.mxu0 %v14290_v26 }
 0x1ad   : > { %2923 = vmatprep.subr.bf16.mxu1 %v14293_v27 }
 0x1af   : > { %2873 = vmatpush2.bf16.msra.mxu0 %v14288_v35 }
 0x1b0   : > { %2924 = vmatpush2.bf16.msra.mxu1 %v14291_v36  ;;  %2874 = vmatprep.subr.bf16.mxu0 %v14296_v37  ;;  %v17280_v36 = vshrl.u32 %v17908_v25, 7 }
 0x1b1   : > { %2925 = vmatprep.subr.bf16.mxu1 %v14299_v38 }
 0x1b2   : > { %17966 = vst [vmem:[#allocation40_spill] sm:$0xff] %v17280_v36 }
 0x1b3   : > { %2875 = vmatpush2.bf16.msra.mxu0 %v14294_v39 }
 0x1b4   : > { %2926 = vmatpush2.bf16.msra.mxu1 %v14297_v40  ;;  %2876 = vmatprep.subr.bf16.mxu0 %v14302_v43  ;;  %v17286_v43 = vsub.s32 2, %v17280_v36 }
 0x1b5   : > { %2927 = vmatprep.subr.bf16.mxu1 %v14305_v45 }
 0x1b6   : > { %17967 = vst [vmem:[#allocation41_spill] sm:$0xff] %v17286_v43 }
 0x1b7   : > { %2877 = vmatpush2.bf16.msra.mxu0 %v14300_v41  ;;  %v17283_v41 = vsub.s32 0, %v17280_v36 }
 0x1b8   : > { %2928 = vmatpush2.bf16.msra.mxu1 %v14303_v44  ;;  %2948 = vmatprep.subr.bf16.mxu0 %v14308_v47  ;;  %v1827_v47 = vld [vmem:[#allocation7] sm:$0xf] }
 0x1b9   : > { %2999 = vmatprep.subr.bf16.mxu1 %v14311_v48  ;;  %v17289_v48 = vsub.s32 1, %v17280_v36 }
 0x1f9   : > { %v17239_v49 = vpop.f32.mrf.mxu0 }
 0x1fa   : > { %v17241_v50 = vpop.f32.mrf.mxu1 }
 0x1fb   : > { %v17243_v51 = vpop.f32.mrf.mxu0 }
 0x1fc   : > { %v17245_v46 = vpop.f32.mrf.mxu1 }
 0x1fd   : > { %v17247_v52 = vpop.f32.mrf.mxu0 }
 0x1fe   : > { %v17249_v53 = vpop.f32.mrf.mxu1 }
 0x1ff   : > { %v17251_v0 = vpop.f32.mrf.mxu0 }
 0x200   : > { %v17253_v54 = vpop.f32.mrf.mxu1 }
 0x201   : > { %v17255_v55 = vpop.f32.mrf.mxu0 }
 0x202   : > { %v17257_v42 = vpop.f32.mrf.mxu1 }
 0x203   : > { %v17259_v56 = vpop.f32.mrf.mxu0 }
 0x204   : > { %v17261_v57 = vpop.f32.mrf.mxu1 }
 0x205   : > { %v1008_v58 = vpop.f32.mrf.mxu0 }
 0x206   : > { %v1059_v59 = vpop.f32.mrf.mxu1  ;;  %v17292_v58 = vsub.s32 3, %v17280_v36 }
 0x207   : > { %v1009_v60 = vpop.f32.mrf.mxu0 }
 0x208   : > { %v1060_v61 = vpop.f32.mrf.mxu1  ;;  %17968 = vst [vmem:[#allocation42_spill] sm:$0xff] %v17292_v58  ;;  %v17310_v25 = vrot.slane %v1827_v47, %v17292_v58 }
 0x209   : > { %v1162_v62 = vpop.f32.mrf.mxu0 }
 0x20a   : > { %v1213_v63 = vpop.f32.mrf.mxu1  ;;  %v1163_v61 = vadd.f32 %v1162_v62, %v17239_v49 }
 0x20b   : > { %v1164_v1 = vpop.f32.mrf.mxu0 }
 0x20c   : > { %v1215_v2 = vpop.f32.mrf.mxu1 }
 0x20d   : > { %v1166_v3 = vpop.f32.mrf.mxu0 }
 0x20e   : > { %v1217_v4 = vpop.f32.mrf.mxu1  ;;  %v1167_v49 = vadd.f32 %v1166_v3, %v17247_v52 }
 0x20f   : > { %v1168_v5 = vpop.f32.mrf.mxu0 }
 0x210   : > { %v1219_v6 = vpop.f32.mrf.mxu1  ;;  %v1169_v36 = vadd.f32 %v1168_v5, %v17251_v0 }
 0x211   : > { %v1172_v7 = vpop.f32.mrf.mxu0 }
 0x212   : > { %v1223_v8 = vpop.f32.mrf.mxu1 }
 0x213   : > { %v17263_v9 = vpop.f32.mrf.mxu0 }
 0x214   : > { %v17265_v10 = vpop.f32.mrf.mxu1  ;;  %v1175_v52 = vadd.f32 %v17263_v9, %v17259_v56 }
 0x215   : > { %v1176_v11 = vpop.f32.mrf.mxu0 }
 0x216   : > { %v1227_v12 = vpop.f32.mrf.mxu1  ;;  %v1214_v11 = vadd.f32 %v1213_v63, %v17241_v50  ;;  %v1218_v50 = vadd.f32 %v1217_v4, %v17249_v53  ;;  %v1226_v53 = vadd.f32 %v17265_v10, %v17261_v57 }
 0x217   : > { %v1177_v13 = vpop.f32.mrf.mxu0  ;;  %v17299_v12 = vrot.slane %v1827_v47, %v17283_v41 }
 0x218   : > { %v1228_v14 = vpop.f32.mrf.mxu1  ;;  %v17302_v13 = vrot.slane %v1827_v47, %v17286_v43 }
 0x219   : > { %v1349_v15 = vpop.f32.mrf.mxu0  ;;  %v1165_v14 = vadd.f32 %v1164_v1, %v17243_v51  ;;  %v1220_v51 = vadd.f32 %v1219_v6, %v17253_v54  ;;  %v1224_v1 = vadd.f32 %v1223_v8, %v17257_v42 }
 0x21a   : > { %v1400_v16 = vpop.f32.mrf.mxu1  ;;  %v1417_v62 = vadd.f32 %v1349_v15, %v1163_v61 }
 0x21b   : > { %v1351_v17 = vpop.f32.mrf.mxu0  ;;  %v1419_v63 = vadd.f32 %v1400_v16, %v1214_v11 }
 0x21c   : > { %v1402_v20 = vpop.f32.mrf.mxu1 }
 0x21d   : > { %v1353_v21 = vpop.f32.mrf.mxu0 }
 0x21e   : > { %v1404_v22 = vpop.f32.mrf.mxu1  ;;  %v1421_v3 = vadd.f32 %v1353_v21, %v1167_v49 }
 0x21f   : > { %v17267_v23 = vpop.f32.mrf.mxu0  ;;  %v1423_v0 = vadd.f32 %v1404_v22, %v1218_v50 }
 0x220   : > { %v17269_v24 = vpop.f32.mrf.mxu1 }
 0x221   : > { %v17271_v28 = vpop.f32.mrf.mxu0  ;;  %v1424_v8 = vadd.f32 %v17269_v24, %v1220_v51 }
 0x222   : > { %v17273_v29 = vpop.f32.mrf.mxu1 }
 0x223   : > { %v17275_v30 = vpop.f32.mrf.mxu0  ;;  %v1427_v16 = vadd.f32 %v17273_v29, %v1224_v1 }
 0x224   : > { %v17277_v31 = vpop.f32.mrf.mxu1  ;;  %v1426_v57 = vadd.f32 %v17275_v30, %v1175_v52 }
 0x225   : > { %v1363_v32 = vpop.f32.mrf.mxu0  ;;  %v1428_v21 = vadd.f32 %v17277_v31, %v1226_v53 }
 0x226   : > { %v1414_v33 = vpop.f32.mrf.mxu1  ;;  %v1216_v32 = vadd.f32 %v1215_v2, %v17245_v46  ;;  %v1173_v46 = vadd.f32 %v1172_v7, %v17255_v55  ;;  %v1422_v7 = vadd.f32 %v17267_v23, %v1169_v36 }
 0x227   : > { %v1364_v34 = vpop.f32.mrf.mxu0 }
 0x228   : > { %v1415_v18 = vpop.f32.mrf.mxu1  ;;  %v1420_v43 = vadd.f32 %v1402_v20, %v1216_v32  ;;  %v1425_v15 = vadd.f32 %v17271_v28, %v1173_v46 }
 0x229   : > { %v1550_v19 = vpop.f32.mrf.mxu0  ;;  %v17307_v18 = vrot.slane %v1827_v47, %v17289_v48 }
 0x22a   : > { %v1601_v26 = vpop.f32.mrf.mxu1  ;;  %v1618_v47 = vadd.f32 %v1550_v19, %v1417_v62 }
 0x22b   : > { %v1552_v27 = vpop.f32.mrf.mxu0  ;;  %v1620_v58 = vadd.f32 %v1601_v26, %v1419_v63 }
 0x22c   : > { %v1603_v35 = vpop.f32.mrf.mxu1 }
 0x22d   : > { %v1554_v37 = vpop.f32.mrf.mxu0  ;;  %v1621_v55 = vadd.f32 %v1603_v35, %v1420_v43 }
 0x22e   : > { %v1605_v38 = vpop.f32.mrf.mxu1  ;;  %v1622_v22 = vadd.f32 %v1554_v37, %v1421_v3 }
 0x22f   : > { %v1556_v39 = vpop.f32.mrf.mxu0  ;;  %v1624_v19 = vadd.f32 %v1605_v38, %v1423_v0 }
 0x230   : > { %v1607_v40 = vpop.f32.mrf.mxu1 }
 0x231   : > { %v1560_v44 = vpop.f32.mrf.mxu0  ;;  %v1625_v28 = vadd.f32 %v1607_v40, %v1424_v8 }
 0x232   : > { %v1611_v45 = vpop.f32.mrf.mxu1  ;;  %v1626_v35 = vadd.f32 %v1560_v44, %v1425_v15 }
 0x233   : > { %v1562_v59 = vpop.f32.mrf.mxu0  ;;  %v1628_v36 = vadd.f32 %v1611_v45, %v1427_v16 }
 0x234   : > { %v17294_v60 = vpop.f32.mrf.mxu1 }
 0x235   : > { %v1564_v33 = vpop.f32.mrf.mxu0  ;;  %v1629_v46 = vadd.f32 %v17294_v60, %v1428_v21 }
 0x236   : > { %v1615_v34 = vpop.f32.mrf.mxu1 }
 0x237   : > { %v1565_v2 = vpop.f32.mrf.mxu0  ;;  %v1418_v34 = vadd.f32 %v1351_v17, %v1165_v14  ;;  %v1627_v14 = vadd.f32 %v1562_v59, %v1426_v57 }
 0x238   : > { %v1616_v33 = vpop.f32.mrf.mxu1 }
 0x239   : > { %v1747_v4 = vpop.f32.mrf.mxu0  ;;  %v1619_v5 = vadd.f32 %v1552_v27, %v1418_v34  ;;  %v1623_v27 = vadd.f32 %v1556_v39, %v1422_v7 }
 0x23a   : > { %v1798_v54 = vpop.f32.mrf.mxu1  ;;  %v1815_v6 = vadd.f32 %v1747_v4, %v1618_v47 }
 0x23b   : > { %v1817_v42 = vadd.f32 %v1798_v54, %v1620_v58  ;;  %v1749_v56 = vpop.f32.mrf.mxu0 }
 0x23c   : > { %v1800_v9 = vpop.f32.mrf.mxu1  ;;  %v1849_v10 = vadd.f32 %v17299_v12, %v1815_v6  ;;  %v1816_v17 = vadd.f32 %v1749_v56, %v1619_v5 }
 0x23d   : > { %v1818_v20 = vadd.f32 %v1800_v9, %v1621_v55  ;;  %v1851_v23 = vadd.f32 %v17302_v13, %v1817_v42  ;;  %v1751_v26 = vpop.f32.mrf.mxu0 }
 0x23e   : > { %v1802_v24 = vpop.f32.mrf.mxu1  ;;  %v1850_v29 = vadd.f32 %v17307_v18, %v1816_v17  ;;  %v1819_v43 = vadd.f32 %v1751_v26, %v1622_v22  ;;  %v1861_v31 = vmax.f32 %v1849_v10, 0.0 }
 0x23f   : > { %v1852_v30 = vadd.f32 %v17310_v25, %v1818_v20  ;;  %v1821_v58 = vadd.f32 %v1802_v24, %v1624_v19  ;;  %v1753_v61 = vpop.f32.mrf.mxu0  ;;  %v1863_v32 = vmax.f32 %v1851_v23, 0.0 }
 0x240   : > { %v1804_v11 = vpop.f32.mrf.mxu1  ;;  %v1820_v37 = vadd.f32 %v1753_v61, %v1623_v27  ;;  %v1862_v49 = vmax.f32 %v1850_v29, 0.0  ;;  %v1853_v50 = vadd.f32 %v17299_v12, %v1819_v43  ;;  %v14306_v61 = vld [vmem:[#allocation8 + $0x4e8] ss:$16 sps:$4 sm:$0xff]  }
 0x241   : > { %v1822_v38 = vadd.f32 %v1804_v11, %v1625_v28  ;;  %v1855_v39 = vadd.f32 %v17302_v13, %v1821_v58  ;;  %v1757_v40 = vpop.f32.mrf.mxu0  ;;  %v1864_v59 = vmax.f32 %v1852_v30, 0.0 }
 0x242   : > { %v1808_v44 = vpop.f32.mrf.mxu1  ;;  %v1854_v45 = vadd.f32 %v17307_v18, %v1820_v37  ;;  %v1823_v63 = vadd.f32 %v1757_v40, %v1626_v35  ;;  %v1865_v1 = vmax.f32 %v1853_v50, 0.0 }
 0x243   : > { %v1856_v62 = vadd.f32 %v17310_v25, %v1822_v38  ;;  %v1825_v51 = vadd.f32 %v1808_v44, %v1628_v36  ;;  %v1867_v2 = vmax.f32 %v1855_v39, 0.0  ;;  %v1759_v33 = vpop.f32.mrf.mxu0 }
 0x244   : > { %v1810_v34 = vpop.f32.mrf.mxu1  ;;  %v1866_v47 = vmax.f32 %v1854_v45, 0.0  ;;  %v1857_v53 = vadd.f32 %v17299_v12, %v1823_v63  ;;  %v17339_v0 = vpack.c.bf16 %v1865_v1, %v1861_v31  ;;  %v1824_v54 = vadd.f32 %v1759_v33, %v1627_v14  ;;  %v14314_v45 = vld [vmem:[#allocation8 + $0x4cc] ss:$16 sps:$4 sm:$0xff]   ;;  %v14312_v33 = vld [vmem:[#allocation8 + $0x4c8] ss:$16 sps:$4 sm:$0xff]  }
 0x245   : > { %v1868_v52 = vmax.f32 %v1856_v62, 0.0  ;;  %v1859_v3 = vadd.f32 %v17302_v13, %v1825_v51  ;;  %v17341_v4 = vpack.c.bf16 %v1867_v2, %v1863_v32  ;;  %v1826_v5 = vadd.f32 %v1810_v34, %v1629_v46  ;;  %v1761_v55 = vpop.f32.mrf.mxu0  ;;  %v14317_v62 = vld [vmem:[#allocation8 + $0x6cc] ss:$16 sps:$4 sm:$0xff]   ;;  %v14315_v34 = vld [vmem:[#allocation8 + $0x6c8] ss:$16 sps:$4 sm:$0xff]  }
 0x246   : > { %v1812_v6 = vpop.f32.mrf.mxu1  ;;  %v17343_v60 = vpack.c.bf16 %v1866_v47, %v1862_v49  ;;  %v1869_v7 = vmax.f32 %v1857_v53, 0.0  ;;  %v1858_v15 = vadd.f32 %v17307_v18, %v1824_v54  ;;  %v2141_v10 = vshll.u32 %v17339_v0, 16  ;;  %v14309_v49 = vld [vmem:[#allocation8 + $0x6e8] ss:$16 sps:$4 sm:$0xff]   ;;  %v14320_v47 = vld [vmem:[#allocation8 + $0x4ac] ss:$16 sps:$4 sm:$0xff]  }
 0x247   : > { %v17345_v42 = vpack.c.bf16 %v1868_v52, %v1864_v59  ;;  %v1871_v8 = vmax.f32 %v1859_v3, 0.0  ;;  %v1860_v12 = vadd.f32 %v17310_v25, %v1826_v5  ;;  %v1762_v16 = vpop.f32.mrf.mxu0  ;;  %v2139_v19 = vshrl.u32 %v17339_v0, 16  ;;  %v14323_v52 = vld [vmem:[#allocation8 + $0x6ac] ss:$16 sps:$4 sm:$0xff]   ;;  %v14318_v53 = vld [vmem:[#allocation8 + $0x4a8] ss:$16 sps:$4 sm:$0xff]  }
 0x248   : > { %v1813_v13 = vpop.f32.mrf.mxu1  ;;  %v17349_v56 = vpack.c.bf16 %v1869_v7, %v1869_v7  ;;  %v2153_v57 = vshll.u32 %v17343_v60, 16  ;;  %v1870_v17 = vmax.f32 %v1858_v15, 0.0  ;;  %v2165_v24 = vshll.u32 %v17341_v4, 16  ;;  %v14321_v3 = vld [vmem:[#allocation8 + $0x6a8] ss:$16 sps:$4 sm:$0xff]  }
 0x249   : > { %v17351_v9 = vpack.c.bf16 %v1871_v8, %v1871_v8  ;;  %v1872_v20 = vmax.f32 %v1860_v12, 0.0  ;;  %v2177_v21 = vshll.u32 %v17345_v42, 16  ;;  %v2151_v27 = vshrl.u32 %v17343_v60, 16  ;;  %v14326_v55 = vld [vmem:[#allocation8 + $0x48c] ss:$16 sps:$4 sm:$0xff]  }
 0x24a   : > { %v2155_v22 = vrot.slane %v2153_v57, 1  ;;  %v2146_v18 = vshll.u32 %v17349_v56, 16  ;;  %v17358_v25 = vpack.c.bf16 %v1870_v17, %v1870_v17  ;;  %v2143_v28 = vrot.slane %v2141_v10, 1  ;;  %v14329_v6 = vld [vmem:[#allocation8 + $0x68c] ss:$16 sps:$4 sm:$0xff]  }
 0x24b   : > { %v17360_v23 = vpack.c.bf16 %v1872_v20, %v1872_v20  ;;  %v2179_v26 = vrot.slane %v2177_v21, 1  ;;  %v2170_v35 = vshll.u32 %v17351_v9, 16  ;;  %v2175_v36 = vshrl.u32 %v17345_v42, 16  ;;  %v14324_v15 = vld [vmem:[#allocation8 + $0x488] ss:$16 sps:$4 sm:$0xff]  }
 0x24c   : > { %v2158_v29 = vshll.u32 %v17358_v25, 16  ;;  %v2167_v43 = vrot.slane %v2165_v24, 1  ;;  %v2156_v58 = vor.u32 %v2155_v22, %v2151_v27  ;;  %v2148_v11 = vrot.slane %v2146_v18, 1  ;;  %v14327_v12 = vld [vmem:[#allocation8 + $0x688] ss:$16 sps:$4 sm:$0xff]  }
 0x24d   : > { %v2182_v30 = vshll.u32 %v17360_v23, 16  ;;  %v2163_v14 = vshrl.u32 %v17341_v4, 16  ;;  %v2172_v31 = vrot.slane %v2170_v35, 1  ;;  %v2180_v38 = vor.u32 %v2179_v26, %v2175_v36  ;;  %v14332_v16 = vld [vmem:[#allocation8 + $0x46c] ss:$16 sps:$4 sm:$0xff]  }
 0x24e   : > { %v2160_v37 = vrot.slane %v2158_v29, 1  ;;  %v2189_v50 = vshrl.u32 %v17358_v25, 16  ;;  %v2144_v39 = vor.u32 %v2143_v28, %v2139_v19  ;;  %v2195_v44 = vshrl.u32 %v17360_v23, 16  ;;  %v14335_v13 = vld [vmem:[#allocation8 + $0x66c] ss:$16 sps:$4 sm:$0xff]  }
 0x24f   : > { %v2184_v32 = vrot.slane %v2182_v30, 1  ;;  %v2168_v40 = vor.u32 %v2167_v43, %v2163_v14  ;;  %v2186_v54 = vshrl.u32 %v17349_v56, 16  ;;  %v2192_v5 = vshrl.u32 %v17351_v9, 16  ;;  %v14330_v57 = vld [vmem:[#allocation8 + $0x468] ss:$16 sps:$4 sm:$0xff]  }
 0x250   : > { %v2161_v63 = vsel %vm874_vm1, %v2156_v58, %v2160_v37  ;;  %v17373_v46 = vor.u32 %v2189_v50, %v2160_v37  ;;  %v17376_v59 = vsel %vm874_vm1, %v2144_v39, %v2148_v11  ;;  %v14333_v10 = vld [vmem:[#allocation8 + $0x668] ss:$16 sps:$4 sm:$0xff]   ;;  %v14338_v17 = vld [vmem:[#allocation8 + $0x44c] ss:$16 sps:$4 sm:$0xff]  }
 0x251   : > { %v2185_v51 = vsel %vm874_vm1, %v2180_v38, %v2184_v32  ;;  %2878 = vmatprep.mubr.bf16.mxu0 %v2161_v63  ;;  %v17379_v1 = vsel %vm874_vm1, %v2168_v40, %v2172_v31  ;;  %v17381_v2 = vor.u32 %v2195_v44, %v2184_v32  ;;  %v17389_v7 = vor.u32 %v2186_v54, %v2148_v11  ;;  %v14341_v20 = vld [vmem:[#allocation8 + $0x64c] ss:$16 sps:$4 sm:$0xff]   ;;  %v14336_v21 = vld [vmem:[#allocation8 + $0x448] ss:$16 sps:$4 sm:$0xff]  }
 0x252   : > { %2929 = vmatprep.mubr.bf16.mxu1 %v2185_v51  ;;  %2879 = vmatmul.mubr.bf16.vlgmr.msra.gmra.mxu0 %v17376_v59  ;;  %v17391_v8 = vor.u32 %v2192_v5, %v2172_v31  ;;  %v14339_v22 = vld [vmem:[#allocation8 + $0x648] ss:$16 sps:$4 sm:$0xff]   ;;  %v14344_v19 = vld [vmem:[#allocation8 + $0x42c] ss:$16 sps:$4 sm:$0xff]  }
 0x253   : > { %2930 = vmatmul.mubr.bf16.vlgmr.msra.gmra.mxu1 %v17379_v1  ;;  %2949 = vmatpush1.bf16.msra.mxu0 %v14306_v61  ;;  %v14347_v18 = vld [vmem:[#allocation8 + $0x62c] ss:$16 sps:$4 sm:$0xff]   ;;  %v14342_v26 = vld [vmem:[#allocation8 + $0x428] ss:$16 sps:$4 sm:$0xff]  }
 0x254   : > { %3000 = vmatpush1.bf16.msra.mxu1 %v14309_v49  ;;  %2888 = vmatprep.mubr.bf16.mxu0 %v17373_v46  ;;  %v14345_v24 = vld [vmem:[#allocation8 + $0x628] ss:$16 sps:$4 sm:$0xff]   ;;  %v14350_v27 = vld [vmem:[#allocation8 + $0x40c] ss:$16 sps:$4 sm:$0xff]  }
 0x255   : > { %2939 = vmatprep.mubr.bf16.mxu1 %v17381_v2  ;;  %2950 = vmatprep.subr.bf16.mxu0 %v14314_v45  ;;  %v14353_v28 = vld [vmem:[#allocation8 + $0x60c] ss:$16 sps:$4 sm:$0xff]   ;;  %v14348_v35 = vld [vmem:[#allocation8 + $0x408] ss:$16 sps:$4 sm:$0xff]  }
 0x256   : > { %3001 = vmatprep.subr.bf16.mxu1 %v14317_v62  ;;  %v14351_v29 = vld [vmem:[#allocation8 + $0x608] ss:$16 sps:$4 sm:$0xff]   ;;  %v14356_v36 = vld [vmem:[#allocation8 + $0x5ec] ss:$16 sps:$4 sm:$0xff]  }
 0x257   : > { %2951 = vmatpush1.bf16.msra.mxu0 %v14312_v33  ;;  %v14359_v30 = vld [vmem:[#allocation8 + $0x7ec] ss:$16 sps:$4 sm:$0xff]   ;;  %v14354_v43 = vld [vmem:[#allocation8 + $0x5e8] ss:$16 sps:$4 sm:$0xff]  }
 0x258   : > { %3002 = vmatpush1.bf16.msra.mxu1 %v14315_v34  ;;  %2952 = vmatprep.subr.bf16.mxu0 %v14320_v47  ;;  %v14357_v58 = vld [vmem:[#allocation8 + $0x7e8] ss:$16 sps:$4 sm:$0xff]   ;;  %v14362_v61 = vld [vmem:[#allocation8 + $0x5cc] ss:$16 sps:$4 sm:$0xff]  }
 0x259   : > { %3003 = vmatprep.subr.bf16.mxu1 %v14323_v52  ;;  %v14365_v11 = vld [vmem:[#allocation8 + $0x7cc] ss:$16 sps:$4 sm:$0xff]   ;;  %v14360_v14 = vld [vmem:[#allocation8 + $0x5c8] ss:$16 sps:$4 sm:$0xff]  }
 0x25a   : > { %2889 = vmatmul.mubr.bf16.gmra.mxu0 %v17389_v7  ;;  %v14363_v31 = vld [vmem:[#allocation8 + $0x7c8] ss:$16 sps:$4 sm:$0xff]   ;;  %v14368_v37 = vld [vmem:[#allocation8 + $0x5ac] ss:$16 sps:$4 sm:$0xff]  }
 0x25b   : > { %2940 = vmatmul.mubr.bf16.gmra.mxu1 %v17391_v8  ;;  %2953 = vmatpush1.bf16.msra.mxu0 %v14318_v53  ;;  %v14371_v38 = vld [vmem:[#allocation8 + $0x7ac] ss:$16 sps:$4 sm:$0xff]   ;;  %v14366_v32 = vld [vmem:[#allocation8 + $0x5a8] ss:$16 sps:$4 sm:$0xff]  }
 0x25c   : > { %3004 = vmatpush1.bf16.msra.mxu1 %v14321_v3  ;;  %2980 = vmatprep.mubr.bf16.mxu0 %v2161_v63  ;;  %v14369_v49 = vld [vmem:[#allocation8 + $0x7a8] ss:$16 sps:$4 sm:$0xff]   ;;  %v14374_v50 = vld [vmem:[#allocation8 + $0x58c] ss:$16 sps:$4 sm:$0xff]  }
 0x25d   : > { %3031 = vmatprep.mubr.bf16.mxu1 %v2185_v51  ;;  %2954 = vmatprep.subr.bf16.mxu0 %v14326_v55  ;;  %v14377_v39 = vld [vmem:[#allocation8 + $0x78c] ss:$16 sps:$4 sm:$0xff]   ;;  %v14372_v40 = vld [vmem:[#allocation8 + $0x588] ss:$16 sps:$4 sm:$0xff]  }
 0x25e   : > { %3005 = vmatprep.subr.bf16.mxu1 %v14329_v6  ;;  %v14375_v44 = vld [vmem:[#allocation8 + $0x788] ss:$16 sps:$4 sm:$0xff]   ;;  %v14380_v45 = vld [vmem:[#allocation8 + $0x56c] ss:$16 sps:$4 sm:$0xff]  }
 0x25f   : > { %2955 = vmatpush1.bf16.msra.mxu0 %v14324_v15  ;;  %v14383_v62 = vld [vmem:[#allocation8 + $0x76c] ss:$16 sps:$4 sm:$0xff]   ;;  %v14378_v63 = vld [vmem:[#allocation8 + $0x568] ss:$16 sps:$4 sm:$0xff]  }
 0x260   : > { %3006 = vmatpush1.bf16.msra.mxu1 %v14327_v12  ;;  %2956 = vmatprep.subr.bf16.mxu0 %v14332_v16  ;;  %v14381_v51 = vld [vmem:[#allocation8 + $0x768] ss:$16 sps:$4 sm:$0xff]   ;;  %v14386_v33 = vld [vmem:[#allocation8 + $0x54c] ss:$16 sps:$4 sm:$0xff]   ;;  %v14404_v16 = vld [vmem:[#allocation8 + $0xe4] ss:$16 sps:$4 sm:$0xff]  }
 0x261   : > { %3007 = vmatprep.subr.bf16.mxu1 %v14335_v13  ;;  %v14389_v34 = vld [vmem:[#allocation8 + $0x74c] ss:$16 sps:$4 sm:$0xff]   ;;  %v14384_v47 = vld [vmem:[#allocation8 + $0x548] ss:$16 sps:$4 sm:$0xff]   ;;  %v14407_v13 = vld [vmem:[#allocation8 + $0x2e4] ss:$16 sps:$4 sm:$0xff]  }
 0x262   : > { %v14387_v52 = vld [vmem:[#allocation8 + $0x748] ss:$16 sps:$4 sm:$0xff]   ;;  %v14392_v53 = vld [vmem:[#allocation8 + $0x52c] ss:$16 sps:$4 sm:$0xff]  }
 0x263   : > { %2957 = vmatpush1.bf16.msra.mxu0 %v14330_v57  ;;  %v14395_v3 = vld [vmem:[#allocation8 + $0x72c] ss:$16 sps:$4 sm:$0xff]   ;;  %v14390_v54 = vld [vmem:[#allocation8 + $0x528] ss:$16 sps:$4 sm:$0xff]   ;;  %v14402_v57 = vld [vmem:[#allocation8 + $0xe0] ss:$16 sps:$4 sm:$0xff]  }
 0x264   : > { %3008 = vmatpush1.bf16.msra.mxu1 %v14333_v10  ;;  %2958 = vmatprep.subr.bf16.mxu0 %v14338_v17  ;;  %v14393_v5 = vld [vmem:[#allocation8 + $0x728] ss:$16 sps:$4 sm:$0xff]   ;;  %v14398_v55 = vld [vmem:[#allocation8 + $0x50c] ss:$16 sps:$4 sm:$0xff]   ;;  %v14405_v10 = vld [vmem:[#allocation8 + $0x2e0] ss:$16 sps:$4 sm:$0xff]  }
 0x265   : > { %3009 = vmatprep.subr.bf16.mxu1 %v14341_v20  ;;  %v14401_v6 = vld [vmem:[#allocation8 + $0x70c] ss:$16 sps:$4 sm:$0xff]   ;;  %v14396_v15 = vld [vmem:[#allocation8 + $0x508] ss:$16 sps:$4 sm:$0xff]   ;;  %v14410_v17 = vld [vmem:[#allocation8 + $0xc4] ss:$16 sps:$4 sm:$0xff]  }
 0x266   : > { %v14399_v12 = vld [vmem:[#allocation8 + $0x708] ss:$16 sps:$4 sm:$0xff]   ;;  %v14413_v20 = vld [vmem:[#allocation8 + $0x2c4] ss:$16 sps:$4 sm:$0xff]  }
 0x267   : > { %2959 = vmatpush1.bf16.msra.mxu0 %v14336_v21  ;;  %v14408_v21 = vld [vmem:[#allocation8 + $0xc0] ss:$16 sps:$4 sm:$0xff]  }
 0x268   : > { %3010 = vmatpush1.bf16.msra.mxu1 %v14339_v22  ;;  %2960 = vmatprep.subr.bf16.mxu0 %v14344_v19  ;;  %v14411_v22 = vld [vmem:[#allocation8 + $0x2c0] ss:$16 sps:$4 sm:$0xff]   ;;  %v14416_v19 = vld [vmem:[#allocation8 + $0xa4] ss:$16 sps:$4 sm:$0xff]  }
 0x269   : > { %3011 = vmatprep.subr.bf16.mxu1 %v14347_v18  ;;  %v14419_v18 = vld [vmem:[#allocation8 + $0x2a4] ss:$16 sps:$4 sm:$0xff]  }
 0x26b   : > { %2961 = vmatpush1.bf16.msra.mxu0 %v14342_v26  ;;  %v14414_v26 = vld [vmem:[#allocation8 + $0xa0] ss:$16 sps:$4 sm:$0xff]  }
 0x26c   : > { %3012 = vmatpush1.bf16.msra.mxu1 %v14345_v24  ;;  %2962 = vmatprep.subr.bf16.mxu0 %v14350_v27  ;;  %v14417_v24 = vld [vmem:[#allocation8 + $0x2a0] ss:$16 sps:$4 sm:$0xff]   ;;  %v14422_v27 = vld [vmem:[#allocation8 + $0x84] ss:$16 sps:$4 sm:$0xff]  }
 0x26d   : > { %3013 = vmatprep.subr.bf16.mxu1 %v14353_v28  ;;  %v14425_v28 = vld [vmem:[#allocation8 + $0x284] ss:$16 sps:$4 sm:$0xff]  }
 0x26f   : > { %2963 = vmatpush1.bf16.msra.mxu0 %v14348_v35  ;;  %v14426_v35 = vld [vmem:[#allocation8 + $0x60] ss:$16 sps:$4 sm:$0xff]  }
 0x270   : > { %3014 = vmatpush1.bf16.msra.mxu1 %v14351_v29  ;;  %2964 = vmatprep.subr.bf16.mxu0 %v14356_v36  ;;  %v14429_v29 = vld [vmem:[#allocation8 + $0x260] ss:$16 sps:$4 sm:$0xff]   ;;  %v14434_v36 = vld [vmem:[#allocation8 + $0x44] ss:$16 sps:$4 sm:$0xff]  }
 0x271   : > { %3015 = vmatprep.subr.bf16.mxu1 %v14359_v30  ;;  %v14437_v30 = vld [vmem:[#allocation8 + $0x244] ss:$16 sps:$4 sm:$0xff]  }
 0x273   : > { %2965 = vmatpush2.bf16.msra.mxu0 %v14354_v43  ;;  %v14440_v43 = vld [vmem:[#allocation8 + $0x24] ss:$16 sps:$4 sm:$0xff]  }
 0x274   : > { %3016 = vmatpush2.bf16.msra.mxu1 %v14357_v58  ;;  %2966 = vmatprep.subr.bf16.mxu0 %v14362_v61  ;;  %v14443_v58 = vld [vmem:[#allocation8 + $0x224] ss:$16 sps:$4 sm:$0xff]   ;;  %v14438_v61 = vld [vmem:[#allocation8 + $0x20] ss:$16 sps:$4 sm:$0xff]  }
 0x275   : > { %3017 = vmatprep.subr.bf16.mxu1 %v14365_v11  ;;  %v14441_v11 = vld [vmem:[#allocation8 + $0x220] ss:$16 sps:$4 sm:$0xff]  }
 0x277   : > { %2967 = vmatpush2.bf16.msra.mxu0 %v14360_v14  ;;  %v14446_v14 = vld [vmem:[#allocation8 + $0x4] ss:$16 sps:$4 sm:$0xff]  }
 0x278   : > { %3018 = vmatpush2.bf16.msra.mxu1 %v14363_v31  ;;  %2968 = vmatprep.subr.bf16.mxu0 %v14368_v37  ;;  %v14449_v31 = vld [vmem:[#allocation8 + $0x204] ss:$16 sps:$4 sm:$0xff]   ;;  %v14444_v37 = vld [vmem:[#allocation8] ss:$16 sps:$4 sm:$0xff]  }
 0x279   : > { %3019 = vmatprep.subr.bf16.mxu1 %v14371_v38  ;;  %v14447_v38 = vld [vmem:[#allocation8 + $0x200] ss:$16 sps:$4 sm:$0xff]  }
 0x27b   : > { %2969 = vmatpush2.bf16.msra.mxu0 %v14366_v32  ;;  %v14452_v32 = vld [vmem:[#allocation8 + $0x1e4] ss:$16 sps:$4 sm:$0xff]  }
 0x27c   : > { %3020 = vmatpush2.bf16.msra.mxu1 %v14369_v49  ;;  %2970 = vmatprep.subr.bf16.mxu0 %v14374_v50  ;;  %v14455_v49 = vld [vmem:[#allocation8 + $0x3e4] ss:$16 sps:$4 sm:$0xff]   ;;  %v14450_v50 = vld [vmem:[#allocation8 + $0x1e0] ss:$16 sps:$4 sm:$0xff]  }
 0x27d   : > { %3021 = vmatprep.subr.bf16.mxu1 %v14377_v39  ;;  %v14453_v39 = vld [vmem:[#allocation8 + $0x3e0] ss:$16 sps:$4 sm:$0xff]  }
 0x27f   : > { %2971 = vmatpush2.bf16.msra.mxu0 %v14372_v40  ;;  %v14458_v40 = vld [vmem:[#allocation8 + $0x1c4] ss:$16 sps:$4 sm:$0xff]  }
 0x280   : > { %3022 = vmatpush2.bf16.msra.mxu1 %v14375_v44  ;;  %2972 = vmatprep.subr.bf16.mxu0 %v14380_v45  ;;  %v14461_v44 = vld [vmem:[#allocation8 + $0x3c4] ss:$16 sps:$4 sm:$0xff]   ;;  %v14456_v45 = vld [vmem:[#allocation8 + $0x1c0] ss:$16 sps:$4 sm:$0xff]  }
 0x281   : > { %3023 = vmatprep.subr.bf16.mxu1 %v14383_v62  ;;  %v14459_v62 = vld [vmem:[#allocation8 + $0x3c0] ss:$16 sps:$4 sm:$0xff]  }
 0x283   : > { %2973 = vmatpush2.bf16.msra.mxu0 %v14378_v63  ;;  %v14464_v63 = vld [vmem:[#allocation8 + $0x1a4] ss:$16 sps:$4 sm:$0xff]  }
 0x284   : > { %3024 = vmatpush2.bf16.msra.mxu1 %v14381_v51  ;;  %2974 = vmatprep.subr.bf16.mxu0 %v14386_v33  ;;  %v14467_v51 = vld [vmem:[#allocation8 + $0x3a4] ss:$16 sps:$4 sm:$0xff]   ;;  %v14462_v33 = vld [vmem:[#allocation8 + $0x1a0] ss:$16 sps:$4 sm:$0xff]  }
 0x285   : > { %3025 = vmatprep.subr.bf16.mxu1 %v14389_v34  ;;  %v14465_v34 = vld [vmem:[#allocation8 + $0x3a0] ss:$16 sps:$4 sm:$0xff]  }
 0x287   : > { %2975 = vmatpush2.bf16.msra.mxu0 %v14384_v47  ;;  %v14470_v47 = vld [vmem:[#allocation8 + $0x184] ss:$16 sps:$4 sm:$0xff]  }
 0x288   : > { %3026 = vmatpush2.bf16.msra.mxu1 %v14387_v52  ;;  %2976 = vmatprep.subr.bf16.mxu0 %v14392_v53  ;;  %v14473_v52 = vld [vmem:[#allocation8 + $0x384] ss:$16 sps:$4 sm:$0xff]   ;;  %v14468_v53 = vld [vmem:[#allocation8 + $0x180] ss:$16 sps:$4 sm:$0xff]  }
 0x289   : > { %3027 = vmatprep.subr.bf16.mxu1 %v14395_v3  ;;  %v14471_v3 = vld [vmem:[#allocation8 + $0x380] ss:$16 sps:$4 sm:$0xff]  }
 0x28b   : > { %2977 = vmatpush2.bf16.msra.mxu0 %v14390_v54  ;;  %v14476_v54 = vld [vmem:[#allocation8 + $0x164] ss:$16 sps:$4 sm:$0xff]  }
 0x28c   : > { %3028 = vmatpush2.bf16.msra.mxu1 %v14393_v5  ;;  %2978 = vmatprep.subr.bf16.mxu0 %v14398_v55  ;;  %v14479_v5 = vld [vmem:[#allocation8 + $0x364] ss:$16 sps:$4 sm:$0xff]   ;;  %v14474_v55 = vld [vmem:[#allocation8 + $0x160] ss:$16 sps:$4 sm:$0xff]  }
 0x28d   : > { %3029 = vmatprep.subr.bf16.mxu1 %v14401_v6  ;;  %v14477_v6 = vld [vmem:[#allocation8 + $0x360] ss:$16 sps:$4 sm:$0xff]  }
 0x28f   : > { %2979 = vmatpush2.bf16.msra.mxu0 %v14396_v15  ;;  %v14482_v15 = vld [vmem:[#allocation8 + $0x144] ss:$16 sps:$4 sm:$0xff]  }
 0x290   : > { %3030 = vmatpush2.bf16.msra.mxu1 %v14399_v12  ;;  %3690 = vmatprep.subr.bf16.mxu0 %v14404_v16  ;;  %v14485_v12 = vld [vmem:[#allocation8 + $0x344] ss:$16 sps:$4 sm:$0xff]   ;;  %v14480_v16 = vld [vmem:[#allocation8 + $0x140] ss:$16 sps:$4 sm:$0xff]  }
 0x291   : > { %3741 = vmatprep.subr.bf16.mxu1 %v14407_v13  ;;  %v14483_v13 = vld [vmem:[#allocation8 + $0x340] ss:$16 sps:$4 sm:$0xff]  }
 0x292   : > { %2981 = vmatmul.mubr.bf16.vlgmr.msra.gmra.mxu0 %v17376_v59  ;;  %v14423_v59 = vld [vmem:[#allocation8 + $0x280] ss:$16 sps:$4 sm:$0xff]  }
 0x293   : > { %3032 = vmatmul.mubr.bf16.vlgmr.msra.gmra.mxu1 %v17379_v1  ;;  %2990 = vmatprep.mubr.bf16.mxu0 %v17373_v46  ;;  %v14420_v46 = vld [vmem:[#allocation8 + $0x80] ss:$16 sps:$4 sm:$0xff]   ;;  %v14428_v1 = vld [vmem:[#allocation8 + $0x64] ss:$16 sps:$4 sm:$0xff]  }
 0x294   : > { %3041 = vmatprep.mubr.bf16.mxu1 %v17381_v2  ;;  %3691 = vmatpush1.bf16.msra.mxu0 %v14402_v57  ;;  %v14431_v2 = vld [vmem:[#allocation8 + $0x264] ss:$16 sps:$4 sm:$0xff]  }
 0x295   : > { %3742 = vmatpush1.bf16.msra.mxu1 %v14405_v10  ;;  %3692 = vmatprep.subr.bf16.mxu0 %v14410_v17  ;;  %v14488_v57 = vld [vmem:[#allocation8 + $0x124] ss:$16 sps:$4 sm:$0xff]   ;;  %v14486_v17 = vld [vmem:[#allocation8 + $0x120] ss:$16 sps:$4 sm:$0xff]  }
 0x296   : > { %3743 = vmatprep.subr.bf16.mxu1 %v14413_v20  ;;  %v14491_v10 = vld [vmem:[#allocation8 + $0x324] ss:$16 sps:$4 sm:$0xff]   ;;  %v14489_v20 = vld [vmem:[#allocation8 + $0x320] ss:$16 sps:$4 sm:$0xff]  }
 0x298   : > { %3693 = vmatpush1.bf16.msra.mxu0 %v14408_v21  ;;  %v14494_v21 = vld [vmem:[#allocation8 + $0x104] ss:$16 sps:$4 sm:$0xff]  }
 0x299   : > { %3744 = vmatpush1.bf16.msra.mxu1 %v14411_v22  ;;  %3694 = vmatprep.subr.bf16.mxu0 %v14416_v19  ;;  %v14497_v22 = vld [vmem:[#allocation8 + $0x304] ss:$16 sps:$4 sm:$0xff]   ;;  %v14492_v19 = vld [vmem:[#allocation8 + $0x100] ss:$16 sps:$4 sm:$0xff]  }
 0x29a   : > { %3745 = vmatprep.subr.bf16.mxu1 %v14419_v18  ;;  %2991 = vmatmul.mubr.bf16.gmra.mxu0 %v17389_v7  ;;  %v14432_v7 = vld [vmem:[#allocation8 + $0x40] ss:$16 sps:$4 sm:$0xff]  }
 0x29b   : > { %3042 = vmatmul.mubr.bf16.gmra.mxu1 %v17391_v8  ;;  %3722 = vmatprep.mubr.bf16.mxu0 %v17343_v60  ;;  %v14435_v8 = vld [vmem:[#allocation8 + $0x240] ss:$16 sps:$4 sm:$0xff]  }
 0x29c   : > { %3773 = vmatprep.mubr.bf16.mxu1 %v17345_v42  ;;  %3695 = vmatpush1.bf16.msra.mxu0 %v14414_v26  ;;  %v14495_v18 = vld [vmem:[#allocation8 + $0x300] ss:$16 sps:$4 sm:$0xff]   ;;  %v14500_v26 = vld [vmem:[#allocation8 + $0xec] ss:$16 sps:$4 sm:$0xff]  }
 0x29d   : > { %3746 = vmatpush1.bf16.msra.mxu1 %v14417_v24  ;;  %3696 = vmatprep.subr.bf16.mxu0 %v14422_v27  ;;  %v14503_v24 = vld [vmem:[#allocation8 + $0x2ec] ss:$16 sps:$4 sm:$0xff]   ;;  %v14498_v27 = vld [vmem:[#allocation8 + $0xe8] ss:$16 sps:$4 sm:$0xff]  }
 0x29e   : > { %3747 = vmatprep.subr.bf16.mxu1 %v14425_v28  ;;  %v14501_v28 = vld [vmem:[#allocation8 + $0x2e8] ss:$16 sps:$4 sm:$0xff]  }
 0x2a0   : > { %3697 = vmatpush1.bf16.msra.mxu0 %v14420_v46  ;;  %v14506_v46 = vld [vmem:[#allocation8 + $0xcc] ss:$16 sps:$4 sm:$0xff]  }
 0x2a1   : > { %3748 = vmatpush1.bf16.msra.mxu1 %v14423_v59  ;;  %3698 = vmatprep.subr.bf16.mxu0 %v14428_v1  ;;  %v14509_v59 = vld [vmem:[#allocation8 + $0x2cc] ss:$16 sps:$4 sm:$0xff]   ;;  %v14504_v1 = vld [vmem:[#allocation8 + $0xc8] ss:$16 sps:$4 sm:$0xff]  }
 0x2a2   : > { %3749 = vmatprep.subr.bf16.mxu1 %v14431_v2  ;;  %v14507_v2 = vld [vmem:[#allocation8 + $0x2c8] ss:$16 sps:$4 sm:$0xff]  }
 0x2a4   : > { %3699 = vmatpush1.bf16.msra.mxu0 %v14426_v35  ;;  %v14512_v35 = vld [vmem:[#allocation8 + $0xac] ss:$16 sps:$4 sm:$0xff]  }
 0x2a5   : > { %3750 = vmatpush1.bf16.msra.mxu1 %v14429_v29  ;;  %3700 = vmatprep.subr.bf16.mxu0 %v14434_v36  ;;  %v14515_v29 = vld [vmem:[#allocation8 + $0x2ac] ss:$16 sps:$4 sm:$0xff]   ;;  %v14510_v36 = vld [vmem:[#allocation8 + $0xa8] ss:$16 sps:$4 sm:$0xff]  }
 0x2a6   : > { %3751 = vmatprep.subr.bf16.mxu1 %v14437_v30  ;;  %v14513_v30 = vld [vmem:[#allocation8 + $0x2a8] ss:$16 sps:$4 sm:$0xff]  }
 0x2a8   : > { %3701 = vmatpush1.bf16.msra.mxu0 %v14432_v7  ;;  %v14518_v7 = vld [vmem:[#allocation8 + $0x8c] ss:$16 sps:$4 sm:$0xff]  }
 0x2a9   : > { %3752 = vmatpush1.bf16.msra.mxu1 %v14435_v8  ;;  %3702 = vmatprep.subr.bf16.mxu0 %v14440_v43  ;;  %v14521_v8 = vld [vmem:[#allocation8 + $0x28c] ss:$16 sps:$4 sm:$0xff]   ;;  %v14516_v43 = vld [vmem:[#allocation8 + $0x88] ss:$16 sps:$4 sm:$0xff]  }
 0x2aa   : > { %3753 = vmatprep.subr.bf16.mxu1 %v14443_v58  ;;  %v14519_v58 = vld [vmem:[#allocation8 + $0x288] ss:$16 sps:$4 sm:$0xff]  }
 0x2ac   : > { %3703 = vmatpush1.bf16.msra.mxu0 %v14438_v61  ;;  %v14524_v61 = vld [vmem:[#allocation8 + $0x6c] ss:$16 sps:$4 sm:$0xff]  }
 0x2ad   : > { %3754 = vmatpush1.bf16.msra.mxu1 %v14441_v11  ;;  %3704 = vmatprep.subr.bf16.mxu0 %v14446_v14  ;;  %v14527_v11 = vld [vmem:[#allocation8 + $0x26c] ss:$16 sps:$4 sm:$0xff]   ;;  %v14522_v14 = vld [vmem:[#allocation8 + $0x68] ss:$16 sps:$4 sm:$0xff]  }
 0x2ae   : > { %3755 = vmatprep.subr.bf16.mxu1 %v14449_v31  ;;  %v14525_v31 = vld [vmem:[#allocation8 + $0x268] ss:$16 sps:$4 sm:$0xff]  }
 0x2b0   : > { %3705 = vmatpush1.bf16.msra.mxu0 %v14444_v37  ;;  %v14530_v37 = vld [vmem:[#allocation8 + $0x4c] ss:$16 sps:$4 sm:$0xff]  }
 0x2b1   : > { %3756 = vmatpush1.bf16.msra.mxu1 %v14447_v38  ;;  %3706 = vmatprep.subr.bf16.mxu0 %v14452_v32  ;;  %v14533_v38 = vld [vmem:[#allocation8 + $0x24c] ss:$16 sps:$4 sm:$0xff]   ;;  %v14528_v32 = vld [vmem:[#allocation8 + $0x48] ss:$16 sps:$4 sm:$0xff]  }
 0x2b2   : > { %3757 = vmatprep.subr.bf16.mxu1 %v14455_v49  ;;  %v14531_v49 = vld [vmem:[#allocation8 + $0x248] ss:$16 sps:$4 sm:$0xff]  }
 0x2b4   : > { %3707 = vmatpush2.bf16.msra.mxu0 %v14450_v50  ;;  %v14536_v50 = vld [vmem:[#allocation8 + $0x2c] ss:$16 sps:$4 sm:$0xff]  }
 0x2b5   : > { %3758 = vmatpush2.bf16.msra.mxu1 %v14453_v39  ;;  %3708 = vmatprep.subr.bf16.mxu0 %v14458_v40  ;;  %v14539_v39 = vld [vmem:[#allocation8 + $0x22c] ss:$16 sps:$4 sm:$0xff]   ;;  %v14534_v40 = vld [vmem:[#allocation8 + $0x28] ss:$16 sps:$4 sm:$0xff]  }
 0x2b6   : > { %3759 = vmatprep.subr.bf16.mxu1 %v14461_v44  ;;  %v14537_v44 = vld [vmem:[#allocation8 + $0x228] ss:$16 sps:$4 sm:$0xff]  }
 0x2b8   : > { %3709 = vmatpush2.bf16.msra.mxu0 %v14456_v45  ;;  %v14542_v45 = vld [vmem:[#allocation8 + $0xc] ss:$16 sps:$4 sm:$0xff]  }
 0x2b9   : > { %3760 = vmatpush2.bf16.msra.mxu1 %v14459_v62  ;;  %3710 = vmatprep.subr.bf16.mxu0 %v14464_v63  ;;  %v14545_v62 = vld [vmem:[#allocation8 + $0x20c] ss:$16 sps:$4 sm:$0xff]   ;;  %v14540_v63 = vld [vmem:[#allocation8 + $0x8] ss:$16 sps:$4 sm:$0xff]  }
 0x2ba   : > { %3761 = vmatprep.subr.bf16.mxu1 %v14467_v51  ;;  %v14543_v51 = vld [vmem:[#allocation8 + $0x208] ss:$16 sps:$4 sm:$0xff]  }
 0x2bc   : > { %3711 = vmatpush2.bf16.msra.mxu0 %v14462_v33  ;;  %v14548_v33 = vld [vmem:[#allocation8 + $0x1ec] ss:$16 sps:$4 sm:$0xff]  }
 0x2bd   : > { %3762 = vmatpush2.bf16.msra.mxu1 %v14465_v34  ;;  %3712 = vmatprep.subr.bf16.mxu0 %v14470_v47  ;;  %v14551_v34 = vld [vmem:[#allocation8 + $0x3ec] ss:$16 sps:$4 sm:$0xff]   ;;  %v14546_v47 = vld [vmem:[#allocation8 + $0x1e8] ss:$16 sps:$4 sm:$0xff]  }
 0x2be   : > { %3763 = vmatprep.subr.bf16.mxu1 %v14473_v52  ;;  %v14549_v52 = vld [vmem:[#allocation8 + $0x3e8] ss:$16 sps:$4 sm:$0xff]  }
 0x2c0   : > { %3713 = vmatpush2.bf16.msra.mxu0 %v14468_v53  ;;  %v14554_v53 = vld [vmem:[#allocation8 + $0x1cc] ss:$16 sps:$4 sm:$0xff]  }
 0x2c1   : > { %3764 = vmatpush2.bf16.msra.mxu1 %v14471_v3  ;;  %3714 = vmatprep.subr.bf16.mxu0 %v14476_v54  ;;  %v14557_v3 = vld [vmem:[#allocation8 + $0x3cc] ss:$16 sps:$4 sm:$0xff]   ;;  %v14552_v54 = vld [vmem:[#allocation8 + $0x1c8] ss:$16 sps:$4 sm:$0xff]  }
 0x2c2   : > { %3765 = vmatprep.subr.bf16.mxu1 %v14479_v5  ;;  %v14555_v5 = vld [vmem:[#allocation8 + $0x3c8] ss:$16 sps:$4 sm:$0xff]  }
 0x2c4   : > { %3715 = vmatpush2.bf16.msra.mxu0 %v14474_v55  ;;  %v14560_v55 = vld [vmem:[#allocation8 + $0x1ac] ss:$16 sps:$4 sm:$0xff]  }
 0x2c5   : > { %3766 = vmatpush2.bf16.msra.mxu1 %v14477_v6  ;;  %3716 = vmatprep.subr.bf16.mxu0 %v14482_v15  ;;  %v14563_v6 = vld [vmem:[#allocation8 + $0x3ac] ss:$16 sps:$4 sm:$0xff]   ;;  %v14558_v15 = vld [vmem:[#allocation8 + $0x1a8] ss:$16 sps:$4 sm:$0xff]  }
 0x2c6   : > { %3767 = vmatprep.subr.bf16.mxu1 %v14485_v12  ;;  %v14561_v12 = vld [vmem:[#allocation8 + $0x3a8] ss:$16 sps:$4 sm:$0xff]  }
 0x2c8   : > { %3717 = vmatpush2.bf16.msra.mxu0 %v14480_v16  ;;  %v14566_v16 = vld [vmem:[#allocation8 + $0x18c] ss:$16 sps:$4 sm:$0xff]  }
 0x2c9   : > { %3768 = vmatpush2.bf16.msra.mxu1 %v14483_v13  ;;  %3718 = vmatprep.subr.bf16.mxu0 %v14488_v57  ;;  %v14569_v13 = vld [vmem:[#allocation8 + $0x38c] ss:$16 sps:$4 sm:$0xff]   ;;  %v14564_v57 = vld [vmem:[#allocation8 + $0x188] ss:$16 sps:$4 sm:$0xff]  }
 0x2ca   : > { %3769 = vmatprep.subr.bf16.mxu1 %v14491_v10  ;;  %v14567_v10 = vld [vmem:[#allocation8 + $0x388] ss:$16 sps:$4 sm:$0xff]  }
 0x2cc   : > { %3719 = vmatpush2.bf16.msra.mxu0 %v14486_v17  ;;  %v14572_v17 = vld [vmem:[#allocation8 + $0x16c] ss:$16 sps:$4 sm:$0xff]  }
 0x2cd   : > { %3770 = vmatpush2.bf16.msra.mxu1 %v14489_v20  ;;  %3720 = vmatprep.subr.bf16.mxu0 %v14494_v21  ;;  %v14575_v20 = vld [vmem:[#allocation8 + $0x36c] ss:$16 sps:$4 sm:$0xff]   ;;  %v14570_v21 = vld [vmem:[#allocation8 + $0x168] ss:$16 sps:$4 sm:$0xff]  }
 0x2ce   : > { %3771 = vmatprep.subr.bf16.mxu1 %v14497_v22  ;;  %v14573_v22 = vld [vmem:[#allocation8 + $0x368] ss:$16 sps:$4 sm:$0xff]  }
 0x2d0   : > { %3721 = vmatpush2.bf16.msra.mxu0 %v14492_v19  ;;  %v14578_v19 = vld [vmem:[#allocation8 + $0x14c] ss:$16 sps:$4 sm:$0xff]  }
 0x2d1   : > { %3772 = vmatpush2.bf16.msra.mxu1 %v14495_v18  ;;  %3792 = vmatprep.subr.bf16.mxu0 %v14500_v26  ;;  %v14581_v18 = vld [vmem:[#allocation8 + $0x34c] ss:$16 sps:$4 sm:$0xff]   ;;  %v14576_v26 = vld [vmem:[#allocation8 + $0x148] ss:$16 sps:$4 sm:$0xff]  }
 0x2d2   : > { %3843 = vmatprep.subr.bf16.mxu1 %v14503_v24  ;;  %v14579_v24 = vld [vmem:[#allocation8 + $0x348] ss:$16 sps:$4 sm:$0xff]  }
 0x2d3   : > { %3723 = vmatmul.mubr.bf16.vlgmr.msra.gmra.mxu0 %v17339_v0 }
 0x2d4   : > { %3774 = vmatmul.mubr.bf16.vlgmr.msra.gmra.mxu1 %v17341_v4  ;;  %3732 = vmatprep.mubr.bf16.mxu0 %v17358_v25 }
 0x2d5   : > { %3783 = vmatprep.mubr.bf16.mxu1 %v17360_v23  ;;  %3793 = vmatpush1.bf16.msra.mxu0 %v14498_v27  ;;  %v14584_v27 = vld [vmem:[#allocation8 + $0x12c] ss:$16 sps:$4 sm:$0xff]  }
 0x2d6   : > { %3844 = vmatpush1.bf16.msra.mxu1 %v14501_v28  ;;  %3794 = vmatprep.subr.bf16.mxu0 %v14506_v46  ;;  %v14587_v28 = vld [vmem:[#allocation8 + $0x32c] ss:$16 sps:$4 sm:$0xff]   ;;  %v14582_v46 = vld [vmem:[#allocation8 + $0x128] ss:$16 sps:$4 sm:$0xff]  }
 0x2d7   : > { %3845 = vmatprep.subr.bf16.mxu1 %v14509_v59  ;;  %v14585_v59 = vld [vmem:[#allocation8 + $0x328] ss:$16 sps:$4 sm:$0xff]  }
 0x2d9   : > { %3795 = vmatpush1.bf16.msra.mxu0 %v14504_v1  ;;  %v14590_v1 = vld [vmem:[#allocation8 + $0x10c] ss:$16 sps:$4 sm:$0xff]  }
 0x2da   : > { %3846 = vmatpush1.bf16.msra.mxu1 %v14507_v2  ;;  %3796 = vmatprep.subr.bf16.mxu0 %v14512_v35  ;;  %v14593_v2 = vld [vmem:[#allocation8 + $0x30c] ss:$16 sps:$4 sm:$0xff]   ;;  %v14588_v35 = vld [vmem:[#allocation8 + $0x108] ss:$16 sps:$4 sm:$0xff]  }
 0x2db   : > { %3847 = vmatprep.subr.bf16.mxu1 %v14515_v29  ;;  %3733 = vmatmul.mubr.bf16.gmra.mxu0 %v17349_v56  ;;  %v14591_v29 = vld [vmem:[#allocation8 + $0x308] ss:$16 sps:$4 sm:$0xff]  }
 0x2dc   : > { %3784 = vmatmul.mubr.bf16.gmra.mxu1 %v17351_v9  ;;  %3824 = vmatprep.mubr.bf16.mxu0 %v17343_v60 }
 0x2dd   : > { %3875 = vmatprep.mubr.bf16.mxu1 %v17345_v42  ;;  %3797 = vmatpush1.bf16.msra.mxu0 %v14510_v36  ;;  %v14596_v36 = vld [vmem:[#allocation8 + $0x8e4] ss:$16 sps:$4 sm:$0xff]  }
 0x2de   : > { %3848 = vmatpush1.bf16.msra.mxu1 %v14513_v30  ;;  %3798 = vmatprep.subr.bf16.mxu0 %v14518_v7  ;;  %v14599_v30 = vld [vmem:[#allocation8 + $0xae4] ss:$16 sps:$4 sm:$0xff]   ;;  %v14594_v7 = vld [vmem:[#allocation8 + $0x8e0] ss:$16 sps:$4 sm:$0xff]  }
 0x2df   : > { %3849 = vmatprep.subr.bf16.mxu1 %v14521_v8  ;;  %v14597_v8 = vld [vmem:[#allocation8 + $0xae0] ss:$16 sps:$4 sm:$0xff]  }
 0x2e1   : > { %3799 = vmatpush1.bf16.msra.mxu0 %v14516_v43  ;;  %v14602_v43 = vld [vmem:[#allocation8 + $0x8c4] ss:$16 sps:$4 sm:$0xff]  }
 0x2e2   : > { %3850 = vmatpush1.bf16.msra.mxu1 %v14519_v58  ;;  %3800 = vmatprep.subr.bf16.mxu0 %v14524_v61  ;;  %v14605_v58 = vld [vmem:[#allocation8 + $0xac4] ss:$16 sps:$4 sm:$0xff]  }
 0x2e3   : > { %3851 = vmatprep.subr.bf16.mxu1 %v14527_v11 }
 0x2e5   : > { %3801 = vmatpush1.bf16.msra.mxu0 %v14522_v14 }
 0x2e6   : > { %3852 = vmatpush1.bf16.msra.mxu1 %v14525_v31  ;;  %3802 = vmatprep.subr.bf16.mxu0 %v14530_v37 }
 0x2e7   : > { %3853 = vmatprep.subr.bf16.mxu1 %v14533_v38  ;;  %v14600_v38 = vld [vmem:[#allocation8 + $0x8c0] ss:$16 sps:$4 sm:$0xff]  }
 0x2e9   : > { %3803 = vmatpush1.bf16.msra.mxu0 %v14528_v32  ;;  %v14603_v32 = vld [vmem:[#allocation8 + $0xac0] ss:$16 sps:$4 sm:$0xff]  }
 0x2ea   : > { %3854 = vmatpush1.bf16.msra.mxu1 %v14531_v49  ;;  %3804 = vmatprep.subr.bf16.mxu0 %v14536_v50  ;;  %v14608_v50 = vld [vmem:[#allocation8 + $0x8a4] ss:$16 sps:$4 sm:$0xff]  }
 0x2eb   : > { %3855 = vmatprep.subr.bf16.mxu1 %v14539_v39  ;;  %v14611_v39 = vld [vmem:[#allocation8 + $0xaa4] ss:$16 sps:$4 sm:$0xff]  }
 0x2ed   : > { %3805 = vmatpush1.bf16.msra.mxu0 %v14534_v40 }
 0x2ee   : > { %3856 = vmatpush1.bf16.msra.mxu1 %v14537_v44  ;;  %3806 = vmatprep.subr.bf16.mxu0 %v14542_v45 }
 0x2ef   : > { %3857 = vmatprep.subr.bf16.mxu1 %v14545_v62 }
 0x2f1   : > { %3807 = vmatpush1.bf16.msra.mxu0 %v14540_v63 }
 0x2f2   : > { %3858 = vmatpush1.bf16.msra.mxu1 %v14543_v51  ;;  %3808 = vmatprep.subr.bf16.mxu0 %v14548_v33  ;;  %v14606_v51 = vld [vmem:[#allocation8 + $0x8a0] ss:$16 sps:$4 sm:$0xff]  }
 0x2f3   : > { %3859 = vmatprep.subr.bf16.mxu1 %v14551_v34  ;;  %v14609_v33 = vld [vmem:[#allocation8 + $0xaa0] ss:$16 sps:$4 sm:$0xff]   ;;  %v17422_v34 = vrot.slane %v17358_v25, 1 }
 0x2f5   : > { %3809 = vmatpush2.bf16.msra.mxu0 %v14546_v47  ;;  %v17425_v47 = vrot.slane %v17360_v23, 1 }
 0x2f6   : > { %3860 = vmatpush2.bf16.msra.mxu1 %v14549_v52  ;;  %3810 = vmatprep.subr.bf16.mxu0 %v14554_v53  ;;  %v14614_v53 = vld [vmem:[#allocation8 + $0x884] ss:$16 sps:$4 sm:$0xff]  }
 0x2f7   : > { %3861 = vmatprep.subr.bf16.mxu1 %v14557_v3  ;;  %v14617_v3 = vld [vmem:[#allocation8 + $0xa84] ss:$16 sps:$4 sm:$0xff]  }
 0x2f9   : > { %3811 = vmatpush2.bf16.msra.mxu0 %v14552_v54 }
 0x2fa   : > { %3862 = vmatpush2.bf16.msra.mxu1 %v14555_v5  ;;  %3812 = vmatprep.subr.bf16.mxu0 %v14560_v55  ;;  %v4034_v55 = vrot.slane %v17343_v60, 1 }
 0x2fb   : > { %3863 = vmatprep.subr.bf16.mxu1 %v14563_v6  ;;  %v4040_v6 = vrot.slane %v17345_v42, 1  ;;  %v14615_v42 = vld [vmem:[#allocation8 + $0xa80] ss:$16 sps:$4 sm:$0xff]  }
 0x2fd   : > { %3813 = vmatpush2.bf16.msra.mxu0 %v14558_v15 }
 0x2fe   : > { %3864 = vmatpush2.bf16.msra.mxu1 %v14561_v12  ;;  %3814 = vmatprep.subr.bf16.mxu0 %v14566_v16  ;;  %v14612_v16 = vld [vmem:[#allocation8 + $0x880] ss:$16 sps:$4 sm:$0xff]  }
 0x2ff   : > { %3865 = vmatprep.subr.bf16.mxu1 %v14569_v13 }
 0x301   : > { %3815 = vmatpush2.bf16.msra.mxu0 %v14564_v57  ;;  %v14620_v57 = vld [vmem:[#allocation8 + $0x864] ss:$16 sps:$4 sm:$0xff]  }
 0x302   : > { %3866 = vmatpush2.bf16.msra.mxu1 %v14567_v10  ;;  %3816 = vmatprep.subr.bf16.mxu0 %v14572_v17  ;;  %v14623_v10 = vld [vmem:[#allocation8 + $0xa64] ss:$16 sps:$4 sm:$0xff]  }
 0x303   : > { %3867 = vmatprep.subr.bf16.mxu1 %v14575_v20 }
 0x305   : > { %3817 = vmatpush2.bf16.msra.mxu0 %v14570_v21 }
 0x306   : > { %3868 = vmatpush2.bf16.msra.mxu1 %v14573_v22  ;;  %3818 = vmatprep.subr.bf16.mxu0 %v14578_v19  ;;  %v14618_v19 = vld [vmem:[#allocation8 + $0x860] ss:$16 sps:$4 sm:$0xff]  }
 0x307   : > { %3869 = vmatprep.subr.bf16.mxu1 %v14581_v18  ;;  %v14621_v18 = vld [vmem:[#allocation8 + $0xa60] ss:$16 sps:$4 sm:$0xff]  }
 0x309   : > { %3819 = vmatpush2.bf16.msra.mxu0 %v14576_v26  ;;  %v14626_v26 = vld [vmem:[#allocation8 + $0x844] ss:$16 sps:$4 sm:$0xff]  }
 0x30a   : > { %3870 = vmatpush2.bf16.msra.mxu1 %v14579_v24  ;;  %3820 = vmatprep.subr.bf16.mxu0 %v14584_v27  ;;  %v14629_v24 = vld [vmem:[#allocation8 + $0xa44] ss:$16 sps:$4 sm:$0xff]   ;;  %v14624_v27 = vld [vmem:[#allocation8 + $0x840] ss:$16 sps:$4 sm:$0xff]  }
 0x30b   : > { %3871 = vmatprep.subr.bf16.mxu1 %v14587_v28  ;;  %v14627_v28 = vld [vmem:[#allocation8 + $0xa40] ss:$16 sps:$4 sm:$0xff]  }
 0x30d   : > { %3821 = vmatpush2.bf16.msra.mxu0 %v14582_v46  ;;  %v14632_v46 = vld [vmem:[#allocation8 + $0x824] ss:$16 sps:$4 sm:$0xff]  }
 0x30e   : > { %3872 = vmatpush2.bf16.msra.mxu1 %v14585_v59  ;;  %3822 = vmatprep.subr.bf16.mxu0 %v14590_v1  ;;  %v14635_v59 = vld [vmem:[#allocation8 + $0xa24] ss:$16 sps:$4 sm:$0xff]   ;;  %v14630_v1 = vld [vmem:[#allocation8 + $0x820] ss:$16 sps:$4 sm:$0xff]  }
 0x30f   : > { %3873 = vmatprep.subr.bf16.mxu1 %v14593_v2  ;;  %v14633_v2 = vld [vmem:[#allocation8 + $0xa20] ss:$16 sps:$4 sm:$0xff]  }
 0x311   : > { %3823 = vmatpush2.bf16.msra.mxu0 %v14588_v35  ;;  %v14638_v35 = vld [vmem:[#allocation8 + $0x804] ss:$16 sps:$4 sm:$0xff]  }
 0x312   : > { %3874 = vmatpush2.bf16.msra.mxu1 %v14591_v29  ;;  %4691 = vmatprep.subr.bf16.mxu0 %v14596_v36  ;;  %v2880_v61 = vpop.f32.mrf.mxu0  ;;  %v14641_v29 = vld [vmem:[#allocation8 + $0xa04] ss:$16 sps:$4 sm:$0xff]   ;;  %v14636_v36 = vld [vmem:[#allocation8 + $0x800] ss:$16 sps:$4 sm:$0xff]  }
 0x313   : > { %4742 = vmatprep.subr.bf16.mxu1 %v14599_v30  ;;  %v2931_v11 = vpop.f32.mrf.mxu1  ;;  %v14639_v30 = vld [vmem:[#allocation8 + $0xa00] ss:$16 sps:$4 sm:$0xff]  }
 0x314   : > { %v17411_v14 = vadd.f32 %v2931_v11, %v2880_v61  ;;  %3825 = vmatmul.mubr.bf16.vlgmr.msra.gmra.mxu0 %v17339_v0  ;;  %v2882_v31 = vpop.f32.mrf.mxu0  ;;  %v14650_v61 = vld [vmem:[#allocation8 + $0x9c4] ss:$16 sps:$4 sm:$0xff]  }
 0x315   : > { %3876 = vmatmul.mubr.bf16.vlgmr.msra.gmra.mxu1 %v17341_v4  ;;  %v2933_v37 = vpop.f32.mrf.mxu1  ;;  %3834 = vmatprep.mubr.bf16.mxu0 %v17358_v25  ;;  %v17437_v25 = vsel %vm1243_vm4, %v4034_v55, %v17422_v34  ;;  %v14653_v11 = vld [vmem:[#allocation8 + $0xbc4] ss:$16 sps:$4 sm:$0xff]   ;;  %v14672_v55 = vld [vmem:[#allocation8 + $0x940] ss:$16 sps:$4 sm:$0xff]  }
 0x316   : > { %3885 = vmatprep.mubr.bf16.mxu1 %v17360_v23  ;;  %v17417_v49 = vadd.f32 %v2933_v37, %v2882_v31  ;;  %4692 = vmatpush1.bf16.msra.mxu0 %v14594_v7  ;;  %v2884_v40 = vpop.f32.mrf.mxu0  ;;  %v17441_v23 = vsel %vm1243_vm4, %v4040_v6, %v17425_v47  ;;  %v14644_v7 = vld [vmem:[#allocation8 + $0x9e4] ss:$16 sps:$4 sm:$0xff]   ;;  %v14648_v31 = vld [vmem:[#allocation8 + $0x9c0] ss:$16 sps:$4 sm:$0xff]  }
 0x317   : > { %4743 = vmatpush1.bf16.msra.mxu1 %v14597_v8  ;;  %v2935_v44 = vpop.f32.mrf.mxu1  ;;  %4693 = vmatprep.subr.bf16.mxu0 %v14602_v43  ;;  %v14647_v8 = vld [vmem:[#allocation8 + $0xbe4] ss:$16 sps:$4 sm:$0xff]   ;;  %v14642_v43 = vld [vmem:[#allocation8 + $0x9e0] ss:$16 sps:$4 sm:$0xff]  }
 0x318   : > { %4744 = vmatprep.subr.bf16.mxu1 %v14605_v58  ;;  %v17419_v45 = vadd.f32 %v2935_v44, %v2884_v40  ;;  %v2886_v62 = vpop.f32.mrf.mxu0  ;;  %v14645_v58 = vld [vmem:[#allocation8 + $0xbe0] ss:$16 sps:$4 sm:$0xff]   ;;  %v14662_v40 = vld [vmem:[#allocation8 + $0x984] ss:$16 sps:$4 sm:$0xff]  }
 0x319   : > { %v2937_v63 = vpop.f32.mrf.mxu1  ;;  %v14651_v37 = vld [vmem:[#allocation8 + $0xbc0] ss:$16 sps:$4 sm:$0xff]   ;;  %v14665_v44 = vld [vmem:[#allocation8 + $0xb84] ss:$16 sps:$4 sm:$0xff]  }
 0x31a   : > { %v17427_v52 = vadd.f32 %v2937_v63, %v2886_v62  ;;  %4694 = vmatpush1.bf16.msra.mxu0 %v14600_v38  ;;  %v2890_v54 = vpop.f32.mrf.mxu0  ;;  %v14656_v38 = vld [vmem:[#allocation8 + $0x9a4] ss:$16 sps:$4 sm:$0xff]   ;;  %v14660_v62 = vld [vmem:[#allocation8 + $0x980] ss:$16 sps:$4 sm:$0xff]  }
 0x31b   : > { %4745 = vmatpush1.bf16.msra.mxu1 %v14603_v32  ;;  %v2941_v5 = vpop.f32.mrf.mxu1  ;;  %4695 = vmatprep.subr.bf16.mxu0 %v14608_v50  ;;  %v14659_v32 = vld [vmem:[#allocation8 + $0xba4] ss:$16 sps:$4 sm:$0xff]   ;;  %v14654_v50 = vld [vmem:[#allocation8 + $0x9a0] ss:$16 sps:$4 sm:$0xff]  }
 0x31c   : > { %4746 = vmatprep.subr.bf16.mxu1 %v14611_v39  ;;  %v17431_v15 = vadd.f32 %v2941_v5, %v2890_v54  ;;  %3835 = vmatmul.mubr.bf16.gmra.mxu0 %v17349_v56  ;;  %v2892_v12 = vpop.f32.mrf.mxu0  ;;  %v14657_v39 = vld [vmem:[#allocation8 + $0xba0] ss:$16 sps:$4 sm:$0xff]   ;;  %v14674_v54 = vld [vmem:[#allocation8 + $0x944] ss:$16 sps:$4 sm:$0xff]  }
 0x31d   : > { %3886 = vmatmul.mubr.bf16.gmra.mxu1 %v17351_v9  ;;  %v2943_v60 = vpop.f32.mrf.mxu1  ;;  %4723 = vmatprep.mubr.bf16.mxu0 %v17437_v25  ;;  %v14663_v63 = vld [vmem:[#allocation8 + $0xb80] ss:$16 sps:$4 sm:$0xff]   ;;  %v14677_v5 = vld [vmem:[#allocation8 + $0xb44] ss:$16 sps:$4 sm:$0xff]  }
 0x31e   : > { %4774 = vmatprep.mubr.bf16.mxu1 %v17441_v23  ;;  %v17445_v13 = vadd.f32 %v2943_v60, %v2892_v12  ;;  %4696 = vmatpush1.bf16.msra.mxu0 %v14606_v51  ;;  %v2894_v17 = vpop.f32.mrf.mxu0  ;;  %v14668_v51 = vld [vmem:[#allocation8 + $0x964] ss:$16 sps:$4 sm:$0xff]   ;;  %v14675_v6 = vld [vmem:[#allocation8 + $0xb40] ss:$16 sps:$4 sm:$0xff]  }
 0x31f   : > { %4747 = vmatpush1.bf16.msra.mxu1 %v14609_v33  ;;  %v2945_v20 = vpop.f32.mrf.mxu1  ;;  %4697 = vmatprep.subr.bf16.mxu0 %v14614_v53  ;;  %v14671_v33 = vld [vmem:[#allocation8 + $0xb64] ss:$16 sps:$4 sm:$0xff]   ;;  %v14666_v53 = vld [vmem:[#allocation8 + $0x960] ss:$16 sps:$4 sm:$0xff]  }
 0x320   : > { %4748 = vmatprep.subr.bf16.mxu1 %v14617_v3  ;;  %v2895_v21 = vpop.f32.mrf.mxu0  ;;  %v14669_v3 = vld [vmem:[#allocation8 + $0xb60] ss:$16 sps:$4 sm:$0xff]   ;;  %v14680_v12 = vld [vmem:[#allocation8 + $0x924] ss:$16 sps:$4 sm:$0xff]  }
 0x321   : > { %v2946_v22 = vpop.f32.mrf.mxu1  ;;  %v14683_v60 = vld [vmem:[#allocation8 + $0xb24] ss:$16 sps:$4 sm:$0xff]   ;;  %v14684_v17 = vld [vmem:[#allocation8 + $0x900] ss:$16 sps:$4 sm:$0xff]   ;;  %v14692_v21 = vld [vmem:[#allocation8 + $0x8ec] ss:$16 sps:$4 sm:$0xff]  }
 0x322   : > { %4698 = vmatpush1.bf16.msra.mxu0 %v14612_v16  ;;  %v14678_v16 = vld [vmem:[#allocation8 + $0x920] ss:$16 sps:$4 sm:$0xff]   ;;  %v14695_v22 = vld [vmem:[#allocation8 + $0xaec] ss:$16 sps:$4 sm:$0xff]  }
 0x323   : > { %4749 = vmatpush1.bf16.msra.mxu1 %v14615_v42  ;;  %4699 = vmatprep.subr.bf16.mxu0 %v14620_v57  ;;  %v14681_v42 = vld [vmem:[#allocation8 + $0xb20] ss:$16 sps:$4 sm:$0xff]   ;;  %v14686_v57 = vld [vmem:[#allocation8 + $0x904] ss:$16 sps:$4 sm:$0xff]  }
 0x324   : > { %4750 = vmatprep.subr.bf16.mxu1 %v14623_v10  ;;  %v14689_v10 = vld [vmem:[#allocation8 + $0xb04] ss:$16 sps:$4 sm:$0xff]   ;;  %v14687_v20 = vld [vmem:[#allocation8 + $0xb00] ss:$16 sps:$4 sm:$0xff]  }
 0x326   : > { %4700 = vmatpush1.bf16.msra.mxu0 %v14618_v19  ;;  %v17448_v19 = vrot.slane %v17349_v56, 1 }
 0x327   : > { %4751 = vmatpush1.bf16.msra.mxu1 %v14621_v18  ;;  %4701 = vmatprep.subr.bf16.mxu0 %v14626_v26  ;;  %v17451_v18 = vrot.slane %v17351_v9, 1  ;;  %v14690_v26 = vld [vmem:[#allocation8 + $0x8e8] ss:$16 sps:$4 sm:$0xff]  }
 0x328   : > { %4752 = vmatprep.subr.bf16.mxu1 %v14629_v24  ;;  %v14693_v24 = vld [vmem:[#allocation8 + $0xae8] ss:$16 sps:$4 sm:$0xff]  }
 0x32a   : > { %4702 = vmatpush1.bf16.msra.mxu0 %v14624_v27 }
 0x32b   : > { %4753 = vmatpush1.bf16.msra.mxu1 %v14627_v28  ;;  %4703 = vmatprep.subr.bf16.mxu0 %v14632_v46  ;;  %v4031_v46 = vrot.slane %v17339_v0, 1 }
 0x32c   : > { %4754 = vmatprep.subr.bf16.mxu1 %v14635_v59  ;;  %v4037_v59 = vrot.slane %v17341_v4, 1  ;;  %v14696_v4 = vld [vmem:[#allocation8 + $0x8c8] ss:$16 sps:$4 sm:$0xff]  }
 0x32d   : > { %v17459_v56 = vsel %vm1243_vm4, %v4031_v46, %v17448_v19  ;;  %v14740_v46 = vld [vmem:[#allocation8 + $0x9ec] ss:$16 sps:$4 sm:$0xff]  }
 0x32e   : > { %4704 = vmatpush1.bf16.msra.mxu0 %v14630_v1  ;;  %v14698_v1 = vld [vmem:[#allocation8 + $0x8cc] ss:$16 sps:$4 sm:$0xff]   ;;  %v17463_v9 = vsel %vm1243_vm4, %v4037_v59, %v17451_v18 }
 0x32f   : > { %4755 = vmatpush1.bf16.msra.mxu1 %v14633_v2  ;;  %4705 = vmatprep.subr.bf16.mxu0 %v14638_v35  ;;  %v14701_v2 = vld [vmem:[#allocation8 + $0xacc] ss:$16 sps:$4 sm:$0xff]  }
 0x330   : > { %4756 = vmatprep.subr.bf16.mxu1 %v14641_v29  ;;  %v14743_v59 = vld [vmem:[#allocation8 + $0xbec] ss:$16 sps:$4 sm:$0xff]  }
 0x332   : > { %4706 = vmatpush1.bf16.msra.mxu0 %v14636_v36 }
 0x333   : > { %4757 = vmatpush1.bf16.msra.mxu1 %v14639_v30  ;;  %4707 = vmatprep.subr.bf16.mxu0 %v14644_v7  ;;  %v14699_v30 = vld [vmem:[#allocation8 + $0xac8] ss:$16 sps:$4 sm:$0xff]  }
 0x334   : > { %4758 = vmatprep.subr.bf16.mxu1 %v14647_v8 }
 0x336   : > { %4708 = vmatpush2.bf16.msra.mxu0 %v14642_v43  ;;  %v14704_v43 = vld [vmem:[#allocation8 + $0x8ac] ss:$16 sps:$4 sm:$0xff]  }
 0x337   : > { %4759 = vmatpush2.bf16.msra.mxu1 %v14645_v58  ;;  %4709 = vmatprep.subr.bf16.mxu0 %v14650_v61  ;;  %v14707_v58 = vld [vmem:[#allocation8 + $0xaac] ss:$16 sps:$4 sm:$0xff]  }
 0x338   : > { %4760 = vmatprep.subr.bf16.mxu1 %v14653_v11 }
 0x33a   : > { %4710 = vmatpush2.bf16.msra.mxu0 %v14648_v31 }
 0x33b   : > { %4761 = vmatpush2.bf16.msra.mxu1 %v14651_v37  ;;  %4711 = vmatprep.subr.bf16.mxu0 %v14656_v38  ;;  %v14702_v38 = vld [vmem:[#allocation8 + $0x8a8] ss:$16 sps:$4 sm:$0xff]  }
 0x33c   : > { %4762 = vmatprep.subr.bf16.mxu1 %v14659_v32  ;;  %v14705_v32 = vld [vmem:[#allocation8 + $0xaa8] ss:$16 sps:$4 sm:$0xff]  }
 0x33e   : > { %4712 = vmatpush2.bf16.msra.mxu0 %v14654_v50 }
 0x33f   : > { %4763 = vmatpush2.bf16.msra.mxu1 %v14657_v39  ;;  %4713 = vmatprep.subr.bf16.mxu0 %v14662_v40  ;;  %v14710_v40 = vld [vmem:[#allocation8 + $0x88c] ss:$16 sps:$4 sm:$0xff]  }
 0x340   : > { %4764 = vmatprep.subr.bf16.mxu1 %v14665_v44  ;;  %v14713_v44 = vld [vmem:[#allocation8 + $0xa8c] ss:$16 sps:$4 sm:$0xff]  }
 0x342   : > { %4714 = vmatpush2.bf16.msra.mxu0 %v14660_v62 }
 0x343   : > { %4765 = vmatpush2.bf16.msra.mxu1 %v14663_v63  ;;  %4715 = vmatprep.subr.bf16.mxu0 %v14668_v51 }
 0x344   : > { %4766 = vmatprep.subr.bf16.mxu1 %v14671_v33 }
 0x346   : > { %4716 = vmatpush2.bf16.msra.mxu0 %v14666_v53  ;;  %v14708_v53 = vld [vmem:[#allocation8 + $0x888] ss:$16 sps:$4 sm:$0xff]  }
 0x347   : > { %4767 = vmatpush2.bf16.msra.mxu1 %v14669_v3  ;;  %4717 = vmatprep.subr.bf16.mxu0 %v14674_v54  ;;  %v14711_v3 = vld [vmem:[#allocation8 + $0xa88] ss:$16 sps:$4 sm:$0xff]  }
 0x348   : > { %4768 = vmatprep.subr.bf16.mxu1 %v14677_v5 }
 0x34a   : > { %4718 = vmatpush2.bf16.msra.mxu0 %v14672_v55  ;;  %v14716_v55 = vld [vmem:[#allocation8 + $0x86c] ss:$16 sps:$4 sm:$0xff]  }
 0x34b   : > { %4769 = vmatpush2.bf16.msra.mxu1 %v14675_v6  ;;  %4719 = vmatprep.subr.bf16.mxu0 %v14680_v12  ;;  %v14719_v6 = vld [vmem:[#allocation8 + $0xa6c] ss:$16 sps:$4 sm:$0xff]  }
 0x34c   : > { %4770 = vmatprep.subr.bf16.mxu1 %v14683_v60 }
 0x34e   : > { %4720 = vmatpush2.bf16.msra.mxu0 %v14678_v16  ;;  %v14714_v16 = vld [vmem:[#allocation8 + $0x868] ss:$16 sps:$4 sm:$0xff]  }
 0x34f   : > { %4771 = vmatpush2.bf16.msra.mxu1 %v14681_v42  ;;  %4721 = vmatprep.subr.bf16.mxu0 %v14686_v57  ;;  %v14717_v42 = vld [vmem:[#allocation8 + $0xa68] ss:$16 sps:$4 sm:$0xff]   ;;  %v14722_v57 = vld [vmem:[#allocation8 + $0x84c] ss:$16 sps:$4 sm:$0xff]  }
 0x350   : > { %4772 = vmatprep.subr.bf16.mxu1 %v14689_v10  ;;  %v14723_v10 = vld [vmem:[#allocation8 + $0xa48] ss:$16 sps:$4 sm:$0xff]  }
 0x352   : > { %4722 = vmatpush2.bf16.msra.mxu0 %v14684_v17  ;;  %v2982_v27 = vpop.f32.mrf.mxu0  ;;  %v14728_v17 = vld [vmem:[#allocation8 + $0x82c] ss:$16 sps:$4 sm:$0xff]  }
 0x353   : > { %4773 = vmatpush2.bf16.msra.mxu1 %v14687_v20  ;;  %v3033_v28 = vpop.f32.mrf.mxu1  ;;  %4793 = vmatprep.subr.bf16.mxu0 %v14692_v21  ;;  %v14731_v20 = vld [vmem:[#allocation8 + $0xa2c] ss:$16 sps:$4 sm:$0xff]   ;;  %v14726_v21 = vld [vmem:[#allocation8 + $0x828] ss:$16 sps:$4 sm:$0xff]  }
 0x354   : > { %v17455_v35 = vadd.f32 %v3033_v28, %v2982_v27  ;;  %4844 = vmatprep.subr.bf16.mxu1 %v14695_v22  ;;  %v2984_v29 = vpop.f32.mrf.mxu0  ;;  %v14729_v22 = vld [vmem:[#allocation8 + $0xa28] ss:$16 sps:$4 sm:$0xff]  }
 0x355   : > { %v3035_v36 = vpop.f32.mrf.mxu1  ;;  %4724 = vmatmul.mubr.bf16.vlgmr.msra.gmra.mxu0 %v17459_v56  ;;  %v14732_v27 = vld [vmem:[#allocation8 + $0x808] ss:$16 sps:$4 sm:$0xff]  }
 0x356   : > { %4775 = vmatmul.mubr.bf16.vlgmr.msra.gmra.mxu1 %v17463_v9  ;;  %v17467_v0 = vadd.f32 %v3035_v36, %v2984_v29  ;;  %4733 = vmatprep.mubr.bf16.mxu0 %v17422_v34  ;;  %v2986_v7 = vpop.f32.mrf.mxu0  ;;  %v14735_v28 = vld [vmem:[#allocation8 + $0xa08] ss:$16 sps:$4 sm:$0xff]   ;;  %v14746_v29 = vld [vmem:[#allocation8 + $0x9cc] ss:$16 sps:$4 sm:$0xff]  }
 0x357   : > { %4784 = vmatprep.mubr.bf16.mxu1 %v17425_v47  ;;  %v3037_v8 = vpop.f32.mrf.mxu1  ;;  %4794 = vmatpush1.bf16.msra.mxu0 %v14690_v26  ;;  %v14734_v26 = vld [vmem:[#allocation8 + $0x80c] ss:$16 sps:$4 sm:$0xff]  }
 0x358   : > { %4845 = vmatpush1.bf16.msra.mxu1 %v14693_v24  ;;  %v17471_v61 = vadd.f32 %v3037_v8, %v2986_v7  ;;  %4795 = vmatprep.subr.bf16.mxu0 %v14698_v1  ;;  %v2988_v11 = vpop.f32.mrf.mxu0  ;;  %v14737_v24 = vld [vmem:[#allocation8 + $0xa0c] ss:$16 sps:$4 sm:$0xff]   ;;  %v14738_v1 = vld [vmem:[#allocation8 + $0x9e8] ss:$16 sps:$4 sm:$0xff]  }
 0x359   : > { %4846 = vmatprep.subr.bf16.mxu1 %v14701_v2  ;;  %v3039_v31 = vpop.f32.mrf.mxu1  ;;  %v14741_v2 = vld [vmem:[#allocation8 + $0xbe8] ss:$16 sps:$4 sm:$0xff]   ;;  %v14749_v36 = vld [vmem:[#allocation8 + $0xbcc] ss:$16 sps:$4 sm:$0xff]  }
 0x35a   : > { %v17473_v37 = vadd.f32 %v3039_v31, %v2988_v11  ;;  %v2992_v50 = vpop.f32.mrf.mxu0  ;;  %v14752_v7 = vld [vmem:[#allocation8 + $0x9ac] ss:$16 sps:$4 sm:$0xff]  }
 0x35b   : > { %v3043_v39 = vpop.f32.mrf.mxu1  ;;  %4796 = vmatpush1.bf16.msra.mxu0 %v14696_v4  ;;  %v14744_v4 = vld [vmem:[#allocation8 + $0x9c8] ss:$16 sps:$4 sm:$0xff]   ;;  %v14755_v8 = vld [vmem:[#allocation8 + $0xbac] ss:$16 sps:$4 sm:$0xff]  }
 0x35c   : > { %4847 = vmatpush1.bf16.msra.mxu1 %v14699_v30  ;;  %v17475_v62 = vadd.f32 %v3043_v39, %v2992_v50  ;;  %4797 = vmatprep.subr.bf16.mxu0 %v14704_v43  ;;  %v2994_v63 = vpop.f32.mrf.mxu0  ;;  %v14747_v30 = vld [vmem:[#allocation8 + $0xbc8] ss:$16 sps:$4 sm:$0xff]   ;;  %v14758_v11 = vld [vmem:[#allocation8 + $0x98c] ss:$16 sps:$4 sm:$0xff]  }
 0x35d   : > { %4848 = vmatprep.subr.bf16.mxu1 %v14707_v58  ;;  %v3045_v51 = vpop.f32.mrf.mxu1  ;;  %4734 = vmatmul.mubr.bf16.gmra.mxu0 %v17448_v19  ;;  %v14750_v43 = vld [vmem:[#allocation8 + $0x9a8] ss:$16 sps:$4 sm:$0xff]   ;;  %v14761_v31 = vld [vmem:[#allocation8 + $0xb8c] ss:$16 sps:$4 sm:$0xff]  }
 0x35e   : > { %4785 = vmatmul.mubr.bf16.gmra.mxu1 %v17451_v18  ;;  %v17479_v33 = vadd.f32 %v3045_v51, %v2994_v63  ;;  %4825 = vmatprep.mubr.bf16.mxu0 %v17437_v25  ;;  %v2996_v54 = vpop.f32.mrf.mxu0  ;;  %v14725_v25 = vld [vmem:[#allocation8 + $0xa4c] ss:$16 sps:$4 sm:$0xff]   ;;  %v14753_v58 = vld [vmem:[#allocation8 + $0xba8] ss:$16 sps:$4 sm:$0xff]  }
 0x35f   : > { %4876 = vmatprep.mubr.bf16.mxu1 %v17441_v23  ;;  %v3047_v5 = vpop.f32.mrf.mxu1  ;;  %4798 = vmatpush1.bf16.msra.mxu0 %v14702_v38  ;;  %v14720_v23 = vld [vmem:[#allocation8 + $0x848] ss:$16 sps:$4 sm:$0xff]   ;;  %v14764_v50 = vld [vmem:[#allocation8 + $0x96c] ss:$16 sps:$4 sm:$0xff]  }
 0x360   : > { %4849 = vmatpush1.bf16.msra.mxu1 %v14705_v32  ;;  %4799 = vmatprep.subr.bf16.mxu0 %v14710_v40  ;;  %v2997_v12 = vpop.f32.mrf.mxu0  ;;  %v14756_v38 = vld [vmem:[#allocation8 + $0x988] ss:$16 sps:$4 sm:$0xff]   ;;  %v14767_v39 = vld [vmem:[#allocation8 + $0xb6c] ss:$16 sps:$4 sm:$0xff]  }
 0x361   : > { %4850 = vmatprep.subr.bf16.mxu1 %v14713_v44  ;;  %v3048_v60 = vpop.f32.mrf.mxu1  ;;  %v14759_v32 = vld [vmem:[#allocation8 + $0xb88] ss:$16 sps:$4 sm:$0xff]   ;;  %v14770_v63 = vld [vmem:[#allocation8 + $0x94c] ss:$16 sps:$4 sm:$0xff]  }
 0x362   : > { %v14762_v40 = vld [vmem:[#allocation8 + $0x968] ss:$16 sps:$4 sm:$0xff]   ;;  %v14773_v51 = vld [vmem:[#allocation8 + $0xb4c] ss:$16 sps:$4 sm:$0xff]  }
 0x363   : > { %4800 = vmatpush1.bf16.msra.mxu0 %v14708_v53  ;;  %v14765_v44 = vld [vmem:[#allocation8 + $0xb68] ss:$16 sps:$4 sm:$0xff]   ;;  %v14776_v54 = vld [vmem:[#allocation8 + $0x92c] ss:$16 sps:$4 sm:$0xff]  }
 0x364   : > { %4851 = vmatpush1.bf16.msra.mxu1 %v14711_v3  ;;  %4801 = vmatprep.subr.bf16.mxu0 %v14716_v55  ;;  %v14768_v53 = vld [vmem:[#allocation8 + $0x948] ss:$16 sps:$4 sm:$0xff]   ;;  %v14779_v5 = vld [vmem:[#allocation8 + $0xb2c] ss:$16 sps:$4 sm:$0xff]  }
 0x365   : > { %4852 = vmatprep.subr.bf16.mxu1 %v14719_v6  ;;  %v14771_v3 = vld [vmem:[#allocation8 + $0xb48] ss:$16 sps:$4 sm:$0xff]   ;;  %v14782_v12 = vld [vmem:[#allocation8 + $0x90c] ss:$16 sps:$4 sm:$0xff]  }
 0x366   : > { %v14774_v55 = vld [vmem:[#allocation8 + $0x928] ss:$16 sps:$4 sm:$0xff]   ;;  %v14785_v60 = vld [vmem:[#allocation8 + $0xb0c] ss:$16 sps:$4 sm:$0xff]  }
 0x367   : > { %4802 = vmatpush1.bf16.msra.mxu0 %v14714_v16  ;;  %v14777_v6 = vld [vmem:[#allocation8 + $0xb28] ss:$16 sps:$4 sm:$0xff]  }
 0x368   : > { %4853 = vmatpush1.bf16.msra.mxu1 %v14717_v42  ;;  %4803 = vmatprep.subr.bf16.mxu0 %v14722_v57  ;;  %v14780_v16 = vld [vmem:[#allocation8 + $0x908] ss:$16 sps:$4 sm:$0xff]  }
 0x369   : > { %4854 = vmatprep.subr.bf16.mxu1 %v14725_v25  ;;  %v14783_v42 = vld [vmem:[#allocation8 + $0xb08] ss:$16 sps:$4 sm:$0xff]  }
 0x36a   : > { %v14788_v57 = vld [vmem:[#allocation11 + $0x4e4] ss:$16 sps:$4 sm:$0xff]  }
 0x36b   : > { %4804 = vmatpush1.bf16.msra.mxu0 %v14720_v23 }
 0x36c   : > { %4855 = vmatpush1.bf16.msra.mxu1 %v14723_v10  ;;  %4805 = vmatprep.subr.bf16.mxu0 %v14728_v17  ;;  %v14786_v17 = vld [vmem:[#allocation11 + $0x4e0] ss:$16 sps:$4 sm:$0xff]  }
 0x36d   : > { %4856 = vmatprep.subr.bf16.mxu1 %v14731_v20 }
 0x36f   : > { %4806 = vmatpush1.bf16.msra.mxu0 %v14726_v21 }
 0x370   : > { %4857 = vmatpush1.bf16.msra.mxu1 %v14729_v22  ;;  %4807 = vmatprep.subr.bf16.mxu0 %v14734_v26  ;;  %v14791_v22 = vld [vmem:[#allocation11 + $0x4c4] ss:$16 sps:$4 sm:$0xff]  }
 0x371   : > { %4858 = vmatprep.subr.bf16.mxu1 %v14737_v24 }
 0x373   : > { %4808 = vmatpush1.bf16.msra.mxu0 %v14732_v27 }
 0x374   : > { %4859 = vmatpush1.bf16.msra.mxu1 %v14735_v28  ;;  %4809 = vmatprep.subr.bf16.mxu0 %v14740_v46 }
 0x375   : > { %4860 = vmatprep.subr.bf16.mxu1 %v14743_v59  ;;  %v14789_v59 = vld [vmem:[#allocation11 + $0x4c0] ss:$16 sps:$4 sm:$0xff]  }
 0x377   : > { %4810 = vmatpush2.bf16.msra.mxu0 %v14738_v1 }
 0x378   : > { %4861 = vmatpush2.bf16.msra.mxu1 %v14741_v2  ;;  %4811 = vmatprep.subr.bf16.mxu0 %v14746_v29 }
 0x379   : > { %4862 = vmatprep.subr.bf16.mxu1 %v14749_v36 }
 0x37b   : > { %4812 = vmatpush2.bf16.msra.mxu0 %v14744_v4  ;;  %v14792_v4 = vld [vmem:[#allocation11 + $0x4a0] ss:$16 sps:$4 sm:$0xff]  }
 0x37c   : > { %4863 = vmatpush2.bf16.msra.mxu1 %v14747_v30  ;;  %4813 = vmatprep.subr.bf16.mxu0 %v14752_v7  ;;  %v14797_v7 = vld [vmem:[#allocation11 + $0x484] ss:$16 sps:$4 sm:$0xff]  }
 0x37d   : > { %4864 = vmatprep.subr.bf16.mxu1 %v14755_v8 }
 0x37f   : > { %4814 = vmatpush2.bf16.msra.mxu0 %v14750_v43 }
 0x380   : > { %4865 = vmatpush2.bf16.msra.mxu1 %v14753_v58  ;;  %4815 = vmatprep.subr.bf16.mxu0 %v14758_v11 }
 0x381   : > { %4866 = vmatprep.subr.bf16.mxu1 %v14761_v31 }
 0x383   : > { %4816 = vmatpush2.bf16.msra.mxu0 %v14756_v38 }
 0x384   : > { %4867 = vmatpush2.bf16.msra.mxu1 %v14759_v32  ;;  %4817 = vmatprep.subr.bf16.mxu0 %v14764_v50  ;;  %v14800_v32 = vld [vmem:[#allocation11 + $0x464] ss:$16 sps:$4 sm:$0xff]   ;;  %v14798_v50 = vld [vmem:[#allocation11 + $0x460] ss:$16 sps:$4 sm:$0xff]  }
 0x385   : > { %4868 = vmatprep.subr.bf16.mxu1 %v14767_v39  ;;  %v14803_v39 = vld [vmem:[#allocation11 + $0x444] ss:$16 sps:$4 sm:$0xff]  }
 0x387   : > { %4818 = vmatpush2.bf16.msra.mxu0 %v14762_v40  ;;  %v14809_v40 = vld [vmem:[#allocation11 + $0x404] ss:$16 sps:$4 sm:$0xff]  }
 0x388   : > { %4869 = vmatpush2.bf16.msra.mxu1 %v14765_v44  ;;  %4819 = vmatprep.subr.bf16.mxu0 %v14770_v63  ;;  %v14834_v44 = vld [vmem:[#allocation11 + $0x6e0] ss:$16 sps:$4 sm:$0xff]   ;;  %v14836_v63 = vld [vmem:[#allocation11 + $0x6e4] ss:$16 sps:$4 sm:$0xff]  }
 0x389   : > { %4870 = vmatprep.subr.bf16.mxu1 %v14773_v51  ;;  %v14842_v51 = vld [vmem:[#allocation11 + $0x6c4] ss:$16 sps:$4 sm:$0xff]  }
 0x38b   : > { %4820 = vmatpush2.bf16.msra.mxu0 %v14768_v53  ;;  %v14807_v53 = vld [vmem:[#allocation11 + $0x400] ss:$16 sps:$4 sm:$0xff]  }
 0x38c   : > { %4871 = vmatpush2.bf16.msra.mxu1 %v14771_v3  ;;  %4821 = vmatprep.subr.bf16.mxu0 %v14776_v54  ;;  %v14840_v3 = vld [vmem:[#allocation11 + $0x6c0] ss:$16 sps:$4 sm:$0xff]   ;;  %v14812_v54 = vld [vmem:[#allocation11 + $0x5e4] ss:$16 sps:$4 sm:$0xff]  }
 0x38d   : > { %4872 = vmatprep.subr.bf16.mxu1 %v14779_v5  ;;  %v14848_v5 = vld [vmem:[#allocation11 + $0x6a4] ss:$16 sps:$4 sm:$0xff]  }
 0x38f   : > { %4822 = vmatpush2.bf16.msra.mxu0 %v14774_v55  ;;  %v14810_v55 = vld [vmem:[#allocation11 + $0x5e0] ss:$16 sps:$4 sm:$0xff]  }
 0x390   : > { %4873 = vmatpush2.bf16.msra.mxu1 %v14777_v6  ;;  %4823 = vmatprep.subr.bf16.mxu0 %v14782_v12  ;;  %v14846_v6 = vld [vmem:[#allocation11 + $0x6a0] ss:$16 sps:$4 sm:$0xff]   ;;  %v14815_v12 = vld [vmem:[#allocation11 + $0x5c4] ss:$16 sps:$4 sm:$0xff]  }
 0x391   : > { %4874 = vmatprep.subr.bf16.mxu1 %v14785_v60  ;;  %v14854_v60 = vld [vmem:[#allocation11 + $0x684] ss:$16 sps:$4 sm:$0xff]  }
 0x393   : > { %4824 = vmatpush2.bf16.msra.mxu0 %v14780_v16  ;;  %v3724_v25 = vpop.f32.mrf.mxu0  ;;  %v14813_v16 = vld [vmem:[#allocation11 + $0x5c0] ss:$16 sps:$4 sm:$0xff]  }
 0x394   : > { %4875 = vmatpush2.bf16.msra.mxu1 %v14783_v42  ;;  %v3775_v23 = vpop.f32.mrf.mxu1  ;;  %v3725_v10 = vadd.f32 %v3724_v25, %v17411_v14  ;;  %5882 = vmatprep.subr.bf16.mxu0 %v14788_v57  ;;  %v14852_v42 = vld [vmem:[#allocation11 + $0x680] ss:$16 sps:$4 sm:$0xff]   ;;  %v14818_v57 = vld [vmem:[#allocation11 + $0x5a4] ss:$16 sps:$4 sm:$0xff]  }
 0x395   : > { %v3726_v20 = vpop.f32.mrf.mxu0  ;;  %5925 = vmatprep.subr.bf16.mxu1 %v14836_v63  ;;  %v14860_v25 = vld [vmem:[#allocation11 + $0x664] ss:$16 sps:$4 sm:$0xff]  }
 0x396   : > { %v3777_v21 = vpop.f32.mrf.mxu1  ;;  %v17484_v26 = vadd.f32 %v3775_v23, %v3725_v10  ;;  %4826 = vmatmul.mubr.bf16.vlgmr.msra.gmra.mxu0 %v17459_v56  ;;  %v3727_v24 = vadd.f32 %v3726_v20, %v17417_v49  ;;  %v14794_v56 = vld [vmem:[#allocation11 + $0x4a4] ss:$16 sps:$4 sm:$0xff]   ;;  %v14816_v23 = vld [vmem:[#allocation11 + $0x5a0] ss:$16 sps:$4 sm:$0xff]  }
 0x397   : > { %4877 = vmatmul.mubr.bf16.vlgmr.msra.gmra.mxu1 %v17463_v9  ;;  %4835 = vmatprep.mubr.bf16.mxu0 %v17422_v34  ;;  %v3728_v27 = vpop.f32.mrf.mxu0  ;;  %v14858_v10 = vld [vmem:[#allocation11 + $0x660] ss:$16 sps:$4 sm:$0xff]   ;;  %v14866_v20 = vld [vmem:[#allocation11 + $0x644] ss:$16 sps:$4 sm:$0xff]  }
 0x398   : > { %4886 = vmatprep.mubr.bf16.mxu1 %v17425_v47  ;;  %v3779_v28 = vpop.f32.mrf.mxu1  ;;  %v17491_v14 = vadd.f32 %v3777_v21, %v3727_v24  ;;  %v3729_v46 = vadd.f32 %v3728_v27, %v17419_v45  ;;  %5883 = vmatpush1.bf16.msra.mxu0 %v14786_v17  ;;  %v14821_v17 = vld [vmem:[#allocation11 + $0x584] ss:$16 sps:$4 sm:$0xff]   ;;  %v14819_v21 = vld [vmem:[#allocation11 + $0x580] ss:$16 sps:$4 sm:$0xff]  }
 0x399   : > { %v3730_v1 = vpop.f32.mrf.mxu0  ;;  %5884 = vmatprep.subr.bf16.mxu0 %v14791_v22  ;;  %5926 = vmatpush1.bf16.msra.mxu1 %v14834_v44  ;;  %v14864_v22 = vld [vmem:[#allocation11 + $0x640] ss:$16 sps:$4 sm:$0xff]   ;;  %v14824_v24 = vld [vmem:[#allocation11 + $0x564] ss:$16 sps:$4 sm:$0xff]  }
 0x39a   : > { %v3781_v2 = vpop.f32.mrf.mxu1  ;;  %v17494_v29 = vadd.f32 %v3779_v28, %v3729_v46  ;;  %v3731_v49 = vadd.f32 %v3730_v1, %v17427_v52  ;;  %5927 = vmatprep.subr.bf16.mxu1 %v14842_v51  ;;  %v14872_v27 = vld [vmem:[#allocation11 + $0x624] ss:$16 sps:$4 sm:$0xff]   ;;  %v14822_v28 = vld [vmem:[#allocation11 + $0x560] ss:$16 sps:$4 sm:$0xff]  }
 0x39b   : > { %v3734_v9 = vpop.f32.mrf.mxu0  ;;  %v14870_v46 = vld [vmem:[#allocation11 + $0x620] ss:$16 sps:$4 sm:$0xff]   ;;  %v14878_v1 = vld [vmem:[#allocation11 + $0x604] ss:$16 sps:$4 sm:$0xff]  }
 0x39c   : > { %v3785_v34 = vpop.f32.mrf.mxu1  ;;  %v17497_v36 = vadd.f32 %v3781_v2, %v3731_v49  ;;  %v3735_v47 = vadd.f32 %v3734_v9, %v17431_v15  ;;  %5885 = vmatpush1.bf16.msra.mxu0 %v14789_v59  ;;  %v14795_v15 = vld [vmem:[#allocation11 + $0x480] ss:$16 sps:$4 sm:$0xff]   ;;  %v14827_v59 = vld [vmem:[#allocation11 + $0x544] ss:$16 sps:$4 sm:$0xff]  }
 0x39d   : > { %v3736_v30 = vpop.f32.mrf.mxu0  ;;  %5886 = vmatprep.subr.bf16.mxu0 %v14794_v56  ;;  %5928 = vmatpush1.bf16.msra.mxu1 %v14840_v3  ;;  %v14825_v2 = vld [vmem:[#allocation11 + $0x540] ss:$16 sps:$4 sm:$0xff]   ;;  %v14830_v49 = vld [vmem:[#allocation11 + $0x524] ss:$16 sps:$4 sm:$0xff]  }
 0x39e   : > { %v3787_v45 = vpop.f32.mrf.mxu1  ;;  %v17500_v8 = vadd.f32 %v3785_v34, %v3735_v47  ;;  %4836 = vmatmul.mubr.bf16.gmra.mxu0 %v17448_v19  ;;  %v3737_v52 = vadd.f32 %v3736_v30, %v17445_v13  ;;  %v14801_v19 = vld [vmem:[#allocation11 + $0x440] ss:$16 sps:$4 sm:$0xff]   ;;  %5929 = vmatprep.subr.bf16.mxu1 %v14848_v5  ;;  %v14884_v9 = vld [vmem:[#allocation11 + $0x7e4] ss:$16 sps:$4 sm:$0xff]  }
 0x39f   : > { %4887 = vmatmul.mubr.bf16.gmra.mxu1 %v17451_v18  ;;  %v3738_v43 = vpop.f32.mrf.mxu0  ;;  %v14806_v18 = vld [vmem:[#allocation11 + $0x424] ss:$16 sps:$4 sm:$0xff]   ;;  %v14804_v13 = vld [vmem:[#allocation11 + $0x420] ss:$16 sps:$4 sm:$0xff]  }
 0x3a0   : > { %v3789_v58 = vpop.f32.mrf.mxu1  ;;  %v17505_v11 = vadd.f32 %v3787_v45, %v3737_v52  ;;  %5887 = vmatpush1.bf16.msra.mxu0 %v14792_v4  ;;  %v14876_v56 = vld [vmem:[#allocation11 + $0x600] ss:$16 sps:$4 sm:$0xff]   ;;  %v14833_v4 = vld [vmem:[#allocation11 + $0x504] ss:$16 sps:$4 sm:$0xff]   ;;  %v14839_v52 = vld [vmem:[#allocation11 + $0x4ec] ss:$16 sps:$4 sm:$0xff]  }
 0x3a1   : > { %v3739_v31 = vpop.f32.mrf.mxu0  ;;  %5888 = vmatprep.subr.bf16.mxu0 %v14797_v7  ;;  %5930 = vmatpush1.bf16.msra.mxu1 %v14846_v6  ;;  %v14828_v34 = vld [vmem:[#allocation11 + $0x520] ss:$16 sps:$4 sm:$0xff]   ;;  %v14890_v30 = vld [vmem:[#allocation11 + $0x7c4] ss:$16 sps:$4 sm:$0xff]  }
 0x3a2   : > { %v3790_v38 = vpop.f32.mrf.mxu1  ;;  %5931 = vmatprep.subr.bf16.mxu1 %v14854_v60  ;;  %v14882_v47 = vld [vmem:[#allocation11 + $0x7e0] ss:$16 sps:$4 sm:$0xff]   ;;  %v14902_v60 = vld [vmem:[#allocation11 + $0x784] ss:$16 sps:$4 sm:$0xff]  }
 0x3a3   : > { %v14831_v45 = vld [vmem:[#allocation11 + $0x500] ss:$16 sps:$4 sm:$0xff]  }
 0x3a4   : > { %5889 = vmatpush1.bf16.msra.mxu0 %v14795_v15  ;;  %v14888_v7 = vld [vmem:[#allocation11 + $0x7c0] ss:$16 sps:$4 sm:$0xff]  }
 0x3a5   : > { %5890 = vmatprep.subr.bf16.mxu0 %v14800_v32  ;;  %5932 = vmatpush1.bf16.msra.mxu1 %v14852_v42 }
 0x3a6   : > { %5933 = vmatprep.subr.bf16.mxu1 %v14860_v25 }
 0x3a8   : > { %5891 = vmatpush1.bf16.msra.mxu0 %v14798_v50 }
 0x3a9   : > { %5892 = vmatprep.subr.bf16.mxu0 %v14803_v39  ;;  %5934 = vmatpush1.bf16.msra.mxu1 %v14858_v10  ;;  %v14908_v10 = vld [vmem:[#allocation11 + $0x764] ss:$16 sps:$4 sm:$0xff]  }
 0x3aa   : > { %5935 = vmatprep.subr.bf16.mxu1 %v14866_v20  ;;  %v14912_v20 = vld [vmem:[#allocation11 + $0x740] ss:$16 sps:$4 sm:$0xff]  }
 0x3ac   : > { %5893 = vmatpush1.bf16.msra.mxu0 %v14801_v19 }
 0x3ad   : > { %5894 = vmatprep.subr.bf16.mxu0 %v14806_v18  ;;  %5936 = vmatpush1.bf16.msra.mxu1 %v14864_v22  ;;  %v14926_v22 = vld [vmem:[#allocation11 + $0x704] ss:$16 sps:$4 sm:$0xff]  }
 0x3ae   : > { %5937 = vmatprep.subr.bf16.mxu1 %v14872_v27  ;;  %v14932_v27 = vld [vmem:[#allocation11 + $0x6ec] ss:$16 sps:$4 sm:$0xff]  }
 0x3b0   : > { %5895 = vmatpush1.bf16.msra.mxu0 %v14804_v13 }
 0x3b1   : > { %5896 = vmatprep.subr.bf16.mxu0 %v14809_v40  ;;  %5938 = vmatpush1.bf16.msra.mxu1 %v14870_v46 }
 0x3b2   : > { %5939 = vmatprep.subr.bf16.mxu1 %v14878_v1 }
 0x3b4   : > { %5897 = vmatpush1.bf16.msra.mxu0 %v14807_v53 }
 0x3b5   : > { %5898 = vmatprep.subr.bf16.mxu0 %v14812_v54  ;;  %5940 = vmatpush1.bf16.msra.mxu1 %v14876_v56  ;;  %v14894_v54 = vld [vmem:[#allocation11 + $0x7a0] ss:$16 sps:$4 sm:$0xff]  }
 0x3b6   : > { %5941 = vmatprep.subr.bf16.mxu1 %v14884_v9 }
 0x3b8   : > { %5899 = vmatpush2.bf16.msra.mxu0 %v14810_v55 }
 0x3b9   : > { %5900 = vmatprep.subr.bf16.mxu0 %v14815_v12  ;;  %5942 = vmatpush2.bf16.msra.mxu1 %v14882_v47 }
 0x3ba   : > { %5943 = vmatprep.subr.bf16.mxu1 %v14890_v30 }
 0x3bc   : > { %5901 = vmatpush2.bf16.msra.mxu0 %v14813_v16 }
 0x3bd   : > { %5902 = vmatprep.subr.bf16.mxu0 %v14818_v57  ;;  %5944 = vmatpush2.bf16.msra.mxu1 %v14888_v7 }
 0x3c0   : > { %5903 = vmatpush2.bf16.msra.mxu0 %v14816_v23 }
 0x3c1   : > { %5904 = vmatprep.subr.bf16.mxu0 %v14821_v17  ;;  %v14914_v17 = vld [vmem:[#allocation11 + $0x744] ss:$16 sps:$4 sm:$0xff]  }
 0x3c4   : > { %5905 = vmatpush2.bf16.msra.mxu0 %v14819_v21  ;;  %v14918_v21 = vld [vmem:[#allocation11 + $0x720] ss:$16 sps:$4 sm:$0xff]  }
 0x3c5   : > { %5906 = vmatprep.subr.bf16.mxu0 %v14824_v24  ;;  %v14924_v24 = vld [vmem:[#allocation11 + $0x700] ss:$16 sps:$4 sm:$0xff]  }
 0x3c8   : > { %5907 = vmatpush2.bf16.msra.mxu0 %v14822_v28  ;;  %v17525_v28 = vld [vmem:[#allocation10] sm:$0xf] }
 0x3c9   : > { %5908 = vmatprep.subr.bf16.mxu0 %v14827_v59  ;;  %v4916_v47 = vrot.slane %v17525_v28, %v17289_v48 }
 0x3cc   : > { %5909 = vmatpush2.bf16.msra.mxu0 %v14825_v2  ;;  %v4912_v2 = vrot.slane %v17525_v28, %v17283_v41 }
 0x3cd   : > { %5910 = vmatprep.subr.bf16.mxu0 %v14830_v49 }
 0x3d0   : > { %5911 = vmatpush2.bf16.msra.mxu0 %v14828_v34 }
 0x3d1   : > { %5912 = vmatprep.subr.bf16.mxu0 %v14833_v4 }
 0x3d4   : > { %v3826_v43 = vpop.f32.mrf.mxu0  ;;  %5913 = vmatpush2.bf16.msra.mxu0 %v14831_v45 }
 0x3d5   : > { %v3877_v58 = vpop.f32.mrf.mxu1  ;;  %v3827_v15 = vadd.f32 %v3826_v43, %v17455_v35  ;;  %5968 = vmatprep.subr.bf16.mxu0 %v14839_v52  ;;  %v14896_v35 = vld [vmem:[#allocation11 + $0x7a4] ss:$16 sps:$4 sm:$0xff]  }
 0x3d6   : > { %v3828_v31 = vpop.f32.mrf.mxu0  ;;  %5945 = vmatprep.subr.bf16.mxu1 %v14896_v35 }
 0x3d7   : > { %v3879_v38 = vpop.f32.mrf.mxu1  ;;  %v17508_v32 = vadd.f32 %v3877_v58, %v3827_v15  ;;  %v3829_v50 = vadd.f32 %v3828_v31, %v17467_v0  ;;  %5946 = vmatpush2.bf16.msra.mxu1 %v14894_v54 }
 0x3d8   : > { %v3830_v39 = vpop.f32.mrf.mxu0  ;;  %5947 = vmatprep.subr.bf16.mxu1 %v14902_v60 }
 0x3d9   : > { %v3881_v19 = vpop.f32.mrf.mxu1  ;;  %v17511_v18 = vadd.f32 %v3879_v38, %v3829_v50  ;;  %v3831_v13 = vadd.f32 %v3830_v39, %v17471_v61 }
 0x3da   : > { %v3832_v40 = vpop.f32.mrf.mxu0 }
 0x3db   : > { %v3883_v44 = vpop.f32.mrf.mxu1  ;;  %v17514_v63 = vadd.f32 %v3881_v19, %v3831_v13  ;;  %v3833_v51 = vadd.f32 %v3832_v40, %v17473_v37  ;;  %v14900_v37 = vld [vmem:[#allocation11 + $0x780] ss:$16 sps:$4 sm:$0xff]  }
 0x3dc   : > { %v3836_v53 = vpop.f32.mrf.mxu0  ;;  %5948 = vmatpush2.bf16.msra.mxu1 %v14900_v37 }
 0x3dd   : > { %v3887_v3 = vpop.f32.mrf.mxu1  ;;  %v17517_v5 = vadd.f32 %v3883_v44, %v3833_v51  ;;  %v3837_v0 = vadd.f32 %v3836_v53, %v17475_v62  ;;  %v14906_v62 = vld [vmem:[#allocation11 + $0x760] ss:$16 sps:$4 sm:$0xff]   ;;  %5949 = vmatprep.subr.bf16.mxu1 %v14908_v10 }
 0x3de   : > { %v3838_v55 = vpop.f32.mrf.mxu0 }
 0x3df   : > { %v3889_v6 = vpop.f32.mrf.mxu1  ;;  %v17520_v12 = vadd.f32 %v3887_v3, %v3837_v0  ;;  %v3839_v61 = vadd.f32 %v3838_v55, %v17479_v33  ;;  %v14920_v33 = vld [vmem:[#allocation11 + $0x724] ss:$16 sps:$4 sm:$0xff]  }
 0x3e0   : > { %v3840_v16 = vpop.f32.mrf.mxu0  ;;  %5950 = vmatpush2.bf16.msra.mxu1 %v14906_v62 }
 0x3e1   : > { %v3891_v42 = vpop.f32.mrf.mxu1  ;;  %v17523_v57 = vadd.f32 %v3889_v6, %v3839_v61  ;;  %5951 = vmatprep.subr.bf16.mxu1 %v14914_v17 }
 0x3e2   : > { %v3841_v25 = vpop.f32.mrf.mxu0 }
 0x3e3   : > { %v3892_v23 = vpop.f32.mrf.mxu1 }
 0x3e4   : > { %5952 = vmatpush2.bf16.msra.mxu1 %v14912_v20 }
 0x3e5   : > { %5953 = vmatprep.subr.bf16.mxu1 %v14920_v33 }
 0x3e8   : > { %5954 = vmatpush2.bf16.msra.mxu1 %v14918_v21  ;;  %v14837_v21 = vld [vmem:[#allocation11 + $0x4e8] ss:$16 sps:$4 sm:$0xff]  }
 0x3e9   : > { %5955 = vmatprep.subr.bf16.mxu1 %v14926_v22 }
 0x3ec   : > { %5956 = vmatpush2.bf16.msra.mxu1 %v14924_v24  ;;  %v14845_v24 = vld [vmem:[#allocation11 + $0x4cc] ss:$16 sps:$4 sm:$0xff]  }
 0x3ed   : > { %6011 = vmatprep.subr.bf16.mxu1 %v14932_v27  ;;  %v14843_v27 = vld [vmem:[#allocation11 + $0x4c8] ss:$16 sps:$4 sm:$0xff]  }
 0x415   : > { %v4725_v46 = vpop.f32.mrf.mxu0 }
 0x416   : > { %v4776_v59 = vpop.f32.mrf.mxu1 }
 0x417   : > { %v4777_v1 = vadd.f32 %v4776_v59, %v4725_v46  ;;  %v4727_v56 = vpop.f32.mrf.mxu0  ;;  %v14851_v46 = vld [vmem:[#allocation11 + $0x4ac] ss:$16 sps:$4 sm:$0xff]   ;;  %v14849_v59 = vld [vmem:[#allocation11 + $0x4a8] ss:$16 sps:$4 sm:$0xff]  }
 0x418   : > { %v4778_v49 = vpop.f32.mrf.mxu1 }
 0x419   : > { %v4895_v9 = vadd.f32 %v4777_v1, %v17484_v26  ;;  %v4779_v34 = vadd.f32 %v4778_v49, %v4727_v56  ;;  %v4729_v4 = vpop.f32.mrf.mxu0  ;;  %v14857_v1 = vld [vmem:[#allocation11 + $0x48c] ss:$16 sps:$4 sm:$0xff]   ;;  %v14861_v49 = vld [vmem:[#allocation11 + $0x468] ss:$16 sps:$4 sm:$0xff]  }
 0x41a   : > { %v4780_v30 = vpop.f32.mrf.mxu1  ;;  %v14863_v56 = vld [vmem:[#allocation11 + $0x46c] ss:$16 sps:$4 sm:$0xff]  }
 0x41b   : > { %v4896_v45 = vadd.f32 %v4779_v34, %v17491_v14  ;;  %v4781_v7 = vadd.f32 %v4780_v30, %v4729_v4  ;;  %v4929_v52 = vadd.f32 %v4912_v2, %v4895_v9  ;;  %v4731_v43 = vpop.f32.mrf.mxu0  ;;  %v14869_v9 = vld [vmem:[#allocation11 + $0x44c] ss:$16 sps:$4 sm:$0xff]   ;;  %v14867_v34 = vld [vmem:[#allocation11 + $0x448] ss:$16 sps:$4 sm:$0xff]  }
 0x41c   : > { %v4782_v58 = vpop.f32.mrf.mxu1  ;;  %v14873_v4 = vld [vmem:[#allocation11 + $0x428] ss:$16 sps:$4 sm:$0xff]   ;;  %v14881_v30 = vld [vmem:[#allocation11 + $0x40c] ss:$16 sps:$4 sm:$0xff]  }
 0x41d   : > { %v4899_v15 = vadd.f32 %v4781_v7, %v17494_v29  ;;  %v4783_v31 = vadd.f32 %v4782_v58, %v4731_v43  ;;  %v4930_v38 = vadd.f32 %v4916_v47, %v4896_v45  ;;  %v4735_v50 = vpop.f32.mrf.mxu0  ;;  %v4941_v40 = vmax.f32 %v4929_v52, 0.0  ;;  %v14879_v45 = vld [vmem:[#allocation11 + $0x408] ss:$16 sps:$4 sm:$0xff]   ;;  %v14887_v7 = vld [vmem:[#allocation11 + $0x5ec] ss:$16 sps:$4 sm:$0xff]  }
 0x41e   : > { %v4786_v39 = vpop.f32.mrf.mxu1  ;;  %v14885_v52 = vld [vmem:[#allocation11 + $0x5e8] ss:$16 sps:$4 sm:$0xff]   ;;  %v14893_v43 = vld [vmem:[#allocation11 + $0x5cc] ss:$16 sps:$4 sm:$0xff]  }
 0x41f   : > { %v4933_v19 = vadd.f32 %v4912_v2, %v4899_v15  ;;  %v4900_v26 = vadd.f32 %v4783_v31, %v17497_v36  ;;  %v4787_v13 = vadd.f32 %v4786_v39, %v4735_v50  ;;  %v4737_v44 = vpop.f32.mrf.mxu0  ;;  %v4942_v54 = vmax.f32 %v4930_v38, 0.0  ;;  %v14891_v58 = vld [vmem:[#allocation11 + $0x5c8] ss:$16 sps:$4 sm:$0xff]   ;;  %v14899_v15 = vld [vmem:[#allocation11 + $0x5ac] ss:$16 sps:$4 sm:$0xff]  }
 0x420   : > { %v4788_v51 = vpop.f32.mrf.mxu1  ;;  %v14897_v31 = vld [vmem:[#allocation11 + $0x5a8] ss:$16 sps:$4 sm:$0xff]   ;;  %v14905_v38 = vld [vmem:[#allocation11 + $0x58c] ss:$16 sps:$4 sm:$0xff]  }
 0x421   : > { %v4945_v35 = vmax.f32 %v4933_v19, 0.0  ;;  %v4934_v53 = vadd.f32 %v4916_v47, %v4900_v26  ;;  %v4903_v14 = vadd.f32 %v4787_v13, %v17500_v8  ;;  %v4789_v3 = vadd.f32 %v4788_v51, %v4737_v44  ;;  %v4739_v0 = vpop.f32.mrf.mxu0  ;;  %v14903_v26 = vld [vmem:[#allocation11 + $0x588] ss:$16 sps:$4 sm:$0xff]   ;;  %v17969_v13 = vld [vmem:[#allocation41_spill] sm:$0xff] }
 0x422   : > { %v4790_v55 = vpop.f32.mrf.mxu1 }
 0x423   : > { %v17536_v29 = vpack.c.bf16 %v4945_v35, %v4941_v40  ;;  %v4946_v6 = vmax.f32 %v4934_v53, 0.0  ;;  %v4937_v61 = vadd.f32 %v4912_v2, %v4903_v14  ;;  %v4904_v60 = vadd.f32 %v4789_v3, %v17505_v11  ;;  %v4740_v16 = vpop.f32.mrf.mxu0  ;;  %v14855_v2 = vld [vmem:[#allocation11 + $0x488] ss:$16 sps:$4 sm:$0xff]   ;;  %v14911_v35 = vld [vmem:[#allocation11 + $0x56c] ss:$16 sps:$4 sm:$0xff]  }
 0x424   : > { %v4791_v36 = vpop.f32.mrf.mxu1  ;;  %v4920_v40 = vrot.slane %v17525_v28, %v17969_v13  ;;  %v17970_v3 = vld [vmem:[#allocation42_spill] sm:$0xff] }
 0x425   : > { %v17539_v42 = vpack.c.bf16 %v4946_v6, %v4942_v54  ;;  %v4949_v37 = vmax.f32 %v4937_v61, 0.0  ;;  %v4938_v25 = vadd.f32 %v4916_v47, %v4904_v60  ;;  %v5226_v33 = vrot.slane %v17536_v29, 1  ;;  %v14875_v47 = vld [vmem:[#allocation11 + $0x42c] ss:$16 sps:$4 sm:$0xff]   ;;  %v14909_v60 = vld [vmem:[#allocation11 + $0x568] ss:$16 sps:$4 sm:$0xff]  }
 0x426   : > { %v4924_v54 = vrot.slane %v17525_v28, %v17970_v3 }
 0x427   : > { %v5085_v23 = vpack.c.bf16 %v4949_v37, %v4949_v37  ;;  %v4950_v10 = vmax.f32 %v4938_v25, 0.0  ;;  %v5229_v20 = vrot.slane %v17539_v42, 1  ;;  %v14917_v25 = vld [vmem:[#allocation11 + $0x54c] ss:$16 sps:$4 sm:$0xff]  }
 0x429   : > { %v5086_v62 = vpack.c.bf16 %v4950_v10, %v4950_v10  ;;  %v5227_v8 = vrot.slane %v5085_v23, 1 }
 0x42b   : > { %v5230_v17 = vrot.slane %v5086_v62, 1  ;;  %v17545_v11 = vsel %vm1243_vm4, %v5226_v33, %v5227_v8 }
 0x42d   : > { %v5231_v22 = vsel %vm1243_vm4, %v5229_v20, %v5230_v17 }
 0x42e   : > { %5914 = vmatprep.mubr.bf16.mxu0 %v5231_v22 }
 0x42f   : > { %5915 = vmatmul.mubr.bf16.vlgmr.msra.gmra.mxu0 %v17545_v11 }
 0x430   : > { %5969 = vmatpush1.bf16.msra.mxu0 %v14837_v21  ;;  %6000 = vmatprep.mubr.bf16.mxu0 %v5231_v22 }
 0x431   : > { %5970 = vmatprep.subr.bf16.mxu0 %v14845_v24  ;;  %v14923_v24 = vld [vmem:[#allocation11 + $0x52c] ss:$16 sps:$4 sm:$0xff]  }
 0x434   : > { %5971 = vmatpush1.bf16.msra.mxu0 %v14843_v27 }
 0x435   : > { %5972 = vmatprep.subr.bf16.mxu0 %v14851_v46 }
 0x438   : > { %5973 = vmatpush1.bf16.msra.mxu0 %v14849_v59 }
 0x439   : > { %5974 = vmatprep.subr.bf16.mxu0 %v14857_v1 }
 0x43c   : > { %5975 = vmatpush1.bf16.msra.mxu0 %v14855_v2 }
 0x43d   : > { %5976 = vmatprep.subr.bf16.mxu0 %v14863_v56 }
 0x440   : > { %5977 = vmatpush1.bf16.msra.mxu0 %v14861_v49 }
 0x441   : > { %5978 = vmatprep.subr.bf16.mxu0 %v14869_v9 }
 0x444   : > { %5979 = vmatpush1.bf16.msra.mxu0 %v14867_v34 }
 0x445   : > { %5980 = vmatprep.subr.bf16.mxu0 %v14875_v47  ;;  %v14921_v47 = vld [vmem:[#allocation11 + $0x528] ss:$16 sps:$4 sm:$0xff]  }
 0x448   : > { %5981 = vmatpush1.bf16.msra.mxu0 %v14873_v4 }
 0x449   : > { %5982 = vmatprep.subr.bf16.mxu0 %v14881_v30 }
 0x44c   : > { %5983 = vmatpush1.bf16.msra.mxu0 %v14879_v45  ;;  %v14929_v45 = vld [vmem:[#allocation11 + $0x50c] ss:$16 sps:$4 sm:$0xff]  }
 0x44d   : > { %5984 = vmatprep.subr.bf16.mxu0 %v14887_v7 }
 0x450   : > { %5985 = vmatpush2.bf16.msra.mxu0 %v14885_v52 }
 0x451   : > { %5986 = vmatprep.subr.bf16.mxu0 %v14893_v43 }
 0x454   : > { %5987 = vmatpush2.bf16.msra.mxu0 %v14891_v58 }
 0x455   : > { %5988 = vmatprep.subr.bf16.mxu0 %v14899_v15  ;;  %v14927_v15 = vld [vmem:[#allocation11 + $0x508] ss:$16 sps:$4 sm:$0xff]  }
 0x456   : > { %v4827_v50 = vpop.f32.mrf.mxu0 }
 0x457   : > { %v4878_v39 = vpop.f32.mrf.mxu1 }
 0x458   : > { %v4879_v19 = vadd.f32 %v4878_v39, %v4827_v50  ;;  %5989 = vmatpush2.bf16.msra.mxu0 %v14897_v31  ;;  %v4829_v44 = vpop.f32.mrf.mxu0  ;;  %v14935_v31 = vld [vmem:[#allocation11 + $0xe4] ss:$16 sps:$4 sm:$0xff]  }
 0x459   : > { %v4880_v51 = vpop.f32.mrf.mxu1  ;;  %5990 = vmatprep.subr.bf16.mxu0 %v14905_v38 }
 0x45a   : > { %v4897_v53 = vadd.f32 %v4879_v19, %v17508_v32  ;;  %v4881_v14 = vadd.f32 %v4880_v51, %v4829_v44  ;;  %v4831_v0 = vpop.f32.mrf.mxu0  ;;  %v14933_v19 = vld [vmem:[#allocation11 + $0xe0] ss:$16 sps:$4 sm:$0xff]   ;;  %v14938_v51 = vld [vmem:[#allocation11 + $0x6cc] ss:$16 sps:$4 sm:$0xff]  }
 0x45b   : > { %v4882_v55 = vpop.f32.mrf.mxu1 }
 0x45c   : > { %v4898_v6 = vadd.f32 %v4881_v14, %v17511_v18  ;;  %v4883_v61 = vadd.f32 %v4882_v55, %v4831_v0  ;;  %5991 = vmatpush2.bf16.msra.mxu0 %v14903_v26  ;;  %v4931_v16 = vadd.f32 %v4920_v40, %v4897_v53  ;;  %v4833_v36 = vpop.f32.mrf.mxu0  ;;  %v14915_v18 = vld [vmem:[#allocation11 + $0x548] ss:$16 sps:$4 sm:$0xff]   ;;  %v14941_v53 = vld [vmem:[#allocation11 + $0xc4] ss:$16 sps:$4 sm:$0xff]   ;;  %v14939_v14 = vld [vmem:[#allocation11 + $0xc0] ss:$16 sps:$4 sm:$0xff]  }
 0x45d   : > { %v4884_v37 = vpop.f32.mrf.mxu1  ;;  %5992 = vmatprep.subr.bf16.mxu0 %v14911_v35  ;;  %v14930_v26 = vld [vmem:[#allocation11 + $0x6e8] ss:$16 sps:$4 sm:$0xff]   ;;  %v14947_v0 = vld [vmem:[#allocation11 + $0xa4] ss:$16 sps:$4 sm:$0xff]   ;;  %v14944_v55 = vld [vmem:[#allocation11 + $0x6ac] ss:$16 sps:$4 sm:$0xff]  }
 0x45e   : > { %v4901_v23 = vadd.f32 %v4883_v61, %v17514_v63  ;;  %v4885_v10 = vadd.f32 %v4884_v37, %v4833_v36  ;;  %v4932_v32 = vadd.f32 %v4924_v54, %v4898_v6  ;;  %v4837_v62 = vpop.f32.mrf.mxu0  ;;  %v4943_v21 = vmax.f32 %v4931_v16, 0.0  ;;  %v14945_v6 = vld [vmem:[#allocation11 + $0xa0] ss:$16 sps:$4 sm:$0xff]   ;;  %v14953_v61 = vld [vmem:[#allocation11 + $0x84] ss:$16 sps:$4 sm:$0xff]  }
 0x45f   : > { %v4888_v8 = vpop.f32.mrf.mxu1  ;;  %v14951_v16 = vld [vmem:[#allocation11 + $0x80] ss:$16 sps:$4 sm:$0xff]   ;;  %v14948_v36 = vld [vmem:[#allocation11 + $0x688] ss:$16 sps:$4 sm:$0xff]   ;;  %v14959_v37 = vld [vmem:[#allocation11 + $0x64] ss:$16 sps:$4 sm:$0xff]  }
 0x460   : > { %v4935_v17 = vadd.f32 %v4920_v40, %v4901_v23  ;;  %v4902_v28 = vadd.f32 %v4885_v10, %v17517_v5  ;;  %v4889_v20 = vadd.f32 %v4888_v8, %v4837_v62  ;;  %5993 = vmatpush2.bf16.msra.mxu0 %v14909_v60  ;;  %v4839_v33 = vpop.f32.mrf.mxu0  ;;  %v4944_v1 = vmax.f32 %v4932_v32, 0.0  ;;  %v14950_v60 = vld [vmem:[#allocation11 + $0x68c] ss:$16 sps:$4 sm:$0xff]   ;;  %v14957_v23 = vld [vmem:[#allocation11 + $0x60] ss:$16 sps:$4 sm:$0xff]  }
 0x461   : > { %v4890_v22 = vpop.f32.mrf.mxu1  ;;  %5994 = vmatprep.subr.bf16.mxu0 %v14917_v25  ;;  %v14956_v25 = vld [vmem:[#allocation11 + $0x66c] ss:$16 sps:$4 sm:$0xff]   ;;  %v14954_v10 = vld [vmem:[#allocation11 + $0x668] ss:$16 sps:$4 sm:$0xff]   ;;  %v14965_v32 = vld [vmem:[#allocation11 + $0x44] ss:$16 sps:$4 sm:$0xff]  }
 0x462   : > { %v4947_v27 = vmax.f32 %v4935_v17, 0.0  ;;  %v4936_v46 = vadd.f32 %v4924_v54, %v4902_v28  ;;  %v4905_v59 = vadd.f32 %v4889_v20, %v17520_v12  ;;  %v4891_v63 = vadd.f32 %v4890_v22, %v4839_v33  ;;  %v4841_v2 = vpop.f32.mrf.mxu0  ;;  %v14962_v62 = vld [vmem:[#allocation11 + $0x64c] ss:$16 sps:$4 sm:$0xff]   ;;  %v14963_v8 = vld [vmem:[#allocation11 + $0x40] ss:$16 sps:$4 sm:$0xff]  }
 0x463   : > { %v4892_v56 = vpop.f32.mrf.mxu1  ;;  %v14960_v17 = vld [vmem:[#allocation11 + $0x648] ss:$16 sps:$4 sm:$0xff]   ;;  %v14971_v28 = vld [vmem:[#allocation11 + $0x24] ss:$16 sps:$4 sm:$0xff]   ;;  %v14968_v20 = vld [vmem:[#allocation11 + $0x62c] ss:$16 sps:$4 sm:$0xff]  }
 0x464   : > { %v17557_v49 = vpack.c.bf16 %v4947_v27, %v4943_v21  ;;  %v4948_v9 = vmax.f32 %v4936_v46, 0.0  ;;  %v4939_v5 = vadd.f32 %v4920_v40, %v4905_v59  ;;  %v4906_v34 = vadd.f32 %v4891_v63, %v17523_v57  ;;  %5995 = vmatpush2.bf16.msra.mxu0 %v14915_v18  ;;  %v4842_v4 = vpop.f32.mrf.mxu0  ;;  %v14969_v18 = vld [vmem:[#allocation11 + $0x20] ss:$16 sps:$4 sm:$0xff]   ;;  %v14966_v21 = vld [vmem:[#allocation11 + $0x628] ss:$16 sps:$4 sm:$0xff]  }
 0x465   : > { %v4893_v30 = vpop.f32.mrf.mxu1  ;;  %5996 = vmatprep.subr.bf16.mxu0 %v14923_v24  ;;  %v14977_v33 = vld [vmem:[#allocation11 + $0x4] ss:$16 sps:$4 sm:$0xff]   ;;  %v14974_v22 = vld [vmem:[#allocation11 + $0x60c] ss:$16 sps:$4 sm:$0xff]   ;;  %v14975_v24 = vld [vmem:[#allocation11] ss:$16 sps:$4 sm:$0xff]  }
 0x466   : > { %v17560_v7 = vpack.c.bf16 %v4948_v9, %v4944_v1  ;;  %v4951_v52 = vmax.f32 %v4939_v5, 0.0  ;;  %v4940_v12 = vadd.f32 %v4924_v54, %v4906_v34  ;;  %v5232_v40 = vrot.slane %v17557_v49, 1  ;;  %v14936_v54 = vld [vmem:[#allocation11 + $0x6c8] ss:$16 sps:$4 sm:$0xff]   ;;  %v14983_v46 = vld [vmem:[#allocation11 + $0x1e4] ss:$16 sps:$4 sm:$0xff]  }
 0x467   : > { %v14972_v27 = vld [vmem:[#allocation11 + $0x608] ss:$16 sps:$4 sm:$0xff]   ;;  %v14980_v59 = vld [vmem:[#allocation11 + $0x7ec] ss:$16 sps:$4 sm:$0xff]   ;;  %v14981_v63 = vld [vmem:[#allocation11 + $0x1e0] ss:$16 sps:$4 sm:$0xff]  }
 0x468   : > { %v5087_v43 = vpack.c.bf16 %v4951_v52, %v4951_v52  ;;  %v4952_v58 = vmax.f32 %v4940_v12, 0.0  ;;  %5997 = vmatpush2.bf16.msra.mxu0 %v14921_v47  ;;  %v5235_v57 = vrot.slane %v17560_v7, 1  ;;  %v14978_v1 = vld [vmem:[#allocation11 + $0x7e8] ss:$16 sps:$4 sm:$0xff]   ;;  %v14989_v2 = vld [vmem:[#allocation11 + $0x1c4] ss:$16 sps:$4 sm:$0xff]  }
 0x469   : > { %5998 = vmatprep.subr.bf16.mxu0 %v14929_v45  ;;  %v14986_v56 = vld [vmem:[#allocation11 + $0x7cc] ss:$16 sps:$4 sm:$0xff]   ;;  %v14987_v9 = vld [vmem:[#allocation11 + $0x1c0] ss:$16 sps:$4 sm:$0xff]   ;;  %v14984_v5 = vld [vmem:[#allocation11 + $0x7c8] ss:$16 sps:$4 sm:$0xff]  }
 0x46a   : > { %v5088_v38 = vpack.c.bf16 %v4952_v58, %v4952_v58  ;;  %v5233_v50 = vrot.slane %v5087_v43, 1  ;;  %v14995_v34 = vld [vmem:[#allocation11 + $0x1a4] ss:$16 sps:$4 sm:$0xff]   ;;  %v14992_v47 = vld [vmem:[#allocation11 + $0x7ac] ss:$16 sps:$4 sm:$0xff]  }
 0x46b   : > { %v14993_v4 = vld [vmem:[#allocation11 + $0x1a0] ss:$16 sps:$4 sm:$0xff]   ;;  %v14990_v30 = vld [vmem:[#allocation11 + $0x7a8] ss:$16 sps:$4 sm:$0xff]   ;;  %v15001_v45 = vld [vmem:[#allocation11 + $0x184] ss:$16 sps:$4 sm:$0xff]  }
 0x46c   : > { %v5236_v39 = vrot.slane %v5088_v38, 1  ;;  %5999 = vmatpush2.bf16.msra.mxu0 %v14927_v15  ;;  %v17567_v35 = vsel %vm1243_vm4, %v5232_v40, %v5233_v50  ;;  %v14998_v52 = vld [vmem:[#allocation11 + $0x78c] ss:$16 sps:$4 sm:$0xff]   ;;  %v14999_v12 = vld [vmem:[#allocation11 + $0x180] ss:$16 sps:$4 sm:$0xff]  }
 0x46d   : > { %6694 = vmatprep.subr.bf16.mxu0 %v14935_v31  ;;  %v14996_v43 = vld [vmem:[#allocation11 + $0x788] ss:$16 sps:$4 sm:$0xff]   ;;  %v15007_v58 = vld [vmem:[#allocation11 + $0x164] ss:$16 sps:$4 sm:$0xff]   ;;  %v15004_v15 = vld [vmem:[#allocation11 + $0x76c] ss:$16 sps:$4 sm:$0xff]  }
 0x46e   : > { %v5237_v44 = vsel %vm1243_vm4, %v5235_v57, %v5236_v39  ;;  %v15005_v31 = vld [vmem:[#allocation11 + $0x160] ss:$16 sps:$4 sm:$0xff]   ;;  %v15002_v38 = vld [vmem:[#allocation11 + $0x768] ss:$16 sps:$4 sm:$0xff]   ;;  %v15013_v50 = vld [vmem:[#allocation11 + $0x144] ss:$16 sps:$4 sm:$0xff]  }
 0x46f   : > { %5957 = vmatprep.mubr.bf16.mxu1 %v5237_v44  ;;  %6001 = vmatmul.mubr.bf16.vlgmr.msra.gmra.mxu0 %v17545_v11  ;;  %v14942_v11 = vld [vmem:[#allocation11 + $0x6a8] ss:$16 sps:$4 sm:$0xff]   ;;  %v15010_v39 = vld [vmem:[#allocation11 + $0x74c] ss:$16 sps:$4 sm:$0xff]   ;;  %v15011_v57 = vld [vmem:[#allocation11 + $0x140] ss:$16 sps:$4 sm:$0xff]  }
 0x470   : > { %5958 = vmatmul.mubr.bf16.vlgmr.msra.gmra.mxu1 %v17567_v35  ;;  %6695 = vmatpush1.bf16.msra.mxu0 %v14933_v19  ;;  %v15008_v19 = vld [vmem:[#allocation11 + $0x748] ss:$16 sps:$4 sm:$0xff]   ;;  %v15016_v40 = vld [vmem:[#allocation11 + $0x72c] ss:$16 sps:$4 sm:$0xff]  }
 0x471   : > { %6012 = vmatpush1.bf16.msra.mxu1 %v14930_v26  ;;  %6726 = vmatprep.mubr.bf16.mxu0 %v17539_v42  ;;  %v15019_v26 = vld [vmem:[#allocation11 + $0x124] ss:$16 sps:$4 sm:$0xff]  }
 0x472   : > { %6043 = vmatprep.mubr.bf16.mxu1 %v5237_v44  ;;  %6013 = vmatprep.subr.bf16.mxu1 %v14938_v51  ;;  %v15017_v44 = vld [vmem:[#allocation11 + $0x120] ss:$16 sps:$4 sm:$0xff]   ;;  %v15014_v51 = vld [vmem:[#allocation11 + $0x728] ss:$16 sps:$4 sm:$0xff]  }
 0x473   : > { %6696 = vmatprep.subr.bf16.mxu0 %v14941_v53  ;;  %v15025_v53 = vld [vmem:[#allocation11 + $0x104] ss:$16 sps:$4 sm:$0xff]  }
 0x474   : > { %6697 = vmatpush1.bf16.msra.mxu0 %v14939_v14  ;;  %v15022_v14 = vld [vmem:[#allocation11 + $0x70c] ss:$16 sps:$4 sm:$0xff]  }
 0x475   : > { %6014 = vmatpush1.bf16.msra.mxu1 %v14936_v54  ;;  %6698 = vmatprep.subr.bf16.mxu0 %v14947_v0  ;;  %v15023_v54 = vld [vmem:[#allocation11 + $0x100] ss:$16 sps:$4 sm:$0xff]   ;;  %v15020_v0 = vld [vmem:[#allocation11 + $0x708] ss:$16 sps:$4 sm:$0xff]  }
 0x476   : > { %6015 = vmatprep.subr.bf16.mxu1 %v14944_v55  ;;  %v15031_v55 = vld [vmem:[#allocation11 + $0xec] ss:$16 sps:$4 sm:$0xff]  }
 0x478   : > { %6699 = vmatpush1.bf16.msra.mxu0 %v14945_v6  ;;  %v15028_v6 = vld [vmem:[#allocation11 + $0x2e4] ss:$16 sps:$4 sm:$0xff]  }
 0x479   : > { %6016 = vmatpush1.bf16.msra.mxu1 %v14942_v11  ;;  %6700 = vmatprep.subr.bf16.mxu0 %v14953_v61  ;;  %v15029_v11 = vld [vmem:[#allocation11 + $0xe8] ss:$16 sps:$4 sm:$0xff]   ;;  %v15026_v61 = vld [vmem:[#allocation11 + $0x2e0] ss:$16 sps:$4 sm:$0xff]  }
 0x47a   : > { %6017 = vmatprep.subr.bf16.mxu1 %v14950_v60  ;;  %v15034_v60 = vld [vmem:[#allocation11 + $0x2c4] ss:$16 sps:$4 sm:$0xff]  }
 0x47c   : > { %6701 = vmatpush1.bf16.msra.mxu0 %v14951_v16  ;;  %v15037_v16 = vld [vmem:[#allocation11 + $0xcc] ss:$16 sps:$4 sm:$0xff]  }
 0x47d   : > { %6018 = vmatpush1.bf16.msra.mxu1 %v14948_v36  ;;  %6702 = vmatprep.subr.bf16.mxu0 %v14959_v37  ;;  %v15035_v36 = vld [vmem:[#allocation11 + $0xc8] ss:$16 sps:$4 sm:$0xff]   ;;  %v15032_v37 = vld [vmem:[#allocation11 + $0x2c0] ss:$16 sps:$4 sm:$0xff]  }
 0x47e   : > { %6019 = vmatprep.subr.bf16.mxu1 %v14956_v25  ;;  %v15043_v25 = vld [vmem:[#allocation11 + $0xac] ss:$16 sps:$4 sm:$0xff]  }
 0x480   : > { %6703 = vmatpush1.bf16.msra.mxu0 %v14957_v23  ;;  %v15040_v23 = vld [vmem:[#allocation11 + $0x2a4] ss:$16 sps:$4 sm:$0xff]  }
 0x481   : > { %6020 = vmatpush1.bf16.msra.mxu1 %v14954_v10  ;;  %6704 = vmatprep.subr.bf16.mxu0 %v14965_v32  ;;  %v15041_v10 = vld [vmem:[#allocation11 + $0xa8] ss:$16 sps:$4 sm:$0xff]   ;;  %v15038_v32 = vld [vmem:[#allocation11 + $0x2a0] ss:$16 sps:$4 sm:$0xff]  }
 0x482   : > { %6021 = vmatprep.subr.bf16.mxu1 %v14962_v62  ;;  %v15049_v62 = vld [vmem:[#allocation11 + $0x8c] ss:$16 sps:$4 sm:$0xff]  }
 0x484   : > { %6705 = vmatpush1.bf16.msra.mxu0 %v14963_v8  ;;  %v15047_v8 = vld [vmem:[#allocation11 + $0x88] ss:$16 sps:$4 sm:$0xff]  }
 0x485   : > { %6022 = vmatpush1.bf16.msra.mxu1 %v14960_v17  ;;  %6706 = vmatprep.subr.bf16.mxu0 %v14971_v28  ;;  %v15044_v17 = vld [vmem:[#allocation11 + $0x280] ss:$16 sps:$4 sm:$0xff]   ;;  %v15055_v28 = vld [vmem:[#allocation11 + $0x6c] ss:$16 sps:$4 sm:$0xff]  }
 0x486   : > { %6023 = vmatprep.subr.bf16.mxu1 %v14968_v20  ;;  %v15052_v20 = vld [vmem:[#allocation11 + $0x264] ss:$16 sps:$4 sm:$0xff]  }
 0x488   : > { %6707 = vmatpush1.bf16.msra.mxu0 %v14969_v18  ;;  %v15050_v18 = vld [vmem:[#allocation11 + $0x260] ss:$16 sps:$4 sm:$0xff]  }
 0x489   : > { %6024 = vmatpush1.bf16.msra.mxu1 %v14966_v21  ;;  %6708 = vmatprep.subr.bf16.mxu0 %v14977_v33  ;;  %v15061_v21 = vld [vmem:[#allocation11 + $0x4c] ss:$16 sps:$4 sm:$0xff]   ;;  %v15058_v33 = vld [vmem:[#allocation11 + $0x244] ss:$16 sps:$4 sm:$0xff]  }
 0x48a   : > { %6025 = vmatprep.subr.bf16.mxu1 %v14974_v22  ;;  %v15059_v22 = vld [vmem:[#allocation11 + $0x48] ss:$16 sps:$4 sm:$0xff]  }
 0x48c   : > { %6709 = vmatpush1.bf16.msra.mxu0 %v14975_v24  ;;  %v15056_v24 = vld [vmem:[#allocation11 + $0x240] ss:$16 sps:$4 sm:$0xff]  }
 0x48d   : > { %6026 = vmatpush1.bf16.msra.mxu1 %v14972_v27  ;;  %6710 = vmatprep.subr.bf16.mxu0 %v14983_v46  ;;  %v15067_v27 = vld [vmem:[#allocation11 + $0x2c] ss:$16 sps:$4 sm:$0xff]   ;;  %v15064_v46 = vld [vmem:[#allocation11 + $0x224] ss:$16 sps:$4 sm:$0xff]  }
 0x48e   : > { %6027 = vmatprep.subr.bf16.mxu1 %v14980_v59  ;;  %v15065_v59 = vld [vmem:[#allocation11 + $0x28] ss:$16 sps:$4 sm:$0xff]  }
 0x490   : > { %6711 = vmatpush2.bf16.msra.mxu0 %v14981_v63  ;;  %v15062_v63 = vld [vmem:[#allocation11 + $0x220] ss:$16 sps:$4 sm:$0xff]  }
 0x491   : > { %6028 = vmatpush2.bf16.msra.mxu1 %v14978_v1  ;;  %6712 = vmatprep.subr.bf16.mxu0 %v14989_v2  ;;  %v15073_v1 = vld [vmem:[#allocation11 + $0xc] ss:$16 sps:$4 sm:$0xff]   ;;  %v15070_v2 = vld [vmem:[#allocation11 + $0x204] ss:$16 sps:$4 sm:$0xff]  }
 0x492   : > { %6029 = vmatprep.subr.bf16.mxu1 %v14986_v56  ;;  %v15071_v56 = vld [vmem:[#allocation11 + $0x8] ss:$16 sps:$4 sm:$0xff]  }
 0x494   : > { %6713 = vmatpush2.bf16.msra.mxu0 %v14987_v9  ;;  %v15068_v9 = vld [vmem:[#allocation11 + $0x200] ss:$16 sps:$4 sm:$0xff]  }
 0x495   : > { %6030 = vmatpush2.bf16.msra.mxu1 %v14984_v5  ;;  %6714 = vmatprep.subr.bf16.mxu0 %v14995_v34  ;;  %v15079_v5 = vld [vmem:[#allocation11 + $0x1ec] ss:$16 sps:$4 sm:$0xff]   ;;  %v15076_v34 = vld [vmem:[#allocation11 + $0x3e4] ss:$16 sps:$4 sm:$0xff]  }
 0x496   : > { %6031 = vmatprep.subr.bf16.mxu1 %v14992_v47  ;;  %v15077_v47 = vld [vmem:[#allocation11 + $0x1e8] ss:$16 sps:$4 sm:$0xff]  }
 0x498   : > { %6715 = vmatpush2.bf16.msra.mxu0 %v14993_v4  ;;  %v15074_v4 = vld [vmem:[#allocation11 + $0x3e0] ss:$16 sps:$4 sm:$0xff]  }
 0x499   : > { %6032 = vmatpush2.bf16.msra.mxu1 %v14990_v30  ;;  %6716 = vmatprep.subr.bf16.mxu0 %v15001_v45  ;;  %v15085_v30 = vld [vmem:[#allocation11 + $0x1cc] ss:$16 sps:$4 sm:$0xff]   ;;  %v15082_v45 = vld [vmem:[#allocation11 + $0x3c4] ss:$16 sps:$4 sm:$0xff]  }
 0x49a   : > { %6033 = vmatprep.subr.bf16.mxu1 %v14998_v52  ;;  %v15083_v52 = vld [vmem:[#allocation11 + $0x1c8] ss:$16 sps:$4 sm:$0xff]  }
 0x49c   : > { %6717 = vmatpush2.bf16.msra.mxu0 %v14999_v12  ;;  %v15080_v12 = vld [vmem:[#allocation11 + $0x3c0] ss:$16 sps:$4 sm:$0xff]  }
 0x49d   : > { %6034 = vmatpush2.bf16.msra.mxu1 %v14996_v43  ;;  %6718 = vmatprep.subr.bf16.mxu0 %v15007_v58  ;;  %v15091_v43 = vld [vmem:[#allocation11 + $0x1ac] ss:$16 sps:$4 sm:$0xff]   ;;  %v15088_v58 = vld [vmem:[#allocation11 + $0x3a4] ss:$16 sps:$4 sm:$0xff]  }
 0x49e   : > { %6035 = vmatprep.subr.bf16.mxu1 %v15004_v15  ;;  %v15089_v15 = vld [vmem:[#allocation11 + $0x1a8] ss:$16 sps:$4 sm:$0xff]  }
 0x4a0   : > { %6719 = vmatpush2.bf16.msra.mxu0 %v15005_v31  ;;  %v15086_v31 = vld [vmem:[#allocation11 + $0x3a0] ss:$16 sps:$4 sm:$0xff]  }
 0x4a1   : > { %6036 = vmatpush2.bf16.msra.mxu1 %v15002_v38  ;;  %6720 = vmatprep.subr.bf16.mxu0 %v15013_v50  ;;  %v15097_v38 = vld [vmem:[#allocation11 + $0x18c] ss:$16 sps:$4 sm:$0xff]   ;;  %v15094_v50 = vld [vmem:[#allocation11 + $0x384] ss:$16 sps:$4 sm:$0xff]  }
 0x4a2   : > { %6037 = vmatprep.subr.bf16.mxu1 %v15010_v39  ;;  %v15095_v39 = vld [vmem:[#allocation11 + $0x188] ss:$16 sps:$4 sm:$0xff]  }
 0x4a4   : > { %6721 = vmatpush2.bf16.msra.mxu0 %v15011_v57  ;;  %v15092_v57 = vld [vmem:[#allocation11 + $0x380] ss:$16 sps:$4 sm:$0xff]  }
 0x4a5   : > { %6038 = vmatpush2.bf16.msra.mxu1 %v15008_v19  ;;  %6722 = vmatprep.subr.bf16.mxu0 %v15019_v26  ;;  %v15103_v19 = vld [vmem:[#allocation11 + $0x16c] ss:$16 sps:$4 sm:$0xff]   ;;  %v15100_v26 = vld [vmem:[#allocation11 + $0x364] ss:$16 sps:$4 sm:$0xff]  }
 0x4a6   : > { %6039 = vmatprep.subr.bf16.mxu1 %v15016_v40  ;;  %v15101_v40 = vld [vmem:[#allocation11 + $0x168] ss:$16 sps:$4 sm:$0xff]  }
 0x4a8   : > { %6723 = vmatpush2.bf16.msra.mxu0 %v15017_v44  ;;  %v15098_v44 = vld [vmem:[#allocation11 + $0x360] ss:$16 sps:$4 sm:$0xff]  }
 0x4a9   : > { %6040 = vmatpush2.bf16.msra.mxu1 %v15014_v51  ;;  %6724 = vmatprep.subr.bf16.mxu0 %v15025_v53  ;;  %v15109_v51 = vld [vmem:[#allocation11 + $0x14c] ss:$16 sps:$4 sm:$0xff]   ;;  %v15106_v53 = vld [vmem:[#allocation11 + $0x344] ss:$16 sps:$4 sm:$0xff]  }
 0x4aa   : > { %6041 = vmatprep.subr.bf16.mxu1 %v15022_v14  ;;  %v15107_v14 = vld [vmem:[#allocation11 + $0x148] ss:$16 sps:$4 sm:$0xff]  }
 0x4ac   : > { %6725 = vmatpush2.bf16.msra.mxu0 %v15023_v54  ;;  %v15104_v54 = vld [vmem:[#allocation11 + $0x340] ss:$16 sps:$4 sm:$0xff]  }
 0x4ad   : > { %6042 = vmatpush2.bf16.msra.mxu1 %v15020_v0  ;;  %6780 = vmatprep.subr.bf16.mxu0 %v15031_v55  ;;  %v15115_v0 = vld [vmem:[#allocation11 + $0x12c] ss:$16 sps:$4 sm:$0xff]   ;;  %v15112_v55 = vld [vmem:[#allocation11 + $0x324] ss:$16 sps:$4 sm:$0xff]  }
 0x4ae   : > { %6737 = vmatprep.subr.bf16.mxu1 %v15028_v6  ;;  %v15113_v6 = vld [vmem:[#allocation11 + $0x128] ss:$16 sps:$4 sm:$0xff]  }
 0x4af   : > { %6727 = vmatmul.mubr.bf16.vlgmr.msra.gmra.mxu0 %v17536_v29 }
 0x4b0   : > { %6044 = vmatmul.mubr.bf16.vlgmr.msra.gmra.mxu1 %v17567_v35  ;;  %6781 = vmatpush1.bf16.msra.mxu0 %v15029_v11  ;;  %v15046_v35 = vld [vmem:[#allocation11 + $0x284] ss:$16 sps:$4 sm:$0xff]   ;;  %v15110_v11 = vld [vmem:[#allocation11 + $0x320] ss:$16 sps:$4 sm:$0xff]  }
 0x4b1   : > { %6738 = vmatpush1.bf16.msra.mxu1 %v15026_v61  ;;  %6769 = vmatprep.mubr.bf16.mxu1 %v17560_v7  ;;  %v15121_v61 = vld [vmem:[#allocation11 + $0x10c] ss:$16 sps:$4 sm:$0xff]  }
 0x4b2   : > { %6812 = vmatprep.mubr.bf16.mxu0 %v17539_v42  ;;  %6739 = vmatprep.subr.bf16.mxu1 %v15034_v60  ;;  %v15053_v42 = vld [vmem:[#allocation11 + $0x68] ss:$16 sps:$4 sm:$0xff]   ;;  %v15118_v60 = vld [vmem:[#allocation11 + $0x304] ss:$16 sps:$4 sm:$0xff]  }
 0x4b3   : > { %6782 = vmatprep.subr.bf16.mxu0 %v15037_v16  ;;  %v15119_v16 = vld [vmem:[#allocation11 + $0x108] ss:$16 sps:$4 sm:$0xff]  }
 0x4b4   : > { %6783 = vmatpush1.bf16.msra.mxu0 %v15035_v36  ;;  %v15116_v36 = vld [vmem:[#allocation11 + $0x300] ss:$16 sps:$4 sm:$0xff]  }
 0x4b5   : > { %6740 = vmatpush1.bf16.msra.mxu1 %v15032_v37  ;;  %6784 = vmatprep.subr.bf16.mxu0 %v15043_v25  ;;  %v15124_v37 = vld [vmem:[#allocation11 + $0x2ec] ss:$16 sps:$4 sm:$0xff]   ;;  %v15122_v25 = vld [vmem:[#allocation11 + $0x2e8] ss:$16 sps:$4 sm:$0xff]  }
 0x4b6   : > { %6741 = vmatprep.subr.bf16.mxu1 %v15040_v23  ;;  %v15127_v23 = vld [vmem:[#allocation11 + $0x2cc] ss:$16 sps:$4 sm:$0xff]  }
 0x4b8   : > { %6785 = vmatpush1.bf16.msra.mxu0 %v15041_v10  ;;  %v15125_v10 = vld [vmem:[#allocation11 + $0x2c8] ss:$16 sps:$4 sm:$0xff]  }
 0x4b9   : > { %6742 = vmatpush1.bf16.msra.mxu1 %v15038_v32  ;;  %6786 = vmatprep.subr.bf16.mxu0 %v15049_v62  ;;  %v15130_v32 = vld [vmem:[#allocation11 + $0x2ac] ss:$16 sps:$4 sm:$0xff]   ;;  %v15128_v62 = vld [vmem:[#allocation11 + $0x2a8] ss:$16 sps:$4 sm:$0xff]  }
 0x4ba   : > { %6743 = vmatprep.subr.bf16.mxu1 %v15046_v35  ;;  %v15133_v35 = vld [vmem:[#allocation11 + $0x28c] ss:$16 sps:$4 sm:$0xff]  }
 0x4bc   : > { %6787 = vmatpush1.bf16.msra.mxu0 %v15047_v8  ;;  %v15170_v8 = vld [vmem:[#allocation14 + $0xe0] ss:$16 sps:$4 sm:$0xff]  }
 0x4bd   : > { %6744 = vmatpush1.bf16.msra.mxu1 %v15044_v17  ;;  %6788 = vmatprep.subr.bf16.mxu0 %v15055_v28  ;;  %v15172_v17 = vld [vmem:[#allocation14 + $0xe4] ss:$16 sps:$4 sm:$0xff]  }
 0x4be   : > { %6745 = vmatprep.subr.bf16.mxu1 %v15052_v20  ;;  %v15175_v28 = vld [vmem:[#allocation14 + $0xc4] ss:$16 sps:$4 sm:$0xff]  }
 0x4bf   : > { %v15131_v20 = vld [vmem:[#allocation11 + $0x288] ss:$16 sps:$4 sm:$0xff]  }
 0x4c0   : > { %6789 = vmatpush1.bf16.msra.mxu0 %v15053_v42  ;;  %v15173_v42 = vld [vmem:[#allocation14 + $0xc0] ss:$16 sps:$4 sm:$0xff]  }
 0x4c1   : > { %6746 = vmatpush1.bf16.msra.mxu1 %v15050_v18  ;;  %6790 = vmatprep.subr.bf16.mxu0 %v15061_v21  ;;  %v15178_v18 = vld [vmem:[#allocation14 + $0xa4] ss:$16 sps:$4 sm:$0xff]   ;;  %v15139_v21 = vld [vmem:[#allocation11 + $0x24c] ss:$16 sps:$4 sm:$0xff]  }
 0x4c2   : > { %6747 = vmatprep.subr.bf16.mxu1 %v15058_v33  ;;  %v15176_v33 = vld [vmem:[#allocation14 + $0xa0] ss:$16 sps:$4 sm:$0xff]  }
 0x4c4   : > { %6791 = vmatpush1.bf16.msra.mxu0 %v15059_v22  ;;  %v15181_v22 = vld [vmem:[#allocation14 + $0x84] ss:$16 sps:$4 sm:$0xff]  }
 0x4c5   : > { %6748 = vmatpush1.bf16.msra.mxu1 %v15056_v24  ;;  %6792 = vmatprep.subr.bf16.mxu0 %v15067_v27  ;;  %v15137_v24 = vld [vmem:[#allocation11 + $0x248] ss:$16 sps:$4 sm:$0xff]   ;;  %v15142_v27 = vld [vmem:[#allocation11 + $0x22c] ss:$16 sps:$4 sm:$0xff]  }
 0x4c6   : > { %6749 = vmatprep.subr.bf16.mxu1 %v15064_v46  ;;  %v15179_v46 = vld [vmem:[#allocation14 + $0x80] ss:$16 sps:$4 sm:$0xff]  }
 0x4c8   : > { %6793 = vmatpush1.bf16.msra.mxu0 %v15065_v59  ;;  %v15184_v59 = vld [vmem:[#allocation14 + $0x64] ss:$16 sps:$4 sm:$0xff]  }
 0x4c9   : > { %6750 = vmatpush1.bf16.msra.mxu1 %v15062_v63  ;;  %6794 = vmatprep.subr.bf16.mxu0 %v15073_v1  ;;  %v15140_v63 = vld [vmem:[#allocation11 + $0x228] ss:$16 sps:$4 sm:$0xff]   ;;  %v15145_v1 = vld [vmem:[#allocation11 + $0x20c] ss:$16 sps:$4 sm:$0xff]  }
 0x4ca   : > { %6751 = vmatprep.subr.bf16.mxu1 %v15070_v2  ;;  %v15182_v2 = vld [vmem:[#allocation14 + $0x60] ss:$16 sps:$4 sm:$0xff]  }
 0x4cc   : > { %6795 = vmatpush1.bf16.msra.mxu0 %v15071_v56  ;;  %v15187_v56 = vld [vmem:[#allocation14 + $0x44] ss:$16 sps:$4 sm:$0xff]  }
 0x4cd   : > { %6752 = vmatpush1.bf16.msra.mxu1 %v15068_v9  ;;  %6796 = vmatprep.subr.bf16.mxu0 %v15079_v5  ;;  %v15143_v9 = vld [vmem:[#allocation11 + $0x208] ss:$16 sps:$4 sm:$0xff]   ;;  %v15148_v5 = vld [vmem:[#allocation11 + $0x3ec] ss:$16 sps:$4 sm:$0xff]  }
 0x4ce   : > { %6753 = vmatprep.subr.bf16.mxu1 %v15076_v34  ;;  %v15185_v34 = vld [vmem:[#allocation14 + $0x40] ss:$16 sps:$4 sm:$0xff]  }
 0x4d0   : > { %6797 = vmatpush2.bf16.msra.mxu0 %v15077_v47  ;;  %v15190_v47 = vld [vmem:[#allocation14 + $0x24] ss:$16 sps:$4 sm:$0xff]  }
 0x4d1   : > { %6754 = vmatpush2.bf16.msra.mxu1 %v15074_v4  ;;  %6798 = vmatprep.subr.bf16.mxu0 %v15085_v30  ;;  %v15146_v4 = vld [vmem:[#allocation11 + $0x3e8] ss:$16 sps:$4 sm:$0xff]   ;;  %v15151_v30 = vld [vmem:[#allocation11 + $0x3cc] ss:$16 sps:$4 sm:$0xff]  }
 0x4d2   : > { %6755 = vmatprep.subr.bf16.mxu1 %v15082_v45  ;;  %v15188_v45 = vld [vmem:[#allocation14 + $0x20] ss:$16 sps:$4 sm:$0xff]  }
 0x4d4   : > { %6799 = vmatpush2.bf16.msra.mxu0 %v15083_v52  ;;  %v15193_v52 = vld [vmem:[#allocation14 + $0x4] ss:$16 sps:$4 sm:$0xff]  }
 0x4d5   : > { %6756 = vmatpush2.bf16.msra.mxu1 %v15080_v12  ;;  %6800 = vmatprep.subr.bf16.mxu0 %v15091_v43  ;;  %v15149_v12 = vld [vmem:[#allocation11 + $0x3c8] ss:$16 sps:$4 sm:$0xff]   ;;  %v15154_v43 = vld [vmem:[#allocation11 + $0x3ac] ss:$16 sps:$4 sm:$0xff]  }
 0x4d6   : > { %6757 = vmatprep.subr.bf16.mxu1 %v15088_v58  ;;  %v15191_v58 = vld [vmem:[#allocation14] ss:$16 sps:$4 sm:$0xff]  }
 0x4d8   : > { %6801 = vmatpush2.bf16.msra.mxu0 %v15089_v15  ;;  %v15196_v15 = vld [vmem:[#allocation14 + $0x1e4] ss:$16 sps:$4 sm:$0xff]  }
 0x4d9   : > { %6758 = vmatpush2.bf16.msra.mxu1 %v15086_v31  ;;  %6802 = vmatprep.subr.bf16.mxu0 %v15097_v38  ;;  %v15152_v31 = vld [vmem:[#allocation11 + $0x3a8] ss:$16 sps:$4 sm:$0xff]   ;;  %v15157_v38 = vld [vmem:[#allocation11 + $0x38c] ss:$16 sps:$4 sm:$0xff]  }
 0x4da   : > { %6759 = vmatprep.subr.bf16.mxu1 %v15094_v50  ;;  %v15194_v50 = vld [vmem:[#allocation14 + $0x1e0] ss:$16 sps:$4 sm:$0xff]  }
 0x4dc   : > { %6803 = vmatpush2.bf16.msra.mxu0 %v15095_v39  ;;  %v15199_v39 = vld [vmem:[#allocation14 + $0x1c4] ss:$16 sps:$4 sm:$0xff]  }
 0x4dd   : > { %6760 = vmatpush2.bf16.msra.mxu1 %v15092_v57  ;;  %6804 = vmatprep.subr.bf16.mxu0 %v15103_v19  ;;  %v15155_v57 = vld [vmem:[#allocation11 + $0x388] ss:$16 sps:$4 sm:$0xff]   ;;  %v15160_v19 = vld [vmem:[#allocation11 + $0x36c] ss:$16 sps:$4 sm:$0xff]  }
 0x4de   : > { %6761 = vmatprep.subr.bf16.mxu1 %v15100_v26  ;;  %v15197_v26 = vld [vmem:[#allocation14 + $0x1c0] ss:$16 sps:$4 sm:$0xff]  }
 0x4e0   : > { %6805 = vmatpush2.bf16.msra.mxu0 %v15101_v40  ;;  %v15202_v40 = vld [vmem:[#allocation14 + $0x1a4] ss:$16 sps:$4 sm:$0xff]  }
 0x4e1   : > { %6762 = vmatpush2.bf16.msra.mxu1 %v15098_v44  ;;  %6806 = vmatprep.subr.bf16.mxu0 %v15109_v51  ;;  %v15158_v44 = vld [vmem:[#allocation11 + $0x368] ss:$16 sps:$4 sm:$0xff]   ;;  %v15163_v51 = vld [vmem:[#allocation11 + $0x34c] ss:$16 sps:$4 sm:$0xff]  }
 0x4e2   : > { %6763 = vmatprep.subr.bf16.mxu1 %v15106_v53  ;;  %v15200_v53 = vld [vmem:[#allocation14 + $0x1a0] ss:$16 sps:$4 sm:$0xff]  }
 0x4e4   : > { %6807 = vmatpush2.bf16.msra.mxu0 %v15107_v14  ;;  %v15205_v14 = vld [vmem:[#allocation14 + $0x184] ss:$16 sps:$4 sm:$0xff]  }
 0x4e5   : > { %6764 = vmatpush2.bf16.msra.mxu1 %v15104_v54  ;;  %6808 = vmatprep.subr.bf16.mxu0 %v15115_v0  ;;  %v15161_v54 = vld [vmem:[#allocation11 + $0x348] ss:$16 sps:$4 sm:$0xff]   ;;  %v15166_v0 = vld [vmem:[#allocation11 + $0x32c] ss:$16 sps:$4 sm:$0xff]  }
 0x4e6   : > { %6765 = vmatprep.subr.bf16.mxu1 %v15112_v55  ;;  %v15203_v55 = vld [vmem:[#allocation14 + $0x180] ss:$16 sps:$4 sm:$0xff]  }
 0x4e8   : > { %6809 = vmatpush2.bf16.msra.mxu0 %v15113_v6  ;;  %v15208_v6 = vld [vmem:[#allocation14 + $0x164] ss:$16 sps:$4 sm:$0xff]  }
 0x4e9   : > { %6766 = vmatpush2.bf16.msra.mxu1 %v15110_v11  ;;  %6810 = vmatprep.subr.bf16.mxu0 %v15121_v61  ;;  %v15164_v11 = vld [vmem:[#allocation11 + $0x328] ss:$16 sps:$4 sm:$0xff]   ;;  %v15169_v61 = vld [vmem:[#allocation11 + $0x30c] ss:$16 sps:$4 sm:$0xff]  }
 0x4ea   : > { %6767 = vmatprep.subr.bf16.mxu1 %v15118_v60  ;;  %v15206_v60 = vld [vmem:[#allocation14 + $0x160] ss:$16 sps:$4 sm:$0xff]  }
 0x4ec   : > { %6811 = vmatpush2.bf16.msra.mxu0 %v15119_v16  ;;  %v15167_v16 = vld [vmem:[#allocation11 + $0x308] ss:$16 sps:$4 sm:$0xff]  }
 0x4ed   : > { %6768 = vmatpush2.bf16.msra.mxu1 %v15116_v36  ;;  %7698 = vmatprep.subr.bf16.mxu0 %v15172_v17  ;;  %v15209_v36 = vld [vmem:[#allocation14 + $0x140] ss:$16 sps:$4 sm:$0xff]   ;;  %v15226_v17 = vld [vmem:[#allocation14 + $0x2c4] ss:$16 sps:$4 sm:$0xff]  }
 0x4ee   : > { %6823 = vmatprep.subr.bf16.mxu1 %v15124_v37  ;;  %v15211_v37 = vld [vmem:[#allocation14 + $0x144] ss:$16 sps:$4 sm:$0xff]  }
 0x4ef   : > { %6813 = vmatmul.mubr.bf16.vlgmr.msra.gmra.mxu0 %v17536_v29  ;;  %v15136_v29 = vld [vmem:[#allocation11 + $0x26c] ss:$16 sps:$4 sm:$0xff]  }
 0x4f0   : > { %6770 = vmatmul.mubr.bf16.vlgmr.msra.gmra.mxu1 %v17557_v49  ;;  %7699 = vmatpush1.bf16.msra.mxu0 %v15170_v8  ;;  %v15223_v8 = vld [vmem:[#allocation14 + $0xec] ss:$16 sps:$4 sm:$0xff]  }
 0x4f1   : > { %6824 = vmatpush1.bf16.msra.mxu1 %v15122_v25  ;;  %6855 = vmatprep.mubr.bf16.mxu1 %v17560_v7  ;;  %v15134_v7 = vld [vmem:[#allocation11 + $0x268] ss:$16 sps:$4 sm:$0xff]   ;;  %v15212_v25 = vld [vmem:[#allocation14 + $0x120] ss:$16 sps:$4 sm:$0xff]  }
 0x4f2   : > { %6825 = vmatprep.subr.bf16.mxu1 %v15127_v23  ;;  %7700 = vmatprep.subr.bf16.mxu0 %v15175_v28  ;;  %v15214_v23 = vld [vmem:[#allocation14 + $0x124] ss:$16 sps:$4 sm:$0xff]   ;;  %v15224_v28 = vld [vmem:[#allocation14 + $0x2c0] ss:$16 sps:$4 sm:$0xff]  }
 0x4f4   : > { %7701 = vmatpush1.bf16.msra.mxu0 %v15173_v42  ;;  %v15236_v42 = vld [vmem:[#allocation14 + $0x280] ss:$16 sps:$4 sm:$0xff]  }
 0x4f5   : > { %6826 = vmatpush1.bf16.msra.mxu1 %v15125_v10  ;;  %7702 = vmatprep.subr.bf16.mxu0 %v15178_v18  ;;  %v15217_v10 = vld [vmem:[#allocation14 + $0x104] ss:$16 sps:$4 sm:$0xff]  }
 0x4f6   : > { %6827 = vmatprep.subr.bf16.mxu1 %v15130_v32  ;;  %v15215_v32 = vld [vmem:[#allocation14 + $0x100] ss:$16 sps:$4 sm:$0xff]   ;;  %v15244_v18 = vld [vmem:[#allocation14 + $0x264] ss:$16 sps:$4 sm:$0xff]  }
 0x4f8   : > { %7703 = vmatpush1.bf16.msra.mxu0 %v15176_v33  ;;  %v15248_v33 = vld [vmem:[#allocation14 + $0x240] ss:$16 sps:$4 sm:$0xff]  }
 0x4f9   : > { %6828 = vmatpush1.bf16.msra.mxu1 %v15128_v62  ;;  %7704 = vmatprep.subr.bf16.mxu0 %v15181_v22  ;;  %v15218_v62 = vld [vmem:[#allocation14 + $0x2e0] ss:$16 sps:$4 sm:$0xff]   ;;  %v15256_v22 = vld [vmem:[#allocation14 + $0x224] ss:$16 sps:$4 sm:$0xff]  }
 0x4fa   : > { %6829 = vmatprep.subr.bf16.mxu1 %v15133_v35  ;;  %v15220_v35 = vld [vmem:[#allocation14 + $0x2e4] ss:$16 sps:$4 sm:$0xff]  }
 0x4fc   : > { %7705 = vmatpush1.bf16.msra.mxu0 %v15179_v46  ;;  %v15260_v46 = vld [vmem:[#allocation14 + $0x200] ss:$16 sps:$4 sm:$0xff]  }
 0x4fd   : > { %6830 = vmatpush1.bf16.msra.mxu1 %v15131_v20  ;;  %7706 = vmatprep.subr.bf16.mxu0 %v15184_v59  ;;  %v15230_v20 = vld [vmem:[#allocation14 + $0x2a0] ss:$16 sps:$4 sm:$0xff]   ;;  %v5916_v59 = vpop.f32.mrf.mxu0 }
 0x4fe   : > { %6831 = vmatprep.subr.bf16.mxu1 %v15136_v29  ;;  %v15238_v29 = vld [vmem:[#allocation14 + $0x284] ss:$16 sps:$4 sm:$0xff]  }
 0x500   : > { %7707 = vmatpush1.bf16.msra.mxu0 %v15182_v2  ;;  %v5918_v2 = vpop.f32.mrf.mxu0 }
 0x501   : > { %6832 = vmatpush1.bf16.msra.mxu1 %v15134_v7  ;;  %7708 = vmatprep.subr.bf16.mxu0 %v15187_v56  ;;  %v15242_v7 = vld [vmem:[#allocation14 + $0x260] ss:$16 sps:$4 sm:$0xff]   ;;  %v15274_v56 = vld [vmem:[#allocation14 + $0x3c4] ss:$16 sps:$4 sm:$0xff]  }
 0x502   : > { %6833 = vmatprep.subr.bf16.mxu1 %v15139_v21  ;;  %v15250_v21 = vld [vmem:[#allocation14 + $0x244] ss:$16 sps:$4 sm:$0xff]  }
 0x504   : > { %7709 = vmatpush1.bf16.msra.mxu0 %v15185_v34  ;;  %v5920_v34 = vpop.f32.mrf.mxu0 }
 0x505   : > { %6834 = vmatpush1.bf16.msra.mxu1 %v15137_v24  ;;  %7710 = vmatprep.subr.bf16.mxu0 %v15190_v47  ;;  %v15254_v24 = vld [vmem:[#allocation14 + $0x220] ss:$16 sps:$4 sm:$0xff]   ;;  %v15280_v47 = vld [vmem:[#allocation14 + $0x3a4] ss:$16 sps:$4 sm:$0xff]  }
 0x506   : > { %6835 = vmatprep.subr.bf16.mxu1 %v15142_v27  ;;  %v15262_v27 = vld [vmem:[#allocation14 + $0x204] ss:$16 sps:$4 sm:$0xff]  }
 0x508   : > { %7711 = vmatpush1.bf16.msra.mxu0 %v15188_v45  ;;  %v5922_v45 = vpop.f32.mrf.mxu0 }
 0x509   : > { %6836 = vmatpush1.bf16.msra.mxu1 %v15140_v63  ;;  %7712 = vmatprep.subr.bf16.mxu0 %v15193_v52  ;;  %v15268_v63 = vld [vmem:[#allocation14 + $0x3e4] ss:$16 sps:$4 sm:$0xff]  }
 0x50a   : > { %6837 = vmatprep.subr.bf16.mxu1 %v15145_v1  ;;  %v15266_v1 = vld [vmem:[#allocation14 + $0x3e0] ss:$16 sps:$4 sm:$0xff]   ;;  %v15286_v52 = vld [vmem:[#allocation14 + $0x384] ss:$16 sps:$4 sm:$0xff]  }
 0x50c   : > { %7713 = vmatpush1.bf16.msra.mxu0 %v15191_v58  ;;  %v15284_v58 = vld [vmem:[#allocation14 + $0x380] ss:$16 sps:$4 sm:$0xff]  }
 0x50d   : > { %6838 = vmatpush1.bf16.msra.mxu1 %v15143_v9  ;;  %7714 = vmatprep.subr.bf16.mxu0 %v15196_v15  ;;  %v15292_v15 = vld [vmem:[#allocation14 + $0x364] ss:$16 sps:$4 sm:$0xff]  }
 0x50e   : > { %6839 = vmatprep.subr.bf16.mxu1 %v15148_v5  ;;  %v15272_v5 = vld [vmem:[#allocation14 + $0x3c0] ss:$16 sps:$4 sm:$0xff]  }
 0x510   : > { %7715 = vmatpush2.bf16.msra.mxu0 %v15194_v50  ;;  %v15290_v50 = vld [vmem:[#allocation14 + $0x360] ss:$16 sps:$4 sm:$0xff]  }
 0x511   : > { %6840 = vmatpush2.bf16.msra.mxu1 %v15146_v4  ;;  %7716 = vmatprep.subr.bf16.mxu0 %v15199_v39 }
 0x512   : > { %6841 = vmatprep.subr.bf16.mxu1 %v15151_v30  ;;  %v15278_v30 = vld [vmem:[#allocation14 + $0x3a0] ss:$16 sps:$4 sm:$0xff]  }
 0x514   : > { %7717 = vmatpush2.bf16.msra.mxu0 %v15197_v26 }
 0x515   : > { %6842 = vmatpush2.bf16.msra.mxu1 %v15149_v12  ;;  %7718 = vmatprep.subr.bf16.mxu0 %v15202_v40 }
 0x516   : > { %6843 = vmatprep.subr.bf16.mxu1 %v15154_v43 }
 0x518   : > { %7719 = vmatpush2.bf16.msra.mxu0 %v15200_v53 }
 0x519   : > { %6844 = vmatpush2.bf16.msra.mxu1 %v15152_v31  ;;  %7720 = vmatprep.subr.bf16.mxu0 %v15205_v14 }
 0x51a   : > { %6845 = vmatprep.subr.bf16.mxu1 %v15157_v38 }
 0x51c   : > { %7721 = vmatpush2.bf16.msra.mxu0 %v15203_v55  ;;  %v15298_v55 = vld [vmem:[#allocation14 + $0x344] ss:$16 sps:$4 sm:$0xff]  }
 0x51d   : > { %6846 = vmatpush2.bf16.msra.mxu1 %v15155_v57  ;;  %7722 = vmatprep.subr.bf16.mxu0 %v15208_v6  ;;  %v15302_v6 = vld [vmem:[#allocation14 + $0x320] ss:$16 sps:$4 sm:$0xff]  }
 0x51e   : > { %6847 = vmatprep.subr.bf16.mxu1 %v15160_v19 }
 0x520   : > { %7723 = vmatpush2.bf16.msra.mxu0 %v15206_v60  ;;  %v15308_v60 = vld [vmem:[#allocation14 + $0x300] ss:$16 sps:$4 sm:$0xff]  }
 0x521   : > { %6848 = vmatpush2.bf16.msra.mxu1 %v15158_v44  ;;  %7724 = vmatprep.subr.bf16.mxu0 %v15211_v37 }
 0x522   : > { %6849 = vmatprep.subr.bf16.mxu1 %v15163_v51 }
 0x524   : > { %7725 = vmatpush2.bf16.msra.mxu0 %v15209_v36 }
 0x525   : > { %6850 = vmatpush2.bf16.msra.mxu1 %v15161_v54  ;;  %7726 = vmatprep.subr.bf16.mxu0 %v15214_v23 }
 0x526   : > { %6851 = vmatprep.subr.bf16.mxu1 %v15166_v0  ;;  %v15296_v0 = vld [vmem:[#allocation14 + $0x340] ss:$16 sps:$4 sm:$0xff]  }
 0x528   : > { %7727 = vmatpush2.bf16.msra.mxu0 %v15212_v25 }
 0x529   : > { %6852 = vmatpush2.bf16.msra.mxu1 %v15164_v11  ;;  %7728 = vmatprep.subr.bf16.mxu0 %v15217_v10  ;;  %v15304_v11 = vld [vmem:[#allocation14 + $0x324] ss:$16 sps:$4 sm:$0xff]  }
 0x52a   : > { %6853 = vmatprep.subr.bf16.mxu1 %v15169_v61  ;;  %v15310_v61 = vld [vmem:[#allocation14 + $0x304] ss:$16 sps:$4 sm:$0xff]  }
 0x52c   : > { %7729 = vmatpush2.bf16.msra.mxu0 %v15215_v32 }
 0x52d   : > { %6854 = vmatpush2.bf16.msra.mxu1 %v15167_v16  ;;  %7784 = vmatprep.subr.bf16.mxu0 %v15223_v8  ;;  %v15316_v16 = vld [vmem:[#allocation14 + $0x2ec] ss:$16 sps:$4 sm:$0xff]  }
 0x52e   : > { %7741 = vmatprep.subr.bf16.mxu1 %v15220_v35  ;;  %v17587_v8 = vld [vmem:[#allocation13] sm:$0xf] }
 0x52f   : > { %v6002_v12 = vpop.f32.mrf.mxu0 }
 0x530   : > { %6856 = vmatmul.mubr.bf16.vlgmr.msra.gmra.mxu1 %v17557_v49  ;;  %v15232_v49 = vld [vmem:[#allocation14 + $0x2a4] ss:$16 sps:$4 sm:$0xff]   ;;  %v5959_v9 = vpop.f32.mrf.mxu1 }
 0x531   : > { %7742 = vmatpush1.bf16.msra.mxu1 %v15218_v62  ;;  %v6004_v31 = vpop.f32.mrf.mxu0  ;;  %v5960_v10 = vadd.f32 %v5959_v9, %v5916_v59 }
 0x532   : > { %7743 = vmatprep.subr.bf16.mxu1 %v15226_v17  ;;  %v5961_v4 = vpop.f32.mrf.mxu1 }
 0x533   : > { %v6006_v19 = vpop.f32.mrf.mxu0  ;;  %v5962_v23 = vadd.f32 %v5961_v4, %v5918_v2  ;;  %v15221_v4 = vld [vmem:[#allocation14 + $0xe8] ss:$16 sps:$4 sm:$0xff]  }
 0x534   : > { %v5963_v43 = vpop.f32.mrf.mxu1 }
 0x535   : > { %7744 = vmatpush1.bf16.msra.mxu1 %v15224_v28  ;;  %v6008_v53 = vpop.f32.mrf.mxu0  ;;  %v5964_v62 = vadd.f32 %v5963_v43, %v5920_v34  ;;  %v15233_v43 = vld [vmem:[#allocation14 + $0xa8] ss:$16 sps:$4 sm:$0xff]  }
 0x536   : > { %7745 = vmatprep.subr.bf16.mxu1 %v15232_v49  ;;  %v5965_v38 = vpop.f32.mrf.mxu1 }
 0x539   : > { %7746 = vmatpush1.bf16.msra.mxu1 %v15230_v20  ;;  %v5966_v20 = vadd.f32 %v5965_v38, %v5922_v45  ;;  %v15229_v45 = vld [vmem:[#allocation14 + $0xcc] ss:$16 sps:$4 sm:$0xff]   ;;  %v15245_v38 = vld [vmem:[#allocation14 + $0x68] ss:$16 sps:$4 sm:$0xff]  }
 0x53a   : > { %7747 = vmatprep.subr.bf16.mxu1 %v15238_v29 }
 0x53d   : > { %7748 = vmatpush1.bf16.msra.mxu1 %v15236_v42 }
 0x53e   : > { %7749 = vmatprep.subr.bf16.mxu1 %v15244_v18  ;;  %v6875_v18 = vrot.slane %v17587_v8, %v17289_v48 }
 0x541   : > { %7750 = vmatpush1.bf16.msra.mxu1 %v15242_v7 }
 0x542   : > { %7751 = vmatprep.subr.bf16.mxu1 %v15250_v21  ;;  %v6871_v21 = vrot.slane %v17587_v8, %v17283_v41 }
 0x545   : > { %7752 = vmatpush1.bf16.msra.mxu1 %v15248_v33 }
 0x546   : > { %7753 = vmatprep.subr.bf16.mxu1 %v15256_v22 }
 0x549   : > { %7754 = vmatpush1.bf16.msra.mxu1 %v15254_v24 }
 0x54a   : > { %7755 = vmatprep.subr.bf16.mxu1 %v15262_v27 }
 0x54d   : > { %7756 = vmatpush1.bf16.msra.mxu1 %v15260_v46 }
 0x54e   : > { %7757 = vmatprep.subr.bf16.mxu1 %v15268_v63 }
 0x551   : > { %7758 = vmatpush2.bf16.msra.mxu1 %v15266_v1 }
 0x552   : > { %7759 = vmatprep.subr.bf16.mxu1 %v15274_v56 }
 0x555   : > { %7760 = vmatpush2.bf16.msra.mxu1 %v15272_v5 }
 0x556   : > { %7761 = vmatprep.subr.bf16.mxu1 %v15280_v47 }
 0x559   : > { %7762 = vmatpush2.bf16.msra.mxu1 %v15278_v30 }
 0x55a   : > { %7763 = vmatprep.subr.bf16.mxu1 %v15286_v52  ;;  %v15227_v52 = vld [vmem:[#allocation14 + $0xc8] ss:$16 sps:$4 sm:$0xff]  }
 0x55d   : > { %7764 = vmatpush2.bf16.msra.mxu1 %v15284_v58  ;;  %v15241_v58 = vld [vmem:[#allocation14 + $0x8c] ss:$16 sps:$4 sm:$0xff]  }
 0x55e   : > { %7765 = vmatprep.subr.bf16.mxu1 %v15292_v15  ;;  %v15239_v15 = vld [vmem:[#allocation14 + $0x88] ss:$16 sps:$4 sm:$0xff]  }
 0x561   : > { %7766 = vmatpush2.bf16.msra.mxu1 %v15290_v50  ;;  %v15253_v50 = vld [vmem:[#allocation14 + $0x4c] ss:$16 sps:$4 sm:$0xff]  }
 0x562   : > { %7767 = vmatprep.subr.bf16.mxu1 %v15298_v55  ;;  %v15277_v55 = vld [vmem:[#allocation14 + $0x1cc] ss:$16 sps:$4 sm:$0xff]  }
 0x565   : > { %7768 = vmatpush2.bf16.msra.mxu1 %v15296_v0  ;;  %v15269_v0 = vld [vmem:[#allocation14 + $0x1e8] ss:$16 sps:$4 sm:$0xff]  }
 0x566   : > { %7769 = vmatprep.subr.bf16.mxu1 %v15304_v11  ;;  %v15283_v11 = vld [vmem:[#allocation14 + $0x1ac] ss:$16 sps:$4 sm:$0xff]  }
 0x569   : > { %7770 = vmatpush2.bf16.msra.mxu1 %v15302_v6  ;;  %v15275_v6 = vld [vmem:[#allocation14 + $0x1c8] ss:$16 sps:$4 sm:$0xff]  }
 0x56a   : > { %7771 = vmatprep.subr.bf16.mxu1 %v15310_v61  ;;  %v15281_v61 = vld [vmem:[#allocation14 + $0x1a8] ss:$16 sps:$4 sm:$0xff]  }
 0x56d   : > { %7772 = vmatpush2.bf16.msra.mxu1 %v15308_v60 }
 0x56e   : > { %7827 = vmatprep.subr.bf16.mxu1 %v15316_v16  ;;  %v15289_v16 = vld [vmem:[#allocation14 + $0x18c] ss:$16 sps:$4 sm:$0xff]  }
 0x56f   : > { %v6728_v36 = vpop.f32.mrf.mxu0 }
 0x570   : > { %v6045_v39 = vpop.f32.mrf.mxu1  ;;  %v6729_v17 = vadd.f32 %v6728_v36, %v5960_v10  ;;  %v15287_v36 = vld [vmem:[#allocation14 + $0x188] ss:$16 sps:$4 sm:$0xff]  }
 0x571   : > { %v17579_v57 = vadd.f32 %v6045_v39, %v6002_v12  ;;  %v6730_v37 = vpop.f32.mrf.mxu0  ;;  %v15235_v12 = vld [vmem:[#allocation14 + $0xac] ss:$16 sps:$4 sm:$0xff]   ;;  %v15251_v39 = vld [vmem:[#allocation14 + $0x48] ss:$16 sps:$4 sm:$0xff]  }
 0x572   : > { %v6047_v26 = vpop.f32.mrf.mxu1  ;;  %v6731_v35 = vadd.f32 %v6730_v37, %v5962_v23  ;;  %v15293_v23 = vld [vmem:[#allocation14 + $0x168] ss:$16 sps:$4 sm:$0xff]  }
 0x573   : > { %v17581_v40 = vadd.f32 %v6047_v26, %v6004_v31  ;;  %v6732_v25 = vpop.f32.mrf.mxu0  ;;  %v15247_v31 = vld [vmem:[#allocation14 + $0x6c] ss:$16 sps:$4 sm:$0xff]   ;;  %v15257_v26 = vld [vmem:[#allocation14 + $0x28] ss:$16 sps:$4 sm:$0xff]  }
 0x574   : > { %v6049_v44 = vpop.f32.mrf.mxu1  ;;  %v6733_v29 = vadd.f32 %v6732_v25, %v5964_v62  ;;  %v15295_v25 = vld [vmem:[#allocation14 + $0x16c] ss:$16 sps:$4 sm:$0xff]  }
 0x575   : > { %v17583_v51 = vadd.f32 %v6049_v44, %v6006_v19  ;;  %v6734_v28 = vpop.f32.mrf.mxu0  ;;  %v15259_v19 = vld [vmem:[#allocation14 + $0x2c] ss:$16 sps:$4 sm:$0xff]  }
 0x576   : > { %v6051_v14 = vpop.f32.mrf.mxu1  ;;  %v6735_v22 = vadd.f32 %v6734_v28, %v5966_v20  ;;  %v15265_v44 = vld [vmem:[#allocation14 + $0xc] ss:$16 sps:$4 sm:$0xff]   ;;  %v15299_v20 = vld [vmem:[#allocation14 + $0x148] ss:$16 sps:$4 sm:$0xff]  }
 0x577   : > { %v17585_v54 = vadd.f32 %v6051_v14, %v6008_v53  ;;  %v15263_v53 = vld [vmem:[#allocation14 + $0x8] ss:$16 sps:$4 sm:$0xff]   ;;  %v15271_v14 = vld [vmem:[#allocation14 + $0x1ec] ss:$16 sps:$4 sm:$0xff]  }
 0x5af   : > { %v6814_v60 = vpop.f32.mrf.mxu0 }
 0x5b0   : > { %v6771_v32 = vpop.f32.mrf.mxu1  ;;  %v6815_v62 = vadd.f32 %v6814_v60, %v17579_v57  ;;  %v15337_v60 = vld [vmem:[#allocation14 + $0x20c] ss:$16 sps:$4 sm:$0xff]  }
 0x5b1   : > { %v6772_v7 = vadd.f32 %v6771_v32, %v6729_v17  ;;  %v6816_v37 = vpop.f32.mrf.mxu0  ;;  %v15301_v32 = vld [vmem:[#allocation14 + $0x14c] ss:$16 sps:$4 sm:$0xff]  }
 0x5b2   : > { %v6773_v49 = vpop.f32.mrf.mxu1  ;;  %v6817_v17 = vadd.f32 %v6816_v37, %v17581_v40  ;;  %v15335_v37 = vld [vmem:[#allocation14 + $0x208] ss:$16 sps:$4 sm:$0xff]  }
 0x5b3   : > { %v6774_v42 = vadd.f32 %v6773_v49, %v6731_v35  ;;  %v6888_v1 = vadd.f32 %v6871_v21, %v6772_v7  ;;  %v6818_v10 = vpop.f32.mrf.mxu0  ;;  %v6879_v49 = vrot.slane %v17587_v8, %v17969_v13 }
 0x5b4   : > { %v6775_v33 = vpop.f32.mrf.mxu1  ;;  %v6819_v7 = vadd.f32 %v6818_v10, %v17583_v51  ;;  %v15382_v10 = vld [vmem:[#allocation17 + $0x24] ss:$16 sps:$4 sm:$0xff]  }
 0x5b5   : > { %v6776_v24 = vadd.f32 %v6775_v33, %v6733_v29  ;;  %v6889_v46 = vadd.f32 %v6875_v18, %v6774_v42  ;;  %v6896_v34 = vmax.f32 %v6888_v1, 0.0  ;;  %v6820_v29 = vpop.f32.mrf.mxu0  ;;  %v6883_v33 = vrot.slane %v17587_v8, %v17970_v3 }
 0x5b6   : > { %v6777_v27 = vpop.f32.mrf.mxu1 }
 0x5b7   : > { %v6892_v59 = vadd.f32 %v6871_v21, %v6776_v24  ;;  %v6778_v63 = vadd.f32 %v6777_v27, %v6735_v22  ;;  %v6897_v9 = vmax.f32 %v6889_v46, 0.0  ;;  %v6821_v22 = vadd.f32 %v6820_v29, %v17585_v54  ;;  %v15305_v27 = vld [vmem:[#allocation14 + $0x128] ss:$16 sps:$4 sm:$0xff]  }
 0x5b8   : > { %v15388_v29 = vld [vmem:[#allocation17 + $0x1e4] ss:$16 sps:$4 sm:$0xff]  }
 0x5b9   : > { %v6893_v2 = vadd.f32 %v6875_v18, %v6778_v63  ;;  %v6900_v56 = vmax.f32 %v6892_v59, 0.0  ;;  %v15307_v18 = vld [vmem:[#allocation14 + $0x12c] ss:$16 sps:$4 sm:$0xff]  }
 0x5ba   : > { %v15313_v59 = vld [vmem:[#allocation14 + $0x10c] ss:$16 sps:$4 sm:$0xff]  }
 0x5bb   : > { %v6901_v5 = vmax.f32 %v6893_v2, 0.0  ;;  %v17593_v30 = vpack.c.bf16 %v6900_v56, %v6896_v34 }
 0x5bd   : > { %v6905_v47 = vpack.c.bf16 %v6901_v5, %v6897_v9  ;;  %v15311_v5 = vld [vmem:[#allocation14 + $0x108] ss:$16 sps:$4 sm:$0xff]  }
 0x5bf   : > { %7730 = vmatprep.mubr.bf16.mxu0 %v6905_v47 }
 0x5c0   : > { %7731 = vmatmul.mubr.bf16.vlgmr.msra.gmra.mxu0 %v17593_v30 }
 0x5c1   : > { %7785 = vmatpush1.bf16.msra.mxu0 %v15221_v4  ;;  %7816 = vmatprep.mubr.bf16.mxu0 %v6905_v47  ;;  %v15314_v4 = vld [vmem:[#allocation14 + $0x2e8] ss:$16 sps:$4 sm:$0xff]  }
 0x5c2   : > { %7786 = vmatprep.subr.bf16.mxu0 %v15229_v45  ;;  %v15319_v45 = vld [vmem:[#allocation14 + $0x2cc] ss:$16 sps:$4 sm:$0xff]  }
 0x5c5   : > { %7787 = vmatpush1.bf16.msra.mxu0 %v15227_v52  ;;  %v15317_v52 = vld [vmem:[#allocation14 + $0x2c8] ss:$16 sps:$4 sm:$0xff]  }
 0x5c6   : > { %7788 = vmatprep.subr.bf16.mxu0 %v15235_v12  ;;  %v15322_v12 = vld [vmem:[#allocation14 + $0x2ac] ss:$16 sps:$4 sm:$0xff]  }
 0x5c9   : > { %7789 = vmatpush1.bf16.msra.mxu0 %v15233_v43  ;;  %v15320_v43 = vld [vmem:[#allocation14 + $0x2a8] ss:$16 sps:$4 sm:$0xff]  }
 0x5ca   : > { %7790 = vmatprep.subr.bf16.mxu0 %v15241_v58  ;;  %v15325_v58 = vld [vmem:[#allocation14 + $0x28c] ss:$16 sps:$4 sm:$0xff]  }
 0x5cd   : > { %7791 = vmatpush1.bf16.msra.mxu0 %v15239_v15  ;;  %v15362_v15 = vld [vmem:[#allocation17 + $0xe0] ss:$16 sps:$4 sm:$0xff]  }
 0x5ce   : > { %7792 = vmatprep.subr.bf16.mxu0 %v15247_v31  ;;  %v15364_v31 = vld [vmem:[#allocation17 + $0xe4] ss:$16 sps:$4 sm:$0xff]  }
 0x5d1   : > { %7793 = vmatpush1.bf16.msra.mxu0 %v15245_v38  ;;  %v15367_v38 = vld [vmem:[#allocation17 + $0xc4] ss:$16 sps:$4 sm:$0xff]  }
 0x5d2   : > { %7794 = vmatprep.subr.bf16.mxu0 %v15253_v50  ;;  %v15323_v50 = vld [vmem:[#allocation14 + $0x288] ss:$16 sps:$4 sm:$0xff]  }
 0x5d5   : > { %7795 = vmatpush1.bf16.msra.mxu0 %v15251_v39  ;;  %v15328_v39 = vld [vmem:[#allocation14 + $0x26c] ss:$16 sps:$4 sm:$0xff]  }
 0x5d6   : > { %7796 = vmatprep.subr.bf16.mxu0 %v15259_v19  ;;  %v15370_v19 = vld [vmem:[#allocation17 + $0xa4] ss:$16 sps:$4 sm:$0xff]  }
 0x5d9   : > { %7797 = vmatpush1.bf16.msra.mxu0 %v15257_v26  ;;  %v15326_v26 = vld [vmem:[#allocation14 + $0x268] ss:$16 sps:$4 sm:$0xff]  }
 0x5da   : > { %7798 = vmatprep.subr.bf16.mxu0 %v15265_v44  ;;  %v15331_v44 = vld [vmem:[#allocation14 + $0x24c] ss:$16 sps:$4 sm:$0xff]  }
 0x5dd   : > { %7799 = vmatpush1.bf16.msra.mxu0 %v15263_v53  ;;  %v15368_v53 = vld [vmem:[#allocation17 + $0xa0] ss:$16 sps:$4 sm:$0xff]  }
 0x5de   : > { %7800 = vmatprep.subr.bf16.mxu0 %v15271_v14  ;;  %v15373_v14 = vld [vmem:[#allocation17 + $0x84] ss:$16 sps:$4 sm:$0xff]  }
 0x5e1   : > { %7801 = vmatpush2.bf16.msra.mxu0 %v15269_v0  ;;  %v15329_v0 = vld [vmem:[#allocation14 + $0x248] ss:$16 sps:$4 sm:$0xff]  }
 0x5e2   : > { %7802 = vmatprep.subr.bf16.mxu0 %v15277_v55  ;;  %v15334_v55 = vld [vmem:[#allocation14 + $0x22c] ss:$16 sps:$4 sm:$0xff]  }
 0x5e5   : > { %7803 = vmatpush2.bf16.msra.mxu0 %v15275_v6  ;;  %v15371_v6 = vld [vmem:[#allocation17 + $0x80] ss:$16 sps:$4 sm:$0xff]  }
 0x5e6   : > { %7804 = vmatprep.subr.bf16.mxu0 %v15283_v11  ;;  %v15376_v11 = vld [vmem:[#allocation17 + $0x64] ss:$16 sps:$4 sm:$0xff]  }
 0x5e9   : > { %7805 = vmatpush2.bf16.msra.mxu0 %v15281_v61  ;;  %v15332_v61 = vld [vmem:[#allocation14 + $0x228] ss:$16 sps:$4 sm:$0xff]  }
 0x5ea   : > { %7806 = vmatprep.subr.bf16.mxu0 %v15289_v16  ;;  %v15374_v16 = vld [vmem:[#allocation17 + $0x60] ss:$16 sps:$4 sm:$0xff]  }
 0x5ed   : > { %7807 = vmatpush2.bf16.msra.mxu0 %v15287_v36  ;;  %v15379_v36 = vld [vmem:[#allocation17 + $0x44] ss:$16 sps:$4 sm:$0xff]  }
 0x5ee   : > { %7808 = vmatprep.subr.bf16.mxu0 %v15295_v25  ;;  %v15340_v25 = vld [vmem:[#allocation14 + $0x3ec] ss:$16 sps:$4 sm:$0xff]  }
 0x5f0   : > { %v6857_v35 = vpop.f32.mrf.mxu1 }
 0x5f1   : > { %v6858_v28 = vadd.f32 %v6857_v35, %v6815_v62  ;;  %7809 = vmatpush2.bf16.msra.mxu0 %v15293_v23  ;;  %v15377_v23 = vld [vmem:[#allocation17 + $0x40] ss:$16 sps:$4 sm:$0xff]   ;;  %v15343_v62 = vld [vmem:[#allocation14 + $0x3cc] ss:$16 sps:$4 sm:$0xff]  }
 0x5f2   : > { %v6859_v42 = vpop.f32.mrf.mxu1  ;;  %7810 = vmatprep.subr.bf16.mxu0 %v15301_v32  ;;  %v15338_v32 = vld [vmem:[#allocation14 + $0x3e8] ss:$16 sps:$4 sm:$0xff]   ;;  %v15380_v35 = vld [vmem:[#allocation17 + $0x20] ss:$16 sps:$4 sm:$0xff]  }
 0x5f3   : > { %v6860_v21 = vadd.f32 %v6859_v42, %v6817_v17  ;;  %v6890_v40 = vadd.f32 %v6879_v49, %v6858_v28  ;;  %v15385_v17 = vld [vmem:[#allocation17 + $0x4] ss:$16 sps:$4 sm:$0xff]  }
 0x5f4   : > { %v6861_v57 = vpop.f32.mrf.mxu1  ;;  %v15341_v28 = vld [vmem:[#allocation14 + $0x3c8] ss:$16 sps:$4 sm:$0xff]  }
 0x5f5   : > { %v6862_v24 = vadd.f32 %v6861_v57, %v6819_v7  ;;  %7811 = vmatpush2.bf16.msra.mxu0 %v15299_v20  ;;  %v6891_v63 = vadd.f32 %v6883_v33, %v6860_v21  ;;  %v6898_v56 = vmax.f32 %v6890_v40, 0.0  ;;  %v15383_v20 = vld [vmem:[#allocation17] ss:$16 sps:$4 sm:$0xff]   ;;  %v15344_v42 = vld [vmem:[#allocation14 + $0x3a8] ss:$16 sps:$4 sm:$0xff]  }
 0x5f6   : > { %v6863_v46 = vpop.f32.mrf.mxu1  ;;  %7812 = vmatprep.subr.bf16.mxu0 %v15307_v18  ;;  %v15349_v18 = vld [vmem:[#allocation14 + $0x38c] ss:$16 sps:$4 sm:$0xff]   ;;  %v15386_v7 = vld [vmem:[#allocation17 + $0x1e0] ss:$16 sps:$4 sm:$0xff]   ;;  %v15391_v21 = vld [vmem:[#allocation17 + $0x1c4] ss:$16 sps:$4 sm:$0xff]  }
 0x5f7   : > { %v6894_v1 = vadd.f32 %v6879_v49, %v6862_v24  ;;  %v6864_v2 = vadd.f32 %v6863_v46, %v6821_v22  ;;  %v6899_v8 = vmax.f32 %v6891_v63, 0.0  ;;  %v15346_v49 = vld [vmem:[#allocation14 + $0x3ac] ss:$16 sps:$4 sm:$0xff]   ;;  %v15389_v22 = vld [vmem:[#allocation17 + $0x1c0] ss:$16 sps:$4 sm:$0xff]  }
 0x5f8   : > { %v15352_v57 = vld [vmem:[#allocation14 + $0x36c] ss:$16 sps:$4 sm:$0xff]   ;;  %v15394_v40 = vld [vmem:[#allocation17 + $0x1a4] ss:$16 sps:$4 sm:$0xff]   ;;  %v15392_v46 = vld [vmem:[#allocation17 + $0x1a0] ss:$16 sps:$4 sm:$0xff]  }
 0x5f9   : > { %v6902_v9 = vmax.f32 %v6894_v1, 0.0  ;;  %v6895_v51 = vadd.f32 %v6883_v33, %v6864_v2  ;;  %7813 = vmatpush2.bf16.msra.mxu0 %v15305_v27  ;;  %v15347_v33 = vld [vmem:[#allocation14 + $0x388] ss:$16 sps:$4 sm:$0xff]   ;;  %v15355_v27 = vld [vmem:[#allocation14 + $0x34c] ss:$16 sps:$4 sm:$0xff]  }
 0x5fa   : > { %7814 = vmatprep.subr.bf16.mxu0 %v15313_v59  ;;  %v15350_v24 = vld [vmem:[#allocation14 + $0x368] ss:$16 sps:$4 sm:$0xff]   ;;  %v15358_v1 = vld [vmem:[#allocation14 + $0x32c] ss:$16 sps:$4 sm:$0xff]   ;;  %v15395_v2 = vld [vmem:[#allocation17 + $0x180] ss:$16 sps:$4 sm:$0xff]  }
 0x5fb   : > { %v17604_v34 = vpack.c.bf16 %v6902_v9, %v6898_v56  ;;  %v6903_v54 = vmax.f32 %v6895_v51, 0.0  ;;  %v15397_v59 = vld [vmem:[#allocation17 + $0x184] ss:$16 sps:$4 sm:$0xff]   ;;  %v15361_v51 = vld [vmem:[#allocation14 + $0x30c] ss:$16 sps:$4 sm:$0xff]  }
 0x5fc   : > { %v15353_v63 = vld [vmem:[#allocation14 + $0x348] ss:$16 sps:$4 sm:$0xff]  }
 0x5fd   : > { %7815 = vmatpush2.bf16.msra.mxu0 %v15311_v5  ;;  %v6907_v47 = vpack.c.bf16 %v6903_v54, %v6899_v8  ;;  %v15400_v56 = vld [vmem:[#allocation17 + $0x164] ss:$16 sps:$4 sm:$0xff]   ;;  %v15398_v5 = vld [vmem:[#allocation17 + $0x160] ss:$16 sps:$4 sm:$0xff]  }
 0x5fe   : > { %8672 = vmatprep.subr.bf16.mxu0 %v15364_v31  ;;  %v15356_v9 = vld [vmem:[#allocation14 + $0x328] ss:$16 sps:$4 sm:$0xff]   ;;  %v15401_v54 = vld [vmem:[#allocation17 + $0x140] ss:$16 sps:$4 sm:$0xff]  }
 0x5ff   : > { %7773 = vmatprep.mubr.bf16.mxu1 %v6907_v47  ;;  %v15359_v8 = vld [vmem:[#allocation14 + $0x308] ss:$16 sps:$4 sm:$0xff]   ;;  %v15416_v31 = vld [vmem:[#allocation17 + $0x2c0] ss:$16 sps:$4 sm:$0xff]  }
 0x600   : > { %7817 = vmatmul.mubr.bf16.vlgmr.msra.gmra.mxu0 %v17593_v30  ;;  %7774 = vmatmul.mubr.bf16.vlgmr.msra.gmra.mxu1 %v17604_v34  ;;  %v15365_v30 = vld [vmem:[#allocation17 + $0xc0] ss:$16 sps:$4 sm:$0xff]  }
 0x601   : > { %7828 = vmatpush1.bf16.msra.mxu1 %v15314_v4  ;;  %7859 = vmatprep.mubr.bf16.mxu1 %v6907_v47  ;;  %v15403_v47 = vld [vmem:[#allocation17 + $0x144] ss:$16 sps:$4 sm:$0xff]   ;;  %v15404_v4 = vld [vmem:[#allocation17 + $0x120] ss:$16 sps:$4 sm:$0xff]  }
 0x602   : > { %7829 = vmatprep.subr.bf16.mxu1 %v15319_v45  ;;  %8673 = vmatpush1.bf16.msra.mxu0 %v15362_v15  ;;  %v15406_v45 = vld [vmem:[#allocation17 + $0x124] ss:$16 sps:$4 sm:$0xff]   ;;  %v15415_v15 = vld [vmem:[#allocation17 + $0xec] ss:$16 sps:$4 sm:$0xff]  }
 0x603   : > { %8674 = vmatprep.subr.bf16.mxu0 %v15367_v38  ;;  %v15418_v38 = vld [vmem:[#allocation17 + $0x2c4] ss:$16 sps:$4 sm:$0xff]  }
 0x605   : > { %7830 = vmatpush1.bf16.msra.mxu1 %v15317_v52  ;;  %v15409_v52 = vld [vmem:[#allocation17 + $0x104] ss:$16 sps:$4 sm:$0xff]  }
 0x606   : > { %7831 = vmatprep.subr.bf16.mxu1 %v15322_v12  ;;  %8675 = vmatpush1.bf16.msra.mxu0 %v15365_v30  ;;  %v15410_v12 = vld [vmem:[#allocation17 + $0x2e0] ss:$16 sps:$4 sm:$0xff]   ;;  %v15430_v30 = vld [vmem:[#allocation17 + $0x284] ss:$16 sps:$4 sm:$0xff]  }
 0x607   : > { %8676 = vmatprep.subr.bf16.mxu0 %v15370_v19  ;;  %v15434_v19 = vld [vmem:[#allocation17 + $0x260] ss:$16 sps:$4 sm:$0xff]  }
 0x609   : > { %7832 = vmatpush1.bf16.msra.mxu1 %v15320_v43  ;;  %v15407_v43 = vld [vmem:[#allocation17 + $0x100] ss:$16 sps:$4 sm:$0xff]  }
 0x60a   : > { %7833 = vmatprep.subr.bf16.mxu1 %v15325_v58  ;;  %8677 = vmatpush1.bf16.msra.mxu0 %v15368_v53  ;;  %v15412_v58 = vld [vmem:[#allocation17 + $0x2e4] ss:$16 sps:$4 sm:$0xff]  }
 0x60b   : > { %8678 = vmatprep.subr.bf16.mxu0 %v15373_v14  ;;  %v15442_v53 = vld [vmem:[#allocation17 + $0x244] ss:$16 sps:$4 sm:$0xff]   ;;  %v15446_v14 = vld [vmem:[#allocation17 + $0x220] ss:$16 sps:$4 sm:$0xff]  }
 0x60d   : > { %7834 = vmatpush1.bf16.msra.mxu1 %v15323_v50  ;;  %v15424_v50 = vld [vmem:[#allocation17 + $0x2a4] ss:$16 sps:$4 sm:$0xff]  }
 0x60e   : > { %7835 = vmatprep.subr.bf16.mxu1 %v15328_v39  ;;  %8679 = vmatpush1.bf16.msra.mxu0 %v15371_v6  ;;  %v15428_v39 = vld [vmem:[#allocation17 + $0x280] ss:$16 sps:$4 sm:$0xff]   ;;  %v15454_v6 = vld [vmem:[#allocation17 + $0x204] ss:$16 sps:$4 sm:$0xff]  }
 0x60f   : > { %8680 = vmatprep.subr.bf16.mxu0 %v15376_v11  ;;  %v15458_v11 = vld [vmem:[#allocation17 + $0x3e0] ss:$16 sps:$4 sm:$0xff]  }
 0x611   : > { %7836 = vmatpush1.bf16.msra.mxu1 %v15326_v26  ;;  %v15436_v26 = vld [vmem:[#allocation17 + $0x264] ss:$16 sps:$4 sm:$0xff]  }
 0x612   : > { %7837 = vmatprep.subr.bf16.mxu1 %v15331_v44  ;;  %8681 = vmatpush1.bf16.msra.mxu0 %v15374_v16  ;;  %v15440_v44 = vld [vmem:[#allocation17 + $0x240] ss:$16 sps:$4 sm:$0xff]   ;;  %v15466_v16 = vld [vmem:[#allocation17 + $0x3c4] ss:$16 sps:$4 sm:$0xff]  }
 0x613   : > { %8682 = vmatprep.subr.bf16.mxu0 %v15379_v36  ;;  %v15470_v36 = vld [vmem:[#allocation17 + $0x3a0] ss:$16 sps:$4 sm:$0xff]  }
 0x615   : > { %7838 = vmatpush1.bf16.msra.mxu1 %v15329_v0  ;;  %v15448_v0 = vld [vmem:[#allocation17 + $0x224] ss:$16 sps:$4 sm:$0xff]  }
 0x616   : > { %7839 = vmatprep.subr.bf16.mxu1 %v15334_v55  ;;  %8683 = vmatpush1.bf16.msra.mxu0 %v15377_v23  ;;  %v15452_v55 = vld [vmem:[#allocation17 + $0x200] ss:$16 sps:$4 sm:$0xff]   ;;  %v15478_v23 = vld [vmem:[#allocation17 + $0x384] ss:$16 sps:$4 sm:$0xff]  }
 0x617   : > { %8684 = vmatprep.subr.bf16.mxu0 %v15382_v10  ;;  %v15482_v10 = vld [vmem:[#allocation17 + $0x360] ss:$16 sps:$4 sm:$0xff]  }
 0x619   : > { %7840 = vmatpush1.bf16.msra.mxu1 %v15332_v61  ;;  %v15460_v61 = vld [vmem:[#allocation17 + $0x3e4] ss:$16 sps:$4 sm:$0xff]  }
 0x61a   : > { %7841 = vmatprep.subr.bf16.mxu1 %v15337_v60  ;;  %8685 = vmatpush1.bf16.msra.mxu0 %v15380_v35  ;;  %v15464_v60 = vld [vmem:[#allocation17 + $0x3c0] ss:$16 sps:$4 sm:$0xff]   ;;  %v15490_v35 = vld [vmem:[#allocation17 + $0x344] ss:$16 sps:$4 sm:$0xff]  }
 0x61b   : > { %8686 = vmatprep.subr.bf16.mxu0 %v15385_v17  ;;  %v15496_v17 = vld [vmem:[#allocation17 + $0x324] ss:$16 sps:$4 sm:$0xff]  }
 0x61d   : > { %7842 = vmatpush1.bf16.msra.mxu1 %v15335_v37  ;;  %v15472_v37 = vld [vmem:[#allocation17 + $0x3a4] ss:$16 sps:$4 sm:$0xff]  }
 0x61e   : > { %7843 = vmatprep.subr.bf16.mxu1 %v15340_v25  ;;  %8687 = vmatpush1.bf16.msra.mxu0 %v15383_v20  ;;  %v15476_v25 = vld [vmem:[#allocation17 + $0x380] ss:$16 sps:$4 sm:$0xff]   ;;  %v15502_v20 = vld [vmem:[#allocation17 + $0x304] ss:$16 sps:$4 sm:$0xff]  }
 0x61f   : > { %8688 = vmatprep.subr.bf16.mxu0 %v15388_v29  ;;  %v15508_v29 = vld [vmem:[#allocation17 + $0x2ec] ss:$16 sps:$4 sm:$0xff]  }
 0x621   : > { %7844 = vmatpush2.bf16.msra.mxu1 %v15338_v32  ;;  %v15484_v32 = vld [vmem:[#allocation17 + $0x364] ss:$16 sps:$4 sm:$0xff]  }
 0x622   : > { %7845 = vmatprep.subr.bf16.mxu1 %v15343_v62  ;;  %8689 = vmatpush2.bf16.msra.mxu0 %v15386_v7  ;;  %v15488_v62 = vld [vmem:[#allocation17 + $0x340] ss:$16 sps:$4 sm:$0xff]   ;;  %v17609_v7 = vld [vmem:[#allocation16] sm:$0xf] }
 0x623   : > { %8690 = vmatprep.subr.bf16.mxu0 %v15391_v21 }
 0x625   : > { %7846 = vmatpush2.bf16.msra.mxu1 %v15341_v28  ;;  %v15494_v28 = vld [vmem:[#allocation17 + $0x320] ss:$16 sps:$4 sm:$0xff]  }
 0x626   : > { %7847 = vmatprep.subr.bf16.mxu1 %v15346_v49  ;;  %8691 = vmatpush2.bf16.msra.mxu0 %v15389_v22  ;;  %v15500_v49 = vld [vmem:[#allocation17 + $0x300] ss:$16 sps:$4 sm:$0xff]  }
 0x627   : > { %8692 = vmatprep.subr.bf16.mxu0 %v15394_v40 }
 0x629   : > { %7848 = vmatpush2.bf16.msra.mxu1 %v15344_v42 }
 0x62a   : > { %7849 = vmatprep.subr.bf16.mxu1 %v15349_v18  ;;  %8693 = vmatpush2.bf16.msra.mxu0 %v15392_v46 }
 0x62b   : > { %8694 = vmatprep.subr.bf16.mxu0 %v15397_v59 }
 0x62d   : > { %7850 = vmatpush2.bf16.msra.mxu1 %v15347_v33  ;;  %v7045_v33 = vrot.slane %v17609_v7, %v17289_v48 }
 0x62e   : > { %7851 = vmatprep.subr.bf16.mxu1 %v15352_v57  ;;  %8695 = vmatpush2.bf16.msra.mxu0 %v15395_v2  ;;  %v7041_v57 = vrot.slane %v17609_v7, %v17283_v41 }
 0x62f   : > { %8696 = vmatprep.subr.bf16.mxu0 %v15400_v56 }
 0x631   : > { %7852 = vmatpush2.bf16.msra.mxu1 %v15350_v24 }
 0x632   : > { %7853 = vmatprep.subr.bf16.mxu1 %v15355_v27  ;;  %8697 = vmatpush2.bf16.msra.mxu0 %v15398_v5 }
 0x633   : > { %8698 = vmatprep.subr.bf16.mxu0 %v15403_v47 }
 0x635   : > { %7854 = vmatpush2.bf16.msra.mxu1 %v15353_v63 }
 0x636   : > { %7855 = vmatprep.subr.bf16.mxu1 %v15358_v1  ;;  %8699 = vmatpush2.bf16.msra.mxu0 %v15401_v54 }
 0x637   : > { %8700 = vmatprep.subr.bf16.mxu0 %v15406_v45 }
 0x639   : > { %7856 = vmatpush2.bf16.msra.mxu1 %v15356_v9 }
 0x63a   : > { %7857 = vmatprep.subr.bf16.mxu1 %v15361_v51  ;;  %8701 = vmatpush2.bf16.msra.mxu0 %v15404_v4 }
 0x63b   : > { %8702 = vmatprep.subr.bf16.mxu0 %v15409_v52  ;;  %v15413_v52 = vld [vmem:[#allocation17 + $0xe8] ss:$16 sps:$4 sm:$0xff]  }
 0x63d   : > { %7858 = vmatpush2.bf16.msra.mxu1 %v15359_v8 }
 0x63e   : > { %8715 = vmatprep.subr.bf16.mxu1 %v15412_v58  ;;  %8703 = vmatpush2.bf16.msra.mxu0 %v15407_v43  ;;  %v15421_v43 = vld [vmem:[#allocation17 + $0xcc] ss:$16 sps:$4 sm:$0xff]   ;;  %v15419_v58 = vld [vmem:[#allocation17 + $0xc8] ss:$16 sps:$4 sm:$0xff]  }
 0x63f   : > { %8758 = vmatprep.subr.bf16.mxu0 %v15415_v15  ;;  %v15427_v15 = vld [vmem:[#allocation17 + $0xac] ss:$16 sps:$4 sm:$0xff]  }
 0x640   : > { %7860 = vmatmul.mubr.bf16.vlgmr.msra.gmra.mxu1 %v17604_v34  ;;  %v15422_v34 = vld [vmem:[#allocation17 + $0x2a0] ss:$16 sps:$4 sm:$0xff]  }
 0x641   : > { %8716 = vmatpush1.bf16.msra.mxu1 %v15410_v12 }
 0x642   : > { %8717 = vmatprep.subr.bf16.mxu1 %v15418_v38  ;;  %v15433_v38 = vld [vmem:[#allocation17 + $0x8c] ss:$16 sps:$4 sm:$0xff]  }
 0x645   : > { %8718 = vmatpush1.bf16.msra.mxu1 %v15416_v31  ;;  %v15425_v31 = vld [vmem:[#allocation17 + $0xa8] ss:$16 sps:$4 sm:$0xff]  }
 0x646   : > { %8719 = vmatprep.subr.bf16.mxu1 %v15424_v50  ;;  %v15439_v50 = vld [vmem:[#allocation17 + $0x6c] ss:$16 sps:$4 sm:$0xff]  }
 0x649   : > { %8720 = vmatpush1.bf16.msra.mxu1 %v15422_v34  ;;  %v15431_v34 = vld [vmem:[#allocation17 + $0x88] ss:$16 sps:$4 sm:$0xff]  }
 0x64a   : > { %8721 = vmatprep.subr.bf16.mxu1 %v15430_v30  ;;  %v15445_v30 = vld [vmem:[#allocation17 + $0x4c] ss:$16 sps:$4 sm:$0xff]  }
 0x64d   : > { %8722 = vmatpush1.bf16.msra.mxu1 %v15428_v39  ;;  %v15437_v39 = vld [vmem:[#allocation17 + $0x68] ss:$16 sps:$4 sm:$0xff]  }
 0x64e   : > { %8723 = vmatprep.subr.bf16.mxu1 %v15436_v26  ;;  %v15451_v26 = vld [vmem:[#allocation17 + $0x2c] ss:$16 sps:$4 sm:$0xff]  }
 0x651   : > { %8724 = vmatpush1.bf16.msra.mxu1 %v15434_v19  ;;  %v15443_v19 = vld [vmem:[#allocation17 + $0x48] ss:$16 sps:$4 sm:$0xff]  }
 0x652   : > { %8725 = vmatprep.subr.bf16.mxu1 %v15442_v53  ;;  %v15457_v53 = vld [vmem:[#allocation17 + $0xc] ss:$16 sps:$4 sm:$0xff]  }
 0x655   : > { %8726 = vmatpush1.bf16.msra.mxu1 %v15440_v44  ;;  %v15449_v44 = vld [vmem:[#allocation17 + $0x28] ss:$16 sps:$4 sm:$0xff]  }
 0x656   : > { %8727 = vmatprep.subr.bf16.mxu1 %v15448_v0  ;;  %v15463_v0 = vld [vmem:[#allocation17 + $0x1ec] ss:$16 sps:$4 sm:$0xff]  }
 0x659   : > { %8728 = vmatpush1.bf16.msra.mxu1 %v15446_v14  ;;  %v15455_v14 = vld [vmem:[#allocation17 + $0x8] ss:$16 sps:$4 sm:$0xff]  }
 0x65a   : > { %8729 = vmatprep.subr.bf16.mxu1 %v15454_v6  ;;  %v15469_v6 = vld [vmem:[#allocation17 + $0x1cc] ss:$16 sps:$4 sm:$0xff]  }
 0x65d   : > { %8730 = vmatpush1.bf16.msra.mxu1 %v15452_v55  ;;  %v15461_v55 = vld [vmem:[#allocation17 + $0x1e8] ss:$16 sps:$4 sm:$0xff]  }
 0x65e   : > { %8731 = vmatprep.subr.bf16.mxu1 %v15460_v61  ;;  %v15475_v61 = vld [vmem:[#allocation17 + $0x1ac] ss:$16 sps:$4 sm:$0xff]  }
 0x661   : > { %8732 = vmatpush2.bf16.msra.mxu1 %v15458_v11  ;;  %v15467_v11 = vld [vmem:[#allocation17 + $0x1c8] ss:$16 sps:$4 sm:$0xff]  }
 0x662   : > { %8733 = vmatprep.subr.bf16.mxu1 %v15466_v16  ;;  %v15481_v16 = vld [vmem:[#allocation17 + $0x18c] ss:$16 sps:$4 sm:$0xff]  }
 0x665   : > { %8734 = vmatpush2.bf16.msra.mxu1 %v15464_v60  ;;  %v15473_v60 = vld [vmem:[#allocation17 + $0x1a8] ss:$16 sps:$4 sm:$0xff]  }
 0x666   : > { %8735 = vmatprep.subr.bf16.mxu1 %v15472_v37  ;;  %v15479_v37 = vld [vmem:[#allocation17 + $0x188] ss:$16 sps:$4 sm:$0xff]  }
 0x669   : > { %8736 = vmatpush2.bf16.msra.mxu1 %v15470_v36 }
 0x66a   : > { %8737 = vmatprep.subr.bf16.mxu1 %v15478_v23 }
 0x66d   : > { %8738 = vmatpush2.bf16.msra.mxu1 %v15476_v25  ;;  %v15487_v25 = vld [vmem:[#allocation17 + $0x16c] ss:$16 sps:$4 sm:$0xff]  }
 0x66e   : > { %8739 = vmatprep.subr.bf16.mxu1 %v15484_v32  ;;  %v15493_v32 = vld [vmem:[#allocation17 + $0x14c] ss:$16 sps:$4 sm:$0xff]  }
 0x671   : > { %8740 = vmatpush2.bf16.msra.mxu1 %v15482_v10  ;;  %v15485_v10 = vld [vmem:[#allocation17 + $0x168] ss:$16 sps:$4 sm:$0xff]  }
 0x672   : > { %8741 = vmatprep.subr.bf16.mxu1 %v15490_v35  ;;  %v7053_v35 = vrot.slane %v17609_v7, %v17970_v3 }
 0x675   : > { %8742 = vmatpush2.bf16.msra.mxu1 %v15488_v62 }
 0x676   : > { %8743 = vmatprep.subr.bf16.mxu1 %v15496_v17  ;;  %v15491_v17 = vld [vmem:[#allocation17 + $0x148] ss:$16 sps:$4 sm:$0xff]  }
 0x679   : > { %8744 = vmatpush2.bf16.msra.mxu1 %v15494_v28  ;;  %v7049_v28 = vrot.slane %v17609_v7, %v17969_v13  ;;  %v15503_v7 = vld [vmem:[#allocation17 + $0x108] ss:$16 sps:$4 sm:$0xff]  }
 0x67a   : > { %8745 = vmatprep.subr.bf16.mxu1 %v15502_v20  ;;  %v15499_v20 = vld [vmem:[#allocation17 + $0x12c] ss:$16 sps:$4 sm:$0xff]  }
 0x67d   : > { %8746 = vmatpush2.bf16.msra.mxu1 %v15500_v49 }
 0x67e   : > { %8801 = vmatprep.subr.bf16.mxu1 %v15508_v29 }
 0x680   : > { %v7732_v42 = vpop.f32.mrf.mxu0 }
 0x681   : > { %v7733_v59 = vadd.f32 %v7732_v42, %v7041_v57 }
 0x682   : > { %v7734_v18 = vpop.f32.mrf.mxu0 }
 0x683   : > { %v7735_v27 = vadd.f32 %v7734_v18, %v7045_v33 }
 0x684   : > { %v7736_v21 = vpop.f32.mrf.mxu0 }
 0x685   : > { %v7737_v46 = vadd.f32 %v7736_v21, %v7041_v57 }
 0x686   : > { %v7738_v40 = vpop.f32.mrf.mxu0 }
 0x687   : > { %v7739_v1 = vadd.f32 %v7738_v40, %v7045_v33  ;;  %v15497_v33 = vld [vmem:[#allocation17 + $0x128] ss:$16 sps:$4 sm:$0xff]   ;;  %v15505_v40 = vld [vmem:[#allocation17 + $0x10c] ss:$16 sps:$4 sm:$0xff]  }
 0x6c0   : > { %v7775_v22 = vpop.f32.mrf.mxu1  ;;  %v7818_v36 = vpop.f32.mrf.mxu0 }
 0x6c1   : > { %v7776_v9 = vadd.f32 %v7775_v22, %v7733_v59  ;;  %v7819_v57 = vadd.f32 %v7818_v36, %v7049_v28  ;;  %v15538_v36 = vld [vmem:[#allocation17 + $0x3ac] ss:$16 sps:$4 sm:$0xff]  }
 0x6c2   : > { %v7777_v24 = vpop.f32.mrf.mxu1  ;;  %v7820_v23 = vpop.f32.mrf.mxu0 }
 0x6c3   : > { %v7778_v2 = vadd.f32 %v7777_v24, %v7735_v27  ;;  %v7870_v4 = vmax.f32 %v7776_v9, 0.0  ;;  %v7821_v18 = vadd.f32 %v7820_v23, %v7053_v35  ;;  %v15539_v23 = vld [vmem:[#allocation17 + $0x388] ss:$16 sps:$4 sm:$0xff]  }
 0x6c4   : > { %v7779_v63 = vpop.f32.mrf.mxu1  ;;  %v7822_v62 = vpop.f32.mrf.mxu0 }
 0x6c5   : > { %v7780_v56 = vadd.f32 %v7779_v63, %v7737_v46  ;;  %v7871_v54 = vmax.f32 %v7778_v2, 0.0  ;;  %v7823_v21 = vadd.f32 %v7822_v62, %v7049_v28  ;;  %v15547_v62 = vld [vmem:[#allocation17 + $0x34c] ss:$16 sps:$4 sm:$0xff]   ;;  %v15548_v28 = vld [vmem:[#allocation17 + $0x328] ss:$16 sps:$4 sm:$0xff]  }
 0x6c6   : > { %v7781_v51 = vpop.f32.mrf.mxu1  ;;  %v7824_v29 = vpop.f32.mrf.mxu0 }
 0x6c7   : > { %v7782_v5 = vadd.f32 %v7781_v51, %v7739_v1  ;;  %v7874_v8 = vmax.f32 %v7780_v56, 0.0  ;;  %v7825_v24 = vadd.f32 %v7824_v29, %v7053_v35  ;;  %v15545_v35 = vld [vmem:[#allocation17 + $0x348] ss:$16 sps:$4 sm:$0xff]   ;;  %v15566_v29 = vld [vmem:[#allocation22 + $0x60] ss:$16 sps:$4 sm:$0xff]  }
 0x6c9   : > { %v7875_v47 = vmax.f32 %v7782_v5, 0.0  ;;  %v17615_v12 = vpack.c.bf16 %v7874_v8, %v7870_v4  ;;  %v15506_v8 = vld [vmem:[#allocation17 + $0x2e8] ss:$16 sps:$4 sm:$0xff]  }
 0x6ca   : > { %v15509_v4 = vld [vmem:[#allocation17 + $0x2c8] ss:$16 sps:$4 sm:$0xff]  }
 0x6cb   : > { %v7879_v45 = vpack.c.bf16 %v7875_v47, %v7871_v54  ;;  %v15511_v47 = vld [vmem:[#allocation17 + $0x2cc] ss:$16 sps:$4 sm:$0xff]  }
 0x6cd   : > { %8704 = vmatprep.mubr.bf16.mxu0 %v7879_v45 }
 0x6ce   : > { %8705 = vmatmul.mubr.bf16.vlgmr.msra.gmra.mxu0 %v17615_v12 }
 0x6cf   : > { %8759 = vmatpush1.bf16.msra.mxu0 %v15413_v52  ;;  %8790 = vmatprep.mubr.bf16.mxu0 %v7879_v45  ;;  %v15514_v45 = vld [vmem:[#allocation17 + $0x2ac] ss:$16 sps:$4 sm:$0xff]   ;;  %v15512_v52 = vld [vmem:[#allocation17 + $0x2a8] ss:$16 sps:$4 sm:$0xff]  }
 0x6d0   : > { %8760 = vmatprep.subr.bf16.mxu0 %v15421_v43  ;;  %v15517_v43 = vld [vmem:[#allocation17 + $0x28c] ss:$16 sps:$4 sm:$0xff]  }
 0x6d3   : > { %8761 = vmatpush1.bf16.msra.mxu0 %v15419_v58  ;;  %v15554_v58 = vld [vmem:[#allocation22 + $0xe0] ss:$16 sps:$4 sm:$0xff]  }
 0x6d4   : > { %8762 = vmatprep.subr.bf16.mxu0 %v15427_v15  ;;  %v15556_v15 = vld [vmem:[#allocation22 + $0xe4] ss:$16 sps:$4 sm:$0xff]  }
 0x6d7   : > { %8763 = vmatpush1.bf16.msra.mxu0 %v15425_v31  ;;  %v15559_v31 = vld [vmem:[#allocation22 + $0xc4] ss:$16 sps:$4 sm:$0xff]  }
 0x6d8   : > { %8764 = vmatprep.subr.bf16.mxu0 %v15433_v38  ;;  %v15515_v38 = vld [vmem:[#allocation17 + $0x288] ss:$16 sps:$4 sm:$0xff]  }
 0x6db   : > { %8765 = vmatpush1.bf16.msra.mxu0 %v15431_v34  ;;  %v15520_v34 = vld [vmem:[#allocation17 + $0x26c] ss:$16 sps:$4 sm:$0xff]  }
 0x6dc   : > { %8766 = vmatprep.subr.bf16.mxu0 %v15439_v50  ;;  %v15557_v50 = vld [vmem:[#allocation22 + $0xc0] ss:$16 sps:$4 sm:$0xff]  }
 0x6df   : > { %8767 = vmatpush1.bf16.msra.mxu0 %v15437_v39  ;;  %v15518_v39 = vld [vmem:[#allocation17 + $0x268] ss:$16 sps:$4 sm:$0xff]  }
 0x6e0   : > { %8768 = vmatprep.subr.bf16.mxu0 %v15445_v30  ;;  %v15523_v30 = vld [vmem:[#allocation17 + $0x24c] ss:$16 sps:$4 sm:$0xff]  }
 0x6e3   : > { %8769 = vmatpush1.bf16.msra.mxu0 %v15443_v19  ;;  %v15560_v19 = vld [vmem:[#allocation22 + $0xa0] ss:$16 sps:$4 sm:$0xff]  }
 0x6e4   : > { %8770 = vmatprep.subr.bf16.mxu0 %v15451_v26  ;;  %v15565_v26 = vld [vmem:[#allocation22 + $0x84] ss:$16 sps:$4 sm:$0xff]  }
 0x6e7   : > { %8771 = vmatpush1.bf16.msra.mxu0 %v15449_v44  ;;  %v15521_v44 = vld [vmem:[#allocation17 + $0x248] ss:$16 sps:$4 sm:$0xff]  }
 0x6e8   : > { %8772 = vmatprep.subr.bf16.mxu0 %v15457_v53  ;;  %v15526_v53 = vld [vmem:[#allocation17 + $0x22c] ss:$16 sps:$4 sm:$0xff]  }
 0x6eb   : > { %8773 = vmatpush1.bf16.msra.mxu0 %v15455_v14  ;;  %v15563_v14 = vld [vmem:[#allocation22 + $0x80] ss:$16 sps:$4 sm:$0xff]  }
 0x6ec   : > { %8774 = vmatprep.subr.bf16.mxu0 %v15463_v0  ;;  %v15524_v0 = vld [vmem:[#allocation17 + $0x228] ss:$16 sps:$4 sm:$0xff]  }
 0x6ef   : > { %8775 = vmatpush2.bf16.msra.mxu0 %v15461_v55  ;;  %v15529_v55 = vld [vmem:[#allocation17 + $0x20c] ss:$16 sps:$4 sm:$0xff]  }
 0x6f0   : > { %8776 = vmatprep.subr.bf16.mxu0 %v15469_v6  ;;  %v15527_v6 = vld [vmem:[#allocation17 + $0x208] ss:$16 sps:$4 sm:$0xff]  }
 0x6f3   : > { %8777 = vmatpush2.bf16.msra.mxu0 %v15467_v11  ;;  %v15532_v11 = vld [vmem:[#allocation17 + $0x3ec] ss:$16 sps:$4 sm:$0xff]  }
 0x6f4   : > { %8778 = vmatprep.subr.bf16.mxu0 %v15475_v61  ;;  %v15530_v61 = vld [vmem:[#allocation17 + $0x3e8] ss:$16 sps:$4 sm:$0xff]  }
 0x6f7   : > { %8779 = vmatpush2.bf16.msra.mxu0 %v15473_v60  ;;  %v15535_v60 = vld [vmem:[#allocation17 + $0x3cc] ss:$16 sps:$4 sm:$0xff]  }
 0x6f8   : > { %8780 = vmatprep.subr.bf16.mxu0 %v15481_v16  ;;  %v15533_v16 = vld [vmem:[#allocation17 + $0x3c8] ss:$16 sps:$4 sm:$0xff]  }
 0x6fb   : > { %8781 = vmatpush2.bf16.msra.mxu0 %v15479_v37  ;;  %v15536_v37 = vld [vmem:[#allocation17 + $0x3a8] ss:$16 sps:$4 sm:$0xff]  }
 0x6fc   : > { %8782 = vmatprep.subr.bf16.mxu0 %v15487_v25  ;;  %v15541_v25 = vld [vmem:[#allocation17 + $0x38c] ss:$16 sps:$4 sm:$0xff]  }
 0x6ff   : > { %8783 = vmatpush2.bf16.msra.mxu0 %v15485_v10  ;;  %v15544_v10 = vld [vmem:[#allocation17 + $0x36c] ss:$16 sps:$4 sm:$0xff]  }
 0x700   : > { %v7861_v49 = vpop.f32.mrf.mxu1  ;;  %8784 = vmatprep.subr.bf16.mxu0 %v15493_v32  ;;  %v15542_v32 = vld [vmem:[#allocation17 + $0x368] ss:$16 sps:$4 sm:$0xff]  }
 0x701   : > { %v7862_v59 = vadd.f32 %v7861_v49, %v7819_v57  ;;  %v15553_v49 = vld [vmem:[#allocation17 + $0x30c] ss:$16 sps:$4 sm:$0xff]   ;;  %v15572_v57 = vld [vmem:[#allocation22 + $0x20] ss:$16 sps:$4 sm:$0xff]  }
 0x702   : > { %v7863_v42 = vpop.f32.mrf.mxu1 }
 0x703   : > { %8785 = vmatpush2.bf16.msra.mxu0 %v15491_v17  ;;  %v7864_v27 = vadd.f32 %v7863_v42, %v7821_v18  ;;  %v7872_v51 = vmax.f32 %v7862_v59, 0.0  ;;  %v15550_v17 = vld [vmem:[#allocation17 + $0x32c] ss:$16 sps:$4 sm:$0xff]   ;;  %v15568_v42 = vld [vmem:[#allocation22 + $0x64] ss:$16 sps:$4 sm:$0xff]  }
 0x704   : > { %v7865_v22 = vpop.f32.mrf.mxu1  ;;  %8786 = vmatprep.subr.bf16.mxu0 %v15499_v20  ;;  %v15551_v20 = vld [vmem:[#allocation17 + $0x308] ss:$16 sps:$4 sm:$0xff]   ;;  %v15581_v59 = vld [vmem:[#allocation22 + $0x1c0] ss:$16 sps:$4 sm:$0xff]  }
 0x705   : > { %v7866_v46 = vadd.f32 %v7865_v22, %v7823_v21  ;;  %v7873_v56 = vmax.f32 %v7864_v27, 0.0  ;;  %v15571_v18 = vld [vmem:[#allocation22 + $0x44] ss:$16 sps:$4 sm:$0xff]   ;;  %v15569_v21 = vld [vmem:[#allocation22 + $0x40] ss:$16 sps:$4 sm:$0xff]  }
 0x706   : > { %v7867_v63 = vpop.f32.mrf.mxu1  ;;  %v15577_v22 = vld [vmem:[#allocation22 + $0x4] ss:$16 sps:$4 sm:$0xff]   ;;  %v15578_v27 = vld [vmem:[#allocation22 + $0x1e0] ss:$16 sps:$4 sm:$0xff]  }
 0x707   : > { %v7868_v1 = vadd.f32 %v7867_v63, %v7825_v24  ;;  %8787 = vmatpush2.bf16.msra.mxu0 %v15497_v33  ;;  %v7876_v2 = vmax.f32 %v7866_v46, 0.0  ;;  %v15574_v33 = vld [vmem:[#allocation22 + $0x24] ss:$16 sps:$4 sm:$0xff]  }
 0x708   : > { %8788 = vmatprep.subr.bf16.mxu0 %v15505_v40  ;;  %v15575_v40 = vld [vmem:[#allocation22] ss:$16 sps:$4 sm:$0xff]   ;;  %v15580_v24 = vld [vmem:[#allocation22 + $0x1e4] ss:$16 sps:$4 sm:$0xff]  }
 0x709   : > { %v7877_v9 = vmax.f32 %v7868_v1, 0.0  ;;  %v17622_v54 = vpack.c.bf16 %v7876_v2, %v7872_v51  ;;  %v15583_v46 = vld [vmem:[#allocation22 + $0x1c4] ss:$16 sps:$4 sm:$0xff]   ;;  %v15584_v1 = vld [vmem:[#allocation22 + $0x1a0] ss:$16 sps:$4 sm:$0xff]  }
 0x70a   : > { %v15586_v63 = vld [vmem:[#allocation22 + $0x1a4] ss:$16 sps:$4 sm:$0xff]   ;;  %v15587_v2 = vld [vmem:[#allocation22 + $0x180] ss:$16 sps:$4 sm:$0xff]  }
 0x70b   : > { %v7881_v5 = vpack.c.bf16 %v7877_v9, %v7873_v56  ;;  %8789 = vmatpush2.bf16.msra.mxu0 %v15503_v7  ;;  %v15589_v7 = vld [vmem:[#allocation22 + $0x184] ss:$16 sps:$4 sm:$0xff]   ;;  %v15590_v9 = vld [vmem:[#allocation22 + $0x160] ss:$16 sps:$4 sm:$0xff]  }
 0x70c   : > { %9836 = vmatprep.subr.bf16.mxu0 %v15556_v15  ;;  %v15592_v56 = vld [vmem:[#allocation22 + $0x164] ss:$16 sps:$4 sm:$0xff]  }
 0x70d   : > { %8747 = vmatprep.mubr.bf16.mxu1 %v7881_v5  ;;  %v15595_v51 = vld [vmem:[#allocation22 + $0x144] ss:$16 sps:$4 sm:$0xff]  }
 0x70e   : > { %8748 = vmatmul.mubr.bf16.vlgmr.msra.gmra.mxu1 %v17622_v54  ;;  %8791 = vmatmul.mubr.bf16.vlgmr.msra.gmra.mxu0 %v17615_v12  ;;  %v15562_v12 = vld [vmem:[#allocation22 + $0xa4] ss:$16 sps:$4 sm:$0xff]  }
 0x70f   : > { %8802 = vmatpush1.bf16.msra.mxu1 %v15506_v8  ;;  %8833 = vmatprep.mubr.bf16.mxu1 %v7881_v5  ;;  %v15593_v5 = vld [vmem:[#allocation22 + $0x140] ss:$16 sps:$4 sm:$0xff]   ;;  %v15610_v15 = vld [vmem:[#allocation22 + $0x2c4] ss:$16 sps:$4 sm:$0xff]  }
 0x710   : > { %8803 = vmatprep.subr.bf16.mxu1 %v15511_v47  ;;  %9837 = vmatpush1.bf16.msra.mxu0 %v15554_v58  ;;  %v15596_v8 = vld [vmem:[#allocation22 + $0x120] ss:$16 sps:$4 sm:$0xff]   ;;  %v15601_v47 = vld [vmem:[#allocation22 + $0x104] ss:$16 sps:$4 sm:$0xff]  }
 0x711   : > { %9838 = vmatprep.subr.bf16.mxu0 %v15559_v31  ;;  %v15608_v58 = vld [vmem:[#allocation22 + $0x2c0] ss:$16 sps:$4 sm:$0xff]  }
 0x712   : > { %v15614_v31 = vld [vmem:[#allocation22 + $0x2a0] ss:$16 sps:$4 sm:$0xff]  }
 0x713   : > { %8804 = vmatpush1.bf16.msra.mxu1 %v15509_v4  ;;  %v15602_v4 = vld [vmem:[#allocation22 + $0x2e0] ss:$16 sps:$4 sm:$0xff]  }
 0x714   : > { %8805 = vmatprep.subr.bf16.mxu1 %v15514_v45  ;;  %9839 = vmatpush1.bf16.msra.mxu0 %v15557_v50  ;;  %v15604_v45 = vld [vmem:[#allocation22 + $0x2e4] ss:$16 sps:$4 sm:$0xff]  }
 0x715   : > { %9840 = vmatprep.subr.bf16.mxu0 %v15562_v12  ;;  %v15622_v50 = vld [vmem:[#allocation22 + $0x284] ss:$16 sps:$4 sm:$0xff]   ;;  %v15626_v12 = vld [vmem:[#allocation22 + $0x260] ss:$16 sps:$4 sm:$0xff]  }
 0x717   : > { %8806 = vmatpush1.bf16.msra.mxu1 %v15512_v52  ;;  %v15599_v52 = vld [vmem:[#allocation22 + $0x100] ss:$16 sps:$4 sm:$0xff]  }
 0x718   : > { %8807 = vmatprep.subr.bf16.mxu1 %v15517_v43  ;;  %9841 = vmatpush1.bf16.msra.mxu0 %v15560_v19  ;;  %v15607_v43 = vld [vmem:[#allocation22 + $0xec] ss:$16 sps:$4 sm:$0xff]   ;;  %v15632_v19 = vld [vmem:[#allocation22 + $0x240] ss:$16 sps:$4 sm:$0xff]  }
 0x719   : > { %9842 = vmatprep.subr.bf16.mxu0 %v15565_v26  ;;  %v15640_v26 = vld [vmem:[#allocation22 + $0x224] ss:$16 sps:$4 sm:$0xff]  }
 0x71b   : > { %8808 = vmatpush1.bf16.msra.mxu1 %v15515_v38  ;;  %v15616_v38 = vld [vmem:[#allocation22 + $0x2a4] ss:$16 sps:$4 sm:$0xff]  }
 0x71c   : > { %8809 = vmatprep.subr.bf16.mxu1 %v15520_v34  ;;  %9843 = vmatpush1.bf16.msra.mxu0 %v15563_v14  ;;  %v15620_v34 = vld [vmem:[#allocation22 + $0x280] ss:$16 sps:$4 sm:$0xff]  }
 0x71d   : > { %9844 = vmatprep.subr.bf16.mxu0 %v15568_v42  ;;  %v15644_v14 = vld [vmem:[#allocation22 + $0x200] ss:$16 sps:$4 sm:$0xff]  }
 0x71f   : > { %8810 = vmatpush1.bf16.msra.mxu1 %v15518_v39  ;;  %v15628_v39 = vld [vmem:[#allocation22 + $0x264] ss:$16 sps:$4 sm:$0xff]  }
 0x720   : > { %8811 = vmatprep.subr.bf16.mxu1 %v15523_v30  ;;  %9845 = vmatpush1.bf16.msra.mxu0 %v15566_v29  ;;  %v15634_v30 = vld [vmem:[#allocation22 + $0x244] ss:$16 sps:$4 sm:$0xff]  }
 0x721   : > { %9846 = vmatprep.subr.bf16.mxu0 %v15571_v18 }
 0x723   : > { %8812 = vmatpush1.bf16.msra.mxu1 %v15521_v44  ;;  %v15638_v44 = vld [vmem:[#allocation22 + $0x220] ss:$16 sps:$4 sm:$0xff]  }
 0x724   : > { %8813 = vmatprep.subr.bf16.mxu1 %v15526_v53  ;;  %9847 = vmatpush1.bf16.msra.mxu0 %v15569_v21  ;;  %v15646_v53 = vld [vmem:[#allocation22 + $0x204] ss:$16 sps:$4 sm:$0xff]  }
 0x725   : > { %9848 = vmatprep.subr.bf16.mxu0 %v15574_v33 }
 0x727   : > { %8814 = vmatpush1.bf16.msra.mxu1 %v15524_v0  ;;  %v15652_v0 = vld [vmem:[#allocation22 + $0x3e4] ss:$16 sps:$4 sm:$0xff]  }
 0x728   : > { %8815 = vmatprep.subr.bf16.mxu1 %v15529_v55  ;;  %9849 = vmatpush1.bf16.msra.mxu0 %v15572_v57  ;;  %v15650_v55 = vld [vmem:[#allocation22 + $0x3e0] ss:$16 sps:$4 sm:$0xff]  }
 0x729   : > { %9850 = vmatprep.subr.bf16.mxu0 %v15577_v22 }
 0x72b   : > { %8816 = vmatpush1.bf16.msra.mxu1 %v15527_v6  ;;  %v15658_v6 = vld [vmem:[#allocation22 + $0x3c4] ss:$16 sps:$4 sm:$0xff]  }
 0x72c   : > { %8817 = vmatprep.subr.bf16.mxu1 %v15532_v11  ;;  %9851 = vmatpush1.bf16.msra.mxu0 %v15575_v40  ;;  %v15656_v11 = vld [vmem:[#allocation22 + $0x3c0] ss:$16 sps:$4 sm:$0xff]  }
 0x72d   : > { %9852 = vmatprep.subr.bf16.mxu0 %v15580_v24 }
 0x72f   : > { %8818 = vmatpush2.bf16.msra.mxu1 %v15530_v61  ;;  %v15664_v61 = vld [vmem:[#allocation22 + $0x3a4] ss:$16 sps:$4 sm:$0xff]  }
 0x730   : > { %8819 = vmatprep.subr.bf16.mxu1 %v15535_v60  ;;  %9853 = vmatpush2.bf16.msra.mxu0 %v15578_v27  ;;  %v15662_v60 = vld [vmem:[#allocation22 + $0x3a0] ss:$16 sps:$4 sm:$0xff]  }
 0x731   : > { %9854 = vmatprep.subr.bf16.mxu0 %v15583_v46 }
 0x733   : > { %8820 = vmatpush2.bf16.msra.mxu1 %v15533_v16  ;;  %v15670_v16 = vld [vmem:[#allocation22 + $0x384] ss:$16 sps:$4 sm:$0xff]  }
 0x734   : > { %8821 = vmatprep.subr.bf16.mxu1 %v15538_v36  ;;  %9855 = vmatpush2.bf16.msra.mxu0 %v15581_v59  ;;  %v15668_v36 = vld [vmem:[#allocation22 + $0x380] ss:$16 sps:$4 sm:$0xff]  }
 0x735   : > { %9856 = vmatprep.subr.bf16.mxu0 %v15586_v63 }
 0x737   : > { %8822 = vmatpush2.bf16.msra.mxu1 %v15536_v37  ;;  %v15676_v37 = vld [vmem:[#allocation22 + $0x364] ss:$16 sps:$4 sm:$0xff]  }
 0x738   : > { %8823 = vmatprep.subr.bf16.mxu1 %v15541_v25  ;;  %9857 = vmatpush2.bf16.msra.mxu0 %v15584_v1  ;;  %v15674_v25 = vld [vmem:[#allocation22 + $0x360] ss:$16 sps:$4 sm:$0xff]  }
 0x739   : > { %9858 = vmatprep.subr.bf16.mxu0 %v15589_v7 }
 0x73b   : > { %8824 = vmatpush2.bf16.msra.mxu1 %v15539_v23  ;;  %v15682_v23 = vld [vmem:[#allocation22 + $0x344] ss:$16 sps:$4 sm:$0xff]  }
 0x73c   : > { %8825 = vmatprep.subr.bf16.mxu1 %v15544_v10  ;;  %9859 = vmatpush2.bf16.msra.mxu0 %v15587_v2  ;;  %v15680_v10 = vld [vmem:[#allocation22 + $0x340] ss:$16 sps:$4 sm:$0xff]  }
 0x73d   : > { %9860 = vmatprep.subr.bf16.mxu0 %v15592_v56 }
 0x73f   : > { %8826 = vmatpush2.bf16.msra.mxu1 %v15542_v32  ;;  %v15686_v32 = vld [vmem:[#allocation22 + $0x320] ss:$16 sps:$4 sm:$0xff]  }
 0x740   : > { %8827 = vmatprep.subr.bf16.mxu1 %v15547_v62  ;;  %9861 = vmatpush2.bf16.msra.mxu0 %v15590_v9  ;;  %v15688_v62 = vld [vmem:[#allocation22 + $0x324] ss:$16 sps:$4 sm:$0xff]  }
 0x741   : > { %9862 = vmatprep.subr.bf16.mxu0 %v15595_v51 }
 0x743   : > { %8828 = vmatpush2.bf16.msra.mxu1 %v15545_v35  ;;  %v15694_v35 = vld [vmem:[#allocation22 + $0x304] ss:$16 sps:$4 sm:$0xff]  }
 0x744   : > { %8829 = vmatprep.subr.bf16.mxu1 %v15550_v17  ;;  %9863 = vmatpush2.bf16.msra.mxu0 %v15593_v5  ;;  %v15692_v17 = vld [vmem:[#allocation22 + $0x300] ss:$16 sps:$4 sm:$0xff]  }
 0x747   : > { %8830 = vmatpush2.bf16.msra.mxu1 %v15548_v28  ;;  %v15700_v28 = vld [vmem:[#allocation22 + $0x2ec] ss:$16 sps:$4 sm:$0xff]  }
 0x748   : > { %8831 = vmatprep.subr.bf16.mxu1 %v15553_v49 }
 0x74b   : > { %8832 = vmatpush2.bf16.msra.mxu1 %v15551_v20  ;;  %v17627_v20 = vld [vmem:[#allocation19] sm:$0xf] }
 0x74c   : > { %9877 = vmatprep.subr.bf16.mxu1 %v15604_v45  ;;  %v8015_v42 = vrot.slane %v17627_v20, %v17283_v41  ;;  %v8019_v21 = vrot.slane %v17627_v20, %v17289_v48 }
 0x74e   : > { %8834 = vmatmul.mubr.bf16.vlgmr.msra.gmra.mxu1 %v17622_v54  ;;  %v15598_v54 = vld [vmem:[#allocation22 + $0x124] ss:$16 sps:$4 sm:$0xff]  }
 0x74f   : > { %9864 = vmatprep.subr.bf16.mxu0 %v15598_v54  ;;  %9878 = vmatpush1.bf16.msra.mxu1 %v15602_v4 }
 0x750   : > { %9865 = vmatpush2.bf16.msra.mxu0 %v15596_v8  ;;  %9879 = vmatprep.subr.bf16.mxu1 %v15610_v15 }
 0x751   : > { %9866 = vmatprep.subr.bf16.mxu0 %v15601_v47 }
 0x753   : > { %9880 = vmatpush1.bf16.msra.mxu1 %v15608_v58 }
 0x754   : > { %9867 = vmatpush2.bf16.msra.mxu0 %v15599_v52  ;;  %9881 = vmatprep.subr.bf16.mxu1 %v15616_v38 }
 0x755   : > { %9918 = vmatprep.subr.bf16.mxu0 %v15607_v43 }
 0x757   : > { %9882 = vmatpush1.bf16.msra.mxu1 %v15614_v31 }
 0x758   : > { %9883 = vmatprep.subr.bf16.mxu1 %v15622_v50 }
 0x75b   : > { %9884 = vmatpush1.bf16.msra.mxu1 %v15620_v34 }
 0x75c   : > { %9885 = vmatprep.subr.bf16.mxu1 %v15628_v39 }
 0x75f   : > { %9886 = vmatpush1.bf16.msra.mxu1 %v15626_v12 }
 0x760   : > { %9887 = vmatprep.subr.bf16.mxu1 %v15634_v30 }
 0x763   : > { %9888 = vmatpush1.bf16.msra.mxu1 %v15632_v19 }
 0x764   : > { %9889 = vmatprep.subr.bf16.mxu1 %v15640_v26 }
 0x767   : > { %9890 = vmatpush1.bf16.msra.mxu1 %v15638_v44 }
 0x768   : > { %9891 = vmatprep.subr.bf16.mxu1 %v15646_v53 }
 0x76b   : > { %9892 = vmatpush1.bf16.msra.mxu1 %v15644_v14 }
 0x76c   : > { %9893 = vmatprep.subr.bf16.mxu1 %v15652_v0 }
 0x76f   : > { %9894 = vmatpush2.bf16.msra.mxu1 %v15650_v55 }
 0x770   : > { %9895 = vmatprep.subr.bf16.mxu1 %v15658_v6 }
 0x773   : > { %9896 = vmatpush2.bf16.msra.mxu1 %v15656_v11 }
 0x774   : > { %9897 = vmatprep.subr.bf16.mxu1 %v15664_v61 }
 0x777   : > { %9898 = vmatpush2.bf16.msra.mxu1 %v15662_v60 }
 0x778   : > { %9899 = vmatprep.subr.bf16.mxu1 %v15670_v16 }
 0x77b   : > { %9900 = vmatpush2.bf16.msra.mxu1 %v15668_v36 }
 0x77c   : > { %9901 = vmatprep.subr.bf16.mxu1 %v15676_v37 }
 0x77f   : > { %9902 = vmatpush2.bf16.msra.mxu1 %v15674_v25 }
 0x780   : > { %9903 = vmatprep.subr.bf16.mxu1 %v15682_v23 }
 0x783   : > { %9904 = vmatpush2.bf16.msra.mxu1 %v15680_v10 }
 0x784   : > { %9905 = vmatprep.subr.bf16.mxu1 %v15688_v62 }
 0x787   : > { %9906 = vmatpush2.bf16.msra.mxu1 %v15686_v32 }
 0x788   : > { %9907 = vmatprep.subr.bf16.mxu1 %v15694_v35 }
 0x78b   : > { %9908 = vmatpush2.bf16.msra.mxu1 %v15692_v17 }
 0x78c   : > { %9959 = vmatprep.subr.bf16.mxu1 %v15700_v28 }
 0x78e   : > { %v8706_v49 = vpop.f32.mrf.mxu0 }
 0x78f   : > { %v8707_v57 = vadd.f32 %v8706_v49, %v8015_v42 }
 0x790   : > { %v8708_v29 = vpop.f32.mrf.mxu0 }
 0x791   : > { %v8709_v24 = vadd.f32 %v8708_v29, %v8019_v21 }
 0x792   : > { %v8710_v18 = vpop.f32.mrf.mxu0 }
 0x793   : > { %v8711_v27 = vadd.f32 %v8710_v18, %v8015_v42 }
 0x794   : > { %v8712_v22 = vpop.f32.mrf.mxu0 }
 0x795   : > { %v8713_v63 = vadd.f32 %v8712_v22, %v8019_v21  ;;  %v15605_v21 = vld [vmem:[#allocation22 + $0xe8] ss:$16 sps:$4 sm:$0xff]  }
 0x796   : > { %v15611_v22 = vld [vmem:[#allocation22 + $0xc8] ss:$16 sps:$4 sm:$0xff]  }
 0x7ce   : > { %v8749_v33 = vpop.f32.mrf.mxu1 }
 0x7cf   : > { %v8750_v46 = vadd.f32 %v8749_v33, %v8707_v57  ;;  %v15613_v57 = vld [vmem:[#allocation22 + $0xcc] ss:$16 sps:$4 sm:$0xff]  }
 0x7d0   : > { %v8751_v40 = vpop.f32.mrf.mxu1 }
 0x7d1   : > { %v8752_v1 = vadd.f32 %v8751_v40, %v8709_v24  ;;  %v8844_v56 = vmax.f32 %v8750_v46, 0.0  ;;  %v15619_v40 = vld [vmem:[#allocation22 + $0xac] ss:$16 sps:$4 sm:$0xff]   ;;  %v8792_v24 = vpop.f32.mrf.mxu0 }
 0x7d2   : > { %v8753_v59 = vpop.f32.mrf.mxu1  ;;  %v15625_v46 = vld [vmem:[#allocation22 + $0x8c] ss:$16 sps:$4 sm:$0xff]  }
 0x7d3   : > { %v8754_v7 = vadd.f32 %v8753_v59, %v8711_v27  ;;  %v8845_v5 = vmax.f32 %v8752_v1, 0.0  ;;  %v15617_v27 = vld [vmem:[#allocation22 + $0xa8] ss:$16 sps:$4 sm:$0xff]   ;;  %v8794_v59 = vpop.f32.mrf.mxu0  ;;  %v15631_v1 = vld [vmem:[#allocation22 + $0x6c] ss:$16 sps:$4 sm:$0xff]  }
 0x7d4   : > { %v8755_v2 = vpop.f32.mrf.mxu1 }
 0x7d5   : > { %v8848_v9 = vmax.f32 %v8754_v7, 0.0  ;;  %v8756_v51 = vadd.f32 %v8755_v2, %v8713_v63  ;;  %v15623_v63 = vld [vmem:[#allocation22 + $0x88] ss:$16 sps:$4 sm:$0xff]   ;;  %v8023_v7 = vrot.slane %v17627_v20, %v17969_v13  ;;  %v8796_v2 = vpop.f32.mrf.mxu0 }
 0x7d7   : > { %v8852_v8 = vadd.f32 %v8848_v9, %v8844_v56  ;;  %v8849_v54 = vmax.f32 %v8756_v51, 0.0 }
 0x7d9   : > { %v8853_v47 = vrot.slane %v8852_v8, 4  ;;  %v8859_v4 = vadd.f32 %v8849_v54, %v8845_v5 }
 0x7db   : > { %v8854_v45 = vadd.f32 %v8853_v47, %v8852_v8  ;;  %v8860_v52 = vrot.slane %v8859_v4, 4  ;;  %v8793_v8 = vadd.f32 %v8792_v24, %v8023_v7 }
 0x7dd   : > { %v8855_v43 = vrot.slane %v8854_v45, 2  ;;  %v8861_v58 = vadd.f32 %v8860_v52, %v8859_v4 }
 0x7df   : > { %v8856_v15 = vadd.f32 %v8855_v43, %v8854_v45  ;;  %v8862_v31 = vrot.slane %v8861_v58, 2  ;;  %v8797_v45 = vadd.f32 %v8796_v2, %v8023_v7  ;;  %v15635_v43 = vld [vmem:[#allocation22 + $0x48] ss:$16 sps:$4 sm:$0xff]   ;;  %v15679_v7 = vld [vmem:[#allocation22 + $0x16c] ss:$16 sps:$4 sm:$0xff]  }
 0x7e1   : > { %v8857_v38 = vrot.slane %v8856_v15, 1  ;;  %v8863_v34 = vadd.f32 %v8862_v31, %v8861_v58 }
 0x7e3   : > { %v8858_v50 = vadd.f32 %v8857_v38, %v8856_v15  ;;  %v8864_v12 = vrot.slane %v8863_v34, 1  ;;  %v15643_v15 = vld [vmem:[#allocation22 + $0x2c] ss:$16 sps:$4 sm:$0xff]  }
 0x7e5   : > { %v17633_v39 = vmul.f32 0.0625, %v8858_v50  ;;  %v8865_v30 = vadd.f32 %v8864_v12, %v8863_v34 }
 0x7e7   : > { %v8884_v19 = vsub.f32 %v8844_v56, %v17633_v39  ;;  %v8888_v26 = vsub.f32 %v8848_v9, %v17633_v39  ;;  %v17637_v44 = vmul.f32 0.0625, %v8865_v30  ;;  %v8027_v56 = vrot.slane %v17627_v20, %v17970_v3  ;;  %v15629_v9 = vld [vmem:[#allocation22 + $0x68] ss:$16 sps:$4 sm:$0xff]  }
 0x7e9   : > { %v8892_v53 = vmul.f32 %v8884_v19, %v8884_v19  ;;  %v8896_v14 = vmul.f32 %v8888_v26, %v8888_v26  ;;  %v8885_v0 = vsub.f32 %v8845_v5, %v17637_v44  ;;  %v8889_v55 = vsub.f32 %v8849_v54, %v17637_v44  ;;  %v15637_v5 = vld [vmem:[#allocation22 + $0x4c] ss:$16 sps:$4 sm:$0xff]   ;;  %v8798_v54 = vpop.f32.mrf.mxu0  ;;  %v15641_v19 = vld [vmem:[#allocation22 + $0x28] ss:$16 sps:$4 sm:$0xff]  }
 0x7ea   : > { %v8795_v4 = vadd.f32 %v8794_v59, %v8027_v56  ;;  %v8799_v31 = vadd.f32 %v8798_v54, %v8027_v56  ;;  %v15649_v26 = vld [vmem:[#allocation22 + $0xc] ss:$16 sps:$4 sm:$0xff]  }
 0x7eb   : > { %v8900_v6 = vadd.f32 %v8896_v14, %v8892_v53  ;;  %v8893_v11 = vmul.f32 %v8885_v0, %v8885_v0  ;;  %v8897_v61 = vmul.f32 %v8889_v55, %v8889_v55  ;;  %v15685_v54 = vld [vmem:[#allocation22 + $0x14c] ss:$16 sps:$4 sm:$0xff]  }
 0x7ed   : > { %v8901_v60 = vrot.slane %v8900_v6, 4  ;;  %v8907_v16 = vadd.f32 %v8897_v61, %v8893_v11  ;;  %v15647_v11 = vld [vmem:[#allocation22 + $0x8] ss:$16 sps:$4 sm:$0xff]   ;;  %v15655_v61 = vld [vmem:[#allocation22 + $0x1ec] ss:$16 sps:$4 sm:$0xff]  }
 0x7ef   : > { %v8902_v36 = vadd.f32 %v8901_v60, %v8900_v6  ;;  %v8908_v37 = vrot.slane %v8907_v16, 4 }
 0x7f1   : > { %v8903_v25 = vrot.slane %v8902_v36, 2  ;;  %v8909_v23 = vadd.f32 %v8908_v37, %v8907_v16 }
 0x7f3   : > { %v8904_v10 = vadd.f32 %v8903_v25, %v8902_v36  ;;  %v8910_v32 = vrot.slane %v8909_v23, 2  ;;  %v15653_v25 = vld [vmem:[#allocation22 + $0x1e8] ss:$16 sps:$4 sm:$0xff]  }
 0x7f5   : > { %v8905_v62 = vrot.slane %v8904_v10, 1  ;;  %v8911_v35 = vadd.f32 %v8910_v32, %v8909_v23  ;;  %v15661_v23 = vld [vmem:[#allocation22 + $0x1cc] ss:$16 sps:$4 sm:$0xff]  }
 0x7f7   : > { %v8906_v17 = vadd.f32 %v8905_v62, %v8904_v10  ;;  %v8912_v28 = vrot.slane %v8911_v35, 1 }
 0x7f9   : > { %v8913_v49 = vadd.f32 %v8912_v28, %v8911_v35  ;;  %v8928_v29 = vmul.f32 0.06666667, %v8906_v17  ;;  %v15659_v17 = vld [vmem:[#allocation22 + $0x1c8] ss:$16 sps:$4 sm:$0xff]   ;;  %v15667_v28 = vld [vmem:[#allocation22 + $0x1ac] ss:$16 sps:$4 sm:$0xff]  }
 0x7fb   : > { %v8929_v42 = vmul.f32 0.06666667, %v8913_v49  ;;  %v17641_v33 = vpack.c.bf16 %v8928_v29, %v8928_v29 }
 0x7fd   : > { %v9065_v18 = vpack.c.bf16 %v8929_v42, %v8929_v42 }
 0x7ff   : > { %9868 = vmatprep.mubr.bf16.mxu0 %v9065_v18 }
 0x800   : > { %9869 = vmatmul.mubr.bf16.vlgmr.msra.gmra.mxu0 %v17641_v33 }
 0x801   : > { %9919 = vmatpush1.bf16.msra.mxu0 %v15605_v21  ;;  %9950 = vmatprep.mubr.bf16.mxu0 %v9065_v18  ;;  %v15665_v21 = vld [vmem:[#allocation22 + $0x1a8] ss:$16 sps:$4 sm:$0xff]  }
 0x802   : > { %9920 = vmatprep.subr.bf16.mxu0 %v15613_v57  ;;  %v15673_v57 = vld [vmem:[#allocation22 + $0x18c] ss:$16 sps:$4 sm:$0xff]  }
 0x805   : > { %9921 = vmatpush1.bf16.msra.mxu0 %v15611_v22 }
 0x806   : > { %9922 = vmatprep.subr.bf16.mxu0 %v15619_v40 }
 0x809   : > { %9923 = vmatpush1.bf16.msra.mxu0 %v15617_v27 }
 0x80a   : > { %9924 = vmatprep.subr.bf16.mxu0 %v15625_v46 }
 0x80d   : > { %9925 = vmatpush1.bf16.msra.mxu0 %v15623_v63 }
 0x80e   : > { %v8835_v51 = vpop.f32.mrf.mxu1  ;;  %9926 = vmatprep.subr.bf16.mxu0 %v15631_v1  ;;  %v15671_v1 = vld [vmem:[#allocation22 + $0x188] ss:$16 sps:$4 sm:$0xff]  }
 0x80f   : > { %v8836_v52 = vadd.f32 %v8835_v51, %v8793_v8  ;;  %v15677_v8 = vld [vmem:[#allocation22 + $0x168] ss:$16 sps:$4 sm:$0xff]  }
 0x810   : > { %v8837_v47 = vpop.f32.mrf.mxu1 }
 0x811   : > { %9927 = vmatpush1.bf16.msra.mxu0 %v15629_v9  ;;  %v8838_v38 = vadd.f32 %v8837_v47, %v8795_v4  ;;  %v8846_v50 = vmax.f32 %v8836_v52, 0.0 }
 0x812   : > { %v8839_v58 = vpop.f32.mrf.mxu1  ;;  %9928 = vmatprep.subr.bf16.mxu0 %v15637_v5 }
 0x813   : > { %v8840_v34 = vadd.f32 %v8839_v58, %v8797_v45  ;;  %v8847_v53 = vmax.f32 %v8838_v38, 0.0  ;;  %v15691_v58 = vld [vmem:[#allocation22 + $0x12c] ss:$16 sps:$4 sm:$0xff]  }
 0x814   : > { %v8841_v20 = vpop.f32.mrf.mxu1 }
 0x815   : > { %v8850_v12 = vmax.f32 %v8840_v34, 0.0  ;;  %v8842_v30 = vadd.f32 %v8841_v20, %v8799_v31  ;;  %9929 = vmatpush1.bf16.msra.mxu0 %v15635_v43  ;;  %v15683_v43 = vld [vmem:[#allocation22 + $0x148] ss:$16 sps:$4 sm:$0xff]  }
 0x816   : > { %9930 = vmatprep.subr.bf16.mxu0 %v15643_v15  ;;  %v15689_v34 = vld [vmem:[#allocation22 + $0x128] ss:$16 sps:$4 sm:$0xff]  }
 0x817   : > { %v8866_v14 = vadd.f32 %v8850_v12, %v8846_v50  ;;  %v8851_v0 = vmax.f32 %v8842_v30, 0.0 }
 0x819   : > { %v8867_v55 = vrot.slane %v8866_v14, 4  ;;  %v8873_v6 = vadd.f32 %v8851_v0, %v8847_v53  ;;  %9931 = vmatpush1.bf16.msra.mxu0 %v15641_v19  ;;  %v15695_v19 = vld [vmem:[#allocation22 + $0x108] ss:$16 sps:$4 sm:$0xff]  }
 0x81a   : > { %9932 = vmatprep.subr.bf16.mxu0 %v15649_v26 }
 0x81b   : > { %v8868_v60 = vadd.f32 %v8867_v55, %v8866_v14  ;;  %v8874_v16 = vrot.slane %v8873_v6, 4  ;;  %v15703_v14 = vld [vmem:[#allocation20 + $0xe4] ss:$16 sps:$4 sm:$0xff]  }
 0x81d   : > { %v8869_v36 = vrot.slane %v8868_v60, 2  ;;  %v8875_v37 = vadd.f32 %v8874_v16, %v8873_v6  ;;  %9933 = vmatpush1.bf16.msra.mxu0 %v15647_v11  ;;  %v15698_v6 = vld [vmem:[#allocation22 + $0x2e8] ss:$16 sps:$4 sm:$0xff]   ;;  %v15709_v16 = vld [vmem:[#allocation20 + $0xc4] ss:$16 sps:$4 sm:$0xff]  }
 0x81e   : > { %9934 = vmatprep.subr.bf16.mxu0 %v15655_v61  ;;  %v15701_v61 = vld [vmem:[#allocation20 + $0xe0] ss:$16 sps:$4 sm:$0xff]  }
 0x81f   : > { %v8870_v10 = vadd.f32 %v8869_v36, %v8868_v60  ;;  %v8876_v32 = vrot.slane %v8875_v37, 2  ;;  %v15706_v60 = vld [vmem:[#allocation22 + $0x2cc] ss:$16 sps:$4 sm:$0xff]   ;;  %v17662_v36 = vpack.c.bf16 %v17637_v44, %v17637_v44  ;;  %v15721_v44 = vld [vmem:[#allocation20 + $0x84] ss:$16 sps:$4 sm:$0xff]  }
 0x821   : > { %v8871_v62 = vrot.slane %v8870_v10, 1  ;;  %v8877_v35 = vadd.f32 %v8876_v32, %v8875_v37  ;;  %9935 = vmatpush2.bf16.msra.mxu0 %v15653_v25  ;;  %v15704_v37 = vld [vmem:[#allocation22 + $0x2c8] ss:$16 sps:$4 sm:$0xff]   ;;  %v15707_v25 = vld [vmem:[#allocation20 + $0xc0] ss:$16 sps:$4 sm:$0xff]  }
 0x822   : > { %9936 = vmatprep.subr.bf16.mxu0 %v15661_v23  ;;  %v15712_v23 = vld [vmem:[#allocation22 + $0x2ac] ss:$16 sps:$4 sm:$0xff]   ;;  %v15710_v32 = vld [vmem:[#allocation22 + $0x2a8] ss:$16 sps:$4 sm:$0xff]  }
 0x823   : > { %v8872_v49 = vadd.f32 %v8871_v62, %v8870_v10  ;;  %v8878_v29 = vrot.slane %v8877_v35, 1  ;;  %v15715_v10 = vld [vmem:[#allocation20 + $0xa4] ss:$16 sps:$4 sm:$0xff]   ;;  %v15718_v62 = vld [vmem:[#allocation22 + $0x28c] ss:$16 sps:$4 sm:$0xff]  }
 0x825   : > { %v17648_v42 = vmul.f32 0.0625, %v8872_v49  ;;  %v8879_v18 = vadd.f32 %v8878_v29, %v8877_v35  ;;  %9937 = vmatpush2.bf16.msra.mxu0 %v15659_v17  ;;  %v15716_v35 = vld [vmem:[#allocation22 + $0x288] ss:$16 sps:$4 sm:$0xff]   ;;  %v15719_v17 = vld [vmem:[#allocation20 + $0x80] ss:$16 sps:$4 sm:$0xff]  }
 0x826   : > { %9938 = vmatprep.subr.bf16.mxu0 %v15667_v28  ;;  %v15724_v28 = vld [vmem:[#allocation22 + $0x26c] ss:$16 sps:$4 sm:$0xff]   ;;  %v15727_v49 = vld [vmem:[#allocation20 + $0x64] ss:$16 sps:$4 sm:$0xff]   ;;  %v15722_v29 = vld [vmem:[#allocation22 + $0x268] ss:$16 sps:$4 sm:$0xff]  }
 0x827   : > { %v8886_v22 = vsub.f32 %v8846_v50, %v17648_v42  ;;  %v8890_v40 = vsub.f32 %v8850_v12, %v17648_v42  ;;  %v17652_v24 = vmul.f32 0.0625, %v8879_v18  ;;  %v15697_v50 = vld [vmem:[#allocation22 + $0x10c] ss:$16 sps:$4 sm:$0xff]   ;;  %v15725_v18 = vld [vmem:[#allocation20 + $0x60] ss:$16 sps:$4 sm:$0xff]  }
 0x829   : > { %v8894_v27 = vmul.f32 %v8886_v22, %v8886_v22  ;;  %v8898_v46 = vmul.f32 %v8890_v40, %v8890_v40  ;;  %v8887_v59 = vsub.f32 %v8847_v53, %v17652_v24  ;;  %v8891_v63 = vsub.f32 %v8851_v0, %v17652_v24  ;;  %9939 = vmatpush2.bf16.msra.mxu0 %v15665_v21  ;;  %v15730_v21 = vld [vmem:[#allocation22 + $0x24c] ss:$16 sps:$4 sm:$0xff]   ;;  %v15728_v22 = vld [vmem:[#allocation22 + $0x248] ss:$16 sps:$4 sm:$0xff]   ;;  %v15731_v40 = vld [vmem:[#allocation20 + $0x40] ss:$16 sps:$4 sm:$0xff]  }
 0x82a   : > { %9940 = vmatprep.subr.bf16.mxu0 %v15673_v57  ;;  %v15733_v57 = vld [vmem:[#allocation20 + $0x44] ss:$16 sps:$4 sm:$0xff]  }
 0x82b   : > { %v8914_v2 = vadd.f32 %v8898_v46, %v8894_v27  ;;  %v8895_v56 = vmul.f32 %v8887_v59, %v8887_v59  ;;  %v8899_v9 = vmul.f32 %v8891_v63, %v8891_v63  ;;  %v15736_v27 = vld [vmem:[#allocation22 + $0x22c] ss:$16 sps:$4 sm:$0xff]   ;;  %v15739_v46 = vld [vmem:[#allocation20 + $0x24] ss:$16 sps:$4 sm:$0xff]   ;;  %v15734_v59 = vld [vmem:[#allocation22 + $0x228] ss:$16 sps:$4 sm:$0xff]  }
 0x82c   : > { %v15737_v63 = vld [vmem:[#allocation20 + $0x20] ss:$16 sps:$4 sm:$0xff]  }
 0x82d   : > { %v8915_v51 = vrot.slane %v8914_v2, 4  ;;  %v8921_v5 = vadd.f32 %v8899_v9, %v8895_v56  ;;  %9941 = vmatpush2.bf16.msra.mxu0 %v15671_v1  ;;  %v15742_v1 = vld [vmem:[#allocation22 + $0x20c] ss:$16 sps:$4 sm:$0xff]   ;;  %v15743_v56 = vld [vmem:[#allocation20] ss:$16 sps:$4 sm:$0xff]  }
 0x82e   : > { %9942 = vmatprep.subr.bf16.mxu0 %v15679_v7  ;;  %v15745_v7 = vld [vmem:[#allocation20 + $0x4] ss:$16 sps:$4 sm:$0xff]   ;;  %v15748_v9 = vld [vmem:[#allocation22 + $0x3ec] ss:$16 sps:$4 sm:$0xff]  }
 0x82f   : > { %v8916_v47 = vadd.f32 %v8915_v51, %v8914_v2  ;;  %v8922_v4 = vrot.slane %v8921_v5, 4  ;;  %v15740_v2 = vld [vmem:[#allocation22 + $0x208] ss:$16 sps:$4 sm:$0xff]   ;;  %v15751_v51 = vld [vmem:[#allocation20 + $0x1e4] ss:$16 sps:$4 sm:$0xff]  }
 0x831   : > { %v8917_v45 = vrot.slane %v8916_v47, 2  ;;  %v8923_v52 = vadd.f32 %v8922_v4, %v8921_v5  ;;  %9943 = vmatpush2.bf16.msra.mxu0 %v15677_v8  ;;  %v15746_v5 = vld [vmem:[#allocation22 + $0x3e8] ss:$16 sps:$4 sm:$0xff]   ;;  %v15749_v8 = vld [vmem:[#allocation20 + $0x1e0] ss:$16 sps:$4 sm:$0xff]  }
 0x832   : > { %9944 = vmatprep.subr.bf16.mxu0 %v15685_v54  ;;  %v15754_v54 = vld [vmem:[#allocation22 + $0x3cc] ss:$16 sps:$4 sm:$0xff]   ;;  %v15752_v4 = vld [vmem:[#allocation22 + $0x3c8] ss:$16 sps:$4 sm:$0xff]  }
 0x833   : > { %v8918_v15 = vadd.f32 %v8917_v45, %v8916_v47  ;;  %v8924_v31 = vrot.slane %v8923_v52, 2  ;;  %v15757_v47 = vld [vmem:[#allocation20 + $0x1c4] ss:$16 sps:$4 sm:$0xff]   ;;  %v15755_v45 = vld [vmem:[#allocation20 + $0x1c0] ss:$16 sps:$4 sm:$0xff]  }
 0x835   : > { %v8919_v38 = vrot.slane %v8918_v15, 1  ;;  %9945 = vmatpush2.bf16.msra.mxu0 %v15683_v43  ;;  %v8925_v20 = vadd.f32 %v8924_v31, %v8923_v52  ;;  %v15760_v52 = vld [vmem:[#allocation22 + $0x3ac] ss:$16 sps:$4 sm:$0xff]   ;;  %v15763_v43 = vld [vmem:[#allocation20 + $0x1a4] ss:$16 sps:$4 sm:$0xff]  }
 0x836   : > { %9946 = vmatprep.subr.bf16.mxu0 %v15691_v58  ;;  %v15758_v58 = vld [vmem:[#allocation22 + $0x3a8] ss:$16 sps:$4 sm:$0xff]   ;;  %v15766_v31 = vld [vmem:[#allocation22 + $0x38c] ss:$16 sps:$4 sm:$0xff]  }
 0x837   : > { %v8920_v12 = vadd.f32 %v8919_v38, %v8918_v15  ;;  %v8926_v30 = vrot.slane %v8925_v20, 1  ;;  %v15761_v15 = vld [vmem:[#allocation20 + $0x1a0] ss:$16 sps:$4 sm:$0xff]   ;;  %v15769_v38 = vld [vmem:[#allocation20 + $0x184] ss:$16 sps:$4 sm:$0xff]  }
 0x839   : > { %9947 = vmatpush2.bf16.msra.mxu0 %v15689_v34  ;;  %v8927_v26 = vadd.f32 %v8926_v30, %v8925_v20  ;;  %v8930_v53 = vmul.f32 0.06666667, %v8920_v12  ;;  %v15764_v34 = vld [vmem:[#allocation22 + $0x388] ss:$16 sps:$4 sm:$0xff]   ;;  %v15767_v20 = vld [vmem:[#allocation20 + $0x180] ss:$16 sps:$4 sm:$0xff]  }
 0x83a   : > { %9948 = vmatprep.subr.bf16.mxu0 %v15697_v50  ;;  %v15772_v50 = vld [vmem:[#allocation22 + $0x36c] ss:$16 sps:$4 sm:$0xff]   ;;  %v15775_v12 = vld [vmem:[#allocation20 + $0x164] ss:$16 sps:$4 sm:$0xff]   ;;  %v15770_v30 = vld [vmem:[#allocation22 + $0x368] ss:$16 sps:$4 sm:$0xff]  }
 0x83b   : > { %v8931_v0 = vmul.f32 0.06666667, %v8927_v26  ;;  %v17656_v11 = vpack.c.bf16 %v8930_v53, %v8930_v53  ;;  %v15778_v26 = vld [vmem:[#allocation22 + $0x34c] ss:$16 sps:$4 sm:$0xff]   ;;  %v15781_v53 = vld [vmem:[#allocation20 + $0x144] ss:$16 sps:$4 sm:$0xff]  }
 0x83d   : > { %9949 = vmatpush2.bf16.msra.mxu0 %v15695_v19  ;;  %v9067_v55 = vpack.c.bf16 %v8931_v0, %v8931_v0  ;;  %v15773_v19 = vld [vmem:[#allocation20 + $0x160] ss:$16 sps:$4 sm:$0xff]  }
 0x83e   : > { %10640 = vmatprep.subr.bf16.mxu0 %v15703_v14  ;;  %v15776_v14 = vld [vmem:[#allocation22 + $0x348] ss:$16 sps:$4 sm:$0xff]   ;;  %v15779_v0 = vld [vmem:[#allocation20 + $0x140] ss:$16 sps:$4 sm:$0xff]  }
 0x83f   : > { %9909 = vmatprep.mubr.bf16.mxu1 %v9067_v55 }
 0x840   : > { %9910 = vmatmul.mubr.bf16.vlgmr.msra.gmra.mxu1 %v17656_v11  ;;  %9951 = vmatmul.mubr.bf16.vlgmr.msra.gmra.mxu0 %v17641_v33  ;;  %v15713_v33 = vld [vmem:[#allocation20 + $0xa0] ss:$16 sps:$4 sm:$0xff]  }
 0x841   : > { %9960 = vmatpush1.bf16.msra.mxu1 %v15698_v6  ;;  %9991 = vmatprep.mubr.bf16.mxu1 %v9067_v55  ;;  %v15784_v55 = vld [vmem:[#allocation22 + $0x32c] ss:$16 sps:$4 sm:$0xff]   ;;  %v15787_v6 = vld [vmem:[#allocation20 + $0x124] ss:$16 sps:$4 sm:$0xff]  }
 0x842   : > { %10641 = vmatpush1.bf16.msra.mxu0 %v15701_v61  ;;  %10672 = vmatprep.mubr.bf16.mxu0 %v17662_v36  ;;  %v15782_v61 = vld [vmem:[#allocation22 + $0x328] ss:$16 sps:$4 sm:$0xff]  }
 0x843   : > { %9961 = vmatprep.subr.bf16.mxu1 %v15706_v60  ;;  %10642 = vmatprep.subr.bf16.mxu0 %v15709_v16  ;;  %v15785_v60 = vld [vmem:[#allocation20 + $0x120] ss:$16 sps:$4 sm:$0xff]   ;;  %v15790_v16 = vld [vmem:[#allocation22 + $0x30c] ss:$16 sps:$4 sm:$0xff]  }
 0x845   : > { %9962 = vmatpush1.bf16.msra.mxu1 %v15704_v37  ;;  %v15793_v37 = vld [vmem:[#allocation20 + $0x104] ss:$16 sps:$4 sm:$0xff]  }
 0x846   : > { %10643 = vmatpush1.bf16.msra.mxu0 %v15707_v25  ;;  %9963 = vmatprep.subr.bf16.mxu1 %v15712_v23  ;;  %v15788_v25 = vld [vmem:[#allocation22 + $0x308] ss:$16 sps:$4 sm:$0xff]   ;;  %v15791_v23 = vld [vmem:[#allocation20 + $0x100] ss:$16 sps:$4 sm:$0xff]  }
 0x847   : > { %10644 = vmatprep.subr.bf16.mxu0 %v15715_v10  ;;  %v15796_v10 = vld [vmem:[#allocation20 + $0x2e4] ss:$16 sps:$4 sm:$0xff]  }
 0x849   : > { %9964 = vmatpush1.bf16.msra.mxu1 %v15710_v32  ;;  %v15799_v32 = vld [vmem:[#allocation20 + $0xec] ss:$16 sps:$4 sm:$0xff]  }
 0x84a   : > { %10645 = vmatpush1.bf16.msra.mxu0 %v15713_v33  ;;  %9965 = vmatprep.subr.bf16.mxu1 %v15718_v62  ;;  %v15794_v33 = vld [vmem:[#allocation20 + $0x2e0] ss:$16 sps:$4 sm:$0xff]   ;;  %v15797_v62 = vld [vmem:[#allocation20 + $0xe8] ss:$16 sps:$4 sm:$0xff]  }
 0x84b   : > { %10646 = vmatprep.subr.bf16.mxu0 %v15721_v44  ;;  %v17667_v44 = vpack.c.bf16 %v17633_v39, %v17633_v39  ;;  %v15811_v39 = vld [vmem:[#allocation20 + $0xac] ss:$16 sps:$4 sm:$0xff]  }
 0x84d   : > { %9966 = vmatpush1.bf16.msra.mxu1 %v15716_v35  ;;  %v15802_v35 = vld [vmem:[#allocation20 + $0x2c4] ss:$16 sps:$4 sm:$0xff]  }
 0x84e   : > { %10647 = vmatpush1.bf16.msra.mxu0 %v15719_v17  ;;  %9967 = vmatprep.subr.bf16.mxu1 %v15724_v28  ;;  %v17672_v17 = vpack.c.bf16 %v17652_v24, %v17652_v24  ;;  %v15805_v28 = vld [vmem:[#allocation20 + $0xcc] ss:$16 sps:$4 sm:$0xff]   ;;  %v15809_v24 = vld [vmem:[#allocation20 + $0xa8] ss:$16 sps:$4 sm:$0xff]  }
 0x84f   : > { %10648 = vmatprep.subr.bf16.mxu0 %v15727_v49  ;;  %v15800_v49 = vld [vmem:[#allocation20 + $0x2c0] ss:$16 sps:$4 sm:$0xff]  }
 0x851   : > { %9968 = vmatpush1.bf16.msra.mxu1 %v15722_v29  ;;  %v15803_v29 = vld [vmem:[#allocation20 + $0xc8] ss:$16 sps:$4 sm:$0xff]  }
 0x852   : > { %10649 = vmatpush1.bf16.msra.mxu0 %v15725_v18  ;;  %9969 = vmatprep.subr.bf16.mxu1 %v15730_v21  ;;  %v15808_v18 = vld [vmem:[#allocation20 + $0x2a4] ss:$16 sps:$4 sm:$0xff]  }
 0x853   : > { %10650 = vmatprep.subr.bf16.mxu0 %v15733_v57  ;;  %v15814_v21 = vld [vmem:[#allocation20 + $0x284] ss:$16 sps:$4 sm:$0xff]   ;;  %v15817_v57 = vld [vmem:[#allocation20 + $0x8c] ss:$16 sps:$4 sm:$0xff]  }
 0x855   : > { %9970 = vmatpush1.bf16.msra.mxu1 %v15728_v22  ;;  %v15812_v22 = vld [vmem:[#allocation20 + $0x280] ss:$16 sps:$4 sm:$0xff]  }
 0x856   : > { %10651 = vmatpush1.bf16.msra.mxu0 %v15731_v40  ;;  %9971 = vmatprep.subr.bf16.mxu1 %v15736_v27  ;;  %v15815_v40 = vld [vmem:[#allocation20 + $0x88] ss:$16 sps:$4 sm:$0xff]   ;;  %v15820_v27 = vld [vmem:[#allocation20 + $0x264] ss:$16 sps:$4 sm:$0xff]  }
 0x857   : > { %10652 = vmatprep.subr.bf16.mxu0 %v15739_v46  ;;  %v15823_v46 = vld [vmem:[#allocation20 + $0x6c] ss:$16 sps:$4 sm:$0xff]  }
 0x859   : > { %9972 = vmatpush1.bf16.msra.mxu1 %v15734_v59  ;;  %v15821_v59 = vld [vmem:[#allocation20 + $0x68] ss:$16 sps:$4 sm:$0xff]  }
 0x85a   : > { %10653 = vmatpush1.bf16.msra.mxu0 %v15737_v63  ;;  %9973 = vmatprep.subr.bf16.mxu1 %v15742_v1  ;;  %v15826_v63 = vld [vmem:[#allocation20 + $0x244] ss:$16 sps:$4 sm:$0xff]   ;;  %v15829_v1 = vld [vmem:[#allocation20 + $0x4c] ss:$16 sps:$4 sm:$0xff]  }
 0x85b   : > { %10654 = vmatprep.subr.bf16.mxu0 %v15745_v7  ;;  %v15824_v7 = vld [vmem:[#allocation20 + $0x240] ss:$16 sps:$4 sm:$0xff]  }
 0x85d   : > { %9974 = vmatpush1.bf16.msra.mxu1 %v15740_v2  ;;  %v15827_v2 = vld [vmem:[#allocation20 + $0x48] ss:$16 sps:$4 sm:$0xff]  }
 0x85e   : > { %10655 = vmatpush1.bf16.msra.mxu0 %v15743_v56  ;;  %9975 = vmatprep.subr.bf16.mxu1 %v15748_v9  ;;  %v15832_v56 = vld [vmem:[#allocation20 + $0x224] ss:$16 sps:$4 sm:$0xff]   ;;  %v15835_v9 = vld [vmem:[#allocation20 + $0x2c] ss:$16 sps:$4 sm:$0xff]  }
 0x85f   : > { %10656 = vmatprep.subr.bf16.mxu0 %v15751_v51  ;;  %v15830_v51 = vld [vmem:[#allocation20 + $0x220] ss:$16 sps:$4 sm:$0xff]  }
 0x861   : > { %9976 = vmatpush2.bf16.msra.mxu1 %v15746_v5  ;;  %v15833_v5 = vld [vmem:[#allocation20 + $0x28] ss:$16 sps:$4 sm:$0xff]  }
 0x862   : > { %10657 = vmatpush2.bf16.msra.mxu0 %v15749_v8  ;;  %9977 = vmatprep.subr.bf16.mxu1 %v15754_v54  ;;  %v15838_v8 = vld [vmem:[#allocation20 + $0x204] ss:$16 sps:$4 sm:$0xff]   ;;  %v15841_v54 = vld [vmem:[#allocation20 + $0xc] ss:$16 sps:$4 sm:$0xff]  }
 0x863   : > { %10658 = vmatprep.subr.bf16.mxu0 %v15757_v47  ;;  %v15836_v47 = vld [vmem:[#allocation20 + $0x200] ss:$16 sps:$4 sm:$0xff]  }
 0x865   : > { %9978 = vmatpush2.bf16.msra.mxu1 %v15752_v4  ;;  %v15839_v4 = vld [vmem:[#allocation20 + $0x8] ss:$16 sps:$4 sm:$0xff]  }
 0x866   : > { %10659 = vmatpush2.bf16.msra.mxu0 %v15755_v45  ;;  %9979 = vmatprep.subr.bf16.mxu1 %v15760_v52  ;;  %v15844_v45 = vld [vmem:[#allocation20 + $0x3e4] ss:$16 sps:$4 sm:$0xff]   ;;  %v15847_v52 = vld [vmem:[#allocation20 + $0x1ec] ss:$16 sps:$4 sm:$0xff]  }
 0x867   : > { %10660 = vmatprep.subr.bf16.mxu0 %v15763_v43  ;;  %v15842_v43 = vld [vmem:[#allocation20 + $0x3e0] ss:$16 sps:$4 sm:$0xff]  }
 0x869   : > { %9980 = vmatpush2.bf16.msra.mxu1 %v15758_v58  ;;  %v15845_v58 = vld [vmem:[#allocation20 + $0x1e8] ss:$16 sps:$4 sm:$0xff]  }
 0x86a   : > { %10661 = vmatpush2.bf16.msra.mxu0 %v15761_v15  ;;  %9981 = vmatprep.subr.bf16.mxu1 %v15766_v31  ;;  %v15850_v15 = vld [vmem:[#allocation20 + $0x3c4] ss:$16 sps:$4 sm:$0xff]   ;;  %v15853_v31 = vld [vmem:[#allocation20 + $0x1cc] ss:$16 sps:$4 sm:$0xff]  }
 0x86b   : > { %10662 = vmatprep.subr.bf16.mxu0 %v15769_v38  ;;  %v15848_v38 = vld [vmem:[#allocation20 + $0x3c0] ss:$16 sps:$4 sm:$0xff]  }
 0x86d   : > { %9982 = vmatpush2.bf16.msra.mxu1 %v15764_v34  ;;  %v15851_v34 = vld [vmem:[#allocation20 + $0x1c8] ss:$16 sps:$4 sm:$0xff]  }
 0x86e   : > { %10663 = vmatpush2.bf16.msra.mxu0 %v15767_v20  ;;  %9983 = vmatprep.subr.bf16.mxu1 %v15772_v50  ;;  %v15856_v20 = vld [vmem:[#allocation20 + $0x3a4] ss:$16 sps:$4 sm:$0xff]   ;;  %v15859_v50 = vld [vmem:[#allocation20 + $0x1ac] ss:$16 sps:$4 sm:$0xff]  }
 0x86f   : > { %10664 = vmatprep.subr.bf16.mxu0 %v15775_v12  ;;  %v15854_v12 = vld [vmem:[#allocation20 + $0x3a0] ss:$16 sps:$4 sm:$0xff]  }
 0x871   : > { %9984 = vmatpush2.bf16.msra.mxu1 %v15770_v30  ;;  %v15857_v30 = vld [vmem:[#allocation20 + $0x1a8] ss:$16 sps:$4 sm:$0xff]  }
 0x872   : > { %10665 = vmatpush2.bf16.msra.mxu0 %v15773_v19  ;;  %9985 = vmatprep.subr.bf16.mxu1 %v15778_v26  ;;  %v15862_v19 = vld [vmem:[#allocation20 + $0x384] ss:$16 sps:$4 sm:$0xff]   ;;  %v15865_v26 = vld [vmem:[#allocation20 + $0x18c] ss:$16 sps:$4 sm:$0xff]  }
 0x873   : > { %10666 = vmatprep.subr.bf16.mxu0 %v15781_v53  ;;  %v15860_v53 = vld [vmem:[#allocation20 + $0x380] ss:$16 sps:$4 sm:$0xff]  }
 0x875   : > { %9986 = vmatpush2.bf16.msra.mxu1 %v15776_v14  ;;  %v15863_v14 = vld [vmem:[#allocation20 + $0x188] ss:$16 sps:$4 sm:$0xff]  }
 0x876   : > { %10667 = vmatpush2.bf16.msra.mxu0 %v15779_v0  ;;  %9987 = vmatprep.subr.bf16.mxu1 %v15784_v55  ;;  %v15868_v0 = vld [vmem:[#allocation20 + $0x364] ss:$16 sps:$4 sm:$0xff]   ;;  %v15871_v55 = vld [vmem:[#allocation20 + $0x16c] ss:$16 sps:$4 sm:$0xff]  }
 0x877   : > { %10668 = vmatprep.subr.bf16.mxu0 %v15787_v6  ;;  %v15866_v6 = vld [vmem:[#allocation20 + $0x360] ss:$16 sps:$4 sm:$0xff]  }
 0x879   : > { %9988 = vmatpush2.bf16.msra.mxu1 %v15782_v61  ;;  %v15869_v61 = vld [vmem:[#allocation20 + $0x168] ss:$16 sps:$4 sm:$0xff]  }
 0x87a   : > { %10669 = vmatpush2.bf16.msra.mxu0 %v15785_v60  ;;  %9989 = vmatprep.subr.bf16.mxu1 %v15790_v16  ;;  %v15874_v60 = vld [vmem:[#allocation20 + $0x344] ss:$16 sps:$4 sm:$0xff]   ;;  %v15877_v16 = vld [vmem:[#allocation20 + $0x14c] ss:$16 sps:$4 sm:$0xff]  }
 0x87b   : > { %10670 = vmatprep.subr.bf16.mxu0 %v15793_v37  ;;  %v15872_v37 = vld [vmem:[#allocation20 + $0x340] ss:$16 sps:$4 sm:$0xff]  }
 0x87d   : > { %9990 = vmatpush2.bf16.msra.mxu1 %v15788_v25  ;;  %v15875_v25 = vld [vmem:[#allocation20 + $0x148] ss:$16 sps:$4 sm:$0xff]  }
 0x87e   : > { %10671 = vmatpush2.bf16.msra.mxu0 %v15791_v23  ;;  %10681 = vmatprep.subr.bf16.mxu1 %v15796_v10  ;;  %v15880_v23 = vld [vmem:[#allocation20 + $0x324] ss:$16 sps:$4 sm:$0xff]   ;;  %v15883_v10 = vld [vmem:[#allocation20 + $0x12c] ss:$16 sps:$4 sm:$0xff]  }
 0x87f   : > { %10722 = vmatprep.subr.bf16.mxu0 %v15799_v32  ;;  %v15878_v32 = vld [vmem:[#allocation20 + $0x320] ss:$16 sps:$4 sm:$0xff]  }
 0x880   : > { %9992 = vmatmul.mubr.bf16.vlgmr.msra.gmra.mxu1 %v17656_v11  ;;  %v15806_v11 = vld [vmem:[#allocation20 + $0x2a0] ss:$16 sps:$4 sm:$0xff]  }
 0x881   : > { %10673 = vmatmul.mubr.bf16.vlgmr.msra.gmra.mxu0 %v17667_v44  ;;  %10682 = vmatpush1.bf16.msra.mxu1 %v15794_v33  ;;  %v15881_v33 = vld [vmem:[#allocation20 + $0x128] ss:$16 sps:$4 sm:$0xff]  }
 0x882   : > { %10713 = vmatprep.mubr.bf16.mxu1 %v17672_v17  ;;  %10723 = vmatpush1.bf16.msra.mxu0 %v15797_v62  ;;  %v15886_v62 = vld [vmem:[#allocation20 + $0x304] ss:$16 sps:$4 sm:$0xff]  }
 0x883   : > { %10754 = vmatprep.mubr.bf16.mxu0 %v17662_v36  ;;  %10683 = vmatprep.subr.bf16.mxu1 %v15802_v35  ;;  %v15818_v36 = vld [vmem:[#allocation20 + $0x260] ss:$16 sps:$4 sm:$0xff]   ;;  %v15889_v35 = vld [vmem:[#allocation20 + $0x10c] ss:$16 sps:$4 sm:$0xff]  }
 0x884   : > { %10724 = vmatprep.subr.bf16.mxu0 %v15805_v28  ;;  %v15884_v28 = vld [vmem:[#allocation20 + $0x300] ss:$16 sps:$4 sm:$0xff]  }
 0x885   : > { %10684 = vmatpush1.bf16.msra.mxu1 %v15800_v49  ;;  %v15887_v49 = vld [vmem:[#allocation20 + $0x108] ss:$16 sps:$4 sm:$0xff]  }
 0x886   : > { %10725 = vmatpush1.bf16.msra.mxu0 %v15803_v29  ;;  %10685 = vmatprep.subr.bf16.mxu1 %v15808_v18  ;;  %v15892_v29 = vld [vmem:[#allocation20 + $0x2ec] ss:$16 sps:$4 sm:$0xff]   ;;  %v15890_v18 = vld [vmem:[#allocation20 + $0x2e8] ss:$16 sps:$4 sm:$0xff]  }
 0x887   : > { %10726 = vmatprep.subr.bf16.mxu0 %v15811_v39  ;;  %v17679_v39 = vpack.c.bf16 %v17648_v42, %v17648_v42  ;;  %v15896_v42 = vld [vmem:[#allocation20 + $0x2a8] ss:$16 sps:$4 sm:$0xff]  }
 0x889   : > { %10686 = vmatpush1.bf16.msra.mxu1 %v15806_v11  ;;  %v15895_v11 = vld [vmem:[#allocation20 + $0x2cc] ss:$16 sps:$4 sm:$0xff]  }
 0x88a   : > { %10727 = vmatpush1.bf16.msra.mxu0 %v15809_v24  ;;  %10687 = vmatprep.subr.bf16.mxu1 %v15814_v21  ;;  %v15893_v21 = vld [vmem:[#allocation20 + $0x2c8] ss:$16 sps:$4 sm:$0xff]  }
 0x88b   : > { %10728 = vmatprep.subr.bf16.mxu0 %v15817_v57 }
 0x88d   : > { %10688 = vmatpush1.bf16.msra.mxu1 %v15812_v22  ;;  %v15898_v22 = vld [vmem:[#allocation20 + $0x2ac] ss:$16 sps:$4 sm:$0xff]  }
 0x88e   : > { %10729 = vmatpush1.bf16.msra.mxu0 %v15815_v40  ;;  %10689 = vmatprep.subr.bf16.mxu1 %v15820_v27 }
 0x88f   : > { %10730 = vmatprep.subr.bf16.mxu0 %v15823_v46  ;;  %v15901_v46 = vld [vmem:[#allocation20 + $0x28c] ss:$16 sps:$4 sm:$0xff]  }
 0x891   : > { %10690 = vmatpush1.bf16.msra.mxu1 %v15818_v36  ;;  %v15938_v36 = vld [vmem:[#allocation25 + $0xe0] ss:$16 sps:$4 sm:$0xff]  }
 0x892   : > { %10731 = vmatpush1.bf16.msra.mxu0 %v15821_v59  ;;  %10691 = vmatprep.subr.bf16.mxu1 %v15826_v63  ;;  %v15940_v59 = vld [vmem:[#allocation25 + $0xe4] ss:$16 sps:$4 sm:$0xff]  }
 0x893   : > { %10732 = vmatprep.subr.bf16.mxu0 %v15829_v1  ;;  %v15943_v63 = vld [vmem:[#allocation25 + $0xc4] ss:$16 sps:$4 sm:$0xff]  }
 0x894   : > { %v15899_v1 = vld [vmem:[#allocation20 + $0x288] ss:$16 sps:$4 sm:$0xff]  }
 0x895   : > { %10692 = vmatpush1.bf16.msra.mxu1 %v15824_v7  ;;  %v15946_v7 = vld [vmem:[#allocation25 + $0xa4] ss:$16 sps:$4 sm:$0xff]  }
 0x896   : > { %10733 = vmatpush1.bf16.msra.mxu0 %v15827_v2  ;;  %10693 = vmatprep.subr.bf16.mxu1 %v15832_v56  ;;  %v15902_v2 = vld [vmem:[#allocation20 + $0x268] ss:$16 sps:$4 sm:$0xff]   ;;  %v15907_v56 = vld [vmem:[#allocation20 + $0x24c] ss:$16 sps:$4 sm:$0xff]  }
 0x897   : > { %10734 = vmatprep.subr.bf16.mxu0 %v15835_v9  ;;  %v15944_v9 = vld [vmem:[#allocation25 + $0xa0] ss:$16 sps:$4 sm:$0xff]  }
 0x899   : > { %10694 = vmatpush1.bf16.msra.mxu1 %v15830_v51  ;;  %v15949_v51 = vld [vmem:[#allocation25 + $0x84] ss:$16 sps:$4 sm:$0xff]  }
 0x89a   : > { %10735 = vmatpush1.bf16.msra.mxu0 %v15833_v5  ;;  %10695 = vmatprep.subr.bf16.mxu1 %v15838_v8  ;;  %v15905_v5 = vld [vmem:[#allocation20 + $0x248] ss:$16 sps:$4 sm:$0xff]   ;;  %v15910_v8 = vld [vmem:[#allocation20 + $0x22c] ss:$16 sps:$4 sm:$0xff]  }
 0x89b   : > { %10736 = vmatprep.subr.bf16.mxu0 %v15841_v54  ;;  %v15947_v54 = vld [vmem:[#allocation25 + $0x80] ss:$16 sps:$4 sm:$0xff]  }
 0x89d   : > { %10696 = vmatpush1.bf16.msra.mxu1 %v15836_v47  ;;  %v15952_v47 = vld [vmem:[#allocation25 + $0x64] ss:$16 sps:$4 sm:$0xff]  }
 0x89e   : > { %10737 = vmatpush1.bf16.msra.mxu0 %v15839_v4  ;;  %10697 = vmatprep.subr.bf16.mxu1 %v15844_v45  ;;  %v15908_v4 = vld [vmem:[#allocation20 + $0x228] ss:$16 sps:$4 sm:$0xff]   ;;  %v15913_v45 = vld [vmem:[#allocation20 + $0x20c] ss:$16 sps:$4 sm:$0xff]  }
 0x89f   : > { %10738 = vmatprep.subr.bf16.mxu0 %v15847_v52  ;;  %v15950_v52 = vld [vmem:[#allocation25 + $0x60] ss:$16 sps:$4 sm:$0xff]  }
 0x8a1   : > { %10698 = vmatpush2.bf16.msra.mxu1 %v15842_v43  ;;  %v15955_v43 = vld [vmem:[#allocation25 + $0x44] ss:$16 sps:$4 sm:$0xff]  }
 0x8a2   : > { %10739 = vmatpush2.bf16.msra.mxu0 %v15845_v58  ;;  %10699 = vmatprep.subr.bf16.mxu1 %v15850_v15  ;;  %v15911_v58 = vld [vmem:[#allocation20 + $0x208] ss:$16 sps:$4 sm:$0xff]   ;;  %v15916_v15 = vld [vmem:[#allocation20 + $0x3ec] ss:$16 sps:$4 sm:$0xff]  }
 0x8a3   : > { %10740 = vmatprep.subr.bf16.mxu0 %v15853_v31  ;;  %v15953_v31 = vld [vmem:[#allocation25 + $0x40] ss:$16 sps:$4 sm:$0xff]  }
 0x8a5   : > { %10700 = vmatpush2.bf16.msra.mxu1 %v15848_v38  ;;  %v15958_v38 = vld [vmem:[#allocation25 + $0x24] ss:$16 sps:$4 sm:$0xff]  }
 0x8a6   : > { %10741 = vmatpush2.bf16.msra.mxu0 %v15851_v34  ;;  %10701 = vmatprep.subr.bf16.mxu1 %v15856_v20  ;;  %v15914_v34 = vld [vmem:[#allocation20 + $0x3e8] ss:$16 sps:$4 sm:$0xff]   ;;  %v15919_v20 = vld [vmem:[#allocation20 + $0x3cc] ss:$16 sps:$4 sm:$0xff]  }
 0x8a7   : > { %10742 = vmatprep.subr.bf16.mxu0 %v15859_v50  ;;  %v15956_v50 = vld [vmem:[#allocation25 + $0x20] ss:$16 sps:$4 sm:$0xff]  }
 0x8a9   : > { %10702 = vmatpush2.bf16.msra.mxu1 %v15854_v12  ;;  %v15961_v12 = vld [vmem:[#allocation25 + $0x4] ss:$16 sps:$4 sm:$0xff]  }
 0x8aa   : > { %10743 = vmatpush2.bf16.msra.mxu0 %v15857_v30  ;;  %10703 = vmatprep.subr.bf16.mxu1 %v15862_v19  ;;  %v15917_v30 = vld [vmem:[#allocation20 + $0x3c8] ss:$16 sps:$4 sm:$0xff]   ;;  %v15922_v19 = vld [vmem:[#allocation20 + $0x3ac] ss:$16 sps:$4 sm:$0xff]  }
 0x8ab   : > { %10744 = vmatprep.subr.bf16.mxu0 %v15865_v26  ;;  %v15959_v26 = vld [vmem:[#allocation25] ss:$16 sps:$4 sm:$0xff]  }
 0x8ad   : > { %10704 = vmatpush2.bf16.msra.mxu1 %v15860_v53  ;;  %v15964_v53 = vld [vmem:[#allocation25 + $0x1e4] ss:$16 sps:$4 sm:$0xff]  }
 0x8ae   : > { %10745 = vmatpush2.bf16.msra.mxu0 %v15863_v14  ;;  %10705 = vmatprep.subr.bf16.mxu1 %v15868_v0  ;;  %v15920_v14 = vld [vmem:[#allocation20 + $0x3a8] ss:$16 sps:$4 sm:$0xff]   ;;  %v15925_v0 = vld [vmem:[#allocation20 + $0x38c] ss:$16 sps:$4 sm:$0xff]  }
 0x8af   : > { %10746 = vmatprep.subr.bf16.mxu0 %v15871_v55  ;;  %v15962_v55 = vld [vmem:[#allocation25 + $0x1e0] ss:$16 sps:$4 sm:$0xff]  }
 0x8b1   : > { %10706 = vmatpush2.bf16.msra.mxu1 %v15866_v6  ;;  %v15967_v6 = vld [vmem:[#allocation25 + $0x1c4] ss:$16 sps:$4 sm:$0xff]  }
 0x8b2   : > { %10747 = vmatpush2.bf16.msra.mxu0 %v15869_v61  ;;  %10707 = vmatprep.subr.bf16.mxu1 %v15874_v60  ;;  %v15923_v61 = vld [vmem:[#allocation20 + $0x388] ss:$16 sps:$4 sm:$0xff]   ;;  %v15928_v60 = vld [vmem:[#allocation20 + $0x36c] ss:$16 sps:$4 sm:$0xff]  }
 0x8b3   : > { %10748 = vmatprep.subr.bf16.mxu0 %v15877_v16  ;;  %v15965_v16 = vld [vmem:[#allocation25 + $0x1c0] ss:$16 sps:$4 sm:$0xff]  }
 0x8b5   : > { %10708 = vmatpush2.bf16.msra.mxu1 %v15872_v37  ;;  %v15970_v37 = vld [vmem:[#allocation25 + $0x1a4] ss:$16 sps:$4 sm:$0xff]  }
 0x8b6   : > { %10749 = vmatpush2.bf16.msra.mxu0 %v15875_v25  ;;  %10709 = vmatprep.subr.bf16.mxu1 %v15880_v23  ;;  %v15926_v25 = vld [vmem:[#allocation20 + $0x368] ss:$16 sps:$4 sm:$0xff]   ;;  %v15931_v23 = vld [vmem:[#allocation20 + $0x34c] ss:$16 sps:$4 sm:$0xff]  }
 0x8b7   : > { %10750 = vmatprep.subr.bf16.mxu0 %v15883_v10  ;;  %v15968_v10 = vld [vmem:[#allocation25 + $0x1a0] ss:$16 sps:$4 sm:$0xff]  }
 0x8b9   : > { %10710 = vmatpush2.bf16.msra.mxu1 %v15878_v32  ;;  %v15973_v32 = vld [vmem:[#allocation25 + $0x184] ss:$16 sps:$4 sm:$0xff]  }
 0x8ba   : > { %10751 = vmatpush2.bf16.msra.mxu0 %v15881_v33  ;;  %10711 = vmatprep.subr.bf16.mxu1 %v15886_v62  ;;  %v15929_v33 = vld [vmem:[#allocation20 + $0x348] ss:$16 sps:$4 sm:$0xff]   ;;  %v15934_v62 = vld [vmem:[#allocation20 + $0x32c] ss:$16 sps:$4 sm:$0xff]  }
 0x8bb   : > { %10752 = vmatprep.subr.bf16.mxu0 %v15889_v35  ;;  %v15971_v35 = vld [vmem:[#allocation25 + $0x180] ss:$16 sps:$4 sm:$0xff]  }
 0x8bd   : > { %10712 = vmatpush2.bf16.msra.mxu1 %v15884_v28  ;;  %v15976_v28 = vld [vmem:[#allocation25 + $0x164] ss:$16 sps:$4 sm:$0xff]  }
 0x8be   : > { %10753 = vmatpush2.bf16.msra.mxu0 %v15887_v49  ;;  %10763 = vmatprep.subr.bf16.mxu1 %v15892_v29  ;;  %v15932_v49 = vld [vmem:[#allocation20 + $0x328] ss:$16 sps:$4 sm:$0xff]   ;;  %v15937_v29 = vld [vmem:[#allocation20 + $0x30c] ss:$16 sps:$4 sm:$0xff]  }
 0x8bf   : > { %11624 = vmatprep.subr.bf16.mxu0 %v15940_v59  ;;  %v15982_v59 = vld [vmem:[#allocation25 + $0x124] ss:$16 sps:$4 sm:$0xff]  }
 0x8c0   : > { %10714 = vmatmul.mubr.bf16.vlgmr.msra.gmra.mxu1 %v17679_v39  ;;  %v17682_v24 = vpop.f32.mrf.mxu0 }
 0x8c1   : > { %10755 = vmatmul.mubr.bf16.vlgmr.msra.gmra.mxu0 %v17667_v44  ;;  %10764 = vmatpush1.bf16.msra.mxu1 %v15890_v18  ;;  %v15904_v44 = vld [vmem:[#allocation20 + $0x26c] ss:$16 sps:$4 sm:$0xff]   ;;  %v15974_v18 = vld [vmem:[#allocation25 + $0x160] ss:$16 sps:$4 sm:$0xff]  }
 0x8c2   : > { %10795 = vmatprep.mubr.bf16.mxu1 %v17672_v17  ;;  %v17686_v57 = vpop.f32.mrf.mxu0  ;;  %10765 = vmatprep.subr.bf16.mxu1 %v15895_v11  ;;  %v15941_v17 = vld [vmem:[#allocation25 + $0xc0] ss:$16 sps:$4 sm:$0xff]   ;;  %v15979_v11 = vld [vmem:[#allocation25 + $0x144] ss:$16 sps:$4 sm:$0xff]  }
 0x8c3   : > { %11625 = vmatpush1.bf16.msra.mxu0 %v15938_v36 }
 0x8c4   : > { %v9874_v40 = vpop.f32.mrf.mxu0  ;;  %11626 = vmatprep.subr.bf16.mxu0 %v15943_v63 }
 0x8c5   : > { %10766 = vmatpush1.bf16.msra.mxu1 %v15893_v21  ;;  %v15935_v21 = vld [vmem:[#allocation20 + $0x308] ss:$16 sps:$4 sm:$0xff]  }
 0x8c6   : > { %v9875_v27 = vpop.f32.mrf.mxu0  ;;  %10767 = vmatprep.subr.bf16.mxu1 %v15898_v22  ;;  %v15977_v22 = vld [vmem:[#allocation25 + $0x140] ss:$16 sps:$4 sm:$0xff]  }
 0x8c7   : > { %11627 = vmatpush1.bf16.msra.mxu0 %v15941_v17 }
 0x8c8   : > { %11628 = vmatprep.subr.bf16.mxu0 %v15946_v7 }
 0x8c9   : > { %10768 = vmatpush1.bf16.msra.mxu1 %v15896_v42 }
 0x8ca   : > { %10769 = vmatprep.subr.bf16.mxu1 %v15901_v46 }
 0x8cb   : > { %11629 = vmatpush1.bf16.msra.mxu0 %v15944_v9  ;;  %v15988_v9 = vld [vmem:[#allocation25 + $0x2e4] ss:$16 sps:$4 sm:$0xff]  }
 0x8cc   : > { %11630 = vmatprep.subr.bf16.mxu0 %v15949_v51  ;;  %v15991_v51 = vld [vmem:[#allocation25 + $0xec] ss:$16 sps:$4 sm:$0xff]  }
 0x8cd   : > { %10770 = vmatpush1.bf16.msra.mxu1 %v15899_v1  ;;  %v15980_v1 = vld [vmem:[#allocation25 + $0x120] ss:$16 sps:$4 sm:$0xff]  }
 0x8ce   : > { %10771 = vmatprep.subr.bf16.mxu1 %v15904_v44 }
 0x8cf   : > { %11631 = vmatpush1.bf16.msra.mxu0 %v15947_v54  ;;  %v15998_v54 = vld [vmem:[#allocation25 + $0x2a0] ss:$16 sps:$4 sm:$0xff]  }
 0x8d0   : > { %11632 = vmatprep.subr.bf16.mxu0 %v15952_v47  ;;  %v16006_v47 = vld [vmem:[#allocation25 + $0x284] ss:$16 sps:$4 sm:$0xff]  }
 0x8d1   : > { %10772 = vmatpush1.bf16.msra.mxu1 %v15902_v2  ;;  %v15985_v2 = vld [vmem:[#allocation25 + $0x104] ss:$16 sps:$4 sm:$0xff]  }
 0x8d2   : > { %10773 = vmatprep.subr.bf16.mxu1 %v15907_v56  ;;  %v15983_v56 = vld [vmem:[#allocation25 + $0x100] ss:$16 sps:$4 sm:$0xff]  }
 0x8d3   : > { %11633 = vmatpush1.bf16.msra.mxu0 %v15950_v52  ;;  %v16010_v52 = vld [vmem:[#allocation25 + $0x260] ss:$16 sps:$4 sm:$0xff]  }
 0x8d4   : > { %11634 = vmatprep.subr.bf16.mxu0 %v15955_v43  ;;  %v16018_v43 = vld [vmem:[#allocation25 + $0x244] ss:$16 sps:$4 sm:$0xff]  }
 0x8d5   : > { %10774 = vmatpush1.bf16.msra.mxu1 %v15905_v5  ;;  %v15994_v5 = vld [vmem:[#allocation25 + $0x2c4] ss:$16 sps:$4 sm:$0xff]  }
 0x8d6   : > { %10775 = vmatprep.subr.bf16.mxu1 %v15910_v8  ;;  %v16000_v8 = vld [vmem:[#allocation25 + $0x2a4] ss:$16 sps:$4 sm:$0xff]  }
 0x8d7   : > { %11635 = vmatpush1.bf16.msra.mxu0 %v15953_v31  ;;  %v16022_v31 = vld [vmem:[#allocation25 + $0x220] ss:$16 sps:$4 sm:$0xff]  }
 0x8d8   : > { %11636 = vmatprep.subr.bf16.mxu0 %v15958_v38  ;;  %v16030_v38 = vld [vmem:[#allocation25 + $0x204] ss:$16 sps:$4 sm:$0xff]  }
 0x8d9   : > { %10776 = vmatpush1.bf16.msra.mxu1 %v15908_v4  ;;  %v16004_v4 = vld [vmem:[#allocation25 + $0x280] ss:$16 sps:$4 sm:$0xff]  }
 0x8da   : > { %10777 = vmatprep.subr.bf16.mxu1 %v15913_v45  ;;  %v16012_v45 = vld [vmem:[#allocation25 + $0x264] ss:$16 sps:$4 sm:$0xff]  }
 0x8db   : > { %11637 = vmatpush1.bf16.msra.mxu0 %v15956_v50  ;;  %v16034_v50 = vld [vmem:[#allocation25 + $0x3e0] ss:$16 sps:$4 sm:$0xff]  }
 0x8dc   : > { %11638 = vmatprep.subr.bf16.mxu0 %v15961_v12  ;;  %v16042_v12 = vld [vmem:[#allocation25 + $0x3c4] ss:$16 sps:$4 sm:$0xff]  }
 0x8dd   : > { %10778 = vmatpush1.bf16.msra.mxu1 %v15911_v58  ;;  %v16016_v58 = vld [vmem:[#allocation25 + $0x240] ss:$16 sps:$4 sm:$0xff]  }
 0x8de   : > { %10779 = vmatprep.subr.bf16.mxu1 %v15916_v15  ;;  %v16024_v15 = vld [vmem:[#allocation25 + $0x224] ss:$16 sps:$4 sm:$0xff]  }
 0x8df   : > { %11639 = vmatpush1.bf16.msra.mxu0 %v15959_v26  ;;  %v16046_v26 = vld [vmem:[#allocation25 + $0x3a0] ss:$16 sps:$4 sm:$0xff]  }
 0x8e0   : > { %11640 = vmatprep.subr.bf16.mxu0 %v15964_v53  ;;  %v16054_v53 = vld [vmem:[#allocation25 + $0x384] ss:$16 sps:$4 sm:$0xff]  }
 0x8e1   : > { %10780 = vmatpush2.bf16.msra.mxu1 %v15914_v34  ;;  %v16028_v34 = vld [vmem:[#allocation25 + $0x200] ss:$16 sps:$4 sm:$0xff]  }
 0x8e2   : > { %10781 = vmatprep.subr.bf16.mxu1 %v15919_v20  ;;  %v16036_v20 = vld [vmem:[#allocation25 + $0x3e4] ss:$16 sps:$4 sm:$0xff]  }
 0x8e3   : > { %11641 = vmatpush2.bf16.msra.mxu0 %v15962_v55  ;;  %v16058_v55 = vld [vmem:[#allocation25 + $0x360] ss:$16 sps:$4 sm:$0xff]  }
 0x8e4   : > { %11642 = vmatprep.subr.bf16.mxu0 %v15967_v6  ;;  %v16066_v6 = vld [vmem:[#allocation25 + $0x344] ss:$16 sps:$4 sm:$0xff]  }
 0x8e5   : > { %10782 = vmatpush2.bf16.msra.mxu1 %v15917_v30  ;;  %v16040_v30 = vld [vmem:[#allocation25 + $0x3c0] ss:$16 sps:$4 sm:$0xff]  }
 0x8e6   : > { %10783 = vmatprep.subr.bf16.mxu1 %v15922_v19  ;;  %v16048_v19 = vld [vmem:[#allocation25 + $0x3a4] ss:$16 sps:$4 sm:$0xff]  }
 0x8e7   : > { %11643 = vmatpush2.bf16.msra.mxu0 %v15965_v16 }
 0x8e8   : > { %11644 = vmatprep.subr.bf16.mxu0 %v15970_v37 }
 0x8e9   : > { %10784 = vmatpush2.bf16.msra.mxu1 %v15920_v14  ;;  %v16052_v14 = vld [vmem:[#allocation25 + $0x380] ss:$16 sps:$4 sm:$0xff]  }
 0x8ea   : > { %10785 = vmatprep.subr.bf16.mxu1 %v15925_v0  ;;  %v16060_v0 = vld [vmem:[#allocation25 + $0x364] ss:$16 sps:$4 sm:$0xff]  }
 0x8eb   : > { %11645 = vmatpush2.bf16.msra.mxu0 %v15968_v10  ;;  %v16072_v10 = vld [vmem:[#allocation25 + $0x324] ss:$16 sps:$4 sm:$0xff]  }
 0x8ec   : > { %11646 = vmatprep.subr.bf16.mxu0 %v15973_v32 }
 0x8ed   : > { %10786 = vmatpush2.bf16.msra.mxu1 %v15923_v61  ;;  %v16064_v61 = vld [vmem:[#allocation25 + $0x340] ss:$16 sps:$4 sm:$0xff]  }
 0x8ee   : > { %10787 = vmatprep.subr.bf16.mxu1 %v15928_v60 }
 0x8ef   : > { %11647 = vmatpush2.bf16.msra.mxu0 %v15971_v35 }
 0x8f0   : > { %11648 = vmatprep.subr.bf16.mxu0 %v15976_v28 }
 0x8f1   : > { %10788 = vmatpush2.bf16.msra.mxu1 %v15926_v25 }
 0x8f2   : > { %10789 = vmatprep.subr.bf16.mxu1 %v15931_v23 }
 0x8f3   : > { %11649 = vmatpush2.bf16.msra.mxu0 %v15974_v18 }
 0x8f4   : > { %11650 = vmatprep.subr.bf16.mxu0 %v15979_v11  ;;  %v16076_v11 = vld [vmem:[#allocation25 + $0x300] ss:$16 sps:$4 sm:$0xff]  }
 0x8f5   : > { %10790 = vmatpush2.bf16.msra.mxu1 %v15929_v33 }
 0x8f6   : > { %10791 = vmatprep.subr.bf16.mxu1 %v15934_v62  ;;  %v16070_v62 = vld [vmem:[#allocation25 + $0x320] ss:$16 sps:$4 sm:$0xff]  }
 0x8f7   : > { %11651 = vmatpush2.bf16.msra.mxu0 %v15977_v22  ;;  %v17704_v22 = vld [vmem:[#allocation23] sm:$0xf] }
 0x8f8   : > { %11652 = vmatprep.subr.bf16.mxu0 %v15982_v59  ;;  %v10813_v59 = vrot.slane %v17704_v22, %v17289_v48 }
 0x8f9   : > { %10792 = vmatpush2.bf16.msra.mxu1 %v15932_v49 }
 0x8fa   : > { %10793 = vmatprep.subr.bf16.mxu1 %v15937_v29  ;;  %v16078_v29 = vld [vmem:[#allocation25 + $0x304] ss:$16 sps:$4 sm:$0xff]  }
 0x8fb   : > { %11653 = vmatpush2.bf16.msra.mxu0 %v15980_v1 }
 0x8fc   : > { %11654 = vmatprep.subr.bf16.mxu0 %v15985_v2 }
 0x8fd   : > { %10794 = vmatpush2.bf16.msra.mxu1 %v15935_v21  ;;  %v16084_v21 = vld [vmem:[#allocation25 + $0x2ec] ss:$16 sps:$4 sm:$0xff]  }
 0x8fe   : > { %11665 = vmatprep.subr.bf16.mxu1 %v15988_v9 }
 0x8ff   : > { %11655 = vmatpush2.bf16.msra.mxu0 %v15983_v56 }
 0x900   : > { %10796 = vmatmul.mubr.bf16.vlgmr.msra.gmra.mxu1 %v17679_v39  ;;  %v9911_v40 = vpop.f32.mrf.mxu1  ;;  %v17689_v42 = vpop.f32.mrf.mxu0  ;;  %11706 = vmatprep.subr.bf16.mxu0 %v15991_v51 }
 0x901   : > { %v17692_v27 = vadd.f32 %v9911_v40, %v17682_v24  ;;  %v15986_v24 = vld [vmem:[#allocation25 + $0x2e0] ss:$16 sps:$4 sm:$0xff]  }
 0x902   : > { %v9913_v46 = vpop.f32.mrf.mxu1  ;;  %v17694_v36 = vpop.f32.mrf.mxu0  ;;  %11666 = vmatpush1.bf16.msra.mxu1 %v15986_v24 }
 0x903   : > { %v17697_v63 = vadd.f32 %v9913_v46, %v17686_v57  ;;  %v15992_v57 = vld [vmem:[#allocation25 + $0x2c0] ss:$16 sps:$4 sm:$0xff]   ;;  %11667 = vmatprep.subr.bf16.mxu1 %v15994_v5 }
 0x904   : > { %v9915_v44 = vpop.f32.mrf.mxu1  ;;  %v9956_v17 = vpop.f32.mrf.mxu0 }
 0x906   : > { %v9916_v7 = vpop.f32.mrf.mxu1  ;;  %v9957_v39 = vpop.f32.mrf.mxu0  ;;  %11668 = vmatpush1.bf16.msra.mxu1 %v15992_v57  ;;  %v15989_v57 = vld [vmem:[#allocation25 + $0xe8] ss:$16 sps:$4 sm:$0xff]  }
 0x907   : > { %11669 = vmatprep.subr.bf16.mxu1 %v16000_v8  ;;  %v15997_v8 = vld [vmem:[#allocation25 + $0xcc] ss:$16 sps:$4 sm:$0xff]  }
 0x90a   : > { %11670 = vmatpush1.bf16.msra.mxu1 %v15998_v54  ;;  %v15995_v54 = vld [vmem:[#allocation25 + $0xc8] ss:$16 sps:$4 sm:$0xff]  }
 0x90b   : > { %11671 = vmatprep.subr.bf16.mxu1 %v16006_v47  ;;  %v16003_v47 = vld [vmem:[#allocation25 + $0xac] ss:$16 sps:$4 sm:$0xff]  }
 0x90e   : > { %11672 = vmatpush1.bf16.msra.mxu1 %v16004_v4  ;;  %v16001_v4 = vld [vmem:[#allocation25 + $0xa8] ss:$16 sps:$4 sm:$0xff]  }
 0x90f   : > { %11673 = vmatprep.subr.bf16.mxu1 %v16012_v45  ;;  %v16009_v45 = vld [vmem:[#allocation25 + $0x8c] ss:$16 sps:$4 sm:$0xff]  }
 0x912   : > { %11674 = vmatpush1.bf16.msra.mxu1 %v16010_v52  ;;  %v16007_v52 = vld [vmem:[#allocation25 + $0x88] ss:$16 sps:$4 sm:$0xff]  }
 0x913   : > { %11675 = vmatprep.subr.bf16.mxu1 %v16018_v43  ;;  %v16015_v43 = vld [vmem:[#allocation25 + $0x6c] ss:$16 sps:$4 sm:$0xff]  }
 0x916   : > { %11676 = vmatpush1.bf16.msra.mxu1 %v16016_v58  ;;  %v16013_v58 = vld [vmem:[#allocation25 + $0x68] ss:$16 sps:$4 sm:$0xff]  }
 0x917   : > { %11677 = vmatprep.subr.bf16.mxu1 %v16024_v15  ;;  %v16021_v15 = vld [vmem:[#allocation25 + $0x4c] ss:$16 sps:$4 sm:$0xff]  }
 0x91a   : > { %11678 = vmatpush1.bf16.msra.mxu1 %v16022_v31  ;;  %v16019_v31 = vld [vmem:[#allocation25 + $0x48] ss:$16 sps:$4 sm:$0xff]  }
 0x91b   : > { %11679 = vmatprep.subr.bf16.mxu1 %v16030_v38  ;;  %v16027_v38 = vld [vmem:[#allocation25 + $0x2c] ss:$16 sps:$4 sm:$0xff]  }
 0x91e   : > { %11680 = vmatpush1.bf16.msra.mxu1 %v16028_v34  ;;  %v16025_v34 = vld [vmem:[#allocation25 + $0x28] ss:$16 sps:$4 sm:$0xff]  }
 0x91f   : > { %11681 = vmatprep.subr.bf16.mxu1 %v16036_v20  ;;  %v16033_v20 = vld [vmem:[#allocation25 + $0xc] ss:$16 sps:$4 sm:$0xff]  }
 0x922   : > { %11682 = vmatpush2.bf16.msra.mxu1 %v16034_v50  ;;  %v16031_v50 = vld [vmem:[#allocation25 + $0x8] ss:$16 sps:$4 sm:$0xff]  }
 0x923   : > { %11683 = vmatprep.subr.bf16.mxu1 %v16042_v12  ;;  %v16039_v12 = vld [vmem:[#allocation25 + $0x1ec] ss:$16 sps:$4 sm:$0xff]  }
 0x926   : > { %11684 = vmatpush2.bf16.msra.mxu1 %v16040_v30  ;;  %v16037_v30 = vld [vmem:[#allocation25 + $0x1e8] ss:$16 sps:$4 sm:$0xff]  }
 0x927   : > { %11685 = vmatprep.subr.bf16.mxu1 %v16048_v19  ;;  %v16045_v19 = vld [vmem:[#allocation25 + $0x1cc] ss:$16 sps:$4 sm:$0xff]  }
 0x92a   : > { %11686 = vmatpush2.bf16.msra.mxu1 %v16046_v26  ;;  %v16043_v26 = vld [vmem:[#allocation25 + $0x1c8] ss:$16 sps:$4 sm:$0xff]  }
 0x92b   : > { %11687 = vmatprep.subr.bf16.mxu1 %v16054_v53  ;;  %v16051_v53 = vld [vmem:[#allocation25 + $0x1ac] ss:$16 sps:$4 sm:$0xff]  }
 0x92e   : > { %11688 = vmatpush2.bf16.msra.mxu1 %v16052_v14  ;;  %v16049_v14 = vld [vmem:[#allocation25 + $0x1a8] ss:$16 sps:$4 sm:$0xff]  }
 0x92f   : > { %11689 = vmatprep.subr.bf16.mxu1 %v16060_v0  ;;  %v16057_v0 = vld [vmem:[#allocation25 + $0x18c] ss:$16 sps:$4 sm:$0xff]  }
 0x932   : > { %11690 = vmatpush2.bf16.msra.mxu1 %v16058_v55  ;;  %v16055_v55 = vld [vmem:[#allocation25 + $0x188] ss:$16 sps:$4 sm:$0xff]  }
 0x933   : > { %11691 = vmatprep.subr.bf16.mxu1 %v16066_v6  ;;  %v16063_v6 = vld [vmem:[#allocation25 + $0x16c] ss:$16 sps:$4 sm:$0xff]  }
 0x936   : > { %11692 = vmatpush2.bf16.msra.mxu1 %v16064_v61  ;;  %v16061_v61 = vld [vmem:[#allocation25 + $0x168] ss:$16 sps:$4 sm:$0xff]  }
 0x937   : > { %11693 = vmatprep.subr.bf16.mxu1 %v16072_v10  ;;  %v10817_v10 = vrot.slane %v17704_v22, %v17969_v13 }
 0x93a   : > { %11694 = vmatpush2.bf16.msra.mxu1 %v16070_v62 }
 0x93b   : > { %11695 = vmatprep.subr.bf16.mxu1 %v16078_v29 }
 0x93e   : > { %11696 = vmatpush2.bf16.msra.mxu1 %v16076_v11 }
 0x93f   : > { %11747 = vmatprep.subr.bf16.mxu1 %v16084_v21 }
 0x940   : > { %v9993_v60 = vpop.f32.mrf.mxu1 }
 0x941   : > { %v9994_v16 = vadd.f32 %v9993_v60, %v17689_v42  ;;  %v10674_v37 = vpop.f32.mrf.mxu0  ;;  %v10809_v42 = vrot.slane %v17704_v22, %v17283_v41  ;;  %v16069_v60 = vld [vmem:[#allocation25 + $0x14c] ss:$16 sps:$4 sm:$0xff]  }
 0x942   : > { %v10675_v25 = vadd.f32 %v10674_v37, %v17692_v27  ;;  %v9995_v23 = vpop.f32.mrf.mxu1  ;;  %v16075_v37 = vld [vmem:[#allocation25 + $0x12c] ss:$16 sps:$4 sm:$0xff]  }
 0x943   : > { %v17702_v32 = vadd.f32 %v9995_v23, %v17694_v36  ;;  %v10676_v33 = vpop.f32.mrf.mxu0 }
 0x944   : > { %v9997_v35 = vpop.f32.mrf.mxu1  ;;  %v10677_v27 = vadd.f32 %v10676_v33, %v17697_v63  ;;  %v16081_v33 = vld [vmem:[#allocation25 + $0x10c] ss:$16 sps:$4 sm:$0xff]  }
 0x945   : > { %v10678_v28 = vpop.f32.mrf.mxu0 }
 0x946   : > { %v9998_v49 = vpop.f32.mrf.mxu1  ;;  %v10821_v28 = vrot.slane %v17704_v22, %v17970_v3  ;;  %v16085_v22 = vld [vmem:[#allocation25 + $0x2c8] ss:$16 sps:$4 sm:$0xff]  }
 0x947   : > { %v10679_v18 = vpop.f32.mrf.mxu0 }
 0x948   : > { %v16079_v18 = vld [vmem:[#allocation25 + $0x108] ss:$16 sps:$4 sm:$0xff]  }
 0x980   : > { %v10715_v40 = vpop.f32.mrf.mxu1 }
 0x981   : > { %v10716_v46 = vadd.f32 %v10715_v40, %v10675_v25  ;;  %v10756_v36 = vpop.f32.mrf.mxu0  ;;  %v16073_v25 = vld [vmem:[#allocation25 + $0x128] ss:$16 sps:$4 sm:$0xff]  }
 0x982   : > { %v17711_v1 = vadd.f32 %v10756_v36, %v9994_v16  ;;  %v10717_v44 = vpop.f32.mrf.mxu1  ;;  %v16067_v16 = vld [vmem:[#allocation25 + $0x148] ss:$16 sps:$4 sm:$0xff]  }
 0x983   : > { %v10718_v17 = vadd.f32 %v10717_v44, %v10677_v27  ;;  %v17713_v7 = vpop.f32.mrf.mxu0  ;;  %v10826_v39 = vadd.f32 %v10809_v42, %v10716_v46  ;;  %v16082_v46 = vld [vmem:[#allocation25 + $0x2e8] ss:$16 sps:$4 sm:$0xff]   ;;  %v16093_v44 = vld [vmem:[#allocation25 + $0x28c] ss:$16 sps:$4 sm:$0xff]  }
 0x984   : > { %v10719_v2 = vpop.f32.mrf.mxu1  ;;  %v10759_v62 = vadd.f32 %v17713_v7, %v17702_v32  ;;  %v16087_v32 = vld [vmem:[#allocation25 + $0x2cc] ss:$16 sps:$4 sm:$0xff]   ;;  %v16131_v7 = vld [vmem:[%s17971_s23 + $0x38] sm:$0xff]  }
 0x985   : > { %v10827_v56 = vadd.f32 %v10813_v59, %v10718_v17  ;;  %v10760_v24 = vpop.f32.mrf.mxu0  ;;  %v17715_v63 = vpack.c.bf16 %v10826_v39, %v10826_v39  ;;  %v16090_v59 = vld [vmem:[#allocation25 + $0x2ac] ss:$16 sps:$4 sm:$0xff]   ;;  %v16130_v17 = vld [vmem:[%s17971_s23 + $0x78] sm:$0xff]   ;;  %v16091_v2 = vld [vmem:[#allocation25 + $0x288] ss:$16 sps:$4 sm:$0xff]  }
 0x986   : > { %v10720_v9 = vpop.f32.mrf.mxu1  ;;  %v16132_v39 = vld [vmem:[%s17971_s23 + $0x70] sm:$0xff]  }
 0x987   : > { %v10831_v51 = vpack.c.bf16 %v10827_v56, %v10827_v56  ;;  %v10761_v5 = vpop.f32.mrf.mxu0  ;;  %v16133_v56 = vld [vmem:[%s17971_s23 + $0x30] sm:$0xff]   ;;  %v16134_v9 = vld [vmem:[%s17971_s23 + $0x68] sm:$0xff]  }
 0x988   : > { %v16096_v24 = vld [vmem:[#allocation25 + $0x26c] ss:$16 sps:$4 sm:$0xff]   ;;  %v16135_v5 = vld [vmem:[%s17971_s23 + $0x28] sm:$0xff]  }
 0x989   : > { %11656 = vmatprep.mubr.bf16.mxu0 %v10831_v51 }
 0x98a   : > { %11657 = vmatmul.mubr.bf16.vlgmr.msra.gmra.mxu0 %v17715_v63 }
 0x98b   : > { %11707 = vmatpush1.bf16.msra.mxu0 %v15989_v57  ;;  %11738 = vmatprep.mubr.bf16.mxu0 %v10831_v51  ;;  %v16094_v51 = vld [vmem:[#allocation25 + $0x268] ss:$16 sps:$4 sm:$0xff]   ;;  %v16099_v57 = vld [vmem:[#allocation25 + $0x24c] ss:$16 sps:$4 sm:$0xff]  }
 0x98c   : > { %11708 = vmatprep.subr.bf16.mxu0 %v15997_v8  ;;  %v16097_v8 = vld [vmem:[#allocation25 + $0x248] ss:$16 sps:$4 sm:$0xff]  }
 0x98f   : > { %11709 = vmatpush1.bf16.msra.mxu0 %v15995_v54  ;;  %v16137_v54 = vld [vmem:[%s17971_s23 + $0x20] sm:$0xff]  }
 0x990   : > { %11710 = vmatprep.subr.bf16.mxu0 %v16003_v47  ;;  %v16102_v47 = vld [vmem:[#allocation25 + $0x22c] ss:$16 sps:$4 sm:$0xff]  }
 0x993   : > { %11711 = vmatpush1.bf16.msra.mxu0 %v16001_v4  ;;  %v16138_v4 = vld [vmem:[%s17971_s23 + $0x58] sm:$0xff]  }
 0x994   : > { %11712 = vmatprep.subr.bf16.mxu0 %v16009_v45  ;;  %v16100_v45 = vld [vmem:[#allocation25 + $0x228] ss:$16 sps:$4 sm:$0xff]  }
 0x997   : > { %11713 = vmatpush1.bf16.msra.mxu0 %v16007_v52  ;;  %v16139_v52 = vld [vmem:[%s17971_s23 + $0x18] sm:$0xff]  }
 0x998   : > { %11714 = vmatprep.subr.bf16.mxu0 %v16015_v43  ;;  %v16105_v43 = vld [vmem:[#allocation25 + $0x20c] ss:$16 sps:$4 sm:$0xff]  }
 0x99b   : > { %11715 = vmatpush1.bf16.msra.mxu0 %v16013_v58  ;;  %v16140_v58 = vld [vmem:[%s17971_s23 + $0x50] sm:$0xff]  }
 0x99c   : > { %11716 = vmatprep.subr.bf16.mxu0 %v16021_v15  ;;  %v16103_v15 = vld [vmem:[#allocation25 + $0x208] ss:$16 sps:$4 sm:$0xff]  }
 0x99f   : > { %11717 = vmatpush1.bf16.msra.mxu0 %v16019_v31  ;;  %v16141_v31 = vld [vmem:[%s17971_s23 + $0x10] sm:$0xff]  }
 0x9a0   : > { %11718 = vmatprep.subr.bf16.mxu0 %v16027_v38  ;;  %v16108_v38 = vld [vmem:[#allocation25 + $0x3ec] ss:$16 sps:$4 sm:$0xff]  }
 0x9a3   : > { %11719 = vmatpush1.bf16.msra.mxu0 %v16025_v34  ;;  %v16106_v34 = vld [vmem:[#allocation25 + $0x3e8] ss:$16 sps:$4 sm:$0xff]  }
 0x9a4   : > { %11720 = vmatprep.subr.bf16.mxu0 %v16033_v20  ;;  %v16111_v20 = vld [vmem:[#allocation25 + $0x3cc] ss:$16 sps:$4 sm:$0xff]  }
 0x9a7   : > { %11721 = vmatpush1.bf16.msra.mxu0 %v16031_v50  ;;  %v16109_v50 = vld [vmem:[#allocation25 + $0x3c8] ss:$16 sps:$4 sm:$0xff]  }
 0x9a8   : > { %11722 = vmatprep.subr.bf16.mxu0 %v16039_v12  ;;  %v16114_v12 = vld [vmem:[#allocation25 + $0x3ac] ss:$16 sps:$4 sm:$0xff]  }
 0x9ab   : > { %11723 = vmatpush2.bf16.msra.mxu0 %v16037_v30  ;;  %v16112_v30 = vld [vmem:[#allocation25 + $0x3a8] ss:$16 sps:$4 sm:$0xff]  }
 0x9ac   : > { %11724 = vmatprep.subr.bf16.mxu0 %v16045_v19  ;;  %v16117_v19 = vld [vmem:[#allocation25 + $0x38c] ss:$16 sps:$4 sm:$0xff]  }
 0x9af   : > { %11725 = vmatpush2.bf16.msra.mxu0 %v16043_v26  ;;  %v16115_v26 = vld [vmem:[#allocation25 + $0x388] ss:$16 sps:$4 sm:$0xff]  }
 0x9b0   : > { %11726 = vmatprep.subr.bf16.mxu0 %v16051_v53  ;;  %v16120_v53 = vld [vmem:[#allocation25 + $0x36c] ss:$16 sps:$4 sm:$0xff]  }
 0x9b3   : > { %11727 = vmatpush2.bf16.msra.mxu0 %v16049_v14  ;;  %v16118_v14 = vld [vmem:[#allocation25 + $0x368] ss:$16 sps:$4 sm:$0xff]  }
 0x9b4   : > { %11728 = vmatprep.subr.bf16.mxu0 %v16057_v0  ;;  %v16123_v0 = vld [vmem:[#allocation25 + $0x34c] ss:$16 sps:$4 sm:$0xff]  }
 0x9b7   : > { %11729 = vmatpush2.bf16.msra.mxu0 %v16055_v55  ;;  %v16121_v55 = vld [vmem:[#allocation25 + $0x348] ss:$16 sps:$4 sm:$0xff]  }
 0x9b8   : > { %11730 = vmatprep.subr.bf16.mxu0 %v16063_v6  ;;  %v16126_v6 = vld [vmem:[#allocation25 + $0x32c] ss:$16 sps:$4 sm:$0xff]  }
 0x9bb   : > { %11731 = vmatpush2.bf16.msra.mxu0 %v16061_v61  ;;  %v16124_v61 = vld [vmem:[#allocation25 + $0x328] ss:$16 sps:$4 sm:$0xff]  }
 0x9bc   : > { %11732 = vmatprep.subr.bf16.mxu0 %v16069_v60  ;;  %v16129_v60 = vld [vmem:[#allocation25 + $0x30c] ss:$16 sps:$4 sm:$0xff]  }
 0x9bf   : > { %11733 = vmatpush2.bf16.msra.mxu0 %v16067_v16  ;;  %v16127_v16 = vld [vmem:[#allocation25 + $0x308] ss:$16 sps:$4 sm:$0xff]  }
 0x9c0   : > { %v10797_v23 = vpop.f32.mrf.mxu1  ;;  %11734 = vmatprep.subr.bf16.mxu0 %v16075_v37  ;;  %v16142_v37 = vld [vmem:[%s17971_s23 + $0x48] sm:$0xff]  }
 0x9c1   : > { %v10798_v35 = vadd.f32 %v10797_v23, %v17711_v1  ;;  %v16088_v1 = vld [vmem:[#allocation25 + $0x2a8] ss:$16 sps:$4 sm:$0xff]  }
 0x9c2   : > { %v10799_v49 = vpop.f32.mrf.mxu1  ;;  %v16144_v23 = vld [vmem:[%s17971_s23 + $0x40] sm:$0xff]  }
 0x9c3   : > { %v10800_v29 = vadd.f32 %v10799_v49, %v10759_v62  ;;  %11735 = vmatpush2.bf16.msra.mxu0 %v16073_v25  ;;  %v10828_v11 = vadd.f32 %v10817_v10, %v10798_v35  ;;  %v16143_v25 = vld [vmem:[%s17971_s23 + $0x8] sm:$0xff]   ;;  %v16145_v10 = vld [vmem:[%s17971_s23] sm:$0xff]   ;;  %v16147_v62 = vld [vmem:[%s17971_s23 + $0xb8] sm:$0xff]  }
 0x9c4   : > { %v10801_v21 = vpop.f32.mrf.mxu1  ;;  %11736 = vmatprep.subr.bf16.mxu0 %v16081_v33  ;;  %v16146_v33 = vld [vmem:[%s17971_s23 + $0xf8] sm:$0xff]   ;;  %v16148_v35 = vld [vmem:[%s17971_s23 + $0xf0] sm:$0xff]   ;;  %v16150_v49 = vld [vmem:[%s17971_s23 + $0xe8] sm:$0xff]  }
 0x9c5   : > { %v10829_v40 = vadd.f32 %v10821_v28, %v10800_v29  ;;  %v17725_v36 = vpack.c.bf16 %v10828_v11, %v10828_v11  ;;  %v16149_v28 = vld [vmem:[%s17971_s23 + $0xb0] sm:$0xff]   ;;  %v16151_v29 = vld [vmem:[%s17971_s23 + $0xa8] sm:$0xff]   ;;  %v16153_v11 = vld [vmem:[%s17971_s23 + $0xa0] sm:$0xff]  }
 0x9c6   : > { %v10802_v42 = vpop.f32.mrf.mxu1  ;;  %v16154_v21 = vld [vmem:[%s17971_s23 + $0xd8] sm:$0xff]  }
 0x9c7   : > { %v10833_v27 = vpack.c.bf16 %v10829_v40, %v10829_v40  ;;  %11737 = vmatpush2.bf16.msra.mxu0 %v16079_v18  ;;  %v16152_v18 = vld [vmem:[%s17971_s23 + $0xe0] sm:$0xff]   ;;  %v16155_v40 = vld [vmem:[%s17971_s23 + $0x98] sm:$0xff]   ;;  %v16156_v42 = vld [vmem:[%s17971_s23 + $0xd0] sm:$0xff]  }
 0x9c8   : > { %13870 = vmatprep.subr.bf16.mxu0 %v16130_v17 }
 0x9c9   : > { %11697 = vmatprep.mubr.bf16.mxu1 %v10833_v27 }
 0x9ca   : > { %11739 = vmatmul.mubr.bf16.vlgmr.msra.gmra.mxu0 %v17715_v63  ;;  %11698 = vmatmul.mubr.bf16.vlgmr.msra.gmra.mxu1 %v17725_v36  ;;  %v16136_v63 = vld [vmem:[%s17971_s23 + $0x60] sm:$0xff]  }
 0x9cb   : > { %11748 = vmatpush1.bf16.msra.mxu1 %v16082_v46  ;;  %11779 = vmatprep.mubr.bf16.mxu1 %v10833_v27  ;;  %v16157_v27 = vld [vmem:[%s17971_s23 + $0x90] sm:$0xff]  }
 0x9cc   : > { %11749 = vmatprep.subr.bf16.mxu1 %v16087_v32  ;;  %13871 = vmatpush3.bf16.msra.mxu0 %v16131_v7  ;;  %v16159_v32 = vld [vmem:[%s17971_s23 + $0x88] sm:$0xff]   ;;  %v10962_v7 = vld [vmem:[#allocation26] sm:$0xf] }
 0x9cd   : > { %13872 = vmatprep.subr.bf16.mxu0 %v16132_v39  ;;  %v11607_v39 = vrot.slane %v10962_v7, %v17283_v41 }
 0x9cf   : > { %11750 = vmatpush1.bf16.msra.mxu1 %v16085_v22 }
 0x9d0   : > { %11751 = vmatprep.subr.bf16.mxu1 %v16090_v59  ;;  %13873 = vmatpush3.bf16.msra.mxu0 %v16133_v56  ;;  %v11615_v56 = vrot.slane %v10962_v7, %v17969_v13  ;;  %v16726_v13 = vmov 1966171168  }
 0x9d1   : > { %13874 = vmatprep.subr.bf16.mxu0 %v16134_v9 }
 0x9d3   : > { %11752 = vmatpush1.bf16.msra.mxu1 %v16088_v1  ;;  %v16160_v1 = vld [vmem:[%s17971_s23 + $0xc0] sm:$0xff]  }
 0x9d4   : > { %11753 = vmatprep.subr.bf16.mxu1 %v16093_v44  ;;  %13875 = vmatpush3.bf16.msra.mxu0 %v16135_v5  ;;  %v16161_v44 = vld [vmem:[%s17971_s23 + $0x80] sm:$0xff]  }
 0x9d5   : > { %13876 = vmatprep.subr.bf16.mxu0 %v16136_v63 }
 0x9d7   : > { %11754 = vmatpush1.bf16.msra.mxu1 %v16091_v2  ;;  %v11611_v2 = vrot.slane %v10962_v7, %v17289_v48 }
 0x9d8   : > { %11755 = vmatprep.subr.bf16.mxu1 %v16096_v24  ;;  %13877 = vmatpush3.bf16.msra.mxu0 %v16137_v54 }
 0x9d9   : > { %13878 = vmatprep.subr.bf16.mxu0 %v16138_v4 }
 0x9db   : > { %11756 = vmatpush1.bf16.msra.mxu1 %v16094_v51 }
 0x9dc   : > { %11757 = vmatprep.subr.bf16.mxu1 %v16099_v57  ;;  %13879 = vmatpush3.bf16.msra.mxu0 %v16139_v52 }
 0x9dd   : > { %13880 = vmatprep.subr.bf16.mxu0 %v16140_v58 }
 0x9df   : > { %11758 = vmatpush1.bf16.msra.mxu1 %v16097_v8 }
 0x9e0   : > { %11759 = vmatprep.subr.bf16.mxu1 %v16102_v47  ;;  %13881 = vmatpush3.bf16.msra.mxu0 %v16141_v31  ;;  %v11619_v31 = vrot.slane %v10962_v7, %v17970_v3 }
 0x9e1   : > { %13882 = vmatprep.subr.bf16.mxu0 %v16142_v37 }
 0x9e3   : > { %11760 = vmatpush1.bf16.msra.mxu1 %v16100_v45 }
 0x9e4   : > { %11761 = vmatprep.subr.bf16.mxu1 %v16105_v43  ;;  %13883 = vmatpush3.bf16.msra.mxu0 %v16143_v25 }
 0x9e5   : > { %13884 = vmatprep.subr.bf16.mxu0 %v16144_v23 }
 0x9e7   : > { %11762 = vmatpush1.bf16.msra.mxu1 %v16103_v15  ;;  %v12138_v15 = vunpack.c.l.s4 %v16726_v13 }
 0x9e8   : > { %11763 = vmatprep.subr.bf16.mxu1 %v16108_v38  ;;  %13885 = vmatpush3.bf16.msra.mxu0 %v16145_v10 }
 0x9e9   : > { %v12139_v38 = vunpack.c.0.s8 %v12138_v15 }
 0x9eb   : > { %11764 = vmatpush2.bf16.msra.mxu1 %v16106_v34 }
 0x9ec   : > { %11765 = vmatprep.subr.bf16.mxu1 %v16111_v20 }
 0x9ef   : > { %11766 = vmatpush2.bf16.msra.mxu1 %v16109_v50 }
 0x9f0   : > { %11767 = vmatprep.subr.bf16.mxu1 %v16114_v12 }
 0x9f3   : > { %11768 = vmatpush2.bf16.msra.mxu1 %v16112_v30  ;;  %v17972_v30 = vld [vmem:[#allocation40_spill] sm:$0xff] }
 0x9f4   : > { %11769 = vmatprep.subr.bf16.mxu1 %v16117_v19  ;;  %v12142_v19 = vsub.s32 %v12139_v38, %v17972_v30 }
 0x9f7   : > { %11770 = vmatpush2.bf16.msra.mxu1 %v16115_v26 }
 0x9f8   : > { %11771 = vmatprep.subr.bf16.mxu1 %v16120_v53 }
 0x9fb   : > { %11772 = vmatpush2.bf16.msra.mxu1 %v16118_v14 }
 0x9fc   : > { %11773 = vmatprep.subr.bf16.mxu1 %v16123_v0 }
 0x9ff   : > { %11774 = vmatpush2.bf16.msra.mxu1 %v16121_v55 }
 0xa00   : > { %11775 = vmatprep.subr.bf16.mxu1 %v16126_v6 }
 0xa03   : > { %11776 = vmatpush2.bf16.msra.mxu1 %v16124_v61 }
 0xa04   : > { %11777 = vmatprep.subr.bf16.mxu1 %v16129_v60 }
 0xa07   : > { %11778 = vmatpush2.bf16.msra.mxu1 %v16127_v16  ;;  %v17974_v16 = vlaneseq }
 0xa08   : > { %13892 = vmatprep.subr.bf16.mxu1 %v16146_v33 }
 0xa09   : > { %vm12162_vm6 = vcmp.lt.s32.totalorder %v17974_v16, 512 }
 0xa0a   : > { %11780 = vmatmul.mubr.bf16.vlgmr.msra.gmra.mxu1 %v17725_v36  ;;  %v16158_v36 = vld [vmem:[%s17971_s23 + $0xc8] sm:$0xff]  }
 0xa0b   : > { %13893 = vmatpush3.bf16.msra.mxu1 %v16147_v62 }
 0xa0c   : > { %13894 = vmatprep.subr.bf16.mxu1 %v16148_v35  ;;  %v11856_v35 = vld [vmem:[#allocation28] sm:$0x1] }
 0xa0f   : > { %13895 = vmatpush3.bf16.msra.mxu1 %v16149_v28 }
 0xa10   : > { %13896 = vmatprep.subr.bf16.mxu1 %v16150_v49 }
 0xa13   : > { %13897 = vmatpush3.bf16.msra.mxu1 %v16151_v29 }
 0xa14   : > { %13898 = vmatprep.subr.bf16.mxu1 %v16152_v18 }
 0xa17   : > { %13899 = vmatpush3.bf16.msra.mxu1 %v16153_v11 }
 0xa18   : > { %13900 = vmatprep.subr.bf16.mxu1 %v16154_v21 }
 0xa1b   : > { %13901 = vmatpush3.bf16.msra.mxu1 %v16155_v40 }
 0xa1c   : > { %13902 = vmatprep.subr.bf16.mxu1 %v16156_v42 }
 0xa1f   : > { %13903 = vmatpush3.bf16.msra.mxu1 %v16157_v27 }
 0xa20   : > { %13904 = vmatprep.subr.bf16.mxu1 %v16158_v36 }
 0xa23   : > { %13905 = vmatpush3.bf16.msra.mxu1 %v16159_v32 }
 0xa24   : > { %13906 = vmatprep.subr.bf16.mxu1 %v16160_v1 }
 0xa27   : > { %13907 = vmatpush3.bf16.msra.mxu1 %v16161_v44 }
 0xa4a   : > { %v11658_v46 = vpop.f32.mrf.mxu0 }
 0xa4b   : > { %v11659_v24 = vadd.f32 %v11658_v46, %v11607_v39 }
 0xa4c   : > { %v11660_v22 = vpop.f32.mrf.mxu0 }
 0xa4d   : > { %v11661_v5 = vadd.f32 %v11660_v22, %v11611_v2 }
 0xa4e   : > { %v11662_v59 = vpop.f32.mrf.mxu0 }
 0xa50   : > { %v11663_v17 = vpop.f32.mrf.mxu0 }
 0xa8a   : > { %v11740_v9 = vpop.f32.mrf.mxu0  ;;  %v11699_v51 = vpop.f32.mrf.mxu1 }
 0xa8b   : > { %v11741_v57 = vadd.f32 %v11740_v9, %v11615_v56  ;;  %v11700_v63 = vadd.f32 %v11699_v51, %v11659_v24 }
 0xa8c   : > { %v11742_v8 = vpop.f32.mrf.mxu0  ;;  %v11701_v54 = vpop.f32.mrf.mxu1 }
 0xa8d   : > { %v11702_v47 = vadd.f32 %v11701_v54, %v11661_v5  ;;  %v11788_v41 = vpack.c.bf16 %v11700_v63, %v11700_v63  ;;  %v11743_v20 = vadd.f32 %v11742_v8, %v11619_v31 }
 0xa8e   : > { %v11744_v4 = vpop.f32.mrf.mxu0  ;;  %v11703_v45 = vpop.f32.mrf.mxu1 }
 0xa8f   : > { %v11789_v52 = vpack.c.bf16 %v11702_v47, %v11702_v47  ;;  %v12135_v43 = vcombine.low %v11700_v63, %v11702_v47 }
 0xa90   : > { %v11745_v58 = vpop.f32.mrf.mxu0  ;;  %v11704_v48 = vpop.f32.mrf.mxu1 }
 0xa91   : > { %12081 = vmatprep.mubr.bf16.mxu0 %v11789_v52  ;;  %v12143_v61 = vrot.slane %v12135_v43, %v12142_v19 }
 0xa92   : > { %12082 = vmatmul.mubr.bf16.vlgmr.msra.gmra.mxu0 %v11788_v41 }
 0xaca   : > { %v11781_v34 = vpop.f32.mrf.mxu1 }
 0xacb   : > { %v11782_v50 = vadd.f32 %v11781_v34, %v11741_v57 }
 0xacc   : > { %v11783_v12 = vpop.f32.mrf.mxu1 }
 0xacd   : > { %v11784_v26 = vadd.f32 %v11783_v12, %v11743_v20  ;;  %v11790_v55 = vpack.c.bf16 %v11782_v50, %v11782_v50 }
 0xace   : > { %v11785_v53 = vpop.f32.mrf.mxu1 }
 0xacf   : > { %v11791_v14 = vpack.c.bf16 %v11784_v26, %v11784_v26  ;;  %v12136_v0 = vcombine.low %v11782_v50, %v11784_v26 }
 0xad0   : > { %v11786_v6 = vpop.f32.mrf.mxu1 }
 0xad1   : > { %v12150_v60 = vrot.slane %v12136_v0, %v12142_v19  ;;  %12121 = vmatprep.mubr.bf16.mxu1 %v11791_v14 }
 0xad2   : > { %12122 = vmatmul.mubr.bf16.vlgmr.msra.gmra.mxu1 %v11790_v55 }
 0xad3   : > { %v12151_v3 = vcombine.low %v12143_v61, %v12150_v60 }
 0xad5   : > { %v12158_v37 = vrot.slane %v12151_v3, %v12142_v19 }
 0xad7   : > { %12164 = vst.msk [vmem:[%s846_s28] sm:$0xf] %vm12162_vm6, %v12158_v37 }
 0xb52   : > { %v13886_v25 = vpop.f32.mrf.mxu0 }
 0xb54   : > { %v13887_v23 = vpop.f32.mrf.mxu0 }
 0xb55   : > { %v13888_v62 = vadd.f32 %v13887_v23, %v13886_v25 }
 0xb56   : > { %v13889_v10 = vpop.f32.mrf.mxu0 }
 0xb57   : > { %v12084_v29 = vadd.f32 %v13888_v62, %v11856_v35 }
 0xb58   : > { %v13890_v33 = vpop.f32.mrf.mxu0 }
 0xb92   : > { %v13908_v28 = vpop.f32.mrf.mxu1 }
 0xb94   : > { %v13909_v49 = vpop.f32.mrf.mxu1 }
 0xb95   : > { %v13910_v18 = vadd.f32 %v13909_v49, %v13908_v28 }
 0xb96   : > { %v13911_v11 = vpop.f32.mrf.mxu1 }
 0xb97   : > { %v12124_v21 = vadd.f32 %v13910_v18, %v12084_v29 }
 0xb98   : > { %v13912_v40 = vpop.f32.mrf.mxu1 }
 0xb99   : > { %12130 = vst.msk [vmem:[%s836_s18] sm:$0x1] %vm12129_vm7, %v12124_v21 }
 0xb9a   : > { %16619 = shalt.err (!%p16616_p13)
}
 0xb9b   : > { %s16620_s5 = scalar_lea.hbm %s17842_s24, 16  ;;  %s16624_s27 = scalar_lea.hbm %s17975_s25, 32 }
 0xb9c   : > { %p16621_p2 = scmp.ne.s32.totalorder %s17842_s24, %s16620_s5  ;;  %p16625_p11 = scmp.lt.s32.totalorder %s17842_s24, %s17975_s25 }
 0xb9d   : > { %p16626_p12 = scmp.lt.s32.totalorder %s16624_s27, %s16620_s5 }
 0xb9e   : > { %p16622_p7 = pnand %p16621_p2, %p17976_p8 }
 0xb9f   : > { %p16627_p0 = por %p16626_p12, %p16625_p11 }
 0xba0   : > { %p16623_p4 = pneg %p16622_p7 }
 0xba2   : > { %p16628_p5 = pnand %p16627_p0, %p16623_p4 }
 0xba4   : > { %16631 = shalt.err (!%p16628_p5)
}
 0xba5   : > { %13983 = dma.vmem_to_hbm [thread:$0]  (%p17976_p8), %s12183_s9, 16, %s17842_s24, %s12166_s4  }
 0xba6 PF: > { %s12197_s10 = sand.u32 1, %s16690_s0   ;;  %p17977_p1 = scmp.ne.s32.totalorder %s17945_s22, 0 }
 0xba7   : > { %p17978_p3 = scmp.ge.s32.totalorder %s16702_s21, 2  ;;  %s12198_s6 = scalar_lea.sflag [#allocation4], %s12197_s10 }
 0xba9   : > { %p14039_p6 = pnand %p17978_p3, %p17977_p1 }
 0xbab   : > { %p14040_p10 = pneg %p14039_p6 }
 0xbad   : > { %16685 = dma.done.wait (%p14040_p10), %s12198_s6, 16  }
 0xbae   : > { %16687 = vsyncadd (%p14040_p10), %s12198_s6, 4294967280  ;;  %p41_p9 = scmp.ge.s32.totalorder %s17025_s3, 4   ;;  %s17979_s0 = smov %s16694_s30 }
 0xbaf   : > { %s17980_s30 = smov %s16698_s20  ;;  %s17981_s20 = smov %s17036_s19 }
 0xbb0   : > { %s17982_s21 = smov %s17025_s3  ;;  %43 = sbr.rel (!%p41_p9) target bundleno = 28 (0x1c), region = 220 }
 0xbb5   :  { %12209 = vsyncpa [#allocation3], 1 }
 0xbb6   :  { %12211 = vsyncpa [#allocation3 + $0x1], 1 }
 0xbb7   :  { %12212 = vsyncpa [#allocation6], 1 }
 0xbb8   :  { %12213 = vsyncpa [#allocation9], 1 }
 0xbb9   :  { %12214 = vsyncpa [#allocation12], 1 }
 0xbba   :  { %12215 = vsyncpa [#allocation15], 1 }
 0xbbb   :  { %12216 = vsyncpa [#allocation18], 1 }
 0xbbc   :  { %12217 = vsyncpa [#allocation21], 1 }
 0xbbd   :  { %12218 = vsyncpa [#allocation24], 1 }
 0xbbe   :  { %12219 = vsyncpa [#allocation27], 1 }
 0xbbf   :  { %12220 = vsyncpa [#allocation4], 1 }
 0xbc0   :  { %12222 = vsyncpa [#allocation4 + $0x1], 1 }

</bundles_post_ra>
